<compile_context>
chip_gen: v7x
topology: tpu7x:2x2x1
jax: 0.10.0
libtpu: 0.0.40
codegen_flags: <defaults>
</compile_context>

<pallas_src>
import functools
from typing import NamedTuple, Tuple

import jax
import jax.numpy as jnp
from jax.experimental import pallas as pl
from jax.experimental.pallas import tpu as pltpu

BN_EPS = 1e-5
MAX_ROW_TILE = 1024            # multiple of 8; bounds VMEM per conv tile
VMEM_LIMIT = 32 * 1024 * 1024  # fits v5e/v6e/v7x scoped-VMEM budgets
GRU_TBLK = 16                  # timesteps per GRU grid step (unrolled)

# TODO(synk): fuse im2col into the conv kernels (shifted strided slices on a
# VMEM-resident NHWC tile) to remove the ~9x HBM patch expansion and layer-1's
# 9-wide (Cin=1) contraction-lane waste; bf16 MXU operands left out to keep
# numerics identical to the f32 reference.


# --------------------------------------------------------------------------
# Pallas kernels
# --------------------------------------------------------------------------
def conv_bn_relu_fused_kernel(p_ref, w_ref, gamma_ref, beta_ref, o_ref, *,
                              n_rows):
    """Single-tile fused conv(matmul) + training-mode BN + ReLU.

    p_ref     : (R, 9*Cin) im2col patches (full array in VMEM)
    w_ref     : (9*Cin, Cout)
    gamma_ref : (1, Cout), beta_ref : (1, Cout)
    o_ref     : (R, Cout)
    """
    y = jnp.dot(p_ref[...], w_ref[...], preferred_element_type=jnp.float32)
    inv_n = 1.0 / float(n_rows)
    mean = jnp.sum(y, axis=0, keepdims=True) * inv_n
    var = jnp.maximum(jnp.sum(y * y, axis=0, keepdims=True) * inv_n
                      - mean * mean, 0.0)
    inv_std = jax.lax.rsqrt(var + BN_EPS)
    scale = gamma_ref[...] * inv_std
    shift = beta_ref[...] - mean * scale
    o_ref[...] = jnp.maximum(y * scale + shift, 0.0)


def conv_stats_kernel(p_ref, w_ref, y_ref, stats_ref, *, total_rows, tile_rows):
    """Pass 1 (large layers): conv-as-matmul on a row tile + sum / sumsq.

    p_ref : (TR, 9*Cin) im2col patch tile
    w_ref : (9*Cin, Cout)
    y_ref : (TR, Cout)   pre-BN conv output tile
    stats_ref : (2, Cout) accumulator (row 0 = sum, row 1 = sumsq), constant
                index_map -> VMEM resident across the row-tile grid axis.
    """
    i = pl.program_id(0)

    @pl.when(i == 0)
    def _():
        stats_ref[...] = jnp.zeros_like(stats_ref)

    y = jnp.dot(p_ref[...], w_ref[...], preferred_element_type=jnp.float32)
    y_ref[...] = y

    if total_rows % tile_rows:  # static: mask the ragged last tile
        row_ids = i * tile_rows + jax.lax.broadcasted_iota(jnp.int32, y.shape, 0)
        ym = jnp.where(row_ids < total_rows, y, 0.0)
    else:
        ym = y
    stats_ref[0:1, :] += jnp.sum(ym, axis=0, keepdims=True)
    stats_ref[1:2, :] += jnp.sum(ym * ym, axis=0, keepdims=True)


def bn_relu_kernel(y_ref, scale_ref, shift_ref, o_ref):
    """Pass 2 (large layers): folded BatchNorm (scale/shift) + ReLU."""
    o_ref[...] = jnp.maximum(y_ref[...] * scale_ref[...] + shift_ref[...], 0.0)


def gru_kernel(x_ref, wih_ref, bih_ref, whh_ref, bhh_ref, h_out_ref,
               h_ref, gi_ref, *, tblk, total_t):
    """GRU over a block of tblk timesteps per grid step (fused input proj).

    x_ref   : (tblk*NP, D)  time-major input rows for this time block
    wih_ref : (D, 3H)  W_ih^T (VMEM resident)     bih_ref : (1, 3H)
    whh_ref : (H, 3H)  W_hh^T (VMEM resident)     bhh_ref : (1, 3H)
    h_out_ref : (NP, H)  final hidden state
    h_ref   : VMEM scratch (NP, H) carried across grid steps
    gi_ref  : VMEM scratch (tblk, NP, 3H) block input projection
    PyTorch nn.GRU gate order: r, z, n.
    """
    b = pl.program_id(0)

    @pl.when(b == 0)
    def _():
        h_ref[...] = jnp.zeros_like(h_ref)

    NP, Hd = h_ref.shape
    H3 = 3 * Hd

    # Hoisted (per-block) input projection: one well-shaped MXU matmul.
    gi = (jnp.dot(x_ref[...], wih_ref[...],
                  preferred_element_type=jnp.float32) + bih_ref[...])
    gi_ref[...] = gi.reshape(tblk, NP, H3)

    whh = whh_ref[...]
    bhh = bhh_ref[...]

    def step(i, h):
        g = gi_ref[i]                                             # (NP, 3H)
        gh = jnp.dot(h, whh, preferred_element_type=jnp.float32) + bhh
        r = jax.nn.sigmoid(g[:, :Hd] + gh[:, :Hd])
        z = jax.nn.sigmoid(g[:, Hd:2 * Hd] + gh[:, Hd:2 * Hd])
        n = jnp.tanh(g[:, 2 * Hd:] + r * gh[:, 2 * Hd:])
        h_new = (1.0 - z) * n + z * h
        if total_t % tblk:  # static: guard zero-padded timesteps
            t = b * tblk + i
            h_new = jnp.where(t < total_t, h_new, h)
        return h_new

    h = jax.lax.fori_loop(0, tblk, step, h_ref[...], unroll=True)
    h_ref[...] = h
    h_out_ref[...] = h


# --------------------------------------------------------------------------
# Wrappers (padding / im2col / tiny scalar glue stay in plain JAX)
# --------------------------------------------------------------------------
def conv_bn_relu_layer(x_nhwc, w_mat, gamma, beta):
    """x_nhwc: (N, H, W, Cin); w_mat: (9*Cin, Cout) pre-reshaped weights."""
    N, H, W, Cin = x_nhwc.shape
    Cout = w_mat.shape[1]
    Ho = (H - 3 + 2) // 2 + 1
    Wo = (W - 3 + 2) // 2 + 1
    R = N * Ho * Wo

    # im2col: 3x3, stride 2, pad 1 -> (R, 9*Cin) patch matrix.
    xp = jnp.pad(x_nhwc, ((0, 0), (1, 1), (1, 1), (0, 0)))
    cols = []
    for ki in range(3):
        for kj in range(3):
            cols.append(xp[:, ki::2, kj::2, :][:, :Ho, :Wo, :])  # (N,Ho,Wo,Cin)
    patches = jnp.concatenate(cols, axis=-1).reshape(R, 9 * Cin)

    gamma2 = gamma.reshape(1, Cout)
    beta2 = beta.reshape(1, Cout)

    if R <= MAX_ROW_TILE:
        # Whole layer fits one VMEM tile: single fused kernel, no HBM y.
        out = pl.pallas_call(
            functools.partial(conv_bn_relu_fused_kernel, n_rows=R),
            out_shape=jax.ShapeDtypeStruct((R, Cout), jnp.float32),
            compiler_params=pltpu.CompilerParams(
                vmem_limit_bytes=VMEM_LIMIT),
        )(patches, w_mat, gamma2, beta2)
        return out.reshape(N, Ho, Wo, Cout)

    TR = MAX_ROW_TILE
    grid = (pl.cdiv(R, TR),)

    # Pass 1: conv matmul + global per-channel sum / sumsq (two-pass BN).
    y, stats = pl.pallas_call(
        functools.partial(conv_stats_kernel, total_rows=R, tile_rows=TR),
        out_shape=(jax.ShapeDtypeStruct((R, Cout), jnp.float32),
                   jax.ShapeDtypeStruct((2, Cout), jnp.float32)),
        grid=grid,
        in_specs=[pl.BlockSpec((TR, 9 * Cin), lambda i: (i, 0)),
                  pl.BlockSpec((9 * Cin, Cout), lambda i: (0, 0))],
        out_specs=(pl.BlockSpec((TR, Cout), lambda i: (i, 0)),
                   pl.BlockSpec((2, Cout), lambda i: (0, 0))),
        compiler_params=pltpu.CompilerParams(
            dimension_semantics=("arbitrary",),
            vmem_limit_bytes=VMEM_LIMIT),
    )(patches, w_mat)

    # Tiny per-channel scale/shift (conv bias omitted: it cancels under
    # training-mode BN since mean(y + b) removes b exactly).
    mean = stats[0] / R
    var = jnp.maximum(stats[1] / R - mean * mean, 0.0)
    inv_std = jax.lax.rsqrt(var + BN_EPS)
    scale = (gamma * inv_std).reshape(1, Cout)
    shift = (beta - mean * gamma * inv_std).reshape(1, Cout)

    # Pass 2: normalize + ReLU, row tiles independent -> "parallel".
    out = pl.pallas_call(
        bn_relu_kernel,
        out_shape=jax.ShapeDtypeStruct((R, Cout), jnp.float32),
        grid=grid,
        in_specs=[pl.BlockSpec((TR, Cout), lambda i: (i, 0)),
                  pl.BlockSpec((1, Cout), lambda i: (0, 0)),
                  pl.BlockSpec((1, Cout), lambda i: (0, 0))],
        out_specs=pl.BlockSpec((TR, Cout), lambda i: (i, 0)),
        compiler_params=pltpu.CompilerParams(
            dimension_semantics=("parallel",),
            vmem_limit_bytes=VMEM_LIMIT),
    )(y, scale, shift)

    return out.reshape(N, Ho, Wo, Cout)


def gru_final_hidden(feats, gru_params, hidden):
    """feats: (N, T, D). Returns the final GRU hidden state (N, hidden)."""
    N, T, D = feats.shape
    H3 = 3 * hidden

    # Pad batch to a full sublane group (8) and time to a block multiple.
    NP = ((N + 7) // 8) * 8
    tblk = min(GRU_TBLK, T)
    T_pad = pl.cdiv(T, tblk) * tblk
    if NP != N or T_pad != T:
        feats = jnp.pad(feats, ((0, NP - N), (0, T_pad - T), (0, 0)))

    # Time-major 2-D layout: rows [t*NP + n], so one grid block = one time
    # block of tblk*NP rows.
    x2d = jnp.transpose(feats, (1, 0, 2)).reshape(T_pad * NP, D)

    h = pl.pallas_call(
        functools.partial(gru_kernel, tblk=tblk, total_t=T),
        out_shape=jax.ShapeDtypeStruct((NP, hidden), jnp.float32),
        grid=(T_pad // tblk,),
        in_specs=[pl.BlockSpec((tblk * NP, D), lambda b: (b, 0)),
                  pl.BlockSpec((D, H3), lambda b: (0, 0)),
                  pl.BlockSpec((1, H3), lambda b: (0, 0)),
                  pl.BlockSpec((hidden, H3), lambda b: (0, 0)),
                  pl.BlockSpec((1, H3), lambda b: (0, 0))],
        out_specs=pl.BlockSpec((NP, hidden), lambda b: (0, 0)),
        scratch_shapes=[pltpu.VMEM((NP, hidden), jnp.float32),
                        pltpu.VMEM((tblk, NP, H3), jnp.float32)],
        compiler_params=pltpu.CompilerParams(
            dimension_semantics=("arbitrary",),
            vmem_limit_bytes=VMEM_LIMIT),
    )(x2d, gru_params["wih_t"], gru_params["bih"],
      gru_params["whh_t"], gru_params["bhh"])

    return h[:N]


# --------------------------------------------------------------------------
# ReferenceEncoder: static config, parameter construction, forward
# --------------------------------------------------------------------------
class RefEncConfig(NamedTuple):
    n_mel: int
    gru_dim: int = 128
    filters: Tuple[int, ...] = (32, 32, 64, 64, 128, 128)


def calculate_channels(L, kernel_size, stride, pad, n_convs):
    for _ in range(n_convs):
        L = (L - kernel_size + 2 * pad) // stride + 1
    return L


def init_reference_encoder_params(key, config: RefEncConfig):
    filters = list(config.filters)
    K = len(filters)
    chans = [1] + filters
    params = {"conv_w": [], "conv_b": [], "bn_gamma": [], "bn_beta": []}

    keys = jax.random.split(key, 2 * K + 4)
    for i in range(K):
        cin, cout = chans[i], chans[i + 1]
        bound = 1.0 / float(jnp.sqrt(cin * 9))
        w = jax.random.uniform(keys[2 * i], (cout, cin, 3, 3),
                               minval=-bound, maxval=bound, dtype=jnp.float32)
        b = jax.random.uniform(keys[2 * i + 1], (cout,),
                               minval=-bound, maxval=bound, dtype=jnp.float32)
        # Pre-reshape to matmul layout (kh,kw,Cin,Cout) -> (9*Cin, Cout).
        params["conv_w"].append(
            jnp.transpose(w, (2, 3, 1, 0)).reshape(9 * cin, cout))
        params["conv_b"].append(b)  # kept for fidelity; cancels under BN
        params["bn_gamma"].append(jnp.ones((cout,), jnp.float32))
        params["bn_beta"].append(jnp.zeros((cout,), jnp.float32))

    out_channels = calculate_channels(config.n_mel, 3, 2, 1, K)
    gru_in = filters[-1] * out_channels
    gd = config.gru_dim
    kb = 1.0 / float(jnp.sqrt(gd))
    # Stored pre-transposed / pre-shaped for the kernels.
    params["gru"] = {
        "wih_t": jnp.transpose(jax.random.uniform(
            keys[2 * K + 0], (3 * gd, gru_in), minval=-kb, maxval=kb,
            dtype=jnp.float32)),                                   # (D, 3H)
        "whh_t": jnp.transpose(jax.random.uniform(
            keys[2 * K + 1], (3 * gd, gd), minval=-kb, maxval=kb,
            dtype=jnp.float32)),                                   # (H, 3H)
        "bih": jax.random.uniform(keys[2 * K + 2], (1, 3 * gd),
                                  minval=-kb, maxval=kb, dtype=jnp.float32),
        "bhh": jax.random.uniform(keys[2 * K + 3], (1, 3 * gd),
                                  minval=-kb, maxval=kb, dtype=jnp.float32),
    }
    return params


def _reference_encoder_forward(inputs, params, config: RefEncConfig):
    """inputs: [N, Ty/r, n_mels*r]  ->  [N, gru_dim]"""
    N = inputs.shape[0]
    # PyTorch: inputs.view(N, 1, -1, n_mel) -> NCHW (C=1); kernels use NHWC.
    x = inputs.reshape(N, 1, -1, config.n_mel)
    x = jnp.transpose(x, (0, 2, 3, 1)).astype(jnp.float32)

    for w_mat, gamma, beta in zip(params["conv_w"], params["bn_gamma"],
                                  params["bn_beta"]):
        x = conv_bn_relu_layer(x, w_mat, gamma, beta)

    # x: (N, T', W', C).  PyTorch: (N,C,T',W') -> transpose(1,2) -> view(N,T',C*W')
    Np, Tp, Wp, C = x.shape
    feats = jnp.transpose(x, (0, 1, 3, 2)).reshape(Np, Tp, C * Wp)

    return gru_final_hidden(feats, params["gru"], config.gru_dim)


reference_encoder_forward = jax.jit(_reference_encoder_forward,
                                    static_argnames=("config",))


# --------------------------------------------------------------------------
if __name__ == "__main__":
    key = jax.random.PRNGKey(0)
    k_param, k_in = jax.random.split(key)

    N = 2          # batch
    T = 128        # mel frames (-> T'=2 after 6 stride-2 convs)
    N_MELS = 32    # ref_enc_input_dim (-> spatial width collapses to 1)
    GRU_DIM = 128

    config = RefEncConfig(n_mel=N_MELS, gru_dim=GRU_DIM)
    params = init_reference_encoder_params(k_param, config)
    inputs = jax.random.normal(k_in, (N, T, N_MELS), dtype=jnp.float32)

    out = reference_encoder_forward(inputs, params, config)
    out = jax.block_until_ready(out)

    assert out.shape == (N, GRU_DIM), out.shape
    assert bool(jnp.all(jnp.isfinite(out)))
    print("KERNEL_OK")
</pallas_src>

<mosaic_0001>
module attributes {stable_mosaic.version = 11 : i64} {
  func.func @conv_stats_kernel(%arg0: i32, %arg1: memref<1024x9xf32, #tpu.memory_space<vmem>>, %arg2: memref<9x32xf32, #tpu.memory_space<vmem>>, %arg3: memref<1024x32xf32, #tpu.memory_space<vmem>>, %arg4: memref<2x32xf32, #tpu.memory_space<vmem>>) attributes {dimension_semantics = [#tpu.dimension_semantics<arbitrary>], iteration_bounds = array<i64: 2>, scalar_prefetch = 0 : i64, scratch_operands = 0 : i64, tpu.core_type = #tpu.core_type<tc>, window_params = [{transform_indices = @transform_0, window_bounds = array<i64: 1024, 9>}, {pipeline_mode = #tpu.pipeline_mode<synchronous>, transform_indices = @transform_1, window_bounds = array<i64: 9, 32>}, {transform_indices = @transform_2, window_bounds = array<i64: 1024, 32>}, {pipeline_mode = #tpu.pipeline_mode<synchronous>, transform_indices = @transform_3, window_bounds = array<i64: 2, 32>}]} {
    %c0_i32 = arith.constant 0 : i32
    %0 = arith.cmpi eq, %arg0, %c0_i32 : i32
    %1 = arith.extui %0 : i1 to i32
    %c0_i32_0 = arith.constant 0 : i32
    %2 = arith.cmpi ne, %1, %c0_i32_0 : i32
    scf.if %2 {
      %cst_15 = arith.constant 0.000000e+00 : f32
      %18 = vector.broadcast %cst_15 : f32 to vector<2x32xf32>
      %c0_16 = arith.constant 0 : index
      %c0_17 = arith.constant 0 : index
      %19 = vector.load %arg4[%c0_16, %c0_17] : memref<2x32xf32, #tpu.memory_space<vmem>>, vector<2x32xf32>
      tpu.vector_store %arg4[%c0_16, %c0_17], %18 {strides = array<i32>} : memref<2x32xf32, #tpu.memory_space<vmem>>, vector<2x32xf32>,
    } else {
    }
    %c0 = arith.constant 0 : index
    %c0_1 = arith.constant 0 : index
    %3 = vector.load %arg1[%c0, %c0_1] : memref<1024x9xf32, #tpu.memory_space<vmem>>, vector<1024x9xf32>
    %c0_2 = arith.constant 0 : index
    %c0_3 = arith.constant 0 : index
    %4 = vector.load %arg2[%c0_2, %c0_3] : memref<9x32xf32, #tpu.memory_space<vmem>>, vector<9x32xf32>
    %cst = arith.constant dense<0.000000e+00> : vector<1024x32xf32>
    %5 = tpu.matmul %3, %4, %cst {dimension_numbers = #tpu.dot_dimension_numbers<[1], [0], [0], [1], [0, 0, 1, 1], [], []>} : vector<1024x9xf32>, vector<9x32xf32>, vector<1024x32xf32> -> vector<1024x32xf32>
    %c0_4 = arith.constant 0 : index
    %c0_5 = arith.constant 0 : index
    %6 = vector.load %arg3[%c0_4, %c0_5] : memref<1024x32xf32, #tpu.memory_space<vmem>>, vector<1024x32xf32>
    tpu.vector_store %arg3[%c0_4, %c0_5], %5 {strides = array<i32>} : memref<1024x32xf32, #tpu.memory_space<vmem>>, vector<1024x32xf32>,
    %c0_6 = arith.constant 0 : index
    %c0_7 = arith.constant 0 : index
    %7 = vector.load %arg4[%c0_6, %c0_7] : memref<2x32xf32, #tpu.memory_space<vmem>>, vector<1x32xf32>
    %cst_8 = arith.constant dense<0.000000e+00> : vector<32xf32>
    %8 = vector.multi_reduction <add>, %5, %cst_8 [0] : vector<1024x32xf32> to vector<32xf32>
    %9 = vector.shape_cast %8 : vector<32xf32> to vector<1x32xf32>
    %10 = arith.addf %7, %9 : vector<1x32xf32>
    %c0_9 = arith.constant 0 : index
    %c0_10 = arith.constant 0 : index
    %11 = vector.load %arg4[%c0_9, %c0_10] : memref<2x32xf32, #tpu.memory_space<vmem>>, vector<1x32xf32>
    tpu.vector_store %arg4[%c0_9, %c0_10], %10 {strides = array<i32>} : memref<2x32xf32, #tpu.memory_space<vmem>>, vector<1x32xf32>,
    %c1 = arith.constant 1 : index
    %c0_11 = arith.constant 0 : index
    %12 = vector.load %arg4[%c1, %c0_11] : memref<2x32xf32, #tpu.memory_space<vmem>>, vector<1x32xf32>
    %13 = arith.mulf %5, %5 : vector<1024x32xf32>
    %cst_12 = arith.constant dense<0.000000e+00> : vector<32xf32>
    %14 = vector.multi_reduction <add>, %13, %cst_12 [0] : vector<1024x32xf32> to vector<32xf32>
    %15 = vector.shape_cast %14 : vector<32xf32> to vector<1x32xf32>
    %16 = arith.addf %12, %15 : vector<1x32xf32>
    %c1_13 = arith.constant 1 : index
    %c0_14 = arith.constant 0 : index
    %17 = vector.load %arg4[%c1_13, %c0_14] : memref<2x32xf32, #tpu.memory_space<vmem>>, vector<1x32xf32>
    tpu.vector_store %arg4[%c1_13, %c0_14], %16 {strides = array<i32>} : memref<2x32xf32, #tpu.memory_space<vmem>>, vector<1x32xf32>,
    return
  }
  func.func @transform_0(%arg0: i32) -> (i32, i32) {
    %c0_i32 = arith.constant 0 : i32
    %c0_i32_0 = arith.constant 0 : i32
    return %arg0, %c0_i32 : i32, i32
  }
  func.func @transform_1(%arg0: i32) -> (i32, i32) {
    %c0_i32 = arith.constant 0 : i32
    %c0_i32_0 = arith.constant 0 : i32
    %c0_i32_1 = arith.constant 0 : i32
    return %c0_i32, %c0_i32_0 : i32, i32
  }
  func.func @transform_2(%arg0: i32) -> (i32, i32) {
    %c0_i32 = arith.constant 0 : i32
    %c0_i32_0 = arith.constant 0 : i32
    return %arg0, %c0_i32 : i32, i32
  }
  func.func @transform_3(%arg0: i32) -> (i32, i32) {
    %c0_i32 = arith.constant 0 : i32
    %c0_i32_0 = arith.constant 0 : i32
    %c0_i32_1 = arith.constant 0 : i32
    return %c0_i32, %c0_i32_0 : i32, i32
  }
}

module attributes {stable_mosaic.version = 11 : i64} {
  func.func @bn_relu_kernel(%arg0: i32, %arg1: memref<1024x32xf32, #tpu.memory_space<vmem>>, %arg2: memref<1x32xf32, #tpu.memory_space<vmem>>, %arg3: memref<1x32xf32, #tpu.memory_space<vmem>>, %arg4: memref<1024x32xf32, #tpu.memory_space<vmem>>) attributes {dimension_semantics = [#tpu.dimension_semantics<parallel>], iteration_bounds = array<i64: 2>, scalar_prefetch = 0 : i64, scratch_operands = 0 : i64, tpu.core_type = #tpu.core_type<tc>, window_params = [{transform_indices = @transform_0, window_bounds = array<i64: 1024, 32>}, {pipeline_mode = #tpu.pipeline_mode<synchronous>, transform_indices = @transform_1, window_bounds = array<i64: 1, 32>}, {pipeline_mode = #tpu.pipeline_mode<synchronous>, transform_indices = @transform_2, window_bounds = array<i64: 1, 32>}, {transform_indices = @transform_3, window_bounds = array<i64: 1024, 32>}]} {
    %c0 = arith.constant 0 : index
    %c0_0 = arith.constant 0 : index
    %0 = vector.load %arg1[%c0, %c0_0] : memref<1024x32xf32, #tpu.memory_space<vmem>>, vector<1024x32xf32>
    %c0_1 = arith.constant 0 : index
    %c0_2 = arith.constant 0 : index
    %1 = vector.load %arg2[%c0_1, %c0_2] : memref<1x32xf32, #tpu.memory_space<vmem>>, vector<1x32xf32>
    %2 = vector.broadcast %1 : vector<1x32xf32> to vector<1024x32xf32>
    %3 = arith.mulf %0, %2 : vector<1024x32xf32>
    %c0_3 = arith.constant 0 : index
    %c0_4 = arith.constant 0 : index
    %4 = vector.load %arg3[%c0_3, %c0_4] : memref<1x32xf32, #tpu.memory_space<vmem>>, vector<1x32xf32>
    %5 = vector.broadcast %4 : vector<1x32xf32> to vector<1024x32xf32>
    %6 = arith.addf %3, %5 : vector<1024x32xf32>
    %cst = arith.constant 0.000000e+00 : f32
    %7 = vector.broadcast %cst : f32 to vector<1024x32xf32>
    %8 = arith.maximumf %6, %7 : vector<1024x32xf32>
    %c0_5 = arith.constant 0 : index
    %c0_6 = arith.constant 0 : index
    %9 = vector.load %arg4[%c0_5, %c0_6] : memref<1024x32xf32, #tpu.memory_space<vmem>>, vector<1024x32xf32>
    tpu.vector_store %arg4[%c0_5, %c0_6], %8 {strides = array<i32>} : memref<1024x32xf32, #tpu.memory_space<vmem>>, vector<1024x32xf32>,
    return
  }
  func.func @transform_0(%arg0: i32) -> (i32, i32) {
    %c0_i32 = arith.constant 0 : i32
    %c0_i32_0 = arith.constant 0 : i32
    return %arg0, %c0_i32 : i32, i32
  }
  func.func @transform_1(%arg0: i32) -> (i32, i32) {
    %c0_i32 = arith.constant 0 : i32
    %c0_i32_0 = arith.constant 0 : i32
    %c0_i32_1 = arith.constant 0 : i32
    return %c0_i32, %c0_i32_0 : i32, i32
  }
  func.func @transform_2(%arg0: i32) -> (i32, i32) {
    %c0_i32 = arith.constant 0 : i32
    %c0_i32_0 = arith.constant 0 : i32
    %c0_i32_1 = arith.constant 0 : i32
    return %c0_i32, %c0_i32_0 : i32, i32
  }
  func.func @transform_3(%arg0: i32) -> (i32, i32) {
    %c0_i32 = arith.constant 0 : i32
    %c0_i32_0 = arith.constant 0 : i32
    return %arg0, %c0_i32 : i32, i32
  }
}

module attributes {stable_mosaic.version = 11 : i64} {
  func.func @conv_bn_relu_fused_kernel(%arg0: memref<512x288xf32, #tpu.memory_space<vmem>>, %arg1: memref<288x32xf32, #tpu.memory_space<vmem>>, %arg2: memref<1x32xf32, #tpu.memory_space<vmem>>, %arg3: memref<1x32xf32, #tpu.memory_space<vmem>>, %arg4: memref<512x32xf32, #tpu.memory_space<vmem>>) attributes {dimension_semantics = [], scalar_prefetch = 0 : i64, scratch_operands = 0 : i64, tpu.core_type = #tpu.core_type<tc>} {
    %c0 = arith.constant 0 : index
    %c0_0 = arith.constant 0 : index
    %0 = vector.load %arg0[%c0, %c0_0] : memref<512x288xf32, #tpu.memory_space<vmem>>, vector<512x288xf32>
    %c0_1 = arith.constant 0 : index
    %c0_2 = arith.constant 0 : index
    %1 = vector.load %arg1[%c0_1, %c0_2] : memref<288x32xf32, #tpu.memory_space<vmem>>, vector<288x32xf32>
    %cst = arith.constant dense<0.000000e+00> : vector<512x32xf32>
    %2 = tpu.matmul %0, %1, %cst {dimension_numbers = #tpu.dot_dimension_numbers<[1], [0], [0], [1], [0, 0, 1, 1], [], []>} : vector<512x288xf32>, vector<288x32xf32>, vector<512x32xf32> -> vector<512x32xf32>
    %cst_3 = arith.constant dense<0.000000e+00> : vector<32xf32>
    %3 = vector.multi_reduction <add>, %2, %cst_3 [0] : vector<512x32xf32> to vector<32xf32>
    %4 = vector.shape_cast %3 : vector<32xf32> to vector<1x32xf32>
    %cst_4 = arith.constant 0.001953125 : f32
    %5 = vector.broadcast %cst_4 : f32 to vector<1x32xf32>
    %6 = arith.mulf %4, %5 : vector<1x32xf32>
    %7 = arith.mulf %2, %2 : vector<512x32xf32>
    %cst_5 = arith.constant dense<0.000000e+00> : vector<32xf32>
    %8 = vector.multi_reduction <add>, %7, %cst_5 [0] : vector<512x32xf32> to vector<32xf32>
    %9 = vector.shape_cast %8 : vector<32xf32> to vector<1x32xf32>
    %cst_6 = arith.constant 0.001953125 : f32
    %10 = vector.broadcast %cst_6 : f32 to vector<1x32xf32>
    %11 = arith.mulf %9, %10 : vector<1x32xf32>
    %12 = arith.mulf %6, %6 : vector<1x32xf32>
    %13 = arith.subf %11, %12 : vector<1x32xf32>
    %cst_7 = arith.constant 0.000000e+00 : f32
    %14 = vector.broadcast %cst_7 : f32 to vector<1x32xf32>
    %15 = arith.maximumf %13, %14 : vector<1x32xf32>
    %cst_8 = arith.constant 9.99999974E-6 : f32
    %16 = vector.broadcast %cst_8 : f32 to vector<1x32xf32>
    %17 = arith.addf %15, %16 : vector<1x32xf32>
    %18 = math.rsqrt %17 : vector<1x32xf32>
    %c0_9 = arith.constant 0 : index
    %c0_10 = arith.constant 0 : index
    %19 = vector.load %arg2[%c0_9, %c0_10] : memref<1x32xf32, #tpu.memory_space<vmem>>, vector<1x32xf32>
    %20 = arith.mulf %19, %18 : vector<1x32xf32>
    %c0_11 = arith.constant 0 : index
    %c0_12 = arith.constant 0 : index
    %21 = vector.load %arg3[%c0_11, %c0_12] : memref<1x32xf32, #tpu.memory_space<vmem>>, vector<1x32xf32>
    %22 = arith.mulf %6, %20 : vector<1x32xf32>
    %23 = arith.subf %21, %22 : vector<1x32xf32>
    %24 = vector.broadcast %20 : vector<1x32xf32> to vector<512x32xf32>
    %25 = arith.mulf %2, %24 : vector<512x32xf32>
    %26 = vector.broadcast %23 : vector<1x32xf32> to vector<512x32xf32>
    %27 = arith.addf %25, %26 : vector<512x32xf32>
    %cst_13 = arith.constant 0.000000e+00 : f32
    %28 = vector.broadcast %cst_13 : f32 to vector<512x32xf32>
    %29 = arith.maximumf %27, %28 : vector<512x32xf32>
    %c0_14 = arith.constant 0 : index
    %c0_15 = arith.constant 0 : index
    %30 = vector.load %arg4[%c0_14, %c0_15] : memref<512x32xf32, #tpu.memory_space<vmem>>, vector<512x32xf32>
    tpu.vector_store %arg4[%c0_14, %c0_15], %29 {strides = array<i32>} : memref<512x32xf32, #tpu.memory_space<vmem>>, vector<512x32xf32>,
    return
  }
}

module attributes {stable_mosaic.version = 11 : i64} {
  func.func @conv_bn_relu_fused_kernel(%arg0: memref<128x288xf32, #tpu.memory_space<vmem>>, %arg1: memref<288x64xf32, #tpu.memory_space<vmem>>, %arg2: memref<1x64xf32, #tpu.memory_space<vmem>>, %arg3: memref<1x64xf32, #tpu.memory_space<vmem>>, %arg4: memref<128x64xf32, #tpu.memory_space<vmem>>) attributes {dimension_semantics = [], scalar_prefetch = 0 : i64, scratch_operands = 0 : i64, tpu.core_type = #tpu.core_type<tc>} {
    %c0 = arith.constant 0 : index
    %c0_0 = arith.constant 0 : index
    %0 = vector.load %arg0[%c0, %c0_0] : memref<128x288xf32, #tpu.memory_space<vmem>>, vector<128x288xf32>
    %c0_1 = arith.constant 0 : index
    %c0_2 = arith.constant 0 : index
    %1 = vector.load %arg1[%c0_1, %c0_2] : memref<288x64xf32, #tpu.memory_space<vmem>>, vector<288x64xf32>
    %cst = arith.constant dense<0.000000e+00> : vector<128x64xf32>
    %2 = tpu.matmul %0, %1, %cst {dimension_numbers = #tpu.dot_dimension_numbers<[1], [0], [0], [1], [0, 0, 1, 1], [], []>} : vector<128x288xf32>, vector<288x64xf32>, vector<128x64xf32> -> vector<128x64xf32>
    %cst_3 = arith.constant dense<0.000000e+00> : vector<64xf32>
    %3 = vector.multi_reduction <add>, %2, %cst_3 [0] : vector<128x64xf32> to vector<64xf32>
    %4 = vector.shape_cast %3 : vector<64xf32> to vector<1x64xf32>
    %cst_4 = arith.constant 7.812500e-03 : f32
    %5 = vector.broadcast %cst_4 : f32 to vector<1x64xf32>
    %6 = arith.mulf %4, %5 : vector<1x64xf32>
    %7 = arith.mulf %2, %2 : vector<128x64xf32>
    %cst_5 = arith.constant dense<0.000000e+00> : vector<64xf32>
    %8 = vector.multi_reduction <add>, %7, %cst_5 [0] : vector<128x64xf32> to vector<64xf32>
    %9 = vector.shape_cast %8 : vector<64xf32> to vector<1x64xf32>
    %cst_6 = arith.constant 7.812500e-03 : f32
    %10 = vector.broadcast %cst_6 : f32 to vector<1x64xf32>
    %11 = arith.mulf %9, %10 : vector<1x64xf32>
    %12 = arith.mulf %6, %6 : vector<1x64xf32>
    %13 = arith.subf %11, %12 : vector<1x64xf32>
    %cst_7 = arith.constant 0.000000e+00 : f32
    %14 = vector.broadcast %cst_7 : f32 to vector<1x64xf32>
    %15 = arith.maximumf %13, %14 : vector<1x64xf32>
    %cst_8 = arith.constant 9.99999974E-6 : f32
    %16 = vector.broadcast %cst_8 : f32 to vector<1x64xf32>
    %17 = arith.addf %15, %16 : vector<1x64xf32>
    %18 = math.rsqrt %17 : vector<1x64xf32>
    %c0_9 = arith.constant 0 : index
    %c0_10 = arith.constant 0 : index
    %19 = vector.load %arg2[%c0_9, %c0_10] : memref<1x64xf32, #tpu.memory_space<vmem>>, vector<1x64xf32>
    %20 = arith.mulf %19, %18 : vector<1x64xf32>
    %c0_11 = arith.constant 0 : index
    %c0_12 = arith.constant 0 : index
    %21 = vector.load %arg3[%c0_11, %c0_12] : memref<1x64xf32, #tpu.memory_space<vmem>>, vector<1x64xf32>
    %22 = arith.mulf %6, %20 : vector<1x64xf32>
    %23 = arith.subf %21, %22 : vector<1x64xf32>
    %24 = vector.broadcast %20 : vector<1x64xf32> to vector<128x64xf32>
    %25 = arith.mulf %2, %24 : vector<128x64xf32>
    %26 = vector.broadcast %23 : vector<1x64xf32> to vector<128x64xf32>
    %27 = arith.addf %25, %26 : vector<128x64xf32>
    %cst_13 = arith.constant 0.000000e+00 : f32
    %28 = vector.broadcast %cst_13 : f32 to vector<128x64xf32>
    %29 = arith.maximumf %27, %28 : vector<128x64xf32>
    %c0_14 = arith.constant 0 : index
    %c0_15 = arith.constant 0 : index
    %30 = vector.load %arg4[%c0_14, %c0_15] : memref<128x64xf32, #tpu.memory_space<vmem>>, vector<128x64xf32>
    tpu.vector_store %arg4[%c0_14, %c0_15], %29 {strides = array<i32>} : memref<128x64xf32, #tpu.memory_space<vmem>>, vector<128x64xf32>,
    return
  }
}

module attributes {stable_mosaic.version = 11 : i64} {
  func.func @conv_bn_relu_fused_kernel(%arg0: memref<32x576xf32, #tpu.memory_space<vmem>>, %arg1: memref<576x64xf32, #tpu.memory_space<vmem>>, %arg2: memref<1x64xf32, #tpu.memory_space<vmem>>, %arg3: memref<1x64xf32, #tpu.memory_space<vmem>>, %arg4: memref<32x64xf32, #tpu.memory_space<vmem>>) attributes {dimension_semantics = [], scalar_prefetch = 0 : i64, scratch_operands = 0 : i64, tpu.core_type = #tpu.core_type<tc>} {
    %c0 = arith.constant 0 : index
    %c0_0 = arith.constant 0 : index
    %0 = vector.load %arg0[%c0, %c0_0] : memref<32x576xf32, #tpu.memory_space<vmem>>, vector<32x576xf32>
    %c0_1 = arith.constant 0 : index
    %c0_2 = arith.constant 0 : index
    %1 = vector.load %arg1[%c0_1, %c0_2] : memref<576x64xf32, #tpu.memory_space<vmem>>, vector<576x64xf32>
    %cst = arith.constant dense<0.000000e+00> : vector<32x64xf32>
    %2 = tpu.matmul %0, %1, %cst {dimension_numbers = #tpu.dot_dimension_numbers<[1], [0], [0], [1], [0, 0, 1, 1], [], []>} : vector<32x576xf32>, vector<576x64xf32>, vector<32x64xf32> -> vector<32x64xf32>
    %cst_3 = arith.constant dense<0.000000e+00> : vector<64xf32>
    %3 = vector.multi_reduction <add>, %2, %cst_3 [0] : vector<32x64xf32> to vector<64xf32>
    %4 = vector.shape_cast %3 : vector<64xf32> to vector<1x64xf32>
    %cst_4 = arith.constant 3.125000e-02 : f32
    %5 = vector.broadcast %cst_4 : f32 to vector<1x64xf32>
    %6 = arith.mulf %4, %5 : vector<1x64xf32>
    %7 = arith.mulf %2, %2 : vector<32x64xf32>
    %cst_5 = arith.constant dense<0.000000e+00> : vector<64xf32>
    %8 = vector.multi_reduction <add>, %7, %cst_5 [0] : vector<32x64xf32> to vector<64xf32>
    %9 = vector.shape_cast %8 : vector<64xf32> to vector<1x64xf32>
    %cst_6 = arith.constant 3.125000e-02 : f32
    %10 = vector.broadcast %cst_6 : f32 to vector<1x64xf32>
    %11 = arith.mulf %9, %10 : vector<1x64xf32>
    %12 = arith.mulf %6, %6 : vector<1x64xf32>
    %13 = arith.subf %11, %12 : vector<1x64xf32>
    %cst_7 = arith.constant 0.000000e+00 : f32
    %14 = vector.broadcast %cst_7 : f32 to vector<1x64xf32>
    %15 = arith.maximumf %13, %14 : vector<1x64xf32>
    %cst_8 = arith.constant 9.99999974E-6 : f32
    %16 = vector.broadcast %cst_8 : f32 to vector<1x64xf32>
    %17 = arith.addf %15, %16 : vector<1x64xf32>
    %18 = math.rsqrt %17 : vector<1x64xf32>
    %c0_9 = arith.constant 0 : index
    %c0_10 = arith.constant 0 : index
    %19 = vector.load %arg2[%c0_9, %c0_10] : memref<1x64xf32, #tpu.memory_space<vmem>>, vector<1x64xf32>
    %20 = arith.mulf %19, %18 : vector<1x64xf32>
    %c0_11 = arith.constant 0 : index
    %c0_12 = arith.constant 0 : index
    %21 = vector.load %arg3[%c0_11, %c0_12] : memref<1x64xf32, #tpu.memory_space<vmem>>, vector<1x64xf32>
    %22 = arith.mulf %6, %20 : vector<1x64xf32>
    %23 = arith.subf %21, %22 : vector<1x64xf32>
    %24 = vector.broadcast %20 : vector<1x64xf32> to vector<32x64xf32>
    %25 = arith.mulf %2, %24 : vector<32x64xf32>
    %26 = vector.broadcast %23 : vector<1x64xf32> to vector<32x64xf32>
    %27 = arith.addf %25, %26 : vector<32x64xf32>
    %cst_13 = arith.constant 0.000000e+00 : f32
    %28 = vector.broadcast %cst_13 : f32 to vector<32x64xf32>
    %29 = arith.maximumf %27, %28 : vector<32x64xf32>
    %c0_14 = arith.constant 0 : index
    %c0_15 = arith.constant 0 : index
    %30 = vector.load %arg4[%c0_14, %c0_15] : memref<32x64xf32, #tpu.memory_space<vmem>>, vector<32x64xf32>
    tpu.vector_store %arg4[%c0_14, %c0_15], %29 {strides = array<i32>} : memref<32x64xf32, #tpu.memory_space<vmem>>, vector<32x64xf32>,
    return
  }
}

module attributes {stable_mosaic.version = 11 : i64} {
  func.func @conv_bn_relu_fused_kernel(%arg0: memref<8x576xf32, #tpu.memory_space<vmem>>, %arg1: memref<576x128xf32, #tpu.memory_space<vmem>>, %arg2: memref<1x128xf32, #tpu.memory_space<vmem>>, %arg3: memref<1x128xf32, #tpu.memory_space<vmem>>, %arg4: memref<8x128xf32, #tpu.memory_space<vmem>>) attributes {dimension_semantics = [], scalar_prefetch = 0 : i64, scratch_operands = 0 : i64, tpu.core_type = #tpu.core_type<tc>} {
    %c0 = arith.constant 0 : index
    %c0_0 = arith.constant 0 : index
    %0 = vector.load %arg0[%c0, %c0_0] : memref<8x576xf32, #tpu.memory_space<vmem>>, vector<8x576xf32>
    %c0_1 = arith.constant 0 : index
    %c0_2 = arith.constant 0 : index
    %1 = vector.load %arg1[%c0_1, %c0_2] : memref<576x128xf32, #tpu.memory_space<vmem>>, vector<576x128xf32>
    %cst = arith.constant dense<0.000000e+00> : vector<8x128xf32>
    %2 = tpu.matmul %0, %1, %cst {dimension_numbers = #tpu.dot_dimension_numbers<[1], [0], [0], [1], [0, 0, 1, 1], [], []>} : vector<8x576xf32>, vector<576x128xf32>, vector<8x128xf32> -> vector<8x128xf32>
    %cst_3 = arith.constant dense<0.000000e+00> : vector<128xf32>
    %3 = vector.multi_reduction <add>, %2, %cst_3 [0] : vector<8x128xf32> to vector<128xf32>
    %4 = vector.shape_cast %3 : vector<128xf32> to vector<1x128xf32>
    %cst_4 = arith.constant 1.250000e-01 : f32
    %5 = vector.broadcast %cst_4 : f32 to vector<1x128xf32>
    %6 = arith.mulf %4, %5 : vector<1x128xf32>
    %7 = arith.mulf %2, %2 : vector<8x128xf32>
    %cst_5 = arith.constant dense<0.000000e+00> : vector<128xf32>
    %8 = vector.multi_reduction <add>, %7, %cst_5 [0] : vector<8x128xf32> to vector<128xf32>
    %9 = vector.shape_cast %8 : vector<128xf32> to vector<1x128xf32>
    %cst_6 = arith.constant 1.250000e-01 : f32
    %10 = vector.broadcast %cst_6 : f32 to vector<1x128xf32>
    %11 = arith.mulf %9, %10 : vector<1x128xf32>
    %12 = arith.mulf %6, %6 : vector<1x128xf32>
    %13 = arith.subf %11, %12 : vector<1x128xf32>
    %cst_7 = arith.constant 0.000000e+00 : f32
    %14 = vector.broadcast %cst_7 : f32 to vector<1x128xf32>
    %15 = arith.maximumf %13, %14 : vector<1x128xf32>
    %cst_8 = arith.constant 9.99999974E-6 : f32
    %16 = vector.broadcast %cst_8 : f32 to vector<1x128xf32>
    %17 = arith.addf %15, %16 : vector<1x128xf32>
    %18 = math.rsqrt %17 : vector<1x128xf32>
    %c0_9 = arith.constant 0 : index
    %c0_10 = arith.constant 0 : index
    %19 = vector.load %arg2[%c0_9, %c0_10] : memref<1x128xf32, #tpu.memory_space<vmem>>, vector<1x128xf32>
    %20 = arith.mulf %19, %18 : vector<1x128xf32>
    %c0_11 = arith.constant 0 : index
    %c0_12 = arith.constant 0 : index
    %21 = vector.load %arg3[%c0_11, %c0_12] : memref<1x128xf32, #tpu.memory_space<vmem>>, vector<1x128xf32>
    %22 = arith.mulf %6, %20 : vector<1x128xf32>
    %23 = arith.subf %21, %22 : vector<1x128xf32>
    %24 = vector.broadcast %20 : vector<1x128xf32> to vector<8x128xf32>
    %25 = arith.mulf %2, %24 : vector<8x128xf32>
    %26 = vector.broadcast %23 : vector<1x128xf32> to vector<8x128xf32>
    %27 = arith.addf %25, %26 : vector<8x128xf32>
    %cst_13 = arith.constant 0.000000e+00 : f32
    %28 = vector.broadcast %cst_13 : f32 to vector<8x128xf32>
    %29 = arith.maximumf %27, %28 : vector<8x128xf32>
    %c0_14 = arith.constant 0 : index
    %c0_15 = arith.constant 0 : index
    %30 = vector.load %arg4[%c0_14, %c0_15] : memref<8x128xf32, #tpu.memory_space<vmem>>, vector<8x128xf32>
    tpu.vector_store %arg4[%c0_14, %c0_15], %29 {strides = array<i32>} : memref<8x128xf32, #tpu.memory_space<vmem>>, vector<8x128xf32>,
    return
  }
}

module attributes {stable_mosaic.version = 11 : i64} {
  func.func @conv_bn_relu_fused_kernel(%arg0: memref<4x1152xf32, #tpu.memory_space<vmem>>, %arg1: memref<1152x128xf32, #tpu.memory_space<vmem>>, %arg2: memref<1x128xf32, #tpu.memory_space<vmem>>, %arg3: memref<1x128xf32, #tpu.memory_space<vmem>>, %arg4: memref<4x128xf32, #tpu.memory_space<vmem>>) attributes {dimension_semantics = [], scalar_prefetch = 0 : i64, scratch_operands = 0 : i64, tpu.core_type = #tpu.core_type<tc>} {
    %c0 = arith.constant 0 : index
    %c0_0 = arith.constant 0 : index
    %0 = vector.load %arg0[%c0, %c0_0] : memref<4x1152xf32, #tpu.memory_space<vmem>>, vector<4x1152xf32>
    %c0_1 = arith.constant 0 : index
    %c0_2 = arith.constant 0 : index
    %1 = vector.load %arg1[%c0_1, %c0_2] : memref<1152x128xf32, #tpu.memory_space<vmem>>, vector<1152x128xf32>
    %cst = arith.constant dense<0.000000e+00> : vector<4x128xf32>
    %2 = tpu.matmul %0, %1, %cst {dimension_numbers = #tpu.dot_dimension_numbers<[1], [0], [0], [1], [0, 0, 1, 1], [], []>} : vector<4x1152xf32>, vector<1152x128xf32>, vector<4x128xf32> -> vector<4x128xf32>
    %cst_3 = arith.constant dense<0.000000e+00> : vector<128xf32>
    %3 = vector.multi_reduction <add>, %2, %cst_3 [0] : vector<4x128xf32> to vector<128xf32>
    %4 = vector.shape_cast %3 : vector<128xf32> to vector<1x128xf32>
    %cst_4 = arith.constant 2.500000e-01 : f32
    %5 = vector.broadcast %cst_4 : f32 to vector<1x128xf32>
    %6 = arith.mulf %4, %5 : vector<1x128xf32>
    %7 = arith.mulf %2, %2 : vector<4x128xf32>
    %cst_5 = arith.constant dense<0.000000e+00> : vector<128xf32>
    %8 = vector.multi_reduction <add>, %7, %cst_5 [0] : vector<4x128xf32> to vector<128xf32>
    %9 = vector.shape_cast %8 : vector<128xf32> to vector<1x128xf32>
    %cst_6 = arith.constant 2.500000e-01 : f32
    %10 = vector.broadcast %cst_6 : f32 to vector<1x128xf32>
    %11 = arith.mulf %9, %10 : vector<1x128xf32>
    %12 = arith.mulf %6, %6 : vector<1x128xf32>
    %13 = arith.subf %11, %12 : vector<1x128xf32>
    %cst_7 = arith.constant 0.000000e+00 : f32
    %14 = vector.broadcast %cst_7 : f32 to vector<1x128xf32>
    %15 = arith.maximumf %13, %14 : vector<1x128xf32>
    %cst_8 = arith.constant 9.99999974E-6 : f32
    %16 = vector.broadcast %cst_8 : f32 to vector<1x128xf32>
    %17 = arith.addf %15, %16 : vector<1x128xf32>
    %18 = math.rsqrt %17 : vector<1x128xf32>
    %c0_9 = arith.constant 0 : index
    %c0_10 = arith.constant 0 : index
    %19 = vector.load %arg2[%c0_9, %c0_10] : memref<1x128xf32, #tpu.memory_space<vmem>>, vector<1x128xf32>
    %20 = arith.mulf %19, %18 : vector<1x128xf32>
    %c0_11 = arith.constant 0 : index
    %c0_12 = arith.constant 0 : index
    %21 = vector.load %arg3[%c0_11, %c0_12] : memref<1x128xf32, #tpu.memory_space<vmem>>, vector<1x128xf32>
    %22 = arith.mulf %6, %20 : vector<1x128xf32>
    %23 = arith.subf %21, %22 : vector<1x128xf32>
    %24 = vector.broadcast %20 : vector<1x128xf32> to vector<4x128xf32>
    %25 = arith.mulf %2, %24 : vector<4x128xf32>
    %26 = vector.broadcast %23 : vector<1x128xf32> to vector<4x128xf32>
    %27 = arith.addf %25, %26 : vector<4x128xf32>
    %cst_13 = arith.constant 0.000000e+00 : f32
    %28 = vector.broadcast %cst_13 : f32 to vector<4x128xf32>
    %29 = arith.maximumf %27, %28 : vector<4x128xf32>
    %c0_14 = arith.constant 0 : index
    %c0_15 = arith.constant 0 : index
    %30 = vector.load %arg4[%c0_14, %c0_15] : memref<4x128xf32, #tpu.memory_space<vmem>>, vector<4x128xf32>
    tpu.vector_store %arg4[%c0_14, %c0_15], %29 {strides = array<i32>} : memref<4x128xf32, #tpu.memory_space<vmem>>, vector<4x128xf32>,
    return
  }
}

module attributes {stable_mosaic.version = 11 : i64} {
  func.func @gru_kernel(%arg0: i32, %arg1: memref<16x128xf32, #tpu.memory_space<vmem>>, %arg2: memref<128x384xf32, #tpu.memory_space<vmem>>, %arg3: memref<1x384xf32, #tpu.memory_space<vmem>>, %arg4: memref<128x384xf32, #tpu.memory_space<vmem>>, %arg5: memref<1x384xf32, #tpu.memory_space<vmem>>, %arg6: memref<8x128xf32, #tpu.memory_space<vmem>>, %arg7: memref<8x128xf32, #tpu.memory_space<vmem>>, %arg8: memref<2x8x384xf32, #tpu.memory_space<vmem>>) attributes {dimension_semantics = [#tpu.dimension_semantics<arbitrary>], iteration_bounds = array<i64: 1>, scalar_prefetch = 0 : i64, scratch_operands = 2 : i64, tpu.core_type = #tpu.core_type<tc>, window_params = [{transform_indices = @transform_0, window_bounds = array<i64: 16, 128>}, {pipeline_mode = #tpu.pipeline_mode<synchronous>, transform_indices = @transform_1, window_bounds = array<i64: 128, 384>}, {pipeline_mode = #tpu.pipeline_mode<synchronous>, transform_indices = @transform_2, window_bounds = array<i64: 1, 384>}, {pipeline_mode = #tpu.pipeline_mode<synchronous>, transform_indices = @transform_3, window_bounds = array<i64: 128, 384>}, {pipeline_mode = #tpu.pipeline_mode<synchronous>, transform_indices = @transform_4, window_bounds = array<i64: 1, 384>}, {pipeline_mode = #tpu.pipeline_mode<synchronous>, transform_indices = @transform_5, window_bounds = array<i64: 8, 128>}]} {
    %c0_i32 = arith.constant 0 : i32
    %0 = arith.cmpi eq, %arg0, %c0_i32 : i32
    %1 = arith.extui %0 : i1 to i32
    %c0_i32_0 = arith.constant 0 : i32
    %2 = arith.cmpi ne, %1, %c0_i32_0 : i32
    scf.if %2 {
      %cst_32 = arith.constant 0.000000e+00 : f32
      %80 = vector.broadcast %cst_32 : f32 to vector<8x128xf32>
      %c0_33 = arith.constant 0 : index
      %c0_34 = arith.constant 0 : index
      %81 = vector.load %arg7[%c0_33, %c0_34] : memref<8x128xf32, #tpu.memory_space<vmem>>, vector<8x128xf32>
      tpu.vector_store %arg7[%c0_33, %c0_34], %80 {strides = array<i32>} : memref<8x128xf32, #tpu.memory_space<vmem>>, vector<8x128xf32>,
    } else {
    }
    %c0 = arith.constant 0 : index
    %c0_1 = arith.constant 0 : index
    %3 = vector.load %arg1[%c0, %c0_1] : memref<16x128xf32, #tpu.memory_space<vmem>>, vector<16x128xf32>
    %c0_2 = arith.constant 0 : index
    %c0_3 = arith.constant 0 : index
    %4 = vector.load %arg2[%c0_2, %c0_3] : memref<128x384xf32, #tpu.memory_space<vmem>>, vector<128x384xf32>
    %cst = arith.constant dense<0.000000e+00> : vector<16x384xf32>
    %5 = tpu.matmul %3, %4, %cst {dimension_numbers = #tpu.dot_dimension_numbers<[1], [0], [0], [1], [0, 0, 1, 1], [], []>} : vector<16x128xf32>, vector<128x384xf32>, vector<16x384xf32> -> vector<16x384xf32>
    %c0_4 = arith.constant 0 : index
    %c0_5 = arith.constant 0 : index
    %6 = vector.load %arg3[%c0_4, %c0_5] : memref<1x384xf32, #tpu.memory_space<vmem>>, vector<1x384xf32>
    %7 = vector.broadcast %6 : vector<1x384xf32> to vector<16x384xf32>
    %8 = arith.addf %5, %7 : vector<16x384xf32>
    %9 = vector.shape_cast %8 : vector<16x384xf32> to vector<2x8x384xf32>
    %c0_6 = arith.constant 0 : index
    %c0_7 = arith.constant 0 : index
    %c0_8 = arith.constant 0 : index
    %10 = vector.load %arg8[%c0_6, %c0_7, %c0_8] : memref<2x8x384xf32, #tpu.memory_space<vmem>>, vector<2x8x384xf32>
    tpu.vector_store %arg8[%c0_6, %c0_7, %c0_8], %9 {strides = array<i32>} : memref<2x8x384xf32, #tpu.memory_space<vmem>>, vector<2x8x384xf32>,
    %c0_9 = arith.constant 0 : index
    %c0_10 = arith.constant 0 : index
    %11 = vector.load %arg4[%c0_9, %c0_10] : memref<128x384xf32, #tpu.memory_space<vmem>>, vector<128x384xf32>
    %c0_11 = arith.constant 0 : index
    %c0_12 = arith.constant 0 : index
    %12 = vector.load %arg5[%c0_11, %c0_12] : memref<1x384xf32, #tpu.memory_space<vmem>>, vector<1x384xf32>
    %c0_13 = arith.constant 0 : index
    %c0_14 = arith.constant 0 : index
    %13 = vector.load %arg7[%c0_13, %c0_14] : memref<8x128xf32, #tpu.memory_space<vmem>>, vector<8x128xf32>
    %c0_i32_15 = arith.constant 0 : i32
    %14 = arith.index_cast %c0_i32_15 : i32 to index
    %c0_16 = arith.constant 0 : index
    %c0_17 = arith.constant 0 : index
    %15 = vector.load %arg8[%14, %c0_16, %c0_17] : memref<2x8x384xf32, #tpu.memory_space<vmem>>, vector<1x8x384xf32>
    %16 = vector.shape_cast %15 : vector<1x8x384xf32> to vector<8x384xf32>
    %cst_18 = arith.constant dense<0.000000e+00> : vector<8x384xf32>
    %17 = tpu.matmul %13, %11, %cst_18 {dimension_numbers = #tpu.dot_dimension_numbers<[1], [0], [0], [1], [0, 0, 1, 1], [], []>} : vector<8x128xf32>, vector<128x384xf32>, vector<8x384xf32> -> vector<8x384xf32>
    %18 = vector.broadcast %12 : vector<1x384xf32> to vector<8x384xf32>
    %19 = arith.addf %17, %18 : vector<8x384xf32>
    %20 = vector.extract_strided_slice %16 {offsets = [0, 0], sizes = [8, 128], strides = [1, 1]} : vector<8x384xf32> to vector<8x128xf32>
    %21 = vector.extract_strided_slice %19 {offsets = [0, 0], sizes = [8, 128], strides = [1, 1]} : vector<8x384xf32> to vector<8x128xf32>
    %22 = arith.addf %20, %21 : vector<8x128xf32>
    %23 = arith.negf %22 : vector<8x128xf32>
    %24 = math.exp %23 : vector<8x128xf32>
    %cst_19 = arith.constant 1.000000e+00 : f32
    %25 = vector.broadcast %cst_19 : f32 to vector<8x128xf32>
    %26 = arith.addf %25, %24 : vector<8x128xf32>
    %27 = arith.divf %25, %26 : vector<8x128xf32>
    %28 = vector.extract_strided_slice %16 {offsets = [0, 128], sizes = [8, 128], strides = [1, 1]} : vector<8x384xf32> to vector<8x128xf32>
    %29 = vector.extract_strided_slice %19 {offsets = [0, 128], sizes = [8, 128], strides = [1, 1]} : vector<8x384xf32> to vector<8x128xf32>
    %30 = arith.addf %28, %29 : vector<8x128xf32>
    %31 = arith.negf %30 : vector<8x128xf32>
    %32 = math.exp %31 : vector<8x128xf32>
    %cst_20 = arith.constant 1.000000e+00 : f32
    %33 = vector.broadcast %cst_20 : f32 to vector<8x128xf32>
    %34 = arith.addf %33, %32 : vector<8x128xf32>
    %35 = arith.divf %33, %34 : vector<8x128xf32>
    %36 = vector.extract_strided_slice %16 {offsets = [0, 256], sizes = [8, 128], strides = [1, 1]} : vector<8x384xf32> to vector<8x128xf32>
    %37 = vector.extract_strided_slice %19 {offsets = [0, 256], sizes = [8, 128], strides = [1, 1]} : vector<8x384xf32> to vector<8x128xf32>
    %38 = arith.mulf %27, %37 : vector<8x128xf32>
    %39 = arith.addf %36, %38 : vector<8x128xf32>
    %40 = math.tanh %39 : vector<8x128xf32>
    %cst_21 = arith.constant 1.000000e+00 : f32
    %41 = vector.broadcast %cst_21 : f32 to vector<8x128xf32>
    %42 = arith.subf %41, %35 : vector<8x128xf32>
    %43 = arith.mulf %42, %40 : vector<8x128xf32>
    %44 = arith.mulf %35, %13 : vector<8x128xf32>
    %45 = arith.addf %43, %44 : vector<8x128xf32>
    %c1_i32 = arith.constant 1 : i32
    %46 = arith.index_cast %c1_i32 : i32 to index
    %c0_22 = arith.constant 0 : index
    %c0_23 = arith.constant 0 : index
    %47 = vector.load %arg8[%46, %c0_22, %c0_23] : memref<2x8x384xf32, #tpu.memory_space<vmem>>, vector<1x8x384xf32>
    %48 = vector.shape_cast %47 : vector<1x8x384xf32> to vector<8x384xf32>
    %cst_24 = arith.constant dense<0.000000e+00> : vector<8x384xf32>
    %49 = tpu.matmul %45, %11, %cst_24 {dimension_numbers = #tpu.dot_dimension_numbers<[1], [0], [0], [1], [0, 0, 1, 1], [], []>} : vector<8x128xf32>, vector<128x384xf32>, vector<8x384xf32> -> vector<8x384xf32>
    %50 = vector.broadcast %12 : vector<1x384xf32> to vector<8x384xf32>
    %51 = arith.addf %49, %50 : vector<8x384xf32>
    %52 = vector.extract_strided_slice %48 {offsets = [0, 0], sizes = [8, 128], strides = [1, 1]} : vector<8x384xf32> to vector<8x128xf32>
    %53 = vector.extract_strided_slice %51 {offsets = [0, 0], sizes = [8, 128], strides = [1, 1]} : vector<8x384xf32> to vector<8x128xf32>
    %54 = arith.addf %52, %53 : vector<8x128xf32>
    %55 = arith.negf %54 : vector<8x128xf32>
    %56 = math.exp %55 : vector<8x128xf32>
    %cst_25 = arith.constant 1.000000e+00 : f32
    %57 = vector.broadcast %cst_25 : f32 to vector<8x128xf32>
    %58 = arith.addf %57, %56 : vector<8x128xf32>
    %59 = arith.divf %57, %58 : vector<8x128xf32>
    %60 = vector.extract_strided_slice %48 {offsets = [0, 128], sizes = [8, 128], strides = [1, 1]} : vector<8x384xf32> to vector<8x128xf32>
    %61 = vector.extract_strided_slice %51 {offsets = [0, 128], sizes = [8, 128], strides = [1, 1]} : vector<8x384xf32> to vector<8x128xf32>
    %62 = arith.addf %60, %61 : vector<8x128xf32>
    %63 = arith.negf %62 : vector<8x128xf32>
    %64 = math.exp %63 : vector<8x128xf32>
    %cst_26 = arith.constant 1.000000e+00 : f32
    %65 = vector.broadcast %cst_26 : f32 to vector<8x128xf32>
    %66 = arith.addf %65, %64 : vector<8x128xf32>
    %67 = arith.divf %65, %66 : vector<8x128xf32>
    %68 = vector.extract_strided_slice %48 {offsets = [0, 256], sizes = [8, 128], strides = [1, 1]} : vector<8x384xf32> to vector<8x128xf32>
    %69 = vector.extract_strided_slice %51 {offsets = [0, 256], sizes = [8, 128], strides = [1, 1]} : vector<8x384xf32> to vector<8x128xf32>
    %70 = arith.mulf %59, %69 : vector<8x128xf32>
    %71 = arith.addf %68, %70 : vector<8x128xf32>
    %72 = math.tanh %71 : vector<8x128xf32>
    %cst_27 = arith.constant 1.000000e+00 : f32
    %73 = vector.broadcast %cst_27 : f32 to vector<8x128xf32>
    %74 = arith.subf %73, %67 : vector<8x128xf32>
    %75 = arith.mulf %74, %72 : vector<8x128xf32>
    %76 = arith.mulf %67, %45 : vector<8x128xf32>
    %77 = arith.addf %75, %76 : vector<8x128xf32>
    %c2_i32 = arith.constant 2 : i32
    %c0_28 = arith.constant 0 : index
    %c0_29 = arith.constant 0 : index
    %78 = vector.load %arg7[%c0_28, %c0_29] : memref<8x128xf32, #tpu.memory_space<vmem>>, vector<8x128xf32>
    tpu.vector_store %arg7[%c0_28, %c0_29], %77 {strides = array<i32>} : memref<8x128xf32, #tpu.memory_space<vmem>>, vector<8x128xf32>,
    %c0_30 = arith.constant 0 : index
    %c0_31 = arith.constant 0 : index
    %79 = vector.load %arg6[%c0_30, %c0_31] : memref<8x128xf32, #tpu.memory_space<vmem>>, vector<8x128xf32>
    tpu.vector_store %arg6[%c0_30, %c0_31], %77 {strides = array<i32>} : memref<8x128xf32, #tpu.memory_space<vmem>>, vector<8x128xf32>,
    return
  }
  func.func @transform_0(%arg0: i32) -> (i32, i32) {
    %c0_i32 = arith.constant 0 : i32
    %c0_i32_0 = arith.constant 0 : i32
    return %arg0, %c0_i32 : i32, i32
  }
  func.func @transform_1(%arg0: i32) -> (i32, i32) {
    %c0_i32 = arith.constant 0 : i32
    %c0_i32_0 = arith.constant 0 : i32
    %c0_i32_1 = arith.constant 0 : i32
    return %c0_i32, %c0_i32_0 : i32, i32
  }
  func.func @transform_2(%arg0: i32) -> (i32, i32) {
    %c0_i32 = arith.constant 0 : i32
    %c0_i32_0 = arith.constant 0 : i32
    %c0_i32_1 = arith.constant 0 : i32
    return %c0_i32, %c0_i32_0 : i32, i32
  }
  func.func @transform_3(%arg0: i32) -> (i32, i32) {
    %c0_i32 = arith.constant 0 : i32
    %c0_i32_0 = arith.constant 0 : i32
    %c0_i32_1 = arith.constant 0 : i32
    return %c0_i32, %c0_i32_0 : i32, i32
  }
  func.func @transform_4(%arg0: i32) -> (i32, i32) {
    %c0_i32 = arith.constant 0 : i32
    %c0_i32_0 = arith.constant 0 : i32
    %c0_i32_1 = arith.constant 0 : i32
    return %c0_i32, %c0_i32_0 : i32, i32
  }
  func.func @transform_5(%arg0: i32) -> (i32, i32) {
    %c0_i32 = arith.constant 0 : i32
    %c0_i32_0 = arith.constant 0 : i32
    %c0_i32_1 = arith.constant 0 : i32
    return %c0_i32, %c0_i32_0 : i32, i32
  }
}

</mosaic_0001>

<bundles_post_ra>
// kernel: _reference_encoder_forward.9
= control target key start
LH: loop header
LB: loop body
LE: loop exit
PB: predicated region body
PF: predicated region fallthrough
CT: control target
= control target key end

     0   :  { %s936_s12 = smov 0   ;;  %s1617_s0 = inlined_call_operand.vmem [shape: f32[2048,32], index: 0, kind: input, shape index: {}]   ;;  %s1618_s1 = inlined_call_operand.vmem [shape: f32[1,32], index: 1, kind: input, shape index: {}]   ;;  %s1619_s2 = inlined_call_operand.vmem [shape: f32[1,32], index: 2, kind: input, shape index: {}]   ;;  %s1620_s3 = inlined_call_operand.vmem [shape: f32[2048,32], index: 3, kind: output, shape index: {}]  }
   0x1 LB: > { %s885_s13 = sadd.s32 4294967295, %s914_s12   ;;  %p889_p0 = scmp.ge.s32.totalorder %s914_s12, 1  ;;  %s914_s12 = sphi %s936_s12, %s13_s12  }
   0x2   : > { %p138_p1 = scmp.lt.s32.totalorder %s914_s12, 3 }
   0x4   : > { %p139_p2 = pnand %p889_p0, %p138_p1 }
   0x5   : > { %s890_s14 = sshll.u32 (!%p139_p2), %s885_s13, 7  ;;  %v947_v0 = vld [vmem:[%s1618_s1] ss:$0 sm:$0xff] (!%p139_p2)  ;;  %vm700_vm0 = vcmask (!%p139_p2), 261120  }
   0x6   : > { %142 = sbr.rel (%p139_p2) target bundleno = 118 (0x76), region = 32  ;;  %p163_p3 = scmp.lt.s32.totalorder (!%p139_p2), %s890_s14, 255  ;;  %v957_v1 = vld [vmem:[%s1619_s2] ss:$0 sm:$0xff] (!%p139_p2) }
   0xd   : > { %s1622_s14 = smov (!%p163_p3, %s890_s14), 255 }
   0xe   : > { %s891_s15 = sshll.u32 %s1622_s14, 3 }
   0xf   : > { %s952_s20 = scalar_lea.vmem %s1617_s0, %s891_s15  ;;  %s980_s25 = scalar_lea.vmem %s1620_s3, %s891_s15 }
  0x10   : > { %v174_v2 = vld [vmem:[%s952_s20] sm:$0xff]  ;;  %v175_v3 = vld [vmem:[%s952_s20 + $0x8] sm:$0xff]  ;;  %v176_v4 = vld [vmem:[%s952_s20 + $0x10] sm:$0xff] }
  0x11   : > { %v309_v5 = vmul.f32 %v947_v0, %v174_v2  ;;  %v310_v6 = vmul.f32 %v947_v0, %v175_v3  ;;  %v311_v7 = vmul.f32 %v947_v0, %v176_v4  ;;  %v177_v8 = vld [vmem:[%s952_s20 + $0x18] sm:$0xff]  ;;  %v178_v9 = vld [vmem:[%s952_s20 + $0x20] sm:$0xff]  ;;  %v179_v10 = vld [vmem:[%s952_s20 + $0x28] sm:$0xff] }
  0x12   : > { %v312_v11 = vmul.f32 %v947_v0, %v177_v8  ;;  %v313_v12 = vmul.f32 %v947_v0, %v178_v9  ;;  %v314_v13 = vmul.f32 %v947_v0, %v179_v10  ;;  %v180_v14 = vld [vmem:[%s952_s20 + $0x30] sm:$0xff]  ;;  %v181_v15 = vld [vmem:[%s952_s20 + $0x38] sm:$0xff]  ;;  %v182_v24 = vld [vmem:[%s952_s20 + $0x40] sm:$0xff] }
  0x13   : > { %v444_v16 = vadd.f32 %v957_v1, %v309_v5  ;;  %v445_v17 = vadd.f32 %v957_v1, %v310_v6  ;;  %v446_v18 = vadd.f32 %v957_v1, %v311_v7  ;;  %v315_v19 = vmul.f32 %v947_v0, %v180_v14  ;;  %v183_v25 = vld [vmem:[%s952_s20 + $0x48] sm:$0xff]  ;;  %v184_v26 = vld [vmem:[%s952_s20 + $0x50] sm:$0xff]  ;;  %v185_v31 = vld [vmem:[%s952_s20 + $0x58] sm:$0xff] }
  0x14   : > { %v447_v20 = vadd.f32 %v957_v1, %v312_v11  ;;  %v448_v21 = vadd.f32 %v957_v1, %v313_v12  ;;  %v449_v22 = vadd.f32 %v957_v1, %v314_v13  ;;  %v316_v23 = vmul.f32 %v947_v0, %v181_v15  ;;  %v186_v32 = vld [vmem:[%s952_s20 + $0x60] sm:$0xff]  ;;  %v187_v33 = vld [vmem:[%s952_s20 + $0x68] sm:$0xff]  ;;  %v188_v38 = vld [vmem:[%s952_s20 + $0x70] sm:$0xff] }
  0x15   : > { %v572_v27 = vmax.f32 %v444_v16, 0.0  ;;  %v573_v28 = vmax.f32 %v445_v17, 0.0  ;;  %v574_v29 = vmax.f32 %v446_v18, 0.0  ;;  %v450_v30 = vadd.f32 %v957_v1, %v315_v19  ;;  %v189_v43 = vld [vmem:[%s952_s20 + $0x78] sm:$0xff]  ;;  %v190_v56 = vld [vmem:[%s952_s20 + $0x80] sm:$0xff]  ;;  %v191_v57 = vld [vmem:[%s952_s20 + $0x88] sm:$0xff] }
  0x16   : > { %v575_v34 = vmax.f32 %v447_v20, 0.0  ;;  %v576_v35 = vmax.f32 %v448_v21, 0.0  ;;  %v577_v36 = vmax.f32 %v449_v22, 0.0  ;;  %v451_v37 = vadd.f32 %v957_v1, %v316_v23  ;;  %v192_v58 = vld [vmem:[%s952_s20 + $0x90] sm:$0xff]  ;;  %v193_v63 = vld [vmem:[%s952_s20 + $0x98] sm:$0xff]  ;;  %v194_v2 = vld [vmem:[%s952_s20 + $0xa0] sm:$0xff] }
  0x17   : > { %701 = vst.msk [vmem:[%s980_s25] sm:$0xff] %vm700_vm0, %v572_v27  ;;  %702 = vst.msk [vmem:[%s980_s25 + $0x8] sm:$0xff] %vm700_vm0, %v573_v28  ;;  %v578_v39 = vmax.f32 %v450_v30, 0.0  ;;  %v317_v40 = vmul.f32 %v947_v0, %v182_v24  ;;  %v318_v41 = vmul.f32 %v947_v0, %v183_v25  ;;  %v319_v42 = vmul.f32 %v947_v0, %v184_v26  ;;  %v195_v3 = vld [vmem:[%s952_s20 + $0xa8] sm:$0xff]  ;;  %v196_v8 = vld [vmem:[%s952_s20 + $0xb0] sm:$0xff] }
  0x18   : > { %703 = vst.msk [vmem:[%s980_s25 + $0x10] sm:$0xff] %vm700_vm0, %v574_v29  ;;  %704 = vst.msk [vmem:[%s980_s25 + $0x18] sm:$0xff] %vm700_vm0, %v575_v34  ;;  %v579_v44 = vmax.f32 %v451_v37, 0.0  ;;  %v320_v45 = vmul.f32 %v947_v0, %v185_v31  ;;  %v321_v46 = vmul.f32 %v947_v0, %v186_v32  ;;  %v322_v47 = vmul.f32 %v947_v0, %v187_v33  ;;  %v197_v13 = vld [vmem:[%s952_s20 + $0xb8] sm:$0xff]  ;;  %v198_v26 = vld [vmem:[%s952_s20 + $0xc0] sm:$0xff] }
  0x19   : > { %705 = vst.msk [vmem:[%s980_s25 + $0x20] sm:$0xff] %vm700_vm0, %v576_v35  ;;  %706 = vst.msk [vmem:[%s980_s25 + $0x28] sm:$0xff] %vm700_vm0, %v577_v36  ;;  %v452_v48 = vadd.f32 %v957_v1, %v317_v40  ;;  %v453_v49 = vadd.f32 %v957_v1, %v318_v41  ;;  %v454_v50 = vadd.f32 %v957_v1, %v319_v42  ;;  %v199_v27 = vld [vmem:[%s952_s20 + $0xc8] sm:$0xff]  ;;  %v200_v28 = vld [vmem:[%s952_s20 + $0xd0] sm:$0xff] }
  0x1a   : > { %707 = vst.msk [vmem:[%s980_s25 + $0x30] sm:$0xff] %vm700_vm0, %v578_v39  ;;  %v323_v51 = vmul.f32 %v947_v0, %v188_v38  ;;  %708 = vst.msk [vmem:[%s980_s25 + $0x38] sm:$0xff] %vm700_vm0, %v579_v44  ;;  %v455_v52 = vadd.f32 %v957_v1, %v320_v45  ;;  %v456_v53 = vadd.f32 %v957_v1, %v321_v46  ;;  %v201_v33 = vld [vmem:[%s952_s20 + $0xd8] sm:$0xff]  ;;  %v202_v34 = vld [vmem:[%s952_s20 + $0xe0] sm:$0xff] }
  0x1b   : > { %v457_v54 = vadd.f32 %v957_v1, %v322_v47  ;;  %v324_v55 = vmul.f32 %v947_v0, %v189_v43  ;;  %v580_v59 = vmax.f32 %v452_v48, 0.0  ;;  %v581_v60 = vmax.f32 %v453_v49, 0.0  ;;  %v203_v35 = vld [vmem:[%s952_s20 + $0xe8] sm:$0xff]  ;;  %v204_v40 = vld [vmem:[%s952_s20 + $0xf0] sm:$0xff]  ;;  %v205_v45 = vld [vmem:[%s952_s20 + $0xf8] sm:$0xff] }
  0x1c   : > { %v582_v61 = vmax.f32 %v454_v50, 0.0  ;;  %v458_v62 = vadd.f32 %v957_v1, %v323_v51  ;;  %v583_v4 = vmax.f32 %v455_v52, 0.0  ;;  %v584_v5 = vmax.f32 %v456_v53, 0.0 }
  0x1d   : > { %v585_v6 = vmax.f32 %v457_v54, 0.0  ;;  %v459_v7 = vadd.f32 %v957_v1, %v324_v55  ;;  %709 = vst.msk [vmem:[%s980_s25 + $0x40] sm:$0xff] %vm700_vm0, %v580_v59  ;;  %710 = vst.msk [vmem:[%s980_s25 + $0x48] sm:$0xff] %vm700_vm0, %v581_v60  ;;  %v325_v10 = vmul.f32 %v947_v0, %v190_v56  ;;  %v326_v11 = vmul.f32 %v947_v0, %v191_v57  ;;  %v207_v59 = vld [vmem:[%s952_s20 + $0x108] sm:$0xff]  ;;  %v208_v60 = vld [vmem:[%s952_s20 + $0x110] sm:$0xff] }
  0x1e   : > { %711 = vst.msk [vmem:[%s980_s25 + $0x50] sm:$0xff] %vm700_vm0, %v582_v61  ;;  %v586_v9 = vmax.f32 %v458_v62, 0.0  ;;  %v327_v12 = vmul.f32 %v947_v0, %v192_v58  ;;  %712 = vst.msk [vmem:[%s980_s25 + $0x58] sm:$0xff] %vm700_vm0, %v583_v4  ;;  %v328_v15 = vmul.f32 %v947_v0, %v193_v63  ;;  %v329_v16 = vmul.f32 %v947_v0, %v194_v2  ;;  %v206_v58 = vld [vmem:[%s952_s20 + $0x100] sm:$0xff] }
  0x1f   : > { %713 = vst.msk [vmem:[%s980_s25 + $0x60] sm:$0xff] %vm700_vm0, %v584_v5  ;;  %714 = vst.msk [vmem:[%s980_s25 + $0x68] sm:$0xff] %vm700_vm0, %v585_v6  ;;  %v587_v14 = vmax.f32 %v459_v7, 0.0  ;;  %v330_v17 = vmul.f32 %v947_v0, %v195_v3  ;;  %v460_v18 = vadd.f32 %v957_v1, %v325_v10  ;;  %v461_v19 = vadd.f32 %v957_v1, %v326_v11  ;;  %v209_v3 = vld [vmem:[%s952_s20 + $0x118] sm:$0xff]  ;;  %v210_v4 = vld [vmem:[%s952_s20 + $0x120] sm:$0xff] }
  0x20   : > { %715 = vst.msk [vmem:[%s980_s25 + $0x70] sm:$0xff] %vm700_vm0, %v586_v9  ;;  %v462_v20 = vadd.f32 %v957_v1, %v327_v12  ;;  %v331_v21 = vmul.f32 %v947_v0, %v196_v8  ;;  %v463_v22 = vadd.f32 %v957_v1, %v328_v15  ;;  %v464_v23 = vadd.f32 %v957_v1, %v329_v16  ;;  %v211_v5 = vld [vmem:[%s952_s20 + $0x128] sm:$0xff]  ;;  %v212_v10 = vld [vmem:[%s952_s20 + $0x130] sm:$0xff]  ;;  %v213_v15 = vld [vmem:[%s952_s20 + $0x138] sm:$0xff] }
  0x21   : > { %716 = vst.msk [vmem:[%s980_s25 + $0x78] sm:$0xff] %vm700_vm0, %v587_v14  ;;  %v465_v24 = vadd.f32 %v957_v1, %v330_v17  ;;  %v332_v25 = vmul.f32 %v947_v0, %v197_v13  ;;  %v588_v29 = vmax.f32 %v460_v18, 0.0  ;;  %v589_v30 = vmax.f32 %v461_v19, 0.0 }
  0x22   : > { %v590_v31 = vmax.f32 %v462_v20, 0.0  ;;  %v466_v32 = vadd.f32 %v957_v1, %v331_v21  ;;  %v591_v36 = vmax.f32 %v463_v22, 0.0  ;;  %v592_v37 = vmax.f32 %v464_v23, 0.0 }
  0x23   : > { %v593_v38 = vmax.f32 %v465_v24, 0.0  ;;  %v467_v39 = vadd.f32 %v957_v1, %v332_v25  ;;  %717 = vst.msk [vmem:[%s980_s25 + $0x80] sm:$0xff] %vm700_vm0, %v588_v29  ;;  %718 = vst.msk [vmem:[%s980_s25 + $0x88] sm:$0xff] %vm700_vm0, %v589_v30  ;;  %v333_v42 = vmul.f32 %v947_v0, %v198_v26  ;;  %v334_v43 = vmul.f32 %v947_v0, %v199_v27  ;;  %v215_v29 = vld [vmem:[%s952_s20 + $0x148] sm:$0xff]  ;;  %v216_v30 = vld [vmem:[%s952_s20 + $0x150] sm:$0xff] }
  0x24   : > { %719 = vst.msk [vmem:[%s980_s25 + $0x90] sm:$0xff] %vm700_vm0, %v590_v31  ;;  %v594_v41 = vmax.f32 %v466_v32, 0.0  ;;  %v335_v44 = vmul.f32 %v947_v0, %v200_v28  ;;  %720 = vst.msk [vmem:[%s980_s25 + $0x98] sm:$0xff] %vm700_vm0, %v591_v36  ;;  %v336_v47 = vmul.f32 %v947_v0, %v201_v33  ;;  %v337_v48 = vmul.f32 %v947_v0, %v202_v34  ;;  %v214_v28 = vld [vmem:[%s952_s20 + $0x140] sm:$0xff] }
  0x25   : > { %721 = vst.msk [vmem:[%s980_s25 + $0xa0] sm:$0xff] %vm700_vm0, %v592_v37  ;;  %722 = vst.msk [vmem:[%s980_s25 + $0xa8] sm:$0xff] %vm700_vm0, %v593_v38  ;;  %v595_v46 = vmax.f32 %v467_v39, 0.0  ;;  %v338_v49 = vmul.f32 %v947_v0, %v203_v35  ;;  %v468_v50 = vadd.f32 %v957_v1, %v333_v42  ;;  %v469_v51 = vadd.f32 %v957_v1, %v334_v43  ;;  %v217_v35 = vld [vmem:[%s952_s20 + $0x158] sm:$0xff]  ;;  %v218_v36 = vld [vmem:[%s952_s20 + $0x160] sm:$0xff] }
  0x26   : > { %723 = vst.msk [vmem:[%s980_s25 + $0xb0] sm:$0xff] %vm700_vm0, %v594_v41  ;;  %v470_v52 = vadd.f32 %v957_v1, %v335_v44  ;;  %v339_v53 = vmul.f32 %v947_v0, %v204_v40  ;;  %v471_v54 = vadd.f32 %v957_v1, %v336_v47  ;;  %v472_v55 = vadd.f32 %v957_v1, %v337_v48  ;;  %v219_v37 = vld [vmem:[%s952_s20 + $0x168] sm:$0xff]  ;;  %v220_v42 = vld [vmem:[%s952_s20 + $0x170] sm:$0xff]  ;;  %v221_v47 = vld [vmem:[%s952_s20 + $0x178] sm:$0xff] }
  0x27   : > { %724 = vst.msk [vmem:[%s980_s25 + $0xb8] sm:$0xff] %vm700_vm0, %v595_v46  ;;  %v473_v56 = vadd.f32 %v957_v1, %v338_v49  ;;  %v340_v57 = vmul.f32 %v947_v0, %v205_v45  ;;  %v596_v61 = vmax.f32 %v468_v50, 0.0  ;;  %v597_v62 = vmax.f32 %v469_v51, 0.0 }
  0x28   : > { %v598_v63 = vmax.f32 %v470_v52, 0.0  ;;  %v474_v2 = vadd.f32 %v957_v1, %v339_v53  ;;  %v599_v6 = vmax.f32 %v471_v54, 0.0  ;;  %v600_v7 = vmax.f32 %v472_v55, 0.0 }
  0x29   : > { %v601_v8 = vmax.f32 %v473_v56, 0.0  ;;  %v475_v9 = vadd.f32 %v957_v1, %v340_v57  ;;  %725 = vst.msk [vmem:[%s980_s25 + $0xc0] sm:$0xff] %vm700_vm0, %v596_v61  ;;  %726 = vst.msk [vmem:[%s980_s25 + $0xc8] sm:$0xff] %vm700_vm0, %v597_v62  ;;  %v341_v12 = vmul.f32 %v947_v0, %v206_v58  ;;  %v342_v13 = vmul.f32 %v947_v0, %v207_v59  ;;  %v223_v61 = vld [vmem:[%s952_s20 + $0x188] sm:$0xff]  ;;  %v224_v62 = vld [vmem:[%s952_s20 + $0x190] sm:$0xff] }
  0x2a   : > { %727 = vst.msk [vmem:[%s980_s25 + $0xd0] sm:$0xff] %vm700_vm0, %v598_v63  ;;  %v602_v11 = vmax.f32 %v474_v2, 0.0  ;;  %v343_v14 = vmul.f32 %v947_v0, %v208_v60  ;;  %728 = vst.msk [vmem:[%s980_s25 + $0xd8] sm:$0xff] %vm700_vm0, %v599_v6  ;;  %v344_v17 = vmul.f32 %v947_v0, %v209_v3  ;;  %v345_v18 = vmul.f32 %v947_v0, %v210_v4  ;;  %v222_v60 = vld [vmem:[%s952_s20 + $0x180] sm:$0xff] }
  0x2b   : > { %729 = vst.msk [vmem:[%s980_s25 + $0xe0] sm:$0xff] %vm700_vm0, %v600_v7  ;;  %730 = vst.msk [vmem:[%s980_s25 + $0xe8] sm:$0xff] %vm700_vm0, %v601_v8  ;;  %v603_v16 = vmax.f32 %v475_v9, 0.0  ;;  %v346_v19 = vmul.f32 %v947_v0, %v211_v5  ;;  %v476_v20 = vadd.f32 %v957_v1, %v341_v12  ;;  %v477_v21 = vadd.f32 %v957_v1, %v342_v13  ;;  %v225_v5 = vld [vmem:[%s952_s20 + $0x198] sm:$0xff]  ;;  %v226_v6 = vld [vmem:[%s952_s20 + $0x1a0] sm:$0xff] }
  0x2c   : > { %731 = vst.msk [vmem:[%s980_s25 + $0xf0] sm:$0xff] %vm700_vm0, %v602_v11  ;;  %v478_v22 = vadd.f32 %v957_v1, %v343_v14  ;;  %v347_v23 = vmul.f32 %v947_v0, %v212_v10  ;;  %v479_v24 = vadd.f32 %v957_v1, %v344_v17  ;;  %v480_v25 = vadd.f32 %v957_v1, %v345_v18  ;;  %v227_v7 = vld [vmem:[%s952_s20 + $0x1a8] sm:$0xff]  ;;  %v228_v12 = vld [vmem:[%s952_s20 + $0x1b0] sm:$0xff]  ;;  %v229_v17 = vld [vmem:[%s952_s20 + $0x1b8] sm:$0xff] }
  0x2d   : > { %732 = vst.msk [vmem:[%s980_s25 + $0xf8] sm:$0xff] %vm700_vm0, %v603_v16  ;;  %v481_v26 = vadd.f32 %v957_v1, %v346_v19  ;;  %v348_v27 = vmul.f32 %v947_v0, %v213_v15  ;;  %v604_v31 = vmax.f32 %v476_v20, 0.0  ;;  %v605_v32 = vmax.f32 %v477_v21, 0.0 }
  0x2e   : > { %v606_v33 = vmax.f32 %v478_v22, 0.0  ;;  %v482_v34 = vadd.f32 %v957_v1, %v347_v23  ;;  %v607_v38 = vmax.f32 %v479_v24, 0.0  ;;  %v608_v39 = vmax.f32 %v480_v25, 0.0 }
  0x2f   : > { %v609_v40 = vmax.f32 %v481_v26, 0.0  ;;  %v483_v41 = vadd.f32 %v957_v1, %v348_v27  ;;  %733 = vst.msk [vmem:[%s980_s25 + $0x100] sm:$0xff] %vm700_vm0, %v604_v31  ;;  %734 = vst.msk [vmem:[%s980_s25 + $0x108] sm:$0xff] %vm700_vm0, %v605_v32  ;;  %v349_v44 = vmul.f32 %v947_v0, %v214_v28  ;;  %v350_v45 = vmul.f32 %v947_v0, %v215_v29  ;;  %v231_v31 = vld [vmem:[%s952_s20 + $0x1c8] sm:$0xff]  ;;  %v232_v32 = vld [vmem:[%s952_s20 + $0x1d0] sm:$0xff] }
  0x30   : > { %735 = vst.msk [vmem:[%s980_s25 + $0x110] sm:$0xff] %vm700_vm0, %v606_v33  ;;  %v610_v43 = vmax.f32 %v482_v34, 0.0  ;;  %v351_v46 = vmul.f32 %v947_v0, %v216_v30  ;;  %736 = vst.msk [vmem:[%s980_s25 + $0x118] sm:$0xff] %vm700_vm0, %v607_v38  ;;  %v352_v49 = vmul.f32 %v947_v0, %v217_v35  ;;  %v353_v50 = vmul.f32 %v947_v0, %v218_v36  ;;  %v230_v30 = vld [vmem:[%s952_s20 + $0x1c0] sm:$0xff] }
  0x31   : > { %737 = vst.msk [vmem:[%s980_s25 + $0x120] sm:$0xff] %vm700_vm0, %v608_v39  ;;  %738 = vst.msk [vmem:[%s980_s25 + $0x128] sm:$0xff] %vm700_vm0, %v609_v40  ;;  %v611_v48 = vmax.f32 %v483_v41, 0.0  ;;  %v354_v51 = vmul.f32 %v947_v0, %v219_v37  ;;  %v484_v52 = vadd.f32 %v957_v1, %v349_v44  ;;  %v485_v53 = vadd.f32 %v957_v1, %v350_v45  ;;  %v233_v37 = vld [vmem:[%s952_s20 + $0x1d8] sm:$0xff]  ;;  %v234_v38 = vld [vmem:[%s952_s20 + $0x1e0] sm:$0xff] }
  0x32   : > { %739 = vst.msk [vmem:[%s980_s25 + $0x130] sm:$0xff] %vm700_vm0, %v610_v43  ;;  %v486_v54 = vadd.f32 %v957_v1, %v351_v46  ;;  %v355_v55 = vmul.f32 %v947_v0, %v220_v42  ;;  %v487_v56 = vadd.f32 %v957_v1, %v352_v49  ;;  %v488_v57 = vadd.f32 %v957_v1, %v353_v50  ;;  %v235_v39 = vld [vmem:[%s952_s20 + $0x1e8] sm:$0xff]  ;;  %v236_v44 = vld [vmem:[%s952_s20 + $0x1f0] sm:$0xff]  ;;  %v237_v49 = vld [vmem:[%s952_s20 + $0x1f8] sm:$0xff] }
  0x33   : > { %740 = vst.msk [vmem:[%s980_s25 + $0x138] sm:$0xff] %vm700_vm0, %v611_v48  ;;  %v489_v58 = vadd.f32 %v957_v1, %v354_v51  ;;  %v356_v59 = vmul.f32 %v947_v0, %v221_v47  ;;  %v612_v63 = vmax.f32 %v484_v52, 0.0  ;;  %v613_v2 = vmax.f32 %v485_v53, 0.0 }
  0x34   : > { %v614_v3 = vmax.f32 %v486_v54, 0.0  ;;  %v490_v4 = vadd.f32 %v957_v1, %v355_v55  ;;  %v615_v8 = vmax.f32 %v487_v56, 0.0  ;;  %v616_v9 = vmax.f32 %v488_v57, 0.0 }
  0x35   : > { %v617_v10 = vmax.f32 %v489_v58, 0.0  ;;  %v491_v11 = vadd.f32 %v957_v1, %v356_v59  ;;  %741 = vst.msk [vmem:[%s980_s25 + $0x140] sm:$0xff] %vm700_vm0, %v612_v63  ;;  %742 = vst.msk [vmem:[%s980_s25 + $0x148] sm:$0xff] %vm700_vm0, %v613_v2  ;;  %v357_v14 = vmul.f32 %v947_v0, %v222_v60  ;;  %v358_v15 = vmul.f32 %v947_v0, %v223_v61  ;;  %v239_v63 = vld [vmem:[%s952_s20 + $0x208] sm:$0xff]  ;;  %v240_v2 = vld [vmem:[%s952_s20 + $0x210] sm:$0xff] }
  0x36   : > { %743 = vst.msk [vmem:[%s980_s25 + $0x150] sm:$0xff] %vm700_vm0, %v614_v3  ;;  %v618_v13 = vmax.f32 %v490_v4, 0.0  ;;  %v359_v16 = vmul.f32 %v947_v0, %v224_v62  ;;  %744 = vst.msk [vmem:[%s980_s25 + $0x158] sm:$0xff] %vm700_vm0, %v615_v8  ;;  %v360_v19 = vmul.f32 %v947_v0, %v225_v5  ;;  %v361_v20 = vmul.f32 %v947_v0, %v226_v6  ;;  %v238_v62 = vld [vmem:[%s952_s20 + $0x200] sm:$0xff] }
  0x37   : > { %745 = vst.msk [vmem:[%s980_s25 + $0x160] sm:$0xff] %vm700_vm0, %v616_v9  ;;  %746 = vst.msk [vmem:[%s980_s25 + $0x168] sm:$0xff] %vm700_vm0, %v617_v10  ;;  %v619_v18 = vmax.f32 %v491_v11, 0.0  ;;  %v362_v21 = vmul.f32 %v947_v0, %v227_v7  ;;  %v492_v22 = vadd.f32 %v957_v1, %v357_v14  ;;  %v493_v23 = vadd.f32 %v957_v1, %v358_v15  ;;  %v241_v7 = vld [vmem:[%s952_s20 + $0x218] sm:$0xff]  ;;  %v242_v8 = vld [vmem:[%s952_s20 + $0x220] sm:$0xff] }
  0x38   : > { %747 = vst.msk [vmem:[%s980_s25 + $0x170] sm:$0xff] %vm700_vm0, %v618_v13  ;;  %v494_v24 = vadd.f32 %v957_v1, %v359_v16  ;;  %v363_v25 = vmul.f32 %v947_v0, %v228_v12  ;;  %v495_v26 = vadd.f32 %v957_v1, %v360_v19  ;;  %v496_v27 = vadd.f32 %v957_v1, %v361_v20  ;;  %v243_v9 = vld [vmem:[%s952_s20 + $0x228] sm:$0xff]  ;;  %v244_v14 = vld [vmem:[%s952_s20 + $0x230] sm:$0xff]  ;;  %v245_v19 = vld [vmem:[%s952_s20 + $0x238] sm:$0xff] }
  0x39   : > { %748 = vst.msk [vmem:[%s980_s25 + $0x178] sm:$0xff] %vm700_vm0, %v619_v18  ;;  %v497_v28 = vadd.f32 %v957_v1, %v362_v21  ;;  %v364_v29 = vmul.f32 %v947_v0, %v229_v17  ;;  %v620_v33 = vmax.f32 %v492_v22, 0.0  ;;  %v621_v34 = vmax.f32 %v493_v23, 0.0 }
  0x3a   : > { %v622_v35 = vmax.f32 %v494_v24, 0.0  ;;  %v498_v36 = vadd.f32 %v957_v1, %v363_v25  ;;  %v623_v40 = vmax.f32 %v495_v26, 0.0  ;;  %v624_v41 = vmax.f32 %v496_v27, 0.0 }
  0x3b   : > { %v625_v42 = vmax.f32 %v497_v28, 0.0  ;;  %v499_v43 = vadd.f32 %v957_v1, %v364_v29  ;;  %749 = vst.msk [vmem:[%s980_s25 + $0x180] sm:$0xff] %vm700_vm0, %v620_v33  ;;  %750 = vst.msk [vmem:[%s980_s25 + $0x188] sm:$0xff] %vm700_vm0, %v621_v34  ;;  %v365_v46 = vmul.f32 %v947_v0, %v230_v30  ;;  %v366_v47 = vmul.f32 %v947_v0, %v231_v31  ;;  %v247_v33 = vld [vmem:[%s952_s20 + $0x248] sm:$0xff]  ;;  %v248_v34 = vld [vmem:[%s952_s20 + $0x250] sm:$0xff] }
  0x3c   : > { %751 = vst.msk [vmem:[%s980_s25 + $0x190] sm:$0xff] %vm700_vm0, %v622_v35  ;;  %v626_v45 = vmax.f32 %v498_v36, 0.0  ;;  %v367_v48 = vmul.f32 %v947_v0, %v232_v32  ;;  %752 = vst.msk [vmem:[%s980_s25 + $0x198] sm:$0xff] %vm700_vm0, %v623_v40  ;;  %v368_v51 = vmul.f32 %v947_v0, %v233_v37  ;;  %v369_v52 = vmul.f32 %v947_v0, %v234_v38  ;;  %v246_v32 = vld [vmem:[%s952_s20 + $0x240] sm:$0xff] }
  0x3d   : > { %753 = vst.msk [vmem:[%s980_s25 + $0x1a0] sm:$0xff] %vm700_vm0, %v624_v41  ;;  %754 = vst.msk [vmem:[%s980_s25 + $0x1a8] sm:$0xff] %vm700_vm0, %v625_v42  ;;  %v627_v50 = vmax.f32 %v499_v43, 0.0  ;;  %v370_v53 = vmul.f32 %v947_v0, %v235_v39  ;;  %v500_v54 = vadd.f32 %v957_v1, %v365_v46  ;;  %v501_v55 = vadd.f32 %v957_v1, %v366_v47  ;;  %v249_v39 = vld [vmem:[%s952_s20 + $0x258] sm:$0xff]  ;;  %v250_v40 = vld [vmem:[%s952_s20 + $0x260] sm:$0xff] }
  0x3e   : > { %755 = vst.msk [vmem:[%s980_s25 + $0x1b0] sm:$0xff] %vm700_vm0, %v626_v45  ;;  %v502_v56 = vadd.f32 %v957_v1, %v367_v48  ;;  %v371_v57 = vmul.f32 %v947_v0, %v236_v44  ;;  %v503_v58 = vadd.f32 %v957_v1, %v368_v51  ;;  %v504_v59 = vadd.f32 %v957_v1, %v369_v52  ;;  %v251_v41 = vld [vmem:[%s952_s20 + $0x268] sm:$0xff]  ;;  %v252_v46 = vld [vmem:[%s952_s20 + $0x270] sm:$0xff]  ;;  %v253_v51 = vld [vmem:[%s952_s20 + $0x278] sm:$0xff] }
  0x3f   : > { %756 = vst.msk [vmem:[%s980_s25 + $0x1b8] sm:$0xff] %vm700_vm0, %v627_v50  ;;  %v505_v60 = vadd.f32 %v957_v1, %v370_v53  ;;  %v372_v61 = vmul.f32 %v947_v0, %v237_v49  ;;  %v628_v3 = vmax.f32 %v500_v54, 0.0  ;;  %v629_v4 = vmax.f32 %v501_v55, 0.0 }
  0x40   : > { %v630_v5 = vmax.f32 %v502_v56, 0.0  ;;  %v506_v6 = vadd.f32 %v957_v1, %v371_v57  ;;  %v631_v10 = vmax.f32 %v503_v58, 0.0  ;;  %v632_v11 = vmax.f32 %v504_v59, 0.0 }
  0x41   : > { %v633_v12 = vmax.f32 %v505_v60, 0.0  ;;  %v507_v13 = vadd.f32 %v957_v1, %v372_v61  ;;  %757 = vst.msk [vmem:[%s980_s25 + $0x1c0] sm:$0xff] %vm700_vm0, %v628_v3  ;;  %758 = vst.msk [vmem:[%s980_s25 + $0x1c8] sm:$0xff] %vm700_vm0, %v629_v4  ;;  %v373_v16 = vmul.f32 %v947_v0, %v238_v62  ;;  %v374_v17 = vmul.f32 %v947_v0, %v239_v63  ;;  %v255_v3 = vld [vmem:[%s952_s20 + $0x288] sm:$0xff]  ;;  %v256_v4 = vld [vmem:[%s952_s20 + $0x290] sm:$0xff] }
  0x42   : > { %759 = vst.msk [vmem:[%s980_s25 + $0x1d0] sm:$0xff] %vm700_vm0, %v630_v5  ;;  %v634_v15 = vmax.f32 %v506_v6, 0.0  ;;  %v375_v18 = vmul.f32 %v947_v0, %v240_v2  ;;  %760 = vst.msk [vmem:[%s980_s25 + $0x1d8] sm:$0xff] %vm700_vm0, %v631_v10  ;;  %v376_v21 = vmul.f32 %v947_v0, %v241_v7  ;;  %v377_v22 = vmul.f32 %v947_v0, %v242_v8  ;;  %v254_v2 = vld [vmem:[%s952_s20 + $0x280] sm:$0xff] }
  0x43   : > { %761 = vst.msk [vmem:[%s980_s25 + $0x1e0] sm:$0xff] %vm700_vm0, %v632_v11  ;;  %762 = vst.msk [vmem:[%s980_s25 + $0x1e8] sm:$0xff] %vm700_vm0, %v633_v12  ;;  %v635_v20 = vmax.f32 %v507_v13, 0.0  ;;  %v378_v23 = vmul.f32 %v947_v0, %v243_v9  ;;  %v508_v24 = vadd.f32 %v957_v1, %v373_v16  ;;  %v509_v25 = vadd.f32 %v957_v1, %v374_v17  ;;  %v257_v9 = vld [vmem:[%s952_s20 + $0x298] sm:$0xff]  ;;  %v258_v10 = vld [vmem:[%s952_s20 + $0x2a0] sm:$0xff] }
  0x44   : > { %763 = vst.msk [vmem:[%s980_s25 + $0x1f0] sm:$0xff] %vm700_vm0, %v634_v15  ;;  %v510_v26 = vadd.f32 %v957_v1, %v375_v18  ;;  %v379_v27 = vmul.f32 %v947_v0, %v244_v14  ;;  %v511_v28 = vadd.f32 %v957_v1, %v376_v21  ;;  %v512_v29 = vadd.f32 %v957_v1, %v377_v22  ;;  %v259_v11 = vld [vmem:[%s952_s20 + $0x2a8] sm:$0xff]  ;;  %v260_v16 = vld [vmem:[%s952_s20 + $0x2b0] sm:$0xff]  ;;  %v261_v21 = vld [vmem:[%s952_s20 + $0x2b8] sm:$0xff] }
  0x45   : > { %764 = vst.msk [vmem:[%s980_s25 + $0x1f8] sm:$0xff] %vm700_vm0, %v635_v20  ;;  %v513_v30 = vadd.f32 %v957_v1, %v378_v23  ;;  %v380_v31 = vmul.f32 %v947_v0, %v245_v19  ;;  %v636_v35 = vmax.f32 %v508_v24, 0.0  ;;  %v637_v36 = vmax.f32 %v509_v25, 0.0 }
  0x46   : > { %v638_v37 = vmax.f32 %v510_v26, 0.0  ;;  %v514_v38 = vadd.f32 %v957_v1, %v379_v27  ;;  %v639_v42 = vmax.f32 %v511_v28, 0.0  ;;  %v640_v43 = vmax.f32 %v512_v29, 0.0 }
  0x47   : > { %v641_v44 = vmax.f32 %v513_v30, 0.0  ;;  %v515_v45 = vadd.f32 %v957_v1, %v380_v31  ;;  %765 = vst.msk [vmem:[%s980_s25 + $0x200] sm:$0xff] %vm700_vm0, %v636_v35  ;;  %766 = vst.msk [vmem:[%s980_s25 + $0x208] sm:$0xff] %vm700_vm0, %v637_v36  ;;  %v381_v48 = vmul.f32 %v947_v0, %v246_v32  ;;  %v382_v49 = vmul.f32 %v947_v0, %v247_v33  ;;  %v263_v35 = vld [vmem:[%s952_s20 + $0x2c8] sm:$0xff]  ;;  %v264_v36 = vld [vmem:[%s952_s20 + $0x2d0] sm:$0xff] }
  0x48   : > { %767 = vst.msk [vmem:[%s980_s25 + $0x210] sm:$0xff] %vm700_vm0, %v638_v37  ;;  %v642_v47 = vmax.f32 %v514_v38, 0.0  ;;  %v383_v50 = vmul.f32 %v947_v0, %v248_v34  ;;  %768 = vst.msk [vmem:[%s980_s25 + $0x218] sm:$0xff] %vm700_vm0, %v639_v42  ;;  %v384_v53 = vmul.f32 %v947_v0, %v249_v39  ;;  %v385_v54 = vmul.f32 %v947_v0, %v250_v40  ;;  %v262_v34 = vld [vmem:[%s952_s20 + $0x2c0] sm:$0xff] }
  0x49   : > { %769 = vst.msk [vmem:[%s980_s25 + $0x220] sm:$0xff] %vm700_vm0, %v640_v43  ;;  %770 = vst.msk [vmem:[%s980_s25 + $0x228] sm:$0xff] %vm700_vm0, %v641_v44  ;;  %v643_v52 = vmax.f32 %v515_v45, 0.0  ;;  %v386_v55 = vmul.f32 %v947_v0, %v251_v41  ;;  %v516_v56 = vadd.f32 %v957_v1, %v381_v48  ;;  %v517_v57 = vadd.f32 %v957_v1, %v382_v49  ;;  %v265_v41 = vld [vmem:[%s952_s20 + $0x2d8] sm:$0xff]  ;;  %v266_v42 = vld [vmem:[%s952_s20 + $0x2e0] sm:$0xff] }
  0x4a   : > { %771 = vst.msk [vmem:[%s980_s25 + $0x230] sm:$0xff] %vm700_vm0, %v642_v47  ;;  %v518_v58 = vadd.f32 %v957_v1, %v383_v50  ;;  %v387_v59 = vmul.f32 %v947_v0, %v252_v46  ;;  %v519_v60 = vadd.f32 %v957_v1, %v384_v53  ;;  %v520_v61 = vadd.f32 %v957_v1, %v385_v54  ;;  %v267_v43 = vld [vmem:[%s952_s20 + $0x2e8] sm:$0xff]  ;;  %v268_v48 = vld [vmem:[%s952_s20 + $0x2f0] sm:$0xff]  ;;  %v269_v53 = vld [vmem:[%s952_s20 + $0x2f8] sm:$0xff] }
  0x4b   : > { %772 = vst.msk [vmem:[%s980_s25 + $0x238] sm:$0xff] %vm700_vm0, %v643_v52  ;;  %v521_v62 = vadd.f32 %v957_v1, %v386_v55  ;;  %v388_v63 = vmul.f32 %v947_v0, %v253_v51  ;;  %v644_v5 = vmax.f32 %v516_v56, 0.0  ;;  %v645_v6 = vmax.f32 %v517_v57, 0.0 }
  0x4c   : > { %v646_v7 = vmax.f32 %v518_v58, 0.0  ;;  %v522_v8 = vadd.f32 %v957_v1, %v387_v59  ;;  %v647_v12 = vmax.f32 %v519_v60, 0.0  ;;  %v648_v13 = vmax.f32 %v520_v61, 0.0 }
  0x4d   : > { %v649_v14 = vmax.f32 %v521_v62, 0.0  ;;  %v523_v15 = vadd.f32 %v957_v1, %v388_v63  ;;  %773 = vst.msk [vmem:[%s980_s25 + $0x240] sm:$0xff] %vm700_vm0, %v644_v5  ;;  %774 = vst.msk [vmem:[%s980_s25 + $0x248] sm:$0xff] %vm700_vm0, %v645_v6  ;;  %v389_v18 = vmul.f32 %v947_v0, %v254_v2  ;;  %v390_v19 = vmul.f32 %v947_v0, %v255_v3  ;;  %v271_v5 = vld [vmem:[%s952_s20 + $0x308] sm:$0xff]  ;;  %v272_v6 = vld [vmem:[%s952_s20 + $0x310] sm:$0xff] }
  0x4e   : > { %775 = vst.msk [vmem:[%s980_s25 + $0x250] sm:$0xff] %vm700_vm0, %v646_v7  ;;  %v650_v17 = vmax.f32 %v522_v8, 0.0  ;;  %v391_v20 = vmul.f32 %v947_v0, %v256_v4  ;;  %776 = vst.msk [vmem:[%s980_s25 + $0x258] sm:$0xff] %vm700_vm0, %v647_v12  ;;  %v392_v23 = vmul.f32 %v947_v0, %v257_v9  ;;  %v393_v24 = vmul.f32 %v947_v0, %v258_v10  ;;  %v270_v4 = vld [vmem:[%s952_s20 + $0x300] sm:$0xff] }
  0x4f   : > { %777 = vst.msk [vmem:[%s980_s25 + $0x260] sm:$0xff] %vm700_vm0, %v648_v13  ;;  %778 = vst.msk [vmem:[%s980_s25 + $0x268] sm:$0xff] %vm700_vm0, %v649_v14  ;;  %v651_v22 = vmax.f32 %v523_v15, 0.0  ;;  %v394_v25 = vmul.f32 %v947_v0, %v259_v11  ;;  %v524_v26 = vadd.f32 %v957_v1, %v389_v18  ;;  %v525_v27 = vadd.f32 %v957_v1, %v390_v19  ;;  %v273_v11 = vld [vmem:[%s952_s20 + $0x318] sm:$0xff]  ;;  %v274_v12 = vld [vmem:[%s952_s20 + $0x320] sm:$0xff] }
  0x50   : > { %779 = vst.msk [vmem:[%s980_s25 + $0x270] sm:$0xff] %vm700_vm0, %v650_v17  ;;  %v526_v28 = vadd.f32 %v957_v1, %v391_v20  ;;  %v395_v29 = vmul.f32 %v947_v0, %v260_v16  ;;  %v527_v30 = vadd.f32 %v957_v1, %v392_v23  ;;  %v528_v31 = vadd.f32 %v957_v1, %v393_v24  ;;  %v275_v13 = vld [vmem:[%s952_s20 + $0x328] sm:$0xff]  ;;  %v276_v18 = vld [vmem:[%s952_s20 + $0x330] sm:$0xff]  ;;  %v277_v23 = vld [vmem:[%s952_s20 + $0x338] sm:$0xff] }
  0x51   : > { %780 = vst.msk [vmem:[%s980_s25 + $0x278] sm:$0xff] %vm700_vm0, %v651_v22  ;;  %v529_v32 = vadd.f32 %v957_v1, %v394_v25  ;;  %v396_v33 = vmul.f32 %v947_v0, %v261_v21  ;;  %v652_v37 = vmax.f32 %v524_v26, 0.0  ;;  %v653_v38 = vmax.f32 %v525_v27, 0.0 }
  0x52   : > { %v654_v39 = vmax.f32 %v526_v28, 0.0  ;;  %v530_v40 = vadd.f32 %v957_v1, %v395_v29  ;;  %v655_v44 = vmax.f32 %v527_v30, 0.0  ;;  %v656_v45 = vmax.f32 %v528_v31, 0.0 }
  0x53   : > { %v657_v46 = vmax.f32 %v529_v32, 0.0  ;;  %v531_v47 = vadd.f32 %v957_v1, %v396_v33  ;;  %781 = vst.msk [vmem:[%s980_s25 + $0x280] sm:$0xff] %vm700_vm0, %v652_v37  ;;  %782 = vst.msk [vmem:[%s980_s25 + $0x288] sm:$0xff] %vm700_vm0, %v653_v38  ;;  %v397_v50 = vmul.f32 %v947_v0, %v262_v34  ;;  %v398_v51 = vmul.f32 %v947_v0, %v263_v35  ;;  %v279_v37 = vld [vmem:[%s952_s20 + $0x348] sm:$0xff]  ;;  %v280_v38 = vld [vmem:[%s952_s20 + $0x350] sm:$0xff] }
  0x54   : > { %783 = vst.msk [vmem:[%s980_s25 + $0x290] sm:$0xff] %vm700_vm0, %v654_v39  ;;  %v658_v49 = vmax.f32 %v530_v40, 0.0  ;;  %v399_v52 = vmul.f32 %v947_v0, %v264_v36  ;;  %784 = vst.msk [vmem:[%s980_s25 + $0x298] sm:$0xff] %vm700_vm0, %v655_v44  ;;  %v400_v55 = vmul.f32 %v947_v0, %v265_v41  ;;  %v401_v56 = vmul.f32 %v947_v0, %v266_v42  ;;  %v278_v36 = vld [vmem:[%s952_s20 + $0x340] sm:$0xff] }
  0x55   : > { %785 = vst.msk [vmem:[%s980_s25 + $0x2a0] sm:$0xff] %vm700_vm0, %v656_v45  ;;  %786 = vst.msk [vmem:[%s980_s25 + $0x2a8] sm:$0xff] %vm700_vm0, %v657_v46  ;;  %v659_v54 = vmax.f32 %v531_v47, 0.0  ;;  %v402_v57 = vmul.f32 %v947_v0, %v267_v43  ;;  %v532_v58 = vadd.f32 %v957_v1, %v397_v50  ;;  %v533_v59 = vadd.f32 %v957_v1, %v398_v51  ;;  %v281_v43 = vld [vmem:[%s952_s20 + $0x358] sm:$0xff]  ;;  %v282_v44 = vld [vmem:[%s952_s20 + $0x360] sm:$0xff] }
  0x56   : > { %787 = vst.msk [vmem:[%s980_s25 + $0x2b0] sm:$0xff] %vm700_vm0, %v658_v49  ;;  %v534_v60 = vadd.f32 %v957_v1, %v399_v52  ;;  %v403_v61 = vmul.f32 %v947_v0, %v268_v48  ;;  %v535_v62 = vadd.f32 %v957_v1, %v400_v55  ;;  %v536_v63 = vadd.f32 %v957_v1, %v401_v56  ;;  %v283_v45 = vld [vmem:[%s952_s20 + $0x368] sm:$0xff]  ;;  %v1476_v48 = vld [vmem:[%s1619_s2] ss:$0 sm:$0xff]  ;;  %v284_v50 = vld [vmem:[%s952_s20 + $0x370] sm:$0xff] }
  0x57   : > { %788 = vst.msk [vmem:[%s980_s25 + $0x2b8] sm:$0xff] %vm700_vm0, %v659_v54  ;;  %v537_v2 = vadd.f32 %v957_v1, %v402_v57  ;;  %v404_v3 = vmul.f32 %v947_v0, %v269_v53  ;;  %v660_v7 = vmax.f32 %v532_v58, 0.0  ;;  %v661_v8 = vmax.f32 %v533_v59, 0.0  ;;  %v1489_v51 = vld [vmem:[%s1618_s1] ss:$0 sm:$0xff]  ;;  %v285_v55 = vld [vmem:[%s952_s20 + $0x378] sm:$0xff] }
  0x58   : > { %v662_v9 = vmax.f32 %v534_v60, 0.0  ;;  %v538_v10 = vadd.f32 %v957_v1, %v403_v61  ;;  %v663_v14 = vmax.f32 %v535_v62, 0.0  ;;  %v664_v15 = vmax.f32 %v536_v63, 0.0 }
  0x59   : > { %v665_v16 = vmax.f32 %v537_v2, 0.0  ;;  %v539_v17 = vadd.f32 %v957_v1, %v404_v3  ;;  %789 = vst.msk [vmem:[%s980_s25 + $0x2c0] sm:$0xff] %vm700_vm0, %v660_v7  ;;  %790 = vst.msk [vmem:[%s980_s25 + $0x2c8] sm:$0xff] %vm700_vm0, %v661_v8  ;;  %v405_v20 = vmul.f32 %v947_v0, %v270_v4  ;;  %v406_v21 = vmul.f32 %v947_v0, %v271_v5  ;;  %v287_v7 = vld [vmem:[%s952_s20 + $0x388] sm:$0xff]  ;;  %v288_v8 = vld [vmem:[%s952_s20 + $0x390] sm:$0xff] }
  0x5a   : > { %791 = vst.msk [vmem:[%s980_s25 + $0x2d0] sm:$0xff] %vm700_vm0, %v662_v9  ;;  %v666_v19 = vmax.f32 %v538_v10, 0.0  ;;  %v407_v22 = vmul.f32 %v947_v0, %v272_v6  ;;  %792 = vst.msk [vmem:[%s980_s25 + $0x2d8] sm:$0xff] %vm700_vm0, %v663_v14  ;;  %v408_v25 = vmul.f32 %v947_v0, %v273_v11  ;;  %v409_v26 = vmul.f32 %v947_v0, %v274_v12  ;;  %v286_v6 = vld [vmem:[%s952_s20 + $0x380] sm:$0xff] }
  0x5b   : > { %793 = vst.msk [vmem:[%s980_s25 + $0x2e0] sm:$0xff] %vm700_vm0, %v664_v15  ;;  %794 = vst.msk [vmem:[%s980_s25 + $0x2e8] sm:$0xff] %vm700_vm0, %v665_v16  ;;  %v667_v24 = vmax.f32 %v539_v17, 0.0  ;;  %v410_v27 = vmul.f32 %v947_v0, %v275_v13  ;;  %v540_v28 = vadd.f32 %v957_v1, %v405_v20  ;;  %v541_v29 = vadd.f32 %v957_v1, %v406_v21  ;;  %v289_v13 = vld [vmem:[%s952_s20 + $0x398] sm:$0xff]  ;;  %v290_v14 = vld [vmem:[%s952_s20 + $0x3a0] sm:$0xff] }
  0x5c   : > { %795 = vst.msk [vmem:[%s980_s25 + $0x2f0] sm:$0xff] %vm700_vm0, %v666_v19  ;;  %v542_v30 = vadd.f32 %v957_v1, %v407_v22  ;;  %v411_v31 = vmul.f32 %v947_v0, %v276_v18  ;;  %v543_v32 = vadd.f32 %v957_v1, %v408_v25  ;;  %v544_v33 = vadd.f32 %v957_v1, %v409_v26  ;;  %v291_v15 = vld [vmem:[%s952_s20 + $0x3a8] sm:$0xff]  ;;  %v292_v20 = vld [vmem:[%s952_s20 + $0x3b0] sm:$0xff]  ;;  %v293_v25 = vld [vmem:[%s952_s20 + $0x3b8] sm:$0xff] }
  0x5d   : > { %796 = vst.msk [vmem:[%s980_s25 + $0x2f8] sm:$0xff] %vm700_vm0, %v667_v24  ;;  %v545_v34 = vadd.f32 %v957_v1, %v410_v27  ;;  %v412_v35 = vmul.f32 %v947_v0, %v277_v23  ;;  %v668_v39 = vmax.f32 %v540_v28, 0.0  ;;  %v669_v40 = vmax.f32 %v541_v29, 0.0 }
  0x5e   : > { %v670_v41 = vmax.f32 %v542_v30, 0.0  ;;  %v546_v42 = vadd.f32 %v957_v1, %v411_v31  ;;  %v671_v46 = vmax.f32 %v543_v32, 0.0  ;;  %v672_v0 = vmax.f32 %v544_v33, 0.0 }
  0x5f   : > { %v673_v47 = vmax.f32 %v545_v34, 0.0  ;;  %v547_v49 = vadd.f32 %v1476_v48, %v412_v35  ;;  %797 = vst.msk [vmem:[%s980_s25 + $0x300] sm:$0xff] %vm700_vm0, %v668_v39  ;;  %798 = vst.msk [vmem:[%s980_s25 + $0x308] sm:$0xff] %vm700_vm0, %v669_v40  ;;  %v413_v52 = vmul.f32 %v1489_v51, %v278_v36  ;;  %v414_v53 = vmul.f32 %v1489_v51, %v279_v37  ;;  %v295_v39 = vld [vmem:[%s952_s20 + $0x3c8] sm:$0xff]  ;;  %v296_v40 = vld [vmem:[%s952_s20 + $0x3d0] sm:$0xff] }
  0x60   : > { %799 = vst.msk [vmem:[%s980_s25 + $0x310] sm:$0xff] %vm700_vm0, %v670_v41  ;;  %v674_v1 = vmax.f32 %v546_v42, 0.0  ;;  %v415_v54 = vmul.f32 %v1489_v51, %v280_v38  ;;  %800 = vst.msk [vmem:[%s980_s25 + $0x318] sm:$0xff] %vm700_vm0, %v671_v46  ;;  %v416_v57 = vmul.f32 %v1489_v51, %v281_v43  ;;  %v417_v58 = vmul.f32 %v1489_v51, %v282_v44  ;;  %v294_v38 = vld [vmem:[%s952_s20 + $0x3c0] sm:$0xff] }
  0x61   : > { %801 = vst.msk [vmem:[%s980_s25 + $0x320] sm:$0xff] %vm700_vm0, %v672_v0  ;;  %802 = vst.msk [vmem:[%s980_s25 + $0x328] sm:$0xff] %vm700_vm0, %v673_v47  ;;  %v675_v56 = vmax.f32 %v547_v49, 0.0  ;;  %v418_v59 = vmul.f32 %v1489_v51, %v283_v45  ;;  %v548_v60 = vadd.f32 %v1476_v48, %v413_v52  ;;  %v549_v61 = vadd.f32 %v1476_v48, %v414_v53  ;;  %v297_v45 = vld [vmem:[%s952_s20 + $0x3d8] sm:$0xff]  ;;  %v298_v46 = vld [vmem:[%s952_s20 + $0x3e0] sm:$0xff] }
  0x62   : > { %803 = vst.msk [vmem:[%s980_s25 + $0x330] sm:$0xff] %vm700_vm0, %v674_v1  ;;  %v550_v62 = vadd.f32 %v1476_v48, %v415_v54  ;;  %v419_v63 = vmul.f32 %v1489_v51, %v284_v50  ;;  %v551_v2 = vadd.f32 %v1476_v48, %v416_v57  ;;  %v552_v3 = vadd.f32 %v1476_v48, %v417_v58  ;;  %v299_v0 = vld [vmem:[%s952_s20 + $0x3e8] sm:$0xff]  ;;  %v300_v52 = vld [vmem:[%s952_s20 + $0x3f0] sm:$0xff]  ;;  %v301_v57 = vld [vmem:[%s952_s20 + $0x3f8] sm:$0xff] }
  0x63   : > { %804 = vst.msk [vmem:[%s980_s25 + $0x338] sm:$0xff] %vm700_vm0, %v675_v56  ;;  %v553_v4 = vadd.f32 %v1476_v48, %v418_v59  ;;  %v420_v5 = vmul.f32 %v1489_v51, %v285_v55  ;;  %v676_v9 = vmax.f32 %v548_v60, 0.0  ;;  %v677_v10 = vmax.f32 %v549_v61, 0.0 }
  0x64   : > { %v678_v11 = vmax.f32 %v550_v62, 0.0  ;;  %v554_v12 = vadd.f32 %v1476_v48, %v419_v63  ;;  %v679_v16 = vmax.f32 %v551_v2, 0.0  ;;  %v680_v17 = vmax.f32 %v552_v3, 0.0 }
  0x65   : > { %v681_v18 = vmax.f32 %v553_v4, 0.0  ;;  %v555_v19 = vadd.f32 %v1476_v48, %v420_v5  ;;  %805 = vst.msk [vmem:[%s980_s25 + $0x340] sm:$0xff] %vm700_vm0, %v676_v9  ;;  %806 = vst.msk [vmem:[%s980_s25 + $0x348] sm:$0xff] %vm700_vm0, %v677_v10  ;;  %v421_v22 = vmul.f32 %v1489_v51, %v286_v6  ;;  %v422_v23 = vmul.f32 %v1489_v51, %v287_v7 }
  0x66   : > { %807 = vst.msk [vmem:[%s980_s25 + $0x350] sm:$0xff] %vm700_vm0, %v678_v11  ;;  %v682_v21 = vmax.f32 %v554_v12, 0.0  ;;  %v423_v24 = vmul.f32 %v1489_v51, %v288_v8  ;;  %808 = vst.msk [vmem:[%s980_s25 + $0x358] sm:$0xff] %vm700_vm0, %v679_v16  ;;  %v424_v27 = vmul.f32 %v1489_v51, %v289_v13  ;;  %v425_v28 = vmul.f32 %v1489_v51, %v290_v14 }
  0x67   : > { %809 = vst.msk [vmem:[%s980_s25 + $0x360] sm:$0xff] %vm700_vm0, %v680_v17  ;;  %810 = vst.msk [vmem:[%s980_s25 + $0x368] sm:$0xff] %vm700_vm0, %v681_v18  ;;  %v683_v26 = vmax.f32 %v555_v19, 0.0  ;;  %v426_v29 = vmul.f32 %v1489_v51, %v291_v15  ;;  %v556_v30 = vadd.f32 %v1476_v48, %v421_v22  ;;  %v557_v31 = vadd.f32 %v1476_v48, %v422_v23 }
  0x68   : > { %811 = vst.msk [vmem:[%s980_s25 + $0x370] sm:$0xff] %vm700_vm0, %v682_v21  ;;  %v558_v32 = vadd.f32 %v1476_v48, %v423_v24  ;;  %v427_v33 = vmul.f32 %v1489_v51, %v292_v20  ;;  %v559_v34 = vadd.f32 %v1476_v48, %v424_v27  ;;  %v560_v35 = vadd.f32 %v1476_v48, %v425_v28 }
  0x69   : > { %812 = vst.msk [vmem:[%s980_s25 + $0x378] sm:$0xff] %vm700_vm0, %v683_v26  ;;  %v561_v36 = vadd.f32 %v1476_v48, %v426_v29  ;;  %v428_v37 = vmul.f32 %v1489_v51, %v293_v25  ;;  %v684_v41 = vmax.f32 %v556_v30, 0.0  ;;  %v685_v42 = vmax.f32 %v557_v31, 0.0 }
  0x6a   : > { %v686_v43 = vmax.f32 %v558_v32, 0.0  ;;  %v562_v44 = vadd.f32 %v1476_v48, %v427_v33  ;;  %v687_v47 = vmax.f32 %v559_v34, 0.0  ;;  %v688_v49 = vmax.f32 %v560_v35, 0.0 }
  0x6b   : > { %v689_v50 = vmax.f32 %v561_v36, 0.0  ;;  %v563_v1 = vadd.f32 %v1476_v48, %v428_v37  ;;  %813 = vst.msk [vmem:[%s980_s25 + $0x380] sm:$0xff] %vm700_vm0, %v684_v41  ;;  %814 = vst.msk [vmem:[%s980_s25 + $0x388] sm:$0xff] %vm700_vm0, %v685_v42  ;;  %v429_v54 = vmul.f32 %v1489_v51, %v294_v38  ;;  %v430_v55 = vmul.f32 %v1489_v51, %v295_v39 }
  0x6c   : > { %815 = vst.msk [vmem:[%s980_s25 + $0x390] sm:$0xff] %vm700_vm0, %v686_v43  ;;  %v690_v53 = vmax.f32 %v562_v44, 0.0  ;;  %v431_v56 = vmul.f32 %v1489_v51, %v296_v40  ;;  %816 = vst.msk [vmem:[%s980_s25 + $0x398] sm:$0xff] %vm700_vm0, %v687_v47  ;;  %v432_v59 = vmul.f32 %v1489_v51, %v297_v45  ;;  %v433_v60 = vmul.f32 %v1489_v51, %v298_v46 }
  0x6d   : > { %817 = vst.msk [vmem:[%s980_s25 + $0x3a0] sm:$0xff] %vm700_vm0, %v688_v49  ;;  %818 = vst.msk [vmem:[%s980_s25 + $0x3a8] sm:$0xff] %vm700_vm0, %v689_v50  ;;  %v691_v58 = vmax.f32 %v563_v1, 0.0  ;;  %v434_v61 = vmul.f32 %v1489_v51, %v299_v0  ;;  %v564_v62 = vadd.f32 %v1476_v48, %v429_v54  ;;  %v565_v63 = vadd.f32 %v1476_v48, %v430_v55 }
  0x6e   : > { %819 = vst.msk [vmem:[%s980_s25 + $0x3b0] sm:$0xff] %vm700_vm0, %v690_v53  ;;  %v566_v2 = vadd.f32 %v1476_v48, %v431_v56  ;;  %v435_v3 = vmul.f32 %v1489_v51, %v300_v52  ;;  %v567_v4 = vadd.f32 %v1476_v48, %v432_v59  ;;  %v568_v5 = vadd.f32 %v1476_v48, %v433_v60 }
  0x6f   : > { %820 = vst.msk [vmem:[%s980_s25 + $0x3b8] sm:$0xff] %vm700_vm0, %v691_v58  ;;  %v569_v6 = vadd.f32 %v1476_v48, %v434_v61  ;;  %v436_v7 = vmul.f32 %v1489_v51, %v301_v57  ;;  %v692_v8 = vmax.f32 %v564_v62, 0.0  ;;  %v693_v9 = vmax.f32 %v565_v63, 0.0 }
  0x70   : > { %v694_v10 = vmax.f32 %v566_v2, 0.0  ;;  %v570_v11 = vadd.f32 %v1476_v48, %v435_v3  ;;  %v695_v12 = vmax.f32 %v567_v4, 0.0  ;;  %v696_v13 = vmax.f32 %v568_v5, 0.0 }
  0x71   : > { %v697_v14 = vmax.f32 %v569_v6, 0.0  ;;  %v571_v15 = vadd.f32 %v1476_v48, %v436_v7  ;;  %821 = vst.msk [vmem:[%s980_s25 + $0x3c0] sm:$0xff] %vm700_vm0, %v692_v8  ;;  %822 = vst.msk [vmem:[%s980_s25 + $0x3c8] sm:$0xff] %vm700_vm0, %v693_v9 }
  0x72   : > { %823 = vst.msk [vmem:[%s980_s25 + $0x3d0] sm:$0xff] %vm700_vm0, %v694_v10  ;;  %v698_v16 = vmax.f32 %v570_v11, 0.0  ;;  %824 = vst.msk [vmem:[%s980_s25 + $0x3d8] sm:$0xff] %vm700_vm0, %v695_v12 }
  0x73   : > { %825 = vst.msk [vmem:[%s980_s25 + $0x3e0] sm:$0xff] %vm700_vm0, %v696_v13  ;;  %826 = vst.msk [vmem:[%s980_s25 + $0x3e8] sm:$0xff] %vm700_vm0, %v697_v14  ;;  %v699_v51 = vmax.f32 %v571_v15, 0.0 }
  0x74   : > { %827 = vst.msk [vmem:[%s980_s25 + $0x3f0] sm:$0xff] %vm700_vm0, %v698_v16 }
  0x75   : > { %828 = vst.msk [vmem:[%s980_s25 + $0x3f8] sm:$0xff] %vm700_vm0, %v699_v51 }
  0x76 PF: > { %s13_s12 = sadd.s32 1, %s914_s12  }
  0x77   : > { %p10_p4 = scmp.ge.s32.totalorder %s13_s12, 4  }
  0x79   :  { %12 = sbr.rel (!%p10_p4) target bundleno = 1 (0x1), region = 62 }

// kernel: _reference_encoder_forward.8
= control target key start
LH: loop header
LB: loop body
LE: loop exit
PB: predicated region body
PF: predicated region fallthrough
CT: control target
= control target key end

     0   :  { %s2765_s12 = smov 0   ;;  %s3959_s0 = inlined_call_operand.vmem [shape: f32[2048,9], index: 0, kind: input, shape index: {}]   ;;  %s3960_s1 = inlined_call_operand.vmem [shape: f32[9,32], index: 1, kind: input, shape index: {}]   ;;  %s3961_s2 = inlined_call_operand.vmem [shape: f32[2048,32], index: 2, kind: output, shape index: {0}]   ;;  %s3962_s3 = inlined_call_operand.vmem [shape: f32[2,32], index: 3, kind: output, shape index: {1}]  }
   0x1 LB: > { %s2250_s13 = sadd.s32 4294967295, %s2741_s12   ;;  %p2254_p0 = scmp.ge.s32.totalorder %s2741_s12, 1  ;;  %s2741_s12 = sphi %s2765_s12, %s14_s12  }
   0x2   : > { %p136_p1 = scmp.lt.s32.totalorder %s2741_s12, 3 }
   0x4   : > { %p137_p2 = pnand %p2254_p0, %p136_p1 }
   0x6   : > { %140 = sbr.rel (%p137_p2) target bundleno = 516 (0x204), region = 28 }
   0xd   : > { %s2255_s14 = sshll.u32 %s2250_s13, 7  ;;  %p2259_p4 = scmp.ne.s32.totalorder %s2250_s13, 0 }
   0xe   : > { %p161_p3 = scmp.lt.s32.totalorder %s2255_s14, 255  ;;  %vm176_vm0 = vcmask (!%p2259_p4), 254976   ;;  %v2743_v0 = vmov (!%p2259_p4), 0.0  }
   0xf   : > { %175 = sbr.rel (%p2259_p4) target bundleno = 22 (0x16), region = 32  ;;  %177 = vst.msk [vmem:[%s3962_s3] sm:$0x3] (!%p2259_p4), %vm176_vm0, %v2743_v0 }
  0x10   : > { %s4000_s14 = smov (!%p161_p3, %s2255_s14), 255 }
  0x11   : > { %s2256_s15 = sshll.u32 %s4000_s14, 3 }
  0x12   : > { %s2776_s18 = scalar_lea.vmem %s3959_s0, %s2256_s15  ;;  %s2781_s21 = scalar_lea.vmem %s3961_s2, %s2256_s15 }
  0x16 PF: > { %v306_v1 = vld [vmem:[%s3960_s1] sm:$0xff]  ;;  %v307_v2 = vld [vmem:[%s3960_s1 + $0x8] sm:$0x1]  ;;  %vm693_vm1 = vcmask 1040384   ;;  %vm2744_vm2 = vmmov 1   ;;  %vm308_vm4 = vcmask 72704  }
  0x17   : > { %v178_v3 = vld [vmem:[%s2776_s18] sm:$0xff]  ;;  %v2717_v4 = vpack.c.bf16 %v307_v2, %v306_v1  ;;  %vm2718_vm3 = vmpackc.low %vm693_vm1, %vm2744_vm2  ;;  %v179_v5 = vld [vmem:[%s2776_s18 + $0x8] sm:$0xff]  ;;  %vm1402_vm5 = vcmask 261120   ;;  %vm1794_vm6 = vcmask 253952  }
  0x18   : > { %2525 = vmatprep.mubr.msk.f32.mxu0 %vm308_vm4, %v178_v3  ;;  %v180_v6 = vld [vmem:[%s2776_s18 + $0x10] sm:$0xff]  ;;  %v181_v7 = vld [vmem:[%s2776_s18 + $0x18] sm:$0xff]  ;;  %v182_v8 = vld [vmem:[%s2776_s18 + $0x20] sm:$0xff] }
  0x19   : > { %2719 = vmatprep.subr.msk.bf16.mxu0 %vm2718_vm3, %v2717_v4  ;;  %2723 = vmatprep.subr.msk.bf16.mxu1 %vm2718_vm3, %v2717_v4  ;;  %v183_v9 = vld [vmem:[%s2776_s18 + $0x28] sm:$0xff]  ;;  %v184_v10 = vld [vmem:[%s2776_s18 + $0x30] sm:$0xff]  ;;  %v185_v11 = vld [vmem:[%s2776_s18 + $0x38] sm:$0xff] }
  0x1a   : > { %2722 = vmatpush3.bf16.msk.msra.mxu0 %vm2718_vm3, %v2717_v4  ;;  %2724 = vmatpush3.bf16.msk.msra.mxu1 %vm2718_vm3, %v2717_v4  ;;  %v186_v12 = vld [vmem:[%s2776_s18 + $0x40] sm:$0xff]  ;;  %v187_v13 = vld [vmem:[%s2776_s18 + $0x48] sm:$0xff]  ;;  %v188_v14 = vld [vmem:[%s2776_s18 + $0x50] sm:$0xff] }
  0x1b   : > { %v242_v15 = vld [vmem:[%s2776_s18 + $0x200] sm:$0xff]  ;;  %v243_v16 = vld [vmem:[%s2776_s18 + $0x208] sm:$0xff]  ;;  %v244_v17 = vld [vmem:[%s2776_s18 + $0x210] sm:$0xff] }
  0x1c   : > { %2621 = vmatprep.mubr.msk.f32.mxu1 %vm308_vm4, %v242_v15  ;;  %v189_v18 = vld [vmem:[%s2776_s18 + $0x58] sm:$0xff]  ;;  %v190_v19 = vld [vmem:[%s2776_s18 + $0x60] sm:$0xff]  ;;  %v191_v22 = vld [vmem:[%s2776_s18 + $0x68] sm:$0xff] }
  0x1d   : > { %2526 = vmatmul.mubr.msk.f32.vlgmr.msra.gmra.mrb[0].mxu0 %vm308_vm4, %v179_v5  ;;  %2622 = vmatmul.mubr.msk.f32.vlgmr.msra.gmra.mrb[0].mxu1 %vm308_vm4, %v243_v16  ;;  %v245_v20 = vld [vmem:[%s2776_s18 + $0x218] sm:$0xff]  ;;  %v246_v21 = vld [vmem:[%s2776_s18 + $0x220] sm:$0xff]  ;;  %v192_v23 = vld [vmem:[%s2776_s18 + $0x70] sm:$0xff] }
  0x1e   : > { %2528 = vmatprep.mubr.msk.f32.mxu0 %vm308_vm4, %v180_v6  ;;  %2624 = vmatprep.mubr.msk.f32.mxu1 %vm308_vm4, %v244_v17  ;;  %v247_v24 = vld [vmem:[%s2776_s18 + $0x228] sm:$0xff]  ;;  %v248_v25 = vld [vmem:[%s2776_s18 + $0x230] sm:$0xff]  ;;  %v193_v26 = vld [vmem:[%s2776_s18 + $0x78] sm:$0xff] }
  0x1f   : > { %v194_v27 = vld [vmem:[%s2776_s18 + $0x80] sm:$0xff]  ;;  %v249_v28 = vld [vmem:[%s2776_s18 + $0x238] sm:$0xff]  ;;  %v195_v30 = vld [vmem:[%s2776_s18 + $0x88] sm:$0xff] }
  0x20   : > { %v250_v29 = vld [vmem:[%s2776_s18 + $0x240] sm:$0xff]  ;;  %v196_v31 = vld [vmem:[%s2776_s18 + $0x90] sm:$0xff]  ;;  %v251_v32 = vld [vmem:[%s2776_s18 + $0x248] sm:$0xff] }
  0x21   : > { %2529 = vmatmul.mubr.msk.f32.gmra.mrb[2].mxu0 %vm308_vm4, %v181_v7  ;;  %2625 = vmatmul.mubr.msk.f32.gmra.mrb[2].mxu1 %vm308_vm4, %v245_v20  ;;  %v252_v33 = vld [vmem:[%s2776_s18 + $0x250] sm:$0xff]  ;;  %v197_v34 = vld [vmem:[%s2776_s18 + $0x98] sm:$0xff]  ;;  %v198_v35 = vld [vmem:[%s2776_s18 + $0xa0] sm:$0xff] }
  0x22   : > { %2531 = vmatprep.mubr.msk.f32.mxu0 %vm308_vm4, %v182_v8  ;;  %2627 = vmatprep.mubr.msk.f32.mxu1 %vm308_vm4, %v246_v21  ;;  %v253_v36 = vld [vmem:[%s2776_s18 + $0x258] sm:$0xff]  ;;  %v254_v37 = vld [vmem:[%s2776_s18 + $0x260] sm:$0xff]  ;;  %v199_v38 = vld [vmem:[%s2776_s18 + $0xa8] sm:$0xff] }
  0x23   : > { %v200_v39 = vld [vmem:[%s2776_s18 + $0xb0] sm:$0xff]  ;;  %v255_v40 = vld [vmem:[%s2776_s18 + $0x268] sm:$0xff]  ;;  %v201_v42 = vld [vmem:[%s2776_s18 + $0xb8] sm:$0xff] }
  0x24   : > { %v256_v41 = vld [vmem:[%s2776_s18 + $0x270] sm:$0xff]  ;;  %v202_v43 = vld [vmem:[%s2776_s18 + $0xc0] sm:$0xff]  ;;  %v257_v44 = vld [vmem:[%s2776_s18 + $0x278] sm:$0xff] }
  0x25   : > { %2532 = vmatmul.mubr.msk.f32.gmra.mrb[4].mxu0 %vm308_vm4, %v183_v9  ;;  %2628 = vmatmul.mubr.msk.f32.gmra.mrb[4].mxu1 %vm308_vm4, %v247_v24  ;;  %v258_v45 = vld [vmem:[%s2776_s18 + $0x280] sm:$0xff]  ;;  %v203_v46 = vld [vmem:[%s2776_s18 + $0xc8] sm:$0xff]  ;;  %v204_v47 = vld [vmem:[%s2776_s18 + $0xd0] sm:$0xff] }
  0x26   : > { %2534 = vmatprep.mubr.msk.f32.mxu0 %vm308_vm4, %v184_v10  ;;  %2630 = vmatprep.mubr.msk.f32.mxu1 %vm308_vm4, %v248_v25  ;;  %v259_v48 = vld [vmem:[%s2776_s18 + $0x288] sm:$0xff]  ;;  %v260_v49 = vld [vmem:[%s2776_s18 + $0x290] sm:$0xff]  ;;  %v205_v50 = vld [vmem:[%s2776_s18 + $0xd8] sm:$0xff] }
  0x27   : > { %v206_v51 = vld [vmem:[%s2776_s18 + $0xe0] sm:$0xff]  ;;  %v261_v52 = vld [vmem:[%s2776_s18 + $0x298] sm:$0xff]  ;;  %v207_v54 = vld [vmem:[%s2776_s18 + $0xe8] sm:$0xff] }
  0x28   : > { %v262_v53 = vld [vmem:[%s2776_s18 + $0x2a0] sm:$0xff]  ;;  %v208_v55 = vld [vmem:[%s2776_s18 + $0xf0] sm:$0xff]  ;;  %v263_v56 = vld [vmem:[%s2776_s18 + $0x2a8] sm:$0xff] }
  0x29   : > { %2535 = vmatmul.mubr.msk.f32.gmra.mrb[6].mxu0 %vm308_vm4, %v185_v11  ;;  %2631 = vmatmul.mubr.msk.f32.gmra.mrb[6].mxu1 %vm308_vm4, %v249_v28  ;;  %v264_v57 = vld [vmem:[%s2776_s18 + $0x2b0] sm:$0xff]  ;;  %v209_v58 = vld [vmem:[%s2776_s18 + $0xf8] sm:$0xff]  ;;  %v210_v59 = vld [vmem:[%s2776_s18 + $0x100] sm:$0xff] }
  0x2a   : > { %2537 = vmatprep.mubr.msk.f32.mxu0 %vm308_vm4, %v186_v12  ;;  %2633 = vmatprep.mubr.msk.f32.mxu1 %vm308_vm4, %v250_v29  ;;  %v265_v60 = vld [vmem:[%s2776_s18 + $0x2b8] sm:$0xff]  ;;  %v266_v61 = vld [vmem:[%s2776_s18 + $0x2c0] sm:$0xff]  ;;  %v211_v62 = vld [vmem:[%s2776_s18 + $0x108] sm:$0xff] }
  0x2b   : > { %v212_v63 = vld [vmem:[%s2776_s18 + $0x110] sm:$0xff]  ;;  %v267_v0 = vld [vmem:[%s2776_s18 + $0x2c8] sm:$0xff]  ;;  %v213_v2 = vld [vmem:[%s2776_s18 + $0x118] sm:$0xff] }
  0x2c   : > { %v268_v1 = vld [vmem:[%s2776_s18 + $0x2d0] sm:$0xff]  ;;  %v214_v3 = vld [vmem:[%s2776_s18 + $0x120] sm:$0xff]  ;;  %v269_v4 = vld [vmem:[%s2776_s18 + $0x2d8] sm:$0xff] }
  0x2d   : > { %2538 = vmatmul.mubr.msk.f32.gmra.mrb[8].mxu0 %vm308_vm4, %v187_v13  ;;  %2634 = vmatmul.mubr.msk.f32.gmra.mrb[8].mxu1 %vm308_vm4, %v251_v32  ;;  %v270_v5 = vld [vmem:[%s2776_s18 + $0x2e0] sm:$0xff]  ;;  %v215_v6 = vld [vmem:[%s2776_s18 + $0x128] sm:$0xff]  ;;  %v216_v7 = vld [vmem:[%s2776_s18 + $0x130] sm:$0xff] }
  0x2e   : > { %2540 = vmatprep.mubr.msk.f32.mxu0 %vm308_vm4, %v188_v14  ;;  %2636 = vmatprep.mubr.msk.f32.mxu1 %vm308_vm4, %v252_v33  ;;  %v271_v8 = vld [vmem:[%s2776_s18 + $0x2e8] sm:$0xff]  ;;  %v272_v9 = vld [vmem:[%s2776_s18 + $0x2f0] sm:$0xff]  ;;  %v217_v10 = vld [vmem:[%s2776_s18 + $0x138] sm:$0xff] }
  0x2f   : > { %v218_v11 = vld [vmem:[%s2776_s18 + $0x140] sm:$0xff]  ;;  %v273_v12 = vld [vmem:[%s2776_s18 + $0x2f8] sm:$0xff]  ;;  %v219_v14 = vld [vmem:[%s2776_s18 + $0x148] sm:$0xff] }
  0x30   : > { %v274_v13 = vld [vmem:[%s2776_s18 + $0x300] sm:$0xff]  ;;  %v220_v15 = vld [vmem:[%s2776_s18 + $0x150] sm:$0xff]  ;;  %v275_v16 = vld [vmem:[%s2776_s18 + $0x308] sm:$0xff] }
  0x31   : > { %2541 = vmatmul.mubr.msk.f32.gmra.mrb[10].mxu0 %vm308_vm4, %v189_v18  ;;  %2637 = vmatmul.mubr.msk.f32.gmra.mrb[10].mxu1 %vm308_vm4, %v253_v36  ;;  %v276_v17 = vld [vmem:[%s2776_s18 + $0x310] sm:$0xff]  ;;  %v221_v18 = vld [vmem:[%s2776_s18 + $0x158] sm:$0xff]  ;;  %v278_v21 = vld [vmem:[%s2776_s18 + $0x320] sm:$0xff] }
  0x32   : > { %2543 = vmatprep.mubr.msk.f32.mxu0 %vm308_vm4, %v190_v19  ;;  %2639 = vmatprep.mubr.msk.f32.mxu1 %vm308_vm4, %v254_v37  ;;  %v222_v19 = vld [vmem:[%s2776_s18 + $0x160] sm:$0xff]  ;;  %v277_v20 = vld [vmem:[%s2776_s18 + $0x318] sm:$0xff]  ;;  %v279_v24 = vld [vmem:[%s2776_s18 + $0x328] sm:$0xff] }
  0x33   : > { %v280_v25 = vld [vmem:[%s2776_s18 + $0x330] sm:$0xff]  ;;  %v281_v28 = vld [vmem:[%s2776_s18 + $0x338] sm:$0xff]  ;;  %v282_v29 = vld [vmem:[%s2776_s18 + $0x340] sm:$0xff] }
  0x34   : > { %v283_v32 = vld [vmem:[%s2776_s18 + $0x348] sm:$0xff]  ;;  %v284_v33 = vld [vmem:[%s2776_s18 + $0x350] sm:$0xff]  ;;  %v285_v36 = vld [vmem:[%s2776_s18 + $0x358] sm:$0xff] }
  0x35   : > { %2544 = vmatmul.mubr.msk.f32.gmra.mrb[12].mxu0 %vm308_vm4, %v191_v22  ;;  %2640 = vmatmul.mubr.msk.f32.gmra.mrb[12].mxu1 %vm308_vm4, %v255_v40  ;;  %v223_v22 = vld [vmem:[%s2776_s18 + $0x168] sm:$0xff]  ;;  %v286_v37 = vld [vmem:[%s2776_s18 + $0x360] sm:$0xff] }
  0x36   : > { %2546 = vmatprep.mubr.msk.f32.mxu0 %vm308_vm4, %v192_v23  ;;  %2642 = vmatprep.mubr.msk.f32.mxu1 %vm308_vm4, %v256_v41  ;;  %v224_v23 = vld [vmem:[%s2776_s18 + $0x170] sm:$0xff]  ;;  %v287_v40 = vld [vmem:[%s2776_s18 + $0x368] sm:$0xff] }
  0x37   : > { %v288_v41 = vld [vmem:[%s2776_s18 + $0x370] sm:$0xff] }
  0x39   : > { %2547 = vmatmul.mubr.msk.f32.gmra.mrb[14].mxu0 %vm308_vm4, %v193_v26  ;;  %2643 = vmatmul.mubr.msk.f32.gmra.mrb[14].mxu1 %vm308_vm4, %v257_v44  ;;  %v225_v26 = vld [vmem:[%s2776_s18 + $0x178] sm:$0xff] }
  0x3a   : > { %2549 = vmatprep.mubr.msk.f32.mxu0 %vm308_vm4, %v194_v27  ;;  %2645 = vmatprep.mubr.msk.f32.mxu1 %vm308_vm4, %v258_v45  ;;  %v226_v27 = vld [vmem:[%s2776_s18 + $0x180] sm:$0xff]  ;;  %v289_v44 = vld [vmem:[%s2776_s18 + $0x378] sm:$0xff] }
  0x3b   : > { %v290_v45 = vld [vmem:[%s2776_s18 + $0x380] sm:$0xff] }
  0x3d   : > { %2550 = vmatmul.mubr.msk.f32.gmra.mrb[16].mxu0 %vm308_vm4, %v195_v30  ;;  %2646 = vmatmul.mubr.msk.f32.gmra.mrb[16].mxu1 %vm308_vm4, %v259_v48  ;;  %v227_v30 = vld [vmem:[%s2776_s18 + $0x188] sm:$0xff] }
  0x3e   : > { %2552 = vmatprep.mubr.msk.f32.mxu0 %vm308_vm4, %v196_v31  ;;  %2648 = vmatprep.mubr.msk.f32.mxu1 %vm308_vm4, %v260_v49  ;;  %v228_v31 = vld [vmem:[%s2776_s18 + $0x190] sm:$0xff]  ;;  %v291_v48 = vld [vmem:[%s2776_s18 + $0x388] sm:$0xff] }
  0x3f   : > { %v292_v49 = vld [vmem:[%s2776_s18 + $0x390] sm:$0xff] }
  0x41   : > { %2553 = vmatmul.mubr.msk.f32.gmra.mrb[18].mxu0 %vm308_vm4, %v197_v34  ;;  %2649 = vmatmul.mubr.msk.f32.gmra.mrb[18].mxu1 %vm308_vm4, %v261_v52  ;;  %v229_v34 = vld [vmem:[%s2776_s18 + $0x198] sm:$0xff] }
  0x42   : > { %2555 = vmatprep.mubr.msk.f32.mxu0 %vm308_vm4, %v198_v35  ;;  %2651 = vmatprep.mubr.msk.f32.mxu1 %vm308_vm4, %v262_v53  ;;  %v230_v35 = vld [vmem:[%s2776_s18 + $0x1a0] sm:$0xff]  ;;  %v293_v52 = vld [vmem:[%s2776_s18 + $0x398] sm:$0xff] }
  0x43   : > { %v294_v53 = vld [vmem:[%s2776_s18 + $0x3a0] sm:$0xff] }
  0x45   : > { %2556 = vmatmul.mubr.msk.f32.gmra.mrb[20].mxu0 %vm308_vm4, %v199_v38  ;;  %2652 = vmatmul.mubr.msk.f32.gmra.mrb[20].mxu1 %vm308_vm4, %v263_v56  ;;  %v231_v38 = vld [vmem:[%s2776_s18 + $0x1a8] sm:$0xff] }
  0x46   : > { %2558 = vmatprep.mubr.msk.f32.mxu0 %vm308_vm4, %v200_v39  ;;  %2654 = vmatprep.mubr.msk.f32.mxu1 %vm308_vm4, %v264_v57  ;;  %v232_v39 = vld [vmem:[%s2776_s18 + $0x1b0] sm:$0xff]  ;;  %v295_v56 = vld [vmem:[%s2776_s18 + $0x3a8] sm:$0xff] }
  0x47   : > { %v296_v57 = vld [vmem:[%s2776_s18 + $0x3b0] sm:$0xff] }
  0x49   : > { %2559 = vmatmul.mubr.msk.f32.gmra.mrb[22].mxu0 %vm308_vm4, %v201_v42  ;;  %2655 = vmatmul.mubr.msk.f32.gmra.mrb[22].mxu1 %vm308_vm4, %v265_v60  ;;  %v233_v42 = vld [vmem:[%s2776_s18 + $0x1b8] sm:$0xff]  ;;  %v298_v60 = vld [vmem:[%s2776_s18 + $0x3c0] sm:$0xff] }
  0x4a   : > { %2561 = vmatprep.mubr.msk.f32.mxu0 %vm308_vm4, %v202_v43  ;;  %2657 = vmatprep.mubr.msk.f32.mxu1 %vm308_vm4, %v266_v61  ;;  %v234_v43 = vld [vmem:[%s2776_s18 + $0x1c0] sm:$0xff]  ;;  %v299_v61 = vld [vmem:[%s2776_s18 + $0x3c8] sm:$0xff] }
  0x4d   : > { %2562 = vmatmul.mubr.msk.f32.gmra.mrb[24].mxu0 %vm308_vm4, %v203_v46  ;;  %2658 = vmatmul.mubr.msk.f32.gmra.mrb[24].mxu1 %vm308_vm4, %v267_v0  ;;  %v235_v46 = vld [vmem:[%s2776_s18 + $0x1c8] sm:$0xff]  ;;  %v302_v0 = vld [vmem:[%s2776_s18 + $0x3e0] sm:$0xff] }
  0x4e   : > { %2564 = vmatprep.mubr.msk.f32.mxu0 %vm308_vm4, %v204_v47  ;;  %2660 = vmatprep.mubr.msk.f32.mxu1 %vm308_vm4, %v268_v1  ;;  %v236_v47 = vld [vmem:[%s2776_s18 + $0x1d0] sm:$0xff]  ;;  %v303_v1 = vld [vmem:[%s2776_s18 + $0x3e8] sm:$0xff] }
  0x51   : > { %2565 = vmatmul.mubr.msk.f32.gmra.mrb[26].mxu0 %vm308_vm4, %v205_v50  ;;  %2661 = vmatmul.mubr.msk.f32.gmra.mrb[26].mxu1 %vm308_vm4, %v269_v4  ;;  %v237_v50 = vld [vmem:[%s2776_s18 + $0x1d8] sm:$0xff] }
  0x52   : > { %2567 = vmatprep.mubr.msk.f32.mxu0 %vm308_vm4, %v206_v51  ;;  %2663 = vmatprep.mubr.msk.f32.mxu1 %vm308_vm4, %v270_v5  ;;  %v238_v51 = vld [vmem:[%s2776_s18 + $0x1e0] sm:$0xff] }
  0x55   : > { %2568 = vmatmul.mubr.msk.f32.gmra.mrb[28].mxu0 %vm308_vm4, %v207_v54  ;;  %2664 = vmatmul.mubr.msk.f32.gmra.mrb[28].mxu1 %vm308_vm4, %v271_v8  ;;  %v239_v54 = vld [vmem:[%s2776_s18 + $0x1e8] sm:$0xff] }
  0x56   : > { %2570 = vmatprep.mubr.msk.f32.mxu0 %vm308_vm4, %v208_v55  ;;  %2666 = vmatprep.mubr.msk.f32.mxu1 %vm308_vm4, %v272_v9  ;;  %v240_v55 = vld [vmem:[%s2776_s18 + $0x1f0] sm:$0xff] }
  0x59   : > { %2571 = vmatmul.mubr.msk.f32.gmra.mrb[30].mxu0 %vm308_vm4, %v209_v58  ;;  %2667 = vmatmul.mubr.msk.f32.gmra.mrb[30].mxu1 %vm308_vm4, %v273_v12  ;;  %v241_v58 = vld [vmem:[%s2776_s18 + $0x1f8] sm:$0xff] }
  0x5a   : > { %2573 = vmatprep.mubr.msk.f32.mxu0 %vm308_vm4, %v210_v59  ;;  %2669 = vmatprep.mubr.msk.f32.mxu1 %vm308_vm4, %v274_v13  ;;  %v297_v59 = vld [vmem:[%s2776_s18 + $0x3b8] sm:$0xff] }
  0x5d   : > { %2574 = vmatmul.mubr.msk.f32.gmra.mrb[32].mxu0 %vm308_vm4, %v211_v62  ;;  %2670 = vmatmul.mubr.msk.f32.gmra.mrb[32].mxu1 %vm308_vm4, %v275_v16  ;;  %v300_v62 = vld [vmem:[%s2776_s18 + $0x3d0] sm:$0xff] }
  0x5e   : > { %2576 = vmatprep.mubr.msk.f32.mxu0 %vm308_vm4, %v212_v63  ;;  %2672 = vmatprep.mubr.msk.f32.mxu1 %vm308_vm4, %v276_v17  ;;  %v301_v63 = vld [vmem:[%s2776_s18 + $0x3d8] sm:$0xff] }
  0x61   : > { %2577 = vmatmul.mubr.msk.f32.gmra.mrb[34].mxu0 %vm308_vm4, %v213_v2  ;;  %2673 = vmatmul.mubr.msk.f32.gmra.mrb[34].mxu1 %vm308_vm4, %v277_v20  ;;  %v304_v2 = vld [vmem:[%s2776_s18 + $0x3f0] sm:$0xff] }
  0x62   : > { %2579 = vmatprep.mubr.msk.f32.mxu0 %vm308_vm4, %v214_v3  ;;  %2675 = vmatprep.mubr.msk.f32.mxu1 %vm308_vm4, %v278_v21  ;;  %v305_v3 = vld [vmem:[%s2776_s18 + $0x3f8] sm:$0xff] }
  0x65   : > { %2580 = vmatmul.mubr.msk.f32.gmra.mrb[36].mxu0 %vm308_vm4, %v215_v6  ;;  %2676 = vmatmul.mubr.msk.f32.gmra.mrb[36].mxu1 %vm308_vm4, %v279_v24 }
  0x66   : > { %2582 = vmatprep.mubr.msk.f32.mxu0 %vm308_vm4, %v216_v7  ;;  %2678 = vmatprep.mubr.msk.f32.mxu1 %vm308_vm4, %v280_v25 }
  0x69   : > { %2583 = vmatmul.mubr.msk.f32.gmra.mrb[38].mxu0 %vm308_vm4, %v217_v10  ;;  %2679 = vmatmul.mubr.msk.f32.gmra.mrb[38].mxu1 %vm308_vm4, %v281_v28 }
  0x6a   : > { %2585 = vmatprep.mubr.msk.f32.mxu0 %vm308_vm4, %v218_v11  ;;  %2681 = vmatprep.mubr.msk.f32.mxu1 %vm308_vm4, %v282_v29 }
  0x6d   : > { %2586 = vmatmul.mubr.msk.f32.gmra.mrb[40].mxu0 %vm308_vm4, %v219_v14  ;;  %2682 = vmatmul.mubr.msk.f32.gmra.mrb[40].mxu1 %vm308_vm4, %v283_v32 }
  0x6e   : > { %2588 = vmatprep.mubr.msk.f32.mxu0 %vm308_vm4, %v220_v15  ;;  %2684 = vmatprep.mubr.msk.f32.mxu1 %vm308_vm4, %v284_v33 }
  0x71   : > { %2589 = vmatmul.mubr.msk.f32.gmra.mrb[42].mxu0 %vm308_vm4, %v221_v18  ;;  %2685 = vmatmul.mubr.msk.f32.gmra.mrb[42].mxu1 %vm308_vm4, %v285_v36 }
  0x72   : > { %2591 = vmatprep.mubr.msk.f32.mxu0 %vm308_vm4, %v222_v19  ;;  %2687 = vmatprep.mubr.msk.f32.mxu1 %vm308_vm4, %v286_v37 }
  0x75   : > { %2592 = vmatmul.mubr.msk.f32.gmra.mrb[44].mxu0 %vm308_vm4, %v223_v22  ;;  %2688 = vmatmul.mubr.msk.f32.gmra.mrb[44].mxu1 %vm308_vm4, %v287_v40 }
  0x76   : > { %2594 = vmatprep.mubr.msk.f32.mxu0 %vm308_vm4, %v224_v23  ;;  %2690 = vmatprep.mubr.msk.f32.mxu1 %vm308_vm4, %v288_v41 }
  0x79   : > { %2595 = vmatmul.mubr.msk.f32.gmra.mrb[46].mxu0 %vm308_vm4, %v225_v26  ;;  %2691 = vmatmul.mubr.msk.f32.gmra.mrb[46].mxu1 %vm308_vm4, %v289_v44 }
  0x7a   : > { %2597 = vmatprep.mubr.msk.f32.mxu0 %vm308_vm4, %v226_v27  ;;  %2693 = vmatprep.mubr.msk.f32.mxu1 %vm308_vm4, %v290_v45 }
  0x7d   : > { %2598 = vmatmul.mubr.msk.f32.gmra.mrb[48].mxu0 %vm308_vm4, %v227_v30  ;;  %2694 = vmatmul.mubr.msk.f32.gmra.mrb[48].mxu1 %vm308_vm4, %v291_v48 }
  0x7e   : > { %2600 = vmatprep.mubr.msk.f32.mxu0 %vm308_vm4, %v228_v31  ;;  %2696 = vmatprep.mubr.msk.f32.mxu1 %vm308_vm4, %v292_v49 }
  0x81   : > { %2601 = vmatmul.mubr.msk.f32.gmra.mrb[50].mxu0 %vm308_vm4, %v229_v34  ;;  %2697 = vmatmul.mubr.msk.f32.gmra.mrb[50].mxu1 %vm308_vm4, %v293_v52 }
  0x82   : > { %2603 = vmatprep.mubr.msk.f32.mxu0 %vm308_vm4, %v230_v35  ;;  %2699 = vmatprep.mubr.msk.f32.mxu1 %vm308_vm4, %v294_v53 }
  0x85   : > { %2604 = vmatmul.mubr.msk.f32.gmra.mrb[52].mxu0 %vm308_vm4, %v231_v38  ;;  %2700 = vmatmul.mubr.msk.f32.gmra.mrb[52].mxu1 %vm308_vm4, %v295_v56 }
  0x86   : > { %2606 = vmatprep.mubr.msk.f32.mxu0 %vm308_vm4, %v232_v39  ;;  %2702 = vmatprep.mubr.msk.f32.mxu1 %vm308_vm4, %v296_v57 }
  0x89   : > { %2607 = vmatmul.mubr.msk.f32.gmra.mrb[54].mxu0 %vm308_vm4, %v233_v42  ;;  %2703 = vmatmul.mubr.msk.f32.gmra.mrb[54].mxu1 %vm308_vm4, %v297_v59 }
  0x8a   : > { %2609 = vmatprep.mubr.msk.f32.mxu0 %vm308_vm4, %v234_v43  ;;  %2705 = vmatprep.mubr.msk.f32.mxu1 %vm308_vm4, %v298_v60 }
  0x8d   : > { %2610 = vmatmul.mubr.msk.f32.gmra.mrb[56].mxu0 %vm308_vm4, %v235_v46  ;;  %2706 = vmatmul.mubr.msk.f32.gmra.mrb[56].mxu1 %vm308_vm4, %v299_v61 }
  0x8e   : > { %2612 = vmatprep.mubr.msk.f32.mxu0 %vm308_vm4, %v236_v47  ;;  %2708 = vmatprep.mubr.msk.f32.mxu1 %vm308_vm4, %v300_v62 }
  0x91   : > { %2613 = vmatmul.mubr.msk.f32.gmra.mrb[58].mxu0 %vm308_vm4, %v237_v50  ;;  %2709 = vmatmul.mubr.msk.f32.gmra.mrb[58].mxu1 %vm308_vm4, %v301_v63 }
  0x92   : > { %2615 = vmatprep.mubr.msk.f32.mxu0 %vm308_vm4, %v238_v51  ;;  %2711 = vmatprep.mubr.msk.f32.mxu1 %vm308_vm4, %v302_v0 }
  0x95   : > { %2616 = vmatmul.mubr.msk.f32.gmra.mrb[60].mxu0 %vm308_vm4, %v239_v54  ;;  %2712 = vmatmul.mubr.msk.f32.gmra.mrb[60].mxu1 %vm308_vm4, %v303_v1 }
  0x96   : > { %2618 = vmatprep.mubr.msk.f32.mxu0 %vm308_vm4, %v240_v55  ;;  %2714 = vmatprep.mubr.msk.f32.mxu1 %vm308_vm4, %v304_v2 }
  0x99   : > { %2619 = vmatmul.mubr.msk.f32.gmra.mrb[62].mxu0 %vm308_vm4, %v241_v58  ;;  %2715 = vmatmul.mubr.msk.f32.gmra.mrb[62].mxu1 %vm308_vm4, %v305_v3 }
  0xf0   : > { %v2527_v4 = vpop.f32.mrb[0].mxu0  ;;  %v3081_v50 = vpop.f32.mrb[0].mxu1 }
  0xf1   : > { %1404 = vst.msk [vmem:[%s2781_s21 + $0x8] sm:$0xff] %vm1402_vm5, %v2527_v4  ;;  %v1533_v5 = vsel %vm1402_vm5, %v2527_v4, 0.0  ;;  %v1798_v6 = vmul.f32 %v2527_v4, %v2527_v4  ;;  %v763_v7 = vpop.f32.mrb[1].mxu0  ;;  %1468 = vst.msk [vmem:[%s2781_s21 + $0x208] sm:$0xff] %vm1402_vm5, %v3081_v50  ;;  %v3090_v55 = vpop.f32.mrb[1].mxu1 }
  0xf2   : > { %1403 = vst.msk [vmem:[%s2781_s21] sm:$0xff] %vm1402_vm5, %v763_v7  ;;  %v1532_v8 = vsel %vm1402_vm5, %v763_v7, 0.0  ;;  %v1797_v9 = vmul.f32 %v763_v7, %v763_v7  ;;  %1467 = vst.msk [vmem:[%s2781_s21 + $0x200] sm:$0xff] %vm1402_vm5, %v3090_v55 }
  0xf3   : > { %v1926_v10 = vsel %vm1402_vm5, %v1798_v6, 0.0  ;;  %v1534_v11 = vadd.f32 %v1533_v5, %v1532_v8 }
  0xf4   : > { %v1925_v12 = vsel %vm1402_vm5, %v1797_v9, 0.0  ;;  %v2530_v13 = vpop.f32.mrb[2].mxu0  ;;  %v3099_v0 = vpop.f32.mrb[2].mxu1 }
  0xf5   : > { %v1927_v14 = vadd.f32 %v1926_v10, %v1925_v12  ;;  %1406 = vst.msk [vmem:[%s2781_s21 + $0x18] sm:$0xff] %vm1402_vm5, %v2530_v13  ;;  %v773_v15 = vpop.f32.mrb[3].mxu0  ;;  %v1800_v16 = vmul.f32 %v2530_v13, %v2530_v13  ;;  %v1537_v20 = vsel %vm1402_vm5, %v2530_v13, 0.0  ;;  %1470 = vst.msk [vmem:[%s2781_s21 + $0x218] sm:$0xff] %vm1402_vm5, %v3099_v0  ;;  %v3108_v5 = vpop.f32.mrb[3].mxu1 }
  0xf6   : > { %1405 = vst.msk [vmem:[%s2781_s21 + $0x10] sm:$0xff] %vm1402_vm5, %v773_v15  ;;  %v1535_v17 = vsel %vm1402_vm5, %v773_v15, 0.0  ;;  %v1799_v18 = vmul.f32 %v773_v15, %v773_v15  ;;  %1469 = vst.msk [vmem:[%s2781_s21 + $0x210] sm:$0xff] %vm1402_vm5, %v3108_v5 }
  0xf7   : > { %v1536_v19 = vadd.f32 %v1535_v17, %v1534_v11  ;;  %v1930_v26 = vsel %vm1402_vm5, %v1800_v16, 0.0 }
  0xf8   : > { %v1928_v21 = vsel %vm1402_vm5, %v1799_v18, 0.0  ;;  %v2533_v22 = vpop.f32.mrb[4].mxu0 }
  0xf9   : > { %v1538_v23 = vadd.f32 %v1537_v20, %v1536_v19  ;;  %v1929_v24 = vadd.f32 %v1928_v21, %v1927_v14  ;;  %1408 = vst.msk [vmem:[%s2781_s21 + $0x28] sm:$0xff] %vm1402_vm5, %v2533_v22  ;;  %v783_v25 = vpop.f32.mrb[5].mxu0  ;;  %v1802_v27 = vmul.f32 %v2533_v22, %v2533_v22  ;;  %v1541_v32 = vsel %vm1402_vm5, %v2533_v22, 0.0  ;;  %v3117_v14 = vpop.f32.mrb[4].mxu1 }
  0xfa   : > { %1407 = vst.msk [vmem:[%s2781_s21 + $0x20] sm:$0xff] %vm1402_vm5, %v783_v25  ;;  %v1539_v28 = vsel %vm1402_vm5, %v783_v25, 0.0  ;;  %v1801_v29 = vmul.f32 %v783_v25, %v783_v25  ;;  %1472 = vst.msk [vmem:[%s2781_s21 + $0x228] sm:$0xff] %vm1402_vm5, %v3117_v14  ;;  %v3126_v19 = vpop.f32.mrb[5].mxu1 }
  0xfb   : > { %v1931_v30 = vadd.f32 %v1930_v26, %v1929_v24  ;;  %v1540_v31 = vadd.f32 %v1539_v28, %v1538_v23  ;;  %v1934_v38 = vsel %vm1402_vm5, %v1802_v27, 0.0  ;;  %1471 = vst.msk [vmem:[%s2781_s21 + $0x220] sm:$0xff] %vm1402_vm5, %v3126_v19 }
  0xfc   : > { %v1932_v33 = vsel %vm1402_vm5, %v1801_v29, 0.0  ;;  %v2536_v34 = vpop.f32.mrb[6].mxu0  ;;  %v3135_v28 = vpop.f32.mrb[6].mxu1 }
  0xfd   : > { %v1933_v35 = vadd.f32 %v1932_v33, %v1931_v30  ;;  %1410 = vst.msk [vmem:[%s2781_s21 + $0x38] sm:$0xff] %vm1402_vm5, %v2536_v34  ;;  %v793_v36 = vpop.f32.mrb[7].mxu0  ;;  %v1542_v37 = vadd.f32 %v1541_v32, %v1540_v31  ;;  %v1804_v39 = vmul.f32 %v2536_v34, %v2536_v34  ;;  %v1545_v44 = vsel %vm1402_vm5, %v2536_v34, 0.0  ;;  %1474 = vst.msk [vmem:[%s2781_s21 + $0x238] sm:$0xff] %vm1402_vm5, %v3135_v28  ;;  %v3144_v33 = vpop.f32.mrb[7].mxu1 }
  0xfe   : > { %1409 = vst.msk [vmem:[%s2781_s21 + $0x30] sm:$0xff] %vm1402_vm5, %v793_v36  ;;  %v1543_v40 = vsel %vm1402_vm5, %v793_v36, 0.0  ;;  %v1803_v41 = vmul.f32 %v793_v36, %v793_v36  ;;  %1473 = vst.msk [vmem:[%s2781_s21 + $0x230] sm:$0xff] %vm1402_vm5, %v3144_v33 }
  0xff   : > { %v1544_v42 = vadd.f32 %v1543_v40, %v1542_v37  ;;  %v1935_v43 = vadd.f32 %v1934_v38, %v1933_v35  ;;  %v1938_v51 = vsel %vm1402_vm5, %v1804_v39, 0.0 }
 0x100   : > { %v1936_v45 = vsel %vm1402_vm5, %v1803_v41, 0.0  ;;  %v2539_v46 = vpop.f32.mrb[8].mxu0 }
 0x101   : > { %v1937_v47 = vadd.f32 %v1936_v45, %v1935_v43  ;;  %1412 = vst.msk [vmem:[%s2781_s21 + $0x48] sm:$0xff] %vm1402_vm5, %v2539_v46  ;;  %v803_v48 = vpop.f32.mrb[9].mxu0  ;;  %v1546_v49 = vadd.f32 %v1545_v44, %v1544_v42  ;;  %v1806_v52 = vmul.f32 %v2539_v46, %v2539_v46  ;;  %v1549_v58 = vsel %vm1402_vm5, %v2539_v46, 0.0  ;;  %v3153_v42 = vpop.f32.mrb[8].mxu1 }
 0x102   : > { %1411 = vst.msk [vmem:[%s2781_s21 + $0x40] sm:$0xff] %vm1402_vm5, %v803_v48  ;;  %v1547_v53 = vsel %vm1402_vm5, %v803_v48, 0.0  ;;  %v1805_v54 = vmul.f32 %v803_v48, %v803_v48  ;;  %1476 = vst.msk [vmem:[%s2781_s21 + $0x248] sm:$0xff] %vm1402_vm5, %v3153_v42 }
 0x103   : > { %v1548_v56 = vadd.f32 %v1547_v53, %v1546_v49  ;;  %v1939_v57 = vadd.f32 %v1938_v51, %v1937_v47  ;;  %v1942_v1 = vsel %vm1402_vm5, %v1806_v52, 0.0  ;;  %v3162_v47 = vpop.f32.mrb[9].mxu1 }
 0x104   : > { %v1940_v59 = vsel %vm1402_vm5, %v1805_v54, 0.0  ;;  %v2542_v60 = vpop.f32.mrb[10].mxu0  ;;  %1475 = vst.msk [vmem:[%s2781_s21 + $0x240] sm:$0xff] %vm1402_vm5, %v3162_v47 }
 0x105   : > { %v1941_v61 = vadd.f32 %v1940_v59, %v1939_v57  ;;  %1414 = vst.msk [vmem:[%s2781_s21 + $0x58] sm:$0xff] %vm1402_vm5, %v2542_v60  ;;  %v813_v62 = vpop.f32.mrb[11].mxu0  ;;  %v1550_v63 = vadd.f32 %v1549_v58, %v1548_v56  ;;  %v1808_v2 = vmul.f32 %v2542_v60, %v2542_v60  ;;  %v1553_v8 = vsel %vm1402_vm5, %v2542_v60, 0.0  ;;  %v3171_v58 = vpop.f32.mrb[10].mxu1 }
 0x106   : > { %1413 = vst.msk [vmem:[%s2781_s21 + $0x50] sm:$0xff] %vm1402_vm5, %v813_v62  ;;  %v1551_v3 = vsel %vm1402_vm5, %v813_v62, 0.0  ;;  %v1807_v4 = vmul.f32 %v813_v62, %v813_v62  ;;  %1478 = vst.msk [vmem:[%s2781_s21 + $0x258] sm:$0xff] %vm1402_vm5, %v3171_v58 }
 0x107   : > { %v1552_v6 = vadd.f32 %v1551_v3, %v1550_v63  ;;  %v1943_v7 = vadd.f32 %v1942_v1, %v1941_v61  ;;  %v1946_v15 = vsel %vm1402_vm5, %v1808_v2, 0.0  ;;  %v3180_v63 = vpop.f32.mrb[11].mxu1 }
 0x108   : > { %v1944_v9 = vsel %vm1402_vm5, %v1807_v4, 0.0  ;;  %v2545_v10 = vpop.f32.mrb[12].mxu0  ;;  %1477 = vst.msk [vmem:[%s2781_s21 + $0x250] sm:$0xff] %vm1402_vm5, %v3180_v63 }
 0x109   : > { %v1945_v11 = vadd.f32 %v1944_v9, %v1943_v7  ;;  %1416 = vst.msk [vmem:[%s2781_s21 + $0x68] sm:$0xff] %vm1402_vm5, %v2545_v10  ;;  %v823_v12 = vpop.f32.mrb[13].mxu0  ;;  %v1554_v13 = vadd.f32 %v1553_v8, %v1552_v6  ;;  %v1810_v16 = vmul.f32 %v2545_v10, %v2545_v10  ;;  %v1557_v22 = vsel %vm1402_vm5, %v2545_v10, 0.0  ;;  %v3189_v10 = vpop.f32.mrb[12].mxu1 }
 0x10a   : > { %1415 = vst.msk [vmem:[%s2781_s21 + $0x60] sm:$0xff] %vm1402_vm5, %v823_v12  ;;  %v1555_v17 = vsel %vm1402_vm5, %v823_v12, 0.0  ;;  %v1809_v18 = vmul.f32 %v823_v12, %v823_v12  ;;  %1480 = vst.msk [vmem:[%s2781_s21 + $0x268] sm:$0xff] %vm1402_vm5, %v3189_v10 }
 0x10b   : > { %v1556_v20 = vadd.f32 %v1555_v17, %v1554_v13  ;;  %v1947_v21 = vadd.f32 %v1946_v15, %v1945_v11  ;;  %v1950_v29 = vsel %vm1402_vm5, %v1810_v16, 0.0  ;;  %v3198_v16 = vpop.f32.mrb[13].mxu1 }
 0x10c   : > { %v1948_v23 = vsel %vm1402_vm5, %v1809_v18, 0.0  ;;  %v2548_v24 = vpop.f32.mrb[14].mxu0  ;;  %1479 = vst.msk [vmem:[%s2781_s21 + $0x260] sm:$0xff] %vm1402_vm5, %v3198_v16 }
 0x10d   : > { %v1949_v25 = vadd.f32 %v1948_v23, %v1947_v21  ;;  %1418 = vst.msk [vmem:[%s2781_s21 + $0x78] sm:$0xff] %vm1402_vm5, %v2548_v24  ;;  %v833_v26 = vpop.f32.mrb[15].mxu0  ;;  %v1558_v27 = vadd.f32 %v1557_v22, %v1556_v20  ;;  %v1812_v30 = vmul.f32 %v2548_v24, %v2548_v24  ;;  %v1561_v36 = vsel %vm1402_vm5, %v2548_v24, 0.0 }
 0x10e   : > { %1417 = vst.msk [vmem:[%s2781_s21 + $0x70] sm:$0xff] %vm1402_vm5, %v833_v26  ;;  %v1559_v31 = vsel %vm1402_vm5, %v833_v26, 0.0  ;;  %v1811_v32 = vmul.f32 %v833_v26, %v833_v26  ;;  %v3207_v26 = vpop.f32.mrb[14].mxu1 }
 0x10f   : > { %v1560_v34 = vadd.f32 %v1559_v31, %v1558_v27  ;;  %v1951_v35 = vadd.f32 %v1950_v29, %v1949_v25  ;;  %v1954_v43 = vsel %vm1402_vm5, %v1812_v30, 0.0  ;;  %1482 = vst.msk [vmem:[%s2781_s21 + $0x278] sm:$0xff] %vm1402_vm5, %v3207_v26 }
 0x110   : > { %v1952_v37 = vsel %vm1402_vm5, %v1811_v32, 0.0  ;;  %v2551_v38 = vpop.f32.mrb[16].mxu0  ;;  %v3216_v32 = vpop.f32.mrb[15].mxu1 }
 0x111   : > { %v1953_v39 = vadd.f32 %v1952_v37, %v1951_v35  ;;  %1420 = vst.msk [vmem:[%s2781_s21 + $0x88] sm:$0xff] %vm1402_vm5, %v2551_v38  ;;  %v843_v40 = vpop.f32.mrb[17].mxu0  ;;  %v1562_v41 = vadd.f32 %v1561_v36, %v1560_v34  ;;  %v1814_v44 = vmul.f32 %v2551_v38, %v2551_v38  ;;  %v1565_v51 = vsel %vm1402_vm5, %v2551_v38, 0.0  ;;  %1481 = vst.msk [vmem:[%s2781_s21 + $0x270] sm:$0xff] %vm1402_vm5, %v3216_v32 }
 0x112   : > { %1419 = vst.msk [vmem:[%s2781_s21 + $0x80] sm:$0xff] %vm1402_vm5, %v843_v40  ;;  %v1563_v45 = vsel %vm1402_vm5, %v843_v40, 0.0  ;;  %v1813_v46 = vmul.f32 %v843_v40, %v843_v40 }
 0x113   : > { %v1564_v48 = vadd.f32 %v1563_v45, %v1562_v41  ;;  %v1955_v49 = vadd.f32 %v1954_v43, %v1953_v39  ;;  %v1958_v59 = vsel %vm1402_vm5, %v1814_v44, 0.0  ;;  %v3225_v43 = vpop.f32.mrb[16].mxu1 }
 0x114   : > { %v1956_v52 = vsel %vm1402_vm5, %v1813_v46, 0.0  ;;  %v2554_v53 = vpop.f32.mrb[18].mxu0  ;;  %1484 = vst.msk [vmem:[%s2781_s21 + $0x288] sm:$0xff] %vm1402_vm5, %v3225_v43 }
 0x115   : > { %v1957_v54 = vadd.f32 %v1956_v52, %v1955_v49  ;;  %1422 = vst.msk [vmem:[%s2781_s21 + $0x98] sm:$0xff] %vm1402_vm5, %v2554_v53  ;;  %v853_v56 = vpop.f32.mrb[19].mxu0  ;;  %v1566_v57 = vadd.f32 %v1565_v51, %v1564_v48  ;;  %v1816_v60 = vmul.f32 %v2554_v53, %v2554_v53  ;;  %v1569_v3 = vsel %vm1402_vm5, %v2554_v53, 0.0  ;;  %v3234_v49 = vpop.f32.mrb[17].mxu1 }
 0x116   : > { %1421 = vst.msk [vmem:[%s2781_s21 + $0x90] sm:$0xff] %vm1402_vm5, %v853_v56  ;;  %v1567_v61 = vsel %vm1402_vm5, %v853_v56, 0.0  ;;  %v1815_v62 = vmul.f32 %v853_v56, %v853_v56  ;;  %1483 = vst.msk [vmem:[%s2781_s21 + $0x280] sm:$0xff] %vm1402_vm5, %v3234_v49 }
 0x117   : > { %v1568_v1 = vadd.f32 %v1567_v61, %v1566_v57  ;;  %v1959_v2 = vadd.f32 %v1958_v59, %v1957_v54  ;;  %v1962_v11 = vsel %vm1402_vm5, %v1816_v60, 0.0  ;;  %v3243_v61 = vpop.f32.mrb[18].mxu1 }
 0x118   : > { %v1960_v4 = vsel %vm1402_vm5, %v1815_v62, 0.0  ;;  %v2557_v6 = vpop.f32.mrb[20].mxu0  ;;  %1486 = vst.msk [vmem:[%s2781_s21 + $0x298] sm:$0xff] %vm1402_vm5, %v3243_v61 }
 0x119   : > { %v1961_v7 = vadd.f32 %v1960_v4, %v1959_v2  ;;  %1424 = vst.msk [vmem:[%s2781_s21 + $0xa8] sm:$0xff] %vm1402_vm5, %v2557_v6  ;;  %v863_v8 = vpop.f32.mrb[21].mxu0  ;;  %v1570_v9 = vadd.f32 %v1569_v3, %v1568_v1  ;;  %v1818_v12 = vmul.f32 %v2557_v6, %v2557_v6  ;;  %v1573_v20 = vsel %vm1402_vm5, %v2557_v6, 0.0  ;;  %v3252_v4 = vpop.f32.mrb[19].mxu1 }
 0x11a   : > { %1423 = vst.msk [vmem:[%s2781_s21 + $0xa0] sm:$0xff] %vm1402_vm5, %v863_v8  ;;  %v1571_v13 = vsel %vm1402_vm5, %v863_v8, 0.0  ;;  %v1817_v15 = vmul.f32 %v863_v8, %v863_v8  ;;  %1485 = vst.msk [vmem:[%s2781_s21 + $0x290] sm:$0xff] %vm1402_vm5, %v3252_v4 }
 0x11b   : > { %v1572_v17 = vadd.f32 %v1571_v13, %v1570_v9  ;;  %v1963_v18 = vadd.f32 %v1962_v11, %v1961_v7  ;;  %v1966_v27 = vsel %vm1402_vm5, %v1818_v12, 0.0 }
 0x11c   : > { %v1964_v21 = vsel %vm1402_vm5, %v1817_v15, 0.0  ;;  %v2560_v22 = vpop.f32.mrb[22].mxu0 }
 0x11d   : > { %v1965_v23 = vadd.f32 %v1964_v21, %v1963_v18  ;;  %1426 = vst.msk [vmem:[%s2781_s21 + $0xb8] sm:$0xff] %vm1402_vm5, %v2560_v22  ;;  %v873_v24 = vpop.f32.mrb[23].mxu0  ;;  %v1574_v25 = vadd.f32 %v1573_v20, %v1572_v17  ;;  %v1820_v29 = vmul.f32 %v2560_v22, %v2560_v22  ;;  %v1577_v36 = vsel %vm1402_vm5, %v2560_v22, 0.0  ;;  %v3261_v17 = vpop.f32.mrb[20].mxu1 }
 0x11e   : > { %1425 = vst.msk [vmem:[%s2781_s21 + $0xb0] sm:$0xff] %vm1402_vm5, %v873_v24  ;;  %v1575_v30 = vsel %vm1402_vm5, %v873_v24, 0.0  ;;  %v1819_v31 = vmul.f32 %v873_v24, %v873_v24  ;;  %1488 = vst.msk [vmem:[%s2781_s21 + $0x2a8] sm:$0xff] %vm1402_vm5, %v3261_v17 }
 0x11f   : > { %v1576_v34 = vadd.f32 %v1575_v30, %v1574_v25  ;;  %v1967_v35 = vadd.f32 %v1966_v27, %v1965_v23  ;;  %v1970_v44 = vsel %vm1402_vm5, %v1820_v29, 0.0  ;;  %v3270_v23 = vpop.f32.mrb[21].mxu1 }
 0x120   : > { %v1968_v37 = vsel %vm1402_vm5, %v1819_v31, 0.0  ;;  %v2563_v38 = vpop.f32.mrb[24].mxu0  ;;  %1487 = vst.msk [vmem:[%s2781_s21 + $0x2a0] sm:$0xff] %vm1402_vm5, %v3270_v23 }
 0x121   : > { %v1969_v39 = vadd.f32 %v1968_v37, %v1967_v35  ;;  %1428 = vst.msk [vmem:[%s2781_s21 + $0xc8] sm:$0xff] %vm1402_vm5, %v2563_v38  ;;  %v883_v40 = vpop.f32.mrb[25].mxu0  ;;  %v1578_v41 = vadd.f32 %v1577_v36, %v1576_v34  ;;  %v1822_v45 = vmul.f32 %v2563_v38, %v2563_v38  ;;  %v1581_v53 = vsel %vm1402_vm5, %v2563_v38, 0.0  ;;  %v3279_v36 = vpop.f32.mrb[22].mxu1 }
 0x122   : > { %1427 = vst.msk [vmem:[%s2781_s21 + $0xc0] sm:$0xff] %vm1402_vm5, %v883_v40  ;;  %v1579_v46 = vsel %vm1402_vm5, %v883_v40, 0.0  ;;  %v1821_v48 = vmul.f32 %v883_v40, %v883_v40  ;;  %1490 = vst.msk [vmem:[%s2781_s21 + $0x2b8] sm:$0xff] %vm1402_vm5, %v3279_v36 }
 0x123   : > { %v1580_v51 = vadd.f32 %v1579_v46, %v1578_v41  ;;  %v1971_v52 = vadd.f32 %v1970_v44, %v1969_v39  ;;  %v1974_v62 = vsel %vm1402_vm5, %v1822_v45, 0.0  ;;  %v3288_v41 = vpop.f32.mrb[23].mxu1 }
 0x124   : > { %v1972_v54 = vsel %vm1402_vm5, %v1821_v48, 0.0  ;;  %v2566_v56 = vpop.f32.mrb[26].mxu0  ;;  %1489 = vst.msk [vmem:[%s2781_s21 + $0x2b0] sm:$0xff] %vm1402_vm5, %v3288_v41 }
 0x125   : > { %v1973_v57 = vadd.f32 %v1972_v54, %v1971_v52  ;;  %1430 = vst.msk [vmem:[%s2781_s21 + $0xd8] sm:$0xff] %vm1402_vm5, %v2566_v56  ;;  %v893_v59 = vpop.f32.mrb[27].mxu0  ;;  %v1582_v60 = vadd.f32 %v1581_v53, %v1580_v51  ;;  %v1824_v1 = vmul.f32 %v2566_v56, %v2566_v56  ;;  %v1585_v8 = vsel %vm1402_vm5, %v2566_v56, 0.0  ;;  %v3297_v56 = vpop.f32.mrb[24].mxu1 }
 0x126   : > { %1429 = vst.msk [vmem:[%s2781_s21 + $0xd0] sm:$0xff] %vm1402_vm5, %v893_v59  ;;  %v1583_v2 = vsel %vm1402_vm5, %v893_v59, 0.0  ;;  %v1823_v3 = vmul.f32 %v893_v59, %v893_v59  ;;  %1492 = vst.msk [vmem:[%s2781_s21 + $0x2c8] sm:$0xff] %vm1402_vm5, %v3297_v56 }
 0x127   : > { %v1584_v6 = vadd.f32 %v1583_v2, %v1582_v60  ;;  %v1975_v7 = vadd.f32 %v1974_v62, %v1973_v57  ;;  %v1978_v18 = vsel %vm1402_vm5, %v1824_v1, 0.0  ;;  %v3306_v1 = vpop.f32.mrb[25].mxu1 }
 0x128   : > { %v1976_v9 = vsel %vm1402_vm5, %v1823_v3, 0.0  ;;  %v2569_v11 = vpop.f32.mrb[28].mxu0  ;;  %1491 = vst.msk [vmem:[%s2781_s21 + $0x2c0] sm:$0xff] %vm1402_vm5, %v3306_v1 }
 0x129   : > { %v1977_v12 = vadd.f32 %v1976_v9, %v1975_v7  ;;  %1432 = vst.msk [vmem:[%s2781_s21 + $0xe8] sm:$0xff] %vm1402_vm5, %v2569_v11  ;;  %v903_v13 = vpop.f32.mrb[29].mxu0  ;;  %v1586_v15 = vadd.f32 %v1585_v8, %v1584_v6  ;;  %v1826_v20 = vmul.f32 %v2569_v11, %v2569_v11  ;;  %v1589_v27 = vsel %vm1402_vm5, %v2569_v11, 0.0 }
 0x12a   : > { %1431 = vst.msk [vmem:[%s2781_s21 + $0xe0] sm:$0xff] %vm1402_vm5, %v903_v13  ;;  %v1587_v21 = vsel %vm1402_vm5, %v903_v13, 0.0  ;;  %v1825_v22 = vmul.f32 %v903_v13, %v903_v13  ;;  %v3315_v13 = vpop.f32.mrb[26].mxu1 }
 0x12b   : > { %v1588_v24 = vadd.f32 %v1587_v21, %v1586_v15  ;;  %v1979_v25 = vadd.f32 %v1978_v18, %v1977_v12  ;;  %v1982_v37 = vsel %vm1402_vm5, %v1826_v20, 0.0  ;;  %1494 = vst.msk [vmem:[%s2781_s21 + $0x2d8] sm:$0xff] %vm1402_vm5, %v3315_v13 }
 0x12c   : > { %v1980_v29 = vsel %vm1402_vm5, %v1825_v22, 0.0  ;;  %v2572_v30 = vpop.f32.mrb[30].mxu0  ;;  %v3324_v22 = vpop.f32.mrb[27].mxu1 }
 0x12d   : > { %v1981_v31 = vadd.f32 %v1980_v29, %v1979_v25  ;;  %1434 = vst.msk [vmem:[%s2781_s21 + $0xf8] sm:$0xff] %vm1402_vm5, %v2572_v30  ;;  %v913_v34 = vpop.f32.mrb[31].mxu0  ;;  %v1590_v35 = vadd.f32 %v1589_v27, %v1588_v24  ;;  %v1828_v38 = vmul.f32 %v2572_v30, %v2572_v30  ;;  %v1593_v46 = vsel %vm1402_vm5, %v2572_v30, 0.0  ;;  %1493 = vst.msk [vmem:[%s2781_s21 + $0x2d0] sm:$0xff] %vm1402_vm5, %v3324_v22 }
 0x12e   : > { %1433 = vst.msk [vmem:[%s2781_s21 + $0xf0] sm:$0xff] %vm1402_vm5, %v913_v34  ;;  %v1591_v39 = vsel %vm1402_vm5, %v913_v34, 0.0  ;;  %v1827_v40 = vmul.f32 %v913_v34, %v913_v34 }
 0x12f   : > { %v1592_v44 = vadd.f32 %v1591_v39, %v1590_v35  ;;  %v1983_v45 = vadd.f32 %v1982_v37, %v1981_v31  ;;  %v1986_v57 = vsel %vm1402_vm5, %v1828_v38, 0.0  ;;  %v3333_v37 = vpop.f32.mrb[28].mxu1 }
 0x130   : > { %v1984_v48 = vsel %vm1402_vm5, %v1827_v40, 0.0  ;;  %v2575_v51 = vpop.f32.mrb[32].mxu0  ;;  %1496 = vst.msk [vmem:[%s2781_s21 + $0x2e8] sm:$0xff] %vm1402_vm5, %v3333_v37 }
 0x131   : > { %v1985_v52 = vadd.f32 %v1984_v48, %v1983_v45  ;;  %1436 = vst.msk [vmem:[%s2781_s21 + $0x108] sm:$0xff] %vm1402_vm5, %v2575_v51  ;;  %v923_v53 = vpop.f32.mrb[33].mxu0  ;;  %v1594_v54 = vadd.f32 %v1593_v46, %v1592_v44  ;;  %v1830_v59 = vmul.f32 %v2575_v51, %v2575_v51  ;;  %v1597_v6 = vsel %vm1402_vm5, %v2575_v51, 0.0  ;;  %v3342_v45 = vpop.f32.mrb[29].mxu1 }
 0x132   : > { %1435 = vst.msk [vmem:[%s2781_s21 + $0x100] sm:$0xff] %vm1402_vm5, %v923_v53  ;;  %v1595_v60 = vsel %vm1402_vm5, %v923_v53, 0.0  ;;  %v1829_v62 = vmul.f32 %v923_v53, %v923_v53  ;;  %1495 = vst.msk [vmem:[%s2781_s21 + $0x2e0] sm:$0xff] %vm1402_vm5, %v3342_v45 }
 0x133   : > { %v1596_v2 = vadd.f32 %v1595_v60, %v1594_v54  ;;  %v1987_v3 = vadd.f32 %v1986_v57, %v1985_v52  ;;  %v1990_v15 = vsel %vm1402_vm5, %v1830_v59, 0.0  ;;  %v3351_v60 = vpop.f32.mrb[30].mxu1 }
 0x134   : > { %v1988_v7 = vsel %vm1402_vm5, %v1829_v62, 0.0  ;;  %v2578_v8 = vpop.f32.mrb[34].mxu0  ;;  %1498 = vst.msk [vmem:[%s2781_s21 + $0x2f8] sm:$0xff] %vm1402_vm5, %v3351_v60 }
 0x135   : > { %v1989_v9 = vadd.f32 %v1988_v7, %v1987_v3  ;;  %1438 = vst.msk [vmem:[%s2781_s21 + $0x118] sm:$0xff] %vm1402_vm5, %v2578_v8  ;;  %v933_v11 = vpop.f32.mrb[35].mxu0  ;;  %v1598_v12 = vadd.f32 %v1597_v6, %v1596_v2  ;;  %v1832_v18 = vmul.f32 %v2578_v8, %v2578_v8  ;;  %v1601_v27 = vsel %vm1402_vm5, %v2578_v8, 0.0  ;;  %v3360_v7 = vpop.f32.mrb[31].mxu1 }
 0x136   : > { %1437 = vst.msk [vmem:[%s2781_s21 + $0x110] sm:$0xff] %vm1402_vm5, %v933_v11  ;;  %v1599_v20 = vsel %vm1402_vm5, %v933_v11, 0.0  ;;  %v1831_v21 = vmul.f32 %v933_v11, %v933_v11  ;;  %1497 = vst.msk [vmem:[%s2781_s21 + $0x2f0] sm:$0xff] %vm1402_vm5, %v3360_v7 }
 0x137   : > { %v1600_v24 = vadd.f32 %v1599_v20, %v1598_v12  ;;  %v1991_v25 = vadd.f32 %v1990_v15, %v1989_v9  ;;  %v1994_v38 = vsel %vm1402_vm5, %v1832_v18, 0.0 }
 0x138   : > { %v1992_v29 = vsel %vm1402_vm5, %v1831_v21, 0.0  ;;  %v2581_v30 = vpop.f32.mrb[36].mxu0 }
 0x139   : > { %v1993_v31 = vadd.f32 %v1992_v29, %v1991_v25  ;;  %1440 = vst.msk [vmem:[%s2781_s21 + $0x128] sm:$0xff] %vm1402_vm5, %v2581_v30  ;;  %v943_v34 = vpop.f32.mrb[37].mxu0  ;;  %v1602_v35 = vadd.f32 %v1601_v27, %v1600_v24  ;;  %v1834_v39 = vmul.f32 %v2581_v30, %v2581_v30  ;;  %v1605_v51 = vsel %vm1402_vm5, %v2581_v30, 0.0  ;;  %v3369_v24 = vpop.f32.mrb[32].mxu1 }
 0x13a   : > { %1439 = vst.msk [vmem:[%s2781_s21 + $0x120] sm:$0xff] %vm1402_vm5, %v943_v34  ;;  %v1603_v40 = vsel %vm1402_vm5, %v943_v34, 0.0  ;;  %v1833_v44 = vmul.f32 %v943_v34, %v943_v34  ;;  %1500 = vst.msk [vmem:[%s2781_s21 + $0x308] sm:$0xff] %vm1402_vm5, %v3369_v24 }
 0x13b   : > { %v1604_v46 = vadd.f32 %v1603_v40, %v1602_v35  ;;  %v1995_v48 = vadd.f32 %v1994_v38, %v1993_v31  ;;  %v1998_v62 = vsel %vm1402_vm5, %v1834_v39, 0.0  ;;  %v3378_v31 = vpop.f32.mrb[33].mxu1 }
 0x13c   : > { %v1996_v52 = vsel %vm1402_vm5, %v1833_v44, 0.0  ;;  %v2584_v53 = vpop.f32.mrb[38].mxu0  ;;  %1499 = vst.msk [vmem:[%s2781_s21 + $0x300] sm:$0xff] %vm1402_vm5, %v3378_v31 }
 0x13d   : > { %v1997_v54 = vadd.f32 %v1996_v52, %v1995_v48  ;;  %1442 = vst.msk [vmem:[%s2781_s21 + $0x138] sm:$0xff] %vm1402_vm5, %v2584_v53  ;;  %v953_v57 = vpop.f32.mrb[39].mxu0  ;;  %v1606_v59 = vadd.f32 %v1605_v51, %v1604_v46  ;;  %v1836_v2 = vmul.f32 %v2584_v53, %v2584_v53  ;;  %v1609_v11 = vsel %vm1402_vm5, %v2584_v53, 0.0  ;;  %v3387_v51 = vpop.f32.mrb[34].mxu1 }
 0x13e   : > { %1441 = vst.msk [vmem:[%s2781_s21 + $0x130] sm:$0xff] %vm1402_vm5, %v953_v57  ;;  %v1607_v3 = vsel %vm1402_vm5, %v953_v57, 0.0  ;;  %v1835_v6 = vmul.f32 %v953_v57, %v953_v57  ;;  %1502 = vst.msk [vmem:[%s2781_s21 + $0x318] sm:$0xff] %vm1402_vm5, %v3387_v51 }
 0x13f   : > { %v1608_v8 = vadd.f32 %v1607_v3, %v1606_v59  ;;  %v1999_v9 = vadd.f32 %v1998_v62, %v1997_v54  ;;  %v2002_v25 = vsel %vm1402_vm5, %v1836_v2, 0.0  ;;  %v3396_v59 = vpop.f32.mrb[35].mxu1 }
 0x140   : > { %v2000_v12 = vsel %vm1402_vm5, %v1835_v6, 0.0  ;;  %v2587_v15 = vpop.f32.mrb[40].mxu0  ;;  %1501 = vst.msk [vmem:[%s2781_s21 + $0x310] sm:$0xff] %vm1402_vm5, %v3396_v59 }
 0x141   : > { %v2001_v18 = vadd.f32 %v2000_v12, %v1999_v9  ;;  %1444 = vst.msk [vmem:[%s2781_s21 + $0x148] sm:$0xff] %vm1402_vm5, %v2587_v15  ;;  %v963_v20 = vpop.f32.mrb[41].mxu0  ;;  %v1610_v21 = vadd.f32 %v1609_v11, %v1608_v8  ;;  %v1838_v27 = vmul.f32 %v2587_v15, %v2587_v15  ;;  %v1613_v38 = vsel %vm1402_vm5, %v2587_v15, 0.0  ;;  %v3405_v15 = vpop.f32.mrb[36].mxu1 }
 0x142   : > { %1443 = vst.msk [vmem:[%s2781_s21 + $0x140] sm:$0xff] %vm1402_vm5, %v963_v20  ;;  %v1611_v29 = vsel %vm1402_vm5, %v963_v20, 0.0  ;;  %v1837_v30 = vmul.f32 %v963_v20, %v963_v20  ;;  %1504 = vst.msk [vmem:[%s2781_s21 + $0x328] sm:$0xff] %vm1402_vm5, %v3405_v15 }
 0x143   : > { %v1612_v34 = vadd.f32 %v1611_v29, %v1610_v21  ;;  %v2003_v35 = vadd.f32 %v2002_v25, %v2001_v18  ;;  %v2006_v52 = vsel %vm1402_vm5, %v1838_v27, 0.0  ;;  %v3414_v27 = vpop.f32.mrb[37].mxu1 }
 0x144   : > { %v2004_v39 = vsel %vm1402_vm5, %v1837_v30, 0.0  ;;  %v2590_v40 = vpop.f32.mrb[42].mxu0  ;;  %1503 = vst.msk [vmem:[%s2781_s21 + $0x320] sm:$0xff] %vm1402_vm5, %v3414_v27 }
 0x145   : > { %v2005_v44 = vadd.f32 %v2004_v39, %v2003_v35  ;;  %1446 = vst.msk [vmem:[%s2781_s21 + $0x158] sm:$0xff] %vm1402_vm5, %v2590_v40  ;;  %v973_v46 = vpop.f32.mrb[43].mxu0  ;;  %v1614_v48 = vadd.f32 %v1613_v38, %v1612_v34  ;;  %v1840_v53 = vmul.f32 %v2590_v40, %v2590_v40  ;;  %v1617_v3 = vsel %vm1402_vm5, %v2590_v40, 0.0 }
 0x146   : > { %1445 = vst.msk [vmem:[%s2781_s21 + $0x150] sm:$0xff] %vm1402_vm5, %v973_v46  ;;  %v1615_v54 = vsel %vm1402_vm5, %v973_v46, 0.0  ;;  %v1839_v57 = vmul.f32 %v973_v46, %v973_v46  ;;  %v3423_v46 = vpop.f32.mrb[38].mxu1 }
 0x147   : > { %v1616_v62 = vadd.f32 %v1615_v54, %v1614_v48  ;;  %v2007_v2 = vadd.f32 %v2006_v52, %v2005_v44  ;;  %v2010_v18 = vsel %vm1402_vm5, %v1840_v53, 0.0  ;;  %1506 = vst.msk [vmem:[%s2781_s21 + $0x338] sm:$0xff] %vm1402_vm5, %v3423_v46 }
 0x148   : > { %v2008_v6 = vsel %vm1402_vm5, %v1839_v57, 0.0  ;;  %v2593_v8 = vpop.f32.mrb[44].mxu0  ;;  %v3432_v57 = vpop.f32.mrb[39].mxu1 }
 0x149   : > { %v2009_v9 = vadd.f32 %v2008_v6, %v2007_v2  ;;  %1448 = vst.msk [vmem:[%s2781_s21 + $0x168] sm:$0xff] %vm1402_vm5, %v2593_v8  ;;  %v983_v11 = vpop.f32.mrb[45].mxu0  ;;  %v1618_v12 = vadd.f32 %v1617_v3, %v1616_v62  ;;  %v1842_v20 = vmul.f32 %v2593_v8, %v2593_v8  ;;  %v1621_v34 = vsel %vm1402_vm5, %v2593_v8, 0.0  ;;  %1505 = vst.msk [vmem:[%s2781_s21 + $0x330] sm:$0xff] %vm1402_vm5, %v3432_v57 }
 0x14a   : > { %1447 = vst.msk [vmem:[%s2781_s21 + $0x160] sm:$0xff] %vm1402_vm5, %v983_v11  ;;  %v1619_v21 = vsel %vm1402_vm5, %v983_v11, 0.0  ;;  %v1841_v25 = vmul.f32 %v983_v11, %v983_v11 }
 0x14b   : > { %v1620_v29 = vadd.f32 %v1619_v21, %v1618_v12  ;;  %v2011_v30 = vadd.f32 %v2010_v18, %v2009_v9  ;;  %v2014_v48 = vsel %vm1402_vm5, %v1842_v20, 0.0  ;;  %v3441_v18 = vpop.f32.mrb[40].mxu1 }
 0x14c   : > { %v2012_v35 = vsel %vm1402_vm5, %v1841_v25, 0.0  ;;  %v2596_v38 = vpop.f32.mrb[46].mxu0  ;;  %1508 = vst.msk [vmem:[%s2781_s21 + $0x348] sm:$0xff] %vm1402_vm5, %v3441_v18 }
 0x14d   : > { %v2013_v39 = vadd.f32 %v2012_v35, %v2011_v30  ;;  %1450 = vst.msk [vmem:[%s2781_s21 + $0x178] sm:$0xff] %vm1402_vm5, %v2596_v38  ;;  %v993_v40 = vpop.f32.mrb[47].mxu0  ;;  %v1622_v44 = vadd.f32 %v1621_v34, %v1620_v29  ;;  %v1844_v52 = vmul.f32 %v2596_v38, %v2596_v38  ;;  %v1625_v3 = vsel %vm1402_vm5, %v2596_v38, 0.0  ;;  %v3450_v30 = vpop.f32.mrb[41].mxu1 }
 0x14e   : > { %1449 = vst.msk [vmem:[%s2781_s21 + $0x170] sm:$0xff] %vm1402_vm5, %v993_v40  ;;  %v1623_v53 = vsel %vm1402_vm5, %v993_v40, 0.0  ;;  %v1843_v54 = vmul.f32 %v993_v40, %v993_v40  ;;  %1507 = vst.msk [vmem:[%s2781_s21 + $0x340] sm:$0xff] %vm1402_vm5, %v3450_v30 }
 0x14f   : > { %v1624_v62 = vadd.f32 %v1623_v53, %v1622_v44  ;;  %v2015_v2 = vadd.f32 %v2014_v48, %v2013_v39  ;;  %v2018_v20 = vsel %vm1402_vm5, %v1844_v52, 0.0  ;;  %v3459_v53 = vpop.f32.mrb[42].mxu1 }
 0x150   : > { %v2016_v6 = vsel %vm1402_vm5, %v1843_v54, 0.0  ;;  %v2599_v8 = vpop.f32.mrb[48].mxu0  ;;  %1510 = vst.msk [vmem:[%s2781_s21 + $0x358] sm:$0xff] %vm1402_vm5, %v3459_v53 }
 0x151   : > { %v2017_v9 = vadd.f32 %v2016_v6, %v2015_v2  ;;  %1452 = vst.msk [vmem:[%s2781_s21 + $0x188] sm:$0xff] %vm1402_vm5, %v2599_v8  ;;  %v1003_v11 = vpop.f32.mrb[49].mxu0  ;;  %v1626_v12 = vadd.f32 %v1625_v3, %v1624_v62  ;;  %v1846_v21 = vmul.f32 %v2599_v8, %v2599_v8  ;;  %v1629_v38 = vsel %vm1402_vm5, %v2599_v8, 0.0  ;;  %v3468_v6 = vpop.f32.mrb[43].mxu1 }
 0x152   : > { %1451 = vst.msk [vmem:[%s2781_s21 + $0x180] sm:$0xff] %vm1402_vm5, %v1003_v11  ;;  %v1627_v25 = vsel %vm1402_vm5, %v1003_v11, 0.0  ;;  %v1845_v29 = vmul.f32 %v1003_v11, %v1003_v11  ;;  %1509 = vst.msk [vmem:[%s2781_s21 + $0x350] sm:$0xff] %vm1402_vm5, %v3468_v6 }
 0x153   : > { %v1628_v34 = vadd.f32 %v1627_v25, %v1626_v12  ;;  %v2019_v35 = vadd.f32 %v2018_v20, %v2017_v9  ;;  %v2022_v54 = vsel %vm1402_vm5, %v1846_v21, 0.0 }
 0x154   : > { %v2020_v39 = vsel %vm1402_vm5, %v1845_v29, 0.0  ;;  %v2602_v40 = vpop.f32.mrb[50].mxu0 }
 0x155   : > { %v2021_v44 = vadd.f32 %v2020_v39, %v2019_v35  ;;  %1454 = vst.msk [vmem:[%s2781_s21 + $0x198] sm:$0xff] %vm1402_vm5, %v2602_v40  ;;  %v1013_v48 = vpop.f32.mrb[51].mxu0  ;;  %v1630_v52 = vadd.f32 %v1629_v38, %v1628_v34  ;;  %v1848_v62 = vmul.f32 %v2602_v40, %v2602_v40  ;;  %v1633_v11 = vsel %vm1402_vm5, %v2602_v40, 0.0  ;;  %v3477_v34 = vpop.f32.mrb[44].mxu1 }
 0x156   : > { %1453 = vst.msk [vmem:[%s2781_s21 + $0x190] sm:$0xff] %vm1402_vm5, %v1013_v48  ;;  %v1631_v2 = vsel %vm1402_vm5, %v1013_v48, 0.0  ;;  %v1847_v3 = vmul.f32 %v1013_v48, %v1013_v48  ;;  %1512 = vst.msk [vmem:[%s2781_s21 + $0x368] sm:$0xff] %vm1402_vm5, %v3477_v34 }
 0x157   : > { %v1632_v8 = vadd.f32 %v1631_v2, %v1630_v52  ;;  %v2023_v9 = vadd.f32 %v2022_v54, %v2021_v44  ;;  %v2026_v35 = vsel %vm1402_vm5, %v1848_v62, 0.0  ;;  %v3486_v44 = vpop.f32.mrb[45].mxu1 }
 0x158   : > { %v2024_v12 = vsel %vm1402_vm5, %v1847_v3, 0.0  ;;  %v2605_v20 = vpop.f32.mrb[52].mxu0  ;;  %1511 = vst.msk [vmem:[%s2781_s21 + $0x360] sm:$0xff] %vm1402_vm5, %v3486_v44 }
 0x159   : > { %v2025_v21 = vadd.f32 %v2024_v12, %v2023_v9  ;;  %1456 = vst.msk [vmem:[%s2781_s21 + $0x1a8] sm:$0xff] %vm1402_vm5, %v2605_v20  ;;  %v1023_v25 = vpop.f32.mrb[53].mxu0  ;;  %v1634_v29 = vadd.f32 %v1633_v11, %v1632_v8  ;;  %v1850_v38 = vmul.f32 %v2605_v20, %v2605_v20  ;;  %v1637_v54 = vsel %vm1402_vm5, %v2605_v20, 0.0  ;;  %v3495_v11 = vpop.f32.mrb[46].mxu1 }
 0x15a   : > { %1455 = vst.msk [vmem:[%s2781_s21 + $0x1a0] sm:$0xff] %vm1402_vm5, %v1023_v25  ;;  %v1635_v39 = vsel %vm1402_vm5, %v1023_v25, 0.0  ;;  %v1849_v40 = vmul.f32 %v1023_v25, %v1023_v25  ;;  %3981 = vst [vmem:[#allocation2_spill] sm:$0xff] %v3495_v11 }
 0x15b   : > { %v1636_v48 = vadd.f32 %v1635_v39, %v1634_v29  ;;  %v2027_v52 = vadd.f32 %v2026_v35, %v2025_v21  ;;  %v2030_v12 = vsel %vm1402_vm5, %v1850_v38, 0.0  ;;  %1514 = vst.msk [vmem:[%s2781_s21 + $0x378] sm:$0xff] %vm1402_vm5, %v3495_v11  ;;  %v3504_v29 = vpop.f32.mrb[47].mxu1 }
 0x15c   : > { %v2028_v62 = vsel %vm1402_vm5, %v1849_v40, 0.0  ;;  %v2608_v2 = vpop.f32.mrb[54].mxu0  ;;  %3982 = vst [vmem:[#allocation3_spill] sm:$0xff] %v3504_v29  ;;  %1513 = vst.msk [vmem:[%s2781_s21 + $0x370] sm:$0xff] %vm1402_vm5, %v3504_v29 }
 0x15d   : > { %v2029_v3 = vadd.f32 %v2028_v62, %v2027_v52  ;;  %1458 = vst.msk [vmem:[%s2781_s21 + $0x1b8] sm:$0xff] %vm1402_vm5, %v2608_v2  ;;  %v1033_v8 = vpop.f32.mrb[55].mxu0  ;;  %v1638_v9 = vadd.f32 %v1637_v54, %v1636_v48  ;;  %v1852_v21 = vmul.f32 %v2608_v2, %v2608_v2  ;;  %v1641_v38 = vsel %vm1402_vm5, %v2608_v2, 0.0 }
 0x15e   : > { %1457 = vst.msk [vmem:[%s2781_s21 + $0x1b0] sm:$0xff] %vm1402_vm5, %v1033_v8  ;;  %v1639_v25 = vsel %vm1402_vm5, %v1033_v8, 0.0  ;;  %v1851_v20 = vmul.f32 %v1033_v8, %v1033_v8  ;;  %v3513_v8 = vpop.f32.mrb[48].mxu1 }
 0x15f   : > { %v1640_v35 = vadd.f32 %v1639_v25, %v1638_v9  ;;  %v2031_v39 = vadd.f32 %v2030_v12, %v2029_v3  ;;  %3983 = vst [vmem:[#allocation4_spill] sm:$0xff] %v3513_v8  ;;  %v2034_v9 = vsel %vm1402_vm5, %v1852_v21, 0.0  ;;  %1516 = vst.msk [vmem:[%s2781_s21 + $0x388] sm:$0xff] %vm1402_vm5, %v3513_v8  ;;  %v3522_v25 = vpop.f32.mrb[49].mxu1 }
 0x160   : > { %v2032_v40 = vsel %vm1402_vm5, %v1851_v20, 0.0  ;;  %v2611_v48 = vpop.f32.mrb[56].mxu0  ;;  %3984 = vst [vmem:[#allocation5_spill] sm:$0xff] %v3522_v25  ;;  %1515 = vst.msk [vmem:[%s2781_s21 + $0x380] sm:$0xff] %vm1402_vm5, %v3522_v25  ;;  %v3531_v8 = vpop.f32.mrb[50].mxu1 }
 0x161   : > { %v2033_v52 = vadd.f32 %v2032_v40, %v2031_v39  ;;  %1460 = vst.msk [vmem:[%s2781_s21 + $0x1c8] sm:$0xff] %vm1402_vm5, %v2611_v48  ;;  %v1043_v54 = vpop.f32.mrb[57].mxu0  ;;  %v1642_v62 = vadd.f32 %v1641_v38, %v1640_v35  ;;  %v1854_v3 = vmul.f32 %v2611_v48, %v2611_v48  ;;  %v1645_v21 = vsel %vm1402_vm5, %v2611_v48, 0.0  ;;  %3985 = vst [vmem:[#allocation6_spill] sm:$0xff] %v3531_v8 }
 0x162   : > { %1459 = vst.msk [vmem:[%s2781_s21 + $0x1c0] sm:$0xff] %vm1402_vm5, %v1043_v54  ;;  %v1643_v12 = vsel %vm1402_vm5, %v1043_v54, 0.0  ;;  %v1853_v2 = vmul.f32 %v1043_v54, %v1043_v54  ;;  %1518 = vst.msk [vmem:[%s2781_s21 + $0x398] sm:$0xff] %vm1402_vm5, %v3531_v8 }
 0x163   : > { %v1644_v20 = vadd.f32 %v1643_v12, %v1642_v62  ;;  %v2035_v35 = vadd.f32 %v2034_v9, %v2033_v52  ;;  %v2038_v62 = vsel %vm1402_vm5, %v1854_v3, 0.0  ;;  %v3540_v12 = vpop.f32.mrb[51].mxu1 }
 0x164   : > { %v2036_v39 = vsel %vm1402_vm5, %v1853_v2, 0.0  ;;  %v2614_v38 = vpop.f32.mrb[58].mxu0  ;;  %3986 = vst [vmem:[#allocation7_spill] sm:$0xff] %v3540_v12  ;;  %1517 = vst.msk [vmem:[%s2781_s21 + $0x390] sm:$0xff] %vm1402_vm5, %v3540_v12  ;;  %v3549_v8 = vpop.f32.mrb[52].mxu1  ;;  %v1861_v12 = vmul.f32 %v3090_v55, %v3090_v55 }
 0x165   : > { %v2037_v40 = vadd.f32 %v2036_v39, %v2035_v35  ;;  %1462 = vst.msk [vmem:[%s2781_s21 + $0x1d8] sm:$0xff] %vm1402_vm5, %v2614_v38  ;;  %v1053_v54 = vpop.f32.mrb[59].mxu0  ;;  %v1646_v11 = vadd.f32 %v1645_v21, %v1644_v20  ;;  %v1856_v52 = vmul.f32 %v2614_v38, %v2614_v38  ;;  %v1649_v3 = vsel %vm1402_vm5, %v2614_v38, 0.0  ;;  %3987 = vst [vmem:[#allocation8_spill] sm:$0xff] %v3549_v8 }
 0x166   : > { %1461 = vst.msk [vmem:[%s2781_s21 + $0x1d0] sm:$0xff] %vm1402_vm5, %v1053_v54  ;;  %v1647_v9 = vsel %vm1402_vm5, %v1053_v54, 0.0  ;;  %v1855_v48 = vmul.f32 %v1053_v54, %v1053_v54  ;;  %1520 = vst.msk [vmem:[%s2781_s21 + $0x3a8] sm:$0xff] %vm1402_vm5, %v3549_v8 }
 0x167   : > { %v1648_v2 = vadd.f32 %v1647_v9, %v1646_v11  ;;  %v2039_v20 = vadd.f32 %v2038_v62, %v2037_v40  ;;  %v2042_v11 = vsel %vm1402_vm5, %v1856_v52, 0.0  ;;  %v3558_v9 = vpop.f32.mrb[53].mxu1 }
 0x168   : > { %v2040_v35 = vsel %vm1402_vm5, %v1855_v48, 0.0  ;;  %v2617_v21 = vpop.f32.mrb[60].mxu0  ;;  %3988 = vst [vmem:[#allocation9_spill] sm:$0xff] %v3558_v9  ;;  %1519 = vst.msk [vmem:[%s2781_s21 + $0x3a0] sm:$0xff] %vm1402_vm5, %v3558_v9 }
 0x169   : > { %v2041_v39 = vadd.f32 %v2040_v35, %v2039_v20  ;;  %1464 = vst.msk [vmem:[%s2781_s21 + $0x1e8] sm:$0xff] %vm1402_vm5, %v2617_v21  ;;  %v1063_v54 = vpop.f32.mrb[61].mxu0  ;;  %v1650_v25 = vadd.f32 %v1649_v3, %v1648_v2  ;;  %v1858_v40 = vmul.f32 %v2617_v21, %v2617_v21  ;;  %v1653_v52 = vsel %vm1402_vm5, %v2617_v21, 0.0 }
 0x16a   : > { %1463 = vst.msk [vmem:[%s2781_s21 + $0x1e0] sm:$0xff] %vm1402_vm5, %v1063_v54  ;;  %v1651_v62 = vsel %vm1402_vm5, %v1063_v54, 0.0  ;;  %v1857_v38 = vmul.f32 %v1063_v54, %v1063_v54 }
 0x16b   : > { %v1652_v48 = vadd.f32 %v1651_v62, %v1650_v25  ;;  %v2043_v20 = vadd.f32 %v2042_v11, %v2041_v39  ;;  %v3569_v25 = vpop.f32.mrb[54].mxu1  ;;  %v2046_v39 = vsel %vm1402_vm5, %v1858_v40, 0.0 }
 0x16c   : > { %v2044_v2 = vsel %vm1402_vm5, %v1857_v38, 0.0  ;;  %v2620_v3 = vpop.f32.mrb[62].mxu0  ;;  %3989 = vst [vmem:[#allocation10_spill] sm:$0xff] %v3569_v25  ;;  %1522 = vst.msk [vmem:[%s2781_s21 + $0x3b8] sm:$0xff] %vm1402_vm5, %v3569_v25  ;;  %v3578_v38 = vpop.f32.mrb[55].mxu1 }
 0x16d   : > { %v2045_v35 = vadd.f32 %v2044_v2, %v2043_v20  ;;  %1466 = vst.msk [vmem:[%s2781_s21 + $0x1f8] sm:$0xff] %vm1402_vm5, %v2620_v3  ;;  %v1073_v54 = vpop.f32.mrb[63].mxu0  ;;  %v1654_v8 = vadd.f32 %v1653_v52, %v1652_v48  ;;  %v1860_v11 = vmul.f32 %v2620_v3, %v2620_v3  ;;  %1521 = vst.msk [vmem:[%s2781_s21 + $0x3b0] sm:$0xff] %vm1402_vm5, %v3578_v38  ;;  %v1657_v40 = vsel %vm1402_vm5, %v2620_v3, 0.0  ;;  %v3587_v29 = vpop.f32.mrb[56].mxu1 }
 0x16e   : > { %1465 = vst.msk [vmem:[%s2781_s21 + $0x1f0] sm:$0xff] %vm1402_vm5, %v1073_v54  ;;  %v1655_v21 = vsel %vm1402_vm5, %v1073_v54, 0.0  ;;  %v1859_v62 = vmul.f32 %v1073_v54, %v1073_v54  ;;  %v1659_v2 = vsel %vm1402_vm5, %v3090_v55, 0.0  ;;  %v1863_v3 = vmul.f32 %v3108_v5, %v3108_v5  ;;  %1524 = vst.msk [vmem:[%s2781_s21 + $0x3c8] sm:$0xff] %vm1402_vm5, %v3587_v29 }
 0x16f   : > { %v1656_v48 = vadd.f32 %v1655_v21, %v1654_v8  ;;  %v2047_v20 = vadd.f32 %v2046_v39, %v2045_v35  ;;  %v2050_v25 = vsel %vm1402_vm5, %v1860_v11, 0.0  ;;  %v1862_v8 = vmul.f32 %v3081_v50, %v3081_v50  ;;  %v3598_v39 = vpop.f32.mrb[57].mxu1 }
 0x170   : > { %v2048_v52 = vsel %vm1402_vm5, %v1859_v62, 0.0  ;;  %v2052_v35 = vsel %vm1402_vm5, %v1861_v12, 0.0  ;;  %1523 = vst.msk [vmem:[%s2781_s21 + $0x3c0] sm:$0xff] %vm1402_vm5, %v3598_v39  ;;  %v1661_v11 = vsel %vm1402_vm5, %v3081_v50, 0.0  ;;  %v1663_v12 = vsel %vm1402_vm5, %v3108_v5, 0.0 }
 0x171   : > { %v1658_v54 = vadd.f32 %v1657_v40, %v1656_v48  ;;  %v2049_v9 = vadd.f32 %v2048_v52, %v2047_v20  ;;  %v3607_v20 = vpop.f32.mrb[58].mxu1  ;;  %v2054_v40 = vsel %vm1402_vm5, %v1862_v8, 0.0  ;;  %v1865_v52 = vmul.f32 %v3126_v19, %v3126_v19 }
 0x172   : > { %1526 = vst.msk [vmem:[%s2781_s21 + $0x3d8] sm:$0xff] %vm1402_vm5, %v3607_v20  ;;  %v3618_v50 = vpop.f32.mrb[59].mxu1  ;;  %v1667_v8 = vsel %vm1402_vm5, %v3126_v19, 0.0 }
 0x173   : > { %v2051_v55 = vadd.f32 %v2050_v25, %v2049_v9  ;;  %v1660_v21 = vadd.f32 %v1659_v2, %v1658_v54  ;;  %v1864_v9 = vmul.f32 %v3099_v0, %v3099_v0  ;;  %v2056_v25 = vsel %vm1402_vm5, %v1863_v3, 0.0  ;;  %1525 = vst.msk [vmem:[%s2781_s21 + $0x3d0] sm:$0xff] %vm1402_vm5, %v3618_v50 }
 0x174   : > { %v1665_v54 = vsel %vm1402_vm5, %v3099_v0, 0.0 }
 0x175   : > { %v1662_v62 = vadd.f32 %v1661_v11, %v1660_v21  ;;  %v2053_v48 = vadd.f32 %v2052_v35, %v2051_v55  ;;  %v3627_v55 = vpop.f32.mrb[60].mxu1  ;;  %v2058_v21 = vsel %vm1402_vm5, %v1864_v9, 0.0  ;;  %v1866_v11 = vmul.f32 %v3117_v14, %v3117_v14 }
 0x176   : > { %1528 = vst.msk [vmem:[%s2781_s21 + $0x3e8] sm:$0xff] %vm1402_vm5, %v3627_v55  ;;  %v3638_v0 = vpop.f32.mrb[61].mxu1  ;;  %v1671_v9 = vsel %vm1402_vm5, %v3144_v33, 0.0 }
 0x177   : > { %v2055_v5 = vadd.f32 %v2054_v40, %v2053_v48  ;;  %v1664_v2 = vadd.f32 %v1663_v12, %v1662_v62  ;;  %v2060_v12 = vsel %vm1402_vm5, %v1865_v52, 0.0  ;;  %v1867_v62 = vmul.f32 %v3144_v33, %v3144_v33  ;;  %1527 = vst.msk [vmem:[%s2781_s21 + $0x3e0] sm:$0xff] %vm1402_vm5, %v3638_v0 }
 0x178   : > { %v1669_v40 = vsel %vm1402_vm5, %v3117_v14, 0.0 }
 0x179   : > { %v2057_v35 = vadd.f32 %v2056_v25, %v2055_v5  ;;  %v1666_v3 = vadd.f32 %v1665_v54, %v1664_v2  ;;  %v3647_v5 = vpop.f32.mrb[62].mxu1  ;;  %v2062_v2 = vsel %vm1402_vm5, %v1866_v11, 0.0  ;;  %v1868_v54 = vmul.f32 %v3135_v28, %v3135_v28 }
 0x17a   : > { %1530 = vst.msk [vmem:[%s2781_s21 + $0x3f8] sm:$0xff] %vm1402_vm5, %v3647_v5  ;;  %v3658_v14 = vpop.f32.mrb[63].mxu1  ;;  %v1675_v11 = vsel %vm1402_vm5, %v3162_v47, 0.0 }
 0x17b   : > { %v1668_v19 = vadd.f32 %v1667_v8, %v1666_v3  ;;  %v2059_v48 = vadd.f32 %v2058_v21, %v2057_v35  ;;  %v2064_v8 = vsel %vm1402_vm5, %v1867_v62, 0.0  ;;  %v1869_v35 = vmul.f32 %v3162_v47, %v3162_v47  ;;  %1529 = vst.msk [vmem:[%s2781_s21 + $0x3f0] sm:$0xff] %vm1402_vm5, %v3658_v14 }
 0x17c   : > { %v1673_v21 = vsel %vm1402_vm5, %v3135_v28, 0.0  ;;  %v1677_v28 = vsel %vm1402_vm5, %v3153_v42, 0.0  ;;  %v1679_v47 = vsel %vm1402_vm5, %v3180_v63, 0.0 }
 0x17d   : > { %v2061_v25 = vadd.f32 %v2060_v12, %v2059_v48  ;;  %v1670_v52 = vadd.f32 %v1669_v40, %v1668_v19  ;;  %v2066_v19 = vsel %vm1402_vm5, %v1868_v54, 0.0  ;;  %v1870_v48 = vmul.f32 %v3153_v42, %v3153_v42 }
 0x17e   : > { %v2068_v40 = vsel %vm1402_vm5, %v1869_v35, 0.0  ;;  %v1681_v42 = vsel %vm1402_vm5, %v3171_v58, 0.0 }
 0x17f   : > { %v1672_v33 = vadd.f32 %v1671_v9, %v1670_v52  ;;  %v2063_v3 = vadd.f32 %v2062_v2, %v2061_v25  ;;  %v1871_v9 = vmul.f32 %v3180_v63, %v3180_v63  ;;  %v2070_v54 = vsel %vm1402_vm5, %v1870_v48, 0.0 }
 0x180   : > { %v1683_v63 = vsel %vm1402_vm5, %v3198_v16, 0.0  ;;  %v1874_v48 = vmul.f32 %v3189_v10, %v3189_v10 }
 0x181   : > { %v2065_v12 = vadd.f32 %v2064_v8, %v2063_v3  ;;  %v1674_v62 = vadd.f32 %v1673_v21, %v1672_v33  ;;  %v1872_v33 = vmul.f32 %v3171_v58, %v3171_v58  ;;  %v2072_v35 = vsel %vm1402_vm5, %v1871_v9, 0.0 }
 0x182   : > { %v1873_v3 = vmul.f32 %v3198_v16, %v3198_v16  ;;  %v1875_v9 = vmul.f32 %v3216_v32, %v3216_v32  ;;  %v1685_v58 = vsel %vm1402_vm5, %v3189_v10, 0.0  ;;  %v1687_v16 = vsel %vm1402_vm5, %v3216_v32, 0.0 }
 0x183   : > { %v1676_v25 = vadd.f32 %v1675_v11, %v1674_v62  ;;  %v2067_v52 = vadd.f32 %v2066_v19, %v2065_v12  ;;  %v2074_v19 = vsel %vm1402_vm5, %v1872_v33, 0.0  ;;  %v1877_v33 = vmul.f32 %v3234_v49, %v3234_v49 }
 0x184   : > { %v1689_v10 = vsel %vm1402_vm5, %v3207_v26, 0.0  ;;  %v1691_v32 = vsel %vm1402_vm5, %v3234_v49, 0.0  ;;  %v1695_v49 = vsel %vm1402_vm5, %v3252_v4, 0.0 }
 0x185   : > { %v2069_v2 = vadd.f32 %v2068_v40, %v2067_v52  ;;  %v1678_v8 = vadd.f32 %v1677_v28, %v1676_v25  ;;  %v2076_v40 = vsel %vm1402_vm5, %v1873_v3, 0.0 }
 0x187   : > { %v1680_v21 = vadd.f32 %v1679_v47, %v1678_v8  ;;  %v2071_v11 = vadd.f32 %v2070_v54, %v2069_v2  ;;  %v2078_v2 = vsel %vm1402_vm5, %v1874_v48, 0.0  ;;  %v1876_v8 = vmul.f32 %v3207_v26, %v3207_v26 }
 0x188   : > { %v2080_v54 = vsel %vm1402_vm5, %v1875_v9, 0.0  ;;  %v1693_v26 = vsel %vm1402_vm5, %v3225_v43, 0.0 }
 0x189   : > { %v2073_v12 = vadd.f32 %v2072_v35, %v2071_v11  ;;  %v1682_v62 = vadd.f32 %v1681_v42, %v1680_v21  ;;  %v2082_v42 = vsel %vm1402_vm5, %v1876_v8, 0.0 }
 0x18b   : > { %v1684_v25 = vadd.f32 %v1683_v63, %v1682_v62  ;;  %v2075_v52 = vadd.f32 %v2074_v19, %v2073_v12  ;;  %v1878_v63 = vmul.f32 %v3225_v43, %v3225_v43  ;;  %v2084_v12 = vsel %vm1402_vm5, %v1877_v33, 0.0 }
 0x18c   : > { %v1879_v62 = vmul.f32 %v3252_v4, %v3252_v4  ;;  %v1697_v43 = vsel %vm1402_vm5, %v3243_v61, 0.0  ;;  %v1699_v4 = vsel %vm1402_vm5, %v3270_v23, 0.0  ;;  %v1882_v33 = vmul.f32 %v3261_v17, %v3261_v17 }
 0x18d   : > { %v2077_v28 = vadd.f32 %v2076_v40, %v2075_v52  ;;  %v1686_v47 = vadd.f32 %v1685_v58, %v1684_v25  ;;  %v2086_v25 = vsel %vm1402_vm5, %v1878_v63, 0.0  ;;  %v1880_v52 = vmul.f32 %v3243_v61, %v3243_v61 }
 0x18e   : > { %v2088_v58 = vsel %vm1402_vm5, %v1879_v62, 0.0  ;;  %v1701_v61 = vsel %vm1402_vm5, %v3261_v17, 0.0  ;;  %v1884_v63 = vmul.f32 %v3279_v36, %v3279_v36  ;;  %v1885_v62 = vmul.f32 %v3306_v1, %v3306_v1 }
 0x18f   : > { %v1688_v35 = vadd.f32 %v1687_v16, %v1686_v47  ;;  %v2079_v3 = vadd.f32 %v2078_v2, %v2077_v28  ;;  %v1881_v16 = vmul.f32 %v3270_v23, %v3270_v23  ;;  %v1703_v23 = vsel %vm1402_vm5, %v3288_v41, 0.0 }
 0x190   : > { %v1705_v17 = vsel %vm1402_vm5, %v3279_v36, 0.0  ;;  %v1709_v36 = vsel %vm1402_vm5, %v3297_v56, 0.0 }
 0x191   : > { %v2081_v21 = vadd.f32 %v2080_v54, %v2079_v3  ;;  %v1690_v11 = vadd.f32 %v1689_v10, %v1688_v35  ;;  %v2090_v54 = vsel %vm1402_vm5, %v1880_v52, 0.0  ;;  %v2092_v35 = vsel %vm1402_vm5, %v1881_v16, 0.0 }
 0x192   : > { %v1883_v3 = vmul.f32 %v3288_v41, %v3288_v41  ;;  %v1707_v41 = vsel %vm1402_vm5, %v3306_v1, 0.0  ;;  %v1887_v52 = vmul.f32 %v3324_v22, %v3324_v22  ;;  %v1711_v1 = vsel %vm1402_vm5, %v3324_v22, 0.0 }
 0x193   : > { %v1692_v19 = vadd.f32 %v1691_v32, %v1690_v11  ;;  %v2083_v48 = vadd.f32 %v2082_v42, %v2081_v21  ;;  %v2094_v42 = vsel %vm1402_vm5, %v1882_v33, 0.0  ;;  %v1715_v22 = vsel %vm1402_vm5, %v3342_v45, 0.0 }
 0x195   : > { %v2085_v40 = vadd.f32 %v2084_v12, %v2083_v48  ;;  %v1694_v9 = vadd.f32 %v1693_v26, %v1692_v19  ;;  %v2096_v12 = vsel %vm1402_vm5, %v1883_v3, 0.0 }
 0x197   : > { %v1696_v28 = vadd.f32 %v1695_v49, %v1694_v9  ;;  %v2087_v47 = vadd.f32 %v2086_v25, %v2085_v40  ;;  %v2098_v40 = vsel %vm1402_vm5, %v1884_v63, 0.0  ;;  %v1886_v9 = vmul.f32 %v3297_v56, %v3297_v56 }
 0x198   : > { %v2100_v25 = vsel %vm1402_vm5, %v1885_v62, 0.0  ;;  %v1713_v56 = vsel %vm1402_vm5, %v3315_v13, 0.0  ;;  %v1892_v62 = vmul.f32 %v3351_v60, %v3351_v60 }
 0x199   : > { %v2089_v2 = vadd.f32 %v2088_v58, %v2087_v47  ;;  %v1698_v8 = vadd.f32 %v1697_v43, %v1696_v28  ;;  %v2102_v43 = vsel %vm1402_vm5, %v1886_v9, 0.0  ;;  %v1894_v9 = vmul.f32 %v3369_v24, %v3369_v24 }
 0x19b   : > { %v1700_v10 = vadd.f32 %v1699_v4, %v1698_v8  ;;  %v2091_v32 = vadd.f32 %v2090_v54, %v2089_v2  ;;  %v1888_v4 = vmul.f32 %v3315_v13, %v3315_v13  ;;  %v2104_v2 = vsel %vm1402_vm5, %v1887_v52, 0.0 }
 0x19c   : > { %v1889_v8 = vmul.f32 %v3342_v45, %v3342_v45  ;;  %v1717_v13 = vsel %vm1402_vm5, %v3333_v37, 0.0  ;;  %v1719_v45 = vsel %vm1402_vm5, %v3360_v7, 0.0  ;;  %v1895_v52 = vmul.f32 %v3396_v59, %v3396_v59 }
 0x19d   : > { %v2093_v21 = vadd.f32 %v2092_v35, %v2091_v32  ;;  %v1702_v11 = vadd.f32 %v1701_v61, %v1700_v10  ;;  %v2106_v10 = vsel %vm1402_vm5, %v1888_v4, 0.0  ;;  %v1890_v32 = vmul.f32 %v3333_v37, %v3333_v37 }
 0x19e   : > { %v2108_v61 = vsel %vm1402_vm5, %v1889_v8, 0.0  ;;  %v1721_v37 = vsel %vm1402_vm5, %v3351_v60, 0.0  ;;  %v1725_v60 = vsel %vm1402_vm5, %v3369_v24, 0.0  ;;  %v1897_v4 = vmul.f32 %v3414_v27, %v3414_v27 }
 0x19f   : > { %v1704_v19 = vadd.f32 %v1703_v23, %v1702_v11  ;;  %v2095_v48 = vadd.f32 %v2094_v42, %v2093_v21  ;;  %v1891_v23 = vmul.f32 %v3360_v7, %v3360_v7  ;;  %v1723_v7 = vsel %vm1402_vm5, %v3378_v31, 0.0 }
 0x1a0   : > { %v1729_v24 = vsel %vm1402_vm5, %v3387_v51, 0.0 }
 0x1a1   : > { %v2097_v26 = vadd.f32 %v2096_v12, %v2095_v48  ;;  %v1706_v49 = vadd.f32 %v1705_v17, %v1704_v19  ;;  %v2110_v12 = vsel %vm1402_vm5, %v1890_v32, 0.0  ;;  %v2112_v19 = vsel %vm1402_vm5, %v1891_v23, 0.0 }
 0x1a2   : > { %v1893_v48 = vmul.f32 %v3378_v31, %v3378_v31  ;;  %v1727_v31 = vsel %vm1402_vm5, %v3396_v59, 0.0  ;;  %v1731_v59 = vsel %vm1402_vm5, %v3414_v27, 0.0  ;;  %v1735_v27 = vsel %vm1402_vm5, %v3432_v57, 0.0 }
 0x1a3   : > { %v1708_v58 = vadd.f32 %v1707_v41, %v1706_v49  ;;  %v2099_v16 = vadd.f32 %v2098_v40, %v2097_v26  ;;  %v2114_v40 = vsel %vm1402_vm5, %v1892_v62, 0.0 }
 0x1a5   : > { %v2101_v28 = vadd.f32 %v2100_v25, %v2099_v16  ;;  %v1710_v47 = vadd.f32 %v1709_v36, %v1708_v58  ;;  %v2116_v25 = vsel %vm1402_vm5, %v1893_v48, 0.0  ;;  %v1902_v48 = vmul.f32 %v3441_v18, %v3441_v18 }
 0x1a7   : > { %v1712_v54 = vadd.f32 %v1711_v1, %v1710_v47  ;;  %v2103_v33 = vadd.f32 %v2102_v43, %v2101_v28  ;;  %v2118_v28 = vsel %vm1402_vm5, %v1894_v9, 0.0  ;;  %v1896_v47 = vmul.f32 %v3387_v51, %v3387_v51 }
 0x1a8   : > { %v2120_v43 = vsel %vm1402_vm5, %v1895_v52, 0.0  ;;  %v1733_v51 = vsel %vm1402_vm5, %v3405_v15, 0.0  ;;  %v1904_v9 = vmul.f32 %v3459_v53, %v3459_v53  ;;  %v1905_v52 = vmul.f32 %v3486_v44, %v3486_v44 }
 0x1a9   : > { %v2105_v35 = vadd.f32 %v2104_v2, %v2103_v33  ;;  %v1714_v3 = vadd.f32 %v1713_v56, %v1712_v54  ;;  %v2122_v56 = vsel %vm1402_vm5, %v1896_v47, 0.0  ;;  %v3990_v47 = vld [vmem:[#allocation3_spill] sm:$0xff] }
 0x1ab   : > { %v1716_v21 = vadd.f32 %v1715_v22, %v1714_v3  ;;  %v2107_v11 = vadd.f32 %v2106_v10, %v2105_v35  ;;  %v1898_v22 = vmul.f32 %v3405_v15, %v3405_v15  ;;  %v2124_v35 = vsel %vm1402_vm5, %v1897_v4, 0.0 }
 0x1ac   : > { %v1899_v3 = vmul.f32 %v3432_v57, %v3432_v57  ;;  %v1737_v15 = vsel %vm1402_vm5, %v3423_v46, 0.0  ;;  %v1739_v57 = vsel %vm1402_vm5, %v3450_v30, 0.0 }
 0x1ad   : > { %v2109_v42 = vadd.f32 %v2108_v61, %v2107_v11  ;;  %v1718_v63 = vadd.f32 %v1717_v13, %v1716_v21  ;;  %v2126_v21 = vsel %vm1402_vm5, %v1898_v22, 0.0  ;;  %v1900_v11 = vmul.f32 %v3423_v46, %v3423_v46  ;;  %v3992_v22 = vld [vmem:[#allocation5_spill] sm:$0xff] }
 0x1ae   : > { %v2128_v13 = vsel %vm1402_vm5, %v1899_v3, 0.0  ;;  %v1741_v46 = vsel %vm1402_vm5, %v3441_v18, 0.0  ;;  %v1745_v18 = vsel %vm1402_vm5, %v3459_v53, 0.0  ;;  %v1749_v53 = vsel %vm1402_vm5, %v3477_v34, 0.0 }
 0x1af   : > { %v1720_v17 = vadd.f32 %v1719_v45, %v1718_v63  ;;  %v2111_v41 = vadd.f32 %v2110_v12, %v2109_v42  ;;  %v1901_v45 = vmul.f32 %v3450_v30, %v3450_v30  ;;  %v1743_v30 = vsel %vm1402_vm5, %v3468_v6, 0.0 }
 0x1b1   : > { %v2113_v26 = vadd.f32 %v2112_v19, %v2111_v41  ;;  %v1722_v49 = vadd.f32 %v1721_v37, %v1720_v17  ;;  %v2130_v19 = vsel %vm1402_vm5, %v1900_v11, 0.0  ;;  %v2132_v17 = vsel %vm1402_vm5, %v1901_v45, 0.0 }
 0x1b2   : > { %v1903_v41 = vmul.f32 %v3468_v6, %v3468_v6  ;;  %v1747_v6 = vsel %vm1402_vm5, %v3486_v44, 0.0  ;;  %v1751_v44 = vsel %vm1402_vm5, %v3990_v47, 0.0 }
 0x1b3   : > { %v1724_v58 = vadd.f32 %v1723_v7, %v1722_v49  ;;  %v2115_v16 = vadd.f32 %v2114_v40, %v2113_v26  ;;  %v2134_v40 = vsel %vm1402_vm5, %v1902_v48, 0.0  ;;  %v3995_v48 = vld [vmem:[#allocation6_spill] sm:$0xff] }
 0x1b5   : > { %v2117_v36 = vadd.f32 %v2116_v25, %v2115_v16  ;;  %v1726_v1 = vadd.f32 %v1725_v60, %v1724_v58  ;;  %v2136_v25 = vsel %vm1402_vm5, %v1903_v41, 0.0 }
 0x1b7   : > { %v1728_v2 = vadd.f32 %v1727_v31, %v1726_v1  ;;  %v2119_v8 = vadd.f32 %v2118_v28, %v2117_v36  ;;  %v2138_v36 = vsel %vm1402_vm5, %v1904_v9, 0.0  ;;  %v1906_v1 = vmul.f32 %v3477_v34, %v3477_v34 }
 0x1b8   : > { %v2140_v28 = vsel %vm1402_vm5, %v1905_v52, 0.0  ;;  %v3997_v52 = vld [vmem:[#allocation8_spill] sm:$0xff] }
 0x1b9   : > { %v2121_v54 = vadd.f32 %v2120_v43, %v2119_v8  ;;  %v1730_v33 = vadd.f32 %v1729_v24, %v1728_v2  ;;  %v1907_v43 = vmul.f32 %v3990_v47, %v3990_v47 }
 0x1bb   : > { %v1732_v10 = vadd.f32 %v1731_v59, %v1730_v33  ;;  %v2123_v32 = vadd.f32 %v2122_v56, %v2121_v54  ;;  %v2142_v59 = vsel %vm1402_vm5, %v1906_v1, 0.0  ;;  %v3991_v54 = vld [vmem:[#allocation2_spill] sm:$0xff]  ;;  %v2144_v56 = vsel %vm1402_vm5, %v1907_v43, 0.0 }
 0x1bc   : > { %v1908_v33 = vmul.f32 %v3991_v54, %v3991_v54  ;;  %v1753_v34 = vsel %vm1402_vm5, %v3991_v54, 0.0  ;;  %v3998_v43 = vld [vmem:[#allocation10_spill] sm:$0xff] }
 0x1bd   : > { %v2125_v61 = vadd.f32 %v2124_v35, %v2123_v32  ;;  %v1734_v23 = vadd.f32 %v1733_v51, %v1732_v10  ;;  %v1909_v35 = vmul.f32 %v3992_v22, %v3992_v22  ;;  %v1755_v32 = vsel %vm1402_vm5, %v3992_v22, 0.0 }
 0x1bf   : > { %v1736_v42 = vadd.f32 %v1735_v27, %v1734_v23  ;;  %v2127_v63 = vadd.f32 %v2126_v21, %v2125_v61  ;;  %v2146_v61 = vsel %vm1402_vm5, %v1908_v33, 0.0  ;;  %v3993_v23 = vld [vmem:[#allocation4_spill] sm:$0xff]  ;;  %v2148_v11 = vsel %vm1402_vm5, %v1909_v35, 0.0 }
 0x1c0   : > { %v1910_v21 = vmul.f32 %v3993_v23, %v3993_v23  ;;  %v1919_v35 = vmul.f32 %v3618_v50, %v3618_v50 }
 0x1c1   : > { %v2129_v12 = vadd.f32 %v2128_v13, %v2127_v63  ;;  %v1738_v62 = vadd.f32 %v1737_v15, %v1736_v42  ;;  %v3994_v13 = vld [vmem:[#allocation7_spill] sm:$0xff]  ;;  %v1757_v15 = vsel %vm1402_vm5, %v3993_v23, 0.0 }
 0x1c2   : > { %v1911_v45 = vmul.f32 %v3994_v13, %v3994_v13  ;;  %v2168_v23 = vsel %vm1402_vm5, %v1919_v35, 0.0 }
 0x1c3   : > { %v1740_v37 = vadd.f32 %v1739_v57, %v1738_v62  ;;  %v2131_v7 = vadd.f32 %v2130_v19, %v2129_v12  ;;  %v1759_v57 = vsel %vm1402_vm5, %v3994_v13, 0.0  ;;  %v2150_v19 = vsel %vm1402_vm5, %v1910_v21, 0.0 }
 0x1c4   : > { %v2152_v41 = vsel %vm1402_vm5, %v1911_v45, 0.0  ;;  %v1921_v21 = vmul.f32 %v3638_v0, %v3638_v0 }
 0x1c5   : > { %v2133_v26 = vadd.f32 %v2132_v17, %v2131_v7  ;;  %v1742_v49 = vadd.f32 %v1741_v46, %v1740_v37  ;;  %v1912_v17 = vmul.f32 %v3995_v48, %v3995_v48  ;;  %v3996_v37 = vld [vmem:[#allocation9_spill] sm:$0xff] }
 0x1c6   : > { %v1913_v7 = vmul.f32 %v3996_v37, %v3996_v37 }
 0x1c7   : > { %v1744_v58 = vadd.f32 %v1743_v30, %v1742_v49  ;;  %v2135_v16 = vadd.f32 %v2134_v40, %v2133_v26  ;;  %v1761_v26 = vsel %vm1402_vm5, %v3995_v48, 0.0  ;;  %v1763_v49 = vsel %vm1402_vm5, %v3996_v37, 0.0 }
 0x1c8   : > { %v1924_v37 = vmul.f32 %v3647_v5, %v3647_v5 }
 0x1c9   : > { %v2137_v60 = vadd.f32 %v2136_v25, %v2135_v16  ;;  %v1746_v31 = vadd.f32 %v1745_v18, %v1744_v58  ;;  %v2154_v25 = vsel %vm1402_vm5, %v1912_v17, 0.0  ;;  %v1914_v58 = vmul.f32 %v3997_v52, %v3997_v52 }
 0x1ca   : > { %v2156_v16 = vsel %vm1402_vm5, %v1913_v7, 0.0  ;;  %v1915_v18 = vmul.f32 %v3578_v38, %v3578_v38 }
 0x1cb   : > { %v1748_v4 = vadd.f32 %v1747_v6, %v1746_v31  ;;  %v2139_v2 = vadd.f32 %v2138_v36, %v2137_v60  ;;  %v1765_v31 = vsel %vm1402_vm5, %v3997_v52, 0.0  ;;  %v1767_v36 = vsel %vm1402_vm5, %v3578_v38, 0.0 }
 0x1cc   : > { %v2158_v47 = vsel %vm1402_vm5, %v1914_v58, 0.0  ;;  %v1771_v38 = vsel %vm1402_vm5, %v3598_v39, 0.0 }
 0x1cd   : > { %v2141_v8 = vadd.f32 %v2140_v28, %v2139_v2  ;;  %v1750_v24 = vadd.f32 %v1749_v53, %v1748_v4  ;;  %v1916_v4 = vmul.f32 %v3998_v43, %v3998_v43  ;;  %v2160_v2 = vsel %vm1402_vm5, %v1915_v18, 0.0 }
 0x1ce   : > { %v1917_v53 = vmul.f32 %v3598_v39, %v3598_v39  ;;  %v1775_v39 = vsel %vm1402_vm5, %v3618_v50, 0.0  ;;  %v1779_v50 = vsel %vm1402_vm5, %v3638_v0, 0.0  ;;  %v1783_v0 = vsel %vm1402_vm5, %v3658_v14, 0.0 }
 0x1cf   : > { %v1752_v3 = vadd.f32 %v1751_v44, %v1750_v24  ;;  %v2143_v10 = vadd.f32 %v2142_v59, %v2141_v8  ;;  %v1769_v24 = vsel %vm1402_vm5, %v3998_v43, 0.0  ;;  %v2162_v33 = vsel %vm1402_vm5, %v1916_v4, 0.0 }
 0x1d0   : > { %v2164_v22 = vsel %vm1402_vm5, %v1917_v53, 0.0 }
 0x1d1   : > { %v2145_v51 = vadd.f32 %v2144_v56, %v2143_v10  ;;  %v1754_v27 = vadd.f32 %v1753_v34, %v1752_v3  ;;  %v1918_v56 = vmul.f32 %v3587_v29, %v3587_v29  ;;  %v1773_v34 = vsel %vm1402_vm5, %v3587_v29, 0.0 }
 0x1d2   : > { %v1777_v29 = vsel %vm1402_vm5, %v3607_v20, 0.0 }
 0x1d3   : > { %v1756_v42 = vadd.f32 %v1755_v32, %v1754_v27  ;;  %v2147_v63 = vadd.f32 %v2146_v61, %v2145_v51  ;;  %v2166_v27 = vsel %vm1402_vm5, %v1918_v56, 0.0  ;;  %v1920_v61 = vmul.f32 %v3607_v20, %v3607_v20 }
 0x1d4   : > { %v1781_v20 = vsel %vm1402_vm5, %v3627_v55, 0.0 }
 0x1d5   : > { %v2149_v12 = vadd.f32 %v2148_v11, %v2147_v63  ;;  %v1758_v62 = vadd.f32 %v1757_v15, %v1756_v42  ;;  %v2170_v63 = vsel %vm1402_vm5, %v1920_v61, 0.0  ;;  %v1922_v15 = vmul.f32 %v3627_v55, %v3627_v55 }
 0x1d6   : > { %v2178_v55 = vsel %vm1402_vm5, %v1924_v37, 0.0 }
 0x1d7   : > { %v1760_v46 = vadd.f32 %v1759_v57, %v1758_v62  ;;  %v2151_v30 = vadd.f32 %v2150_v19, %v2149_v12  ;;  %v2172_v57 = vsel %vm1402_vm5, %v1921_v21, 0.0  ;;  %v1923_v12 = vmul.f32 %v3658_v14, %v3658_v14 }
 0x1d9   : > { %v2153_v40 = vadd.f32 %v2152_v41, %v2151_v30  ;;  %v1762_v9 = vadd.f32 %v1761_v26, %v1760_v46  ;;  %v2174_v41 = vsel %vm1402_vm5, %v1922_v15, 0.0  ;;  %v2176_v7 = vsel %vm1402_vm5, %v1923_v12, 0.0 }
 0x1da   : > { %v1785_v26 = vsel %vm1402_vm5, %v3647_v5, 0.0 }
 0x1db   : > { %v1764_v6 = vadd.f32 %v1763_v49, %v1762_v9  ;;  %v2155_v60 = vadd.f32 %v2154_v25, %v2153_v40 }
 0x1dd   : > { %v2157_v1 = vadd.f32 %v2156_v16, %v2155_v60  ;;  %v1766_v28 = vadd.f32 %v1765_v31, %v1764_v6 }
 0x1df   : > { %v1768_v44 = vadd.f32 %v1767_v36, %v1766_v28  ;;  %v2159_v8 = vadd.f32 %v2158_v47, %v2157_v1  ;;  %v1531_v36 = vld [vmem:[%s3962_s3] sm:$0x1]  ;;  %v1796_v28 = vld [vmem:[%s3962_s3 + $0x1] sm:$0x1] }
 0x1e1   : > { %v2161_v59 = vadd.f32 %v2160_v2, %v2159_v8  ;;  %v1770_v54 = vadd.f32 %v1769_v24, %v1768_v44 }
 0x1e3   : > { %v1772_v3 = vadd.f32 %v1771_v38, %v1770_v54  ;;  %v2163_v10 = vadd.f32 %v2162_v33, %v2161_v59 }
 0x1e5   : > { %v2165_v32 = vadd.f32 %v2164_v22, %v2163_v10  ;;  %v1774_v51 = vadd.f32 %v1773_v34, %v1772_v3 }
 0x1e7   : > { %v1776_v11 = vadd.f32 %v1775_v39, %v1774_v51  ;;  %v2167_v13 = vadd.f32 %v2166_v27, %v2165_v32 }
 0x1e9   : > { %v2169_v45 = vadd.f32 %v2168_v23, %v2167_v13  ;;  %v1778_v42 = vadd.f32 %v1777_v29, %v1776_v11 }
 0x1eb   : > { %v1780_v62 = vadd.f32 %v1779_v50, %v1778_v42  ;;  %v2171_v19 = vadd.f32 %v2170_v63, %v2169_v45 }
 0x1ed   : > { %v2173_v48 = vadd.f32 %v2172_v57, %v2171_v19  ;;  %v1782_v17 = vadd.f32 %v1781_v20, %v1780_v62 }
 0x1ef   : > { %v1784_v46 = vadd.f32 %v1783_v0, %v1782_v17  ;;  %v2175_v30 = vadd.f32 %v2174_v41, %v2173_v48 }
 0x1f1   : > { %v1786_v49 = vadd.f32 %v1785_v26, %v1784_v46  ;;  %v2177_v40 = vadd.f32 %v2176_v7, %v2175_v30 }
 0x1f3   : > { %v1787_v9 = vrot.slane %v1786_v49, 4  ;;  %v2179_v14 = vadd.f32 %v2178_v55, %v2177_v40 }
 0x1f5   : > { %v1788_v25 = vadd.f32 %v1787_v9, %v1786_v49  ;;  %v2180_v52 = vrot.slane %v2179_v14, 4 }
 0x1f7   : > { %v1789_v58 = vrot.slane %v1788_v25, 2  ;;  %v2181_v16 = vadd.f32 %v2180_v52, %v2179_v14 }
 0x1f9   : > { %v1790_v18 = vadd.f32 %v1789_v58, %v1788_v25  ;;  %v2182_v6 = vrot.slane %v2181_v16, 2 }
 0x1fb   : > { %v1791_v60 = vrot.slane %v1790_v18, 1  ;;  %v2183_v31 = vadd.f32 %v2182_v6, %v2181_v16 }
 0x1fd   : > { %v1792_v1 = vadd.f32 %v1791_v60, %v1790_v18  ;;  %v2184_v5 = vrot.slane %v2183_v31, 1 }
 0x1ff   : > { %v1793_v47 = vadd.f32 %v1792_v1, %v1531_v36  ;;  %v2185_v43 = vadd.f32 %v2184_v5, %v2183_v31 }
 0x201   : > { %1795 = vst.msk [vmem:[%s3962_s3] sm:$0x1] %vm1794_vm6, %v1793_v47  ;;  %v2186_v4 = vadd.f32 %v2185_v43, %v1796_v28 }
 0x203   : > { %2187 = vst.msk [vmem:[%s3962_s3 + $0x1] sm:$0x1] %vm1794_vm6, %v2186_v4 }
 0x204 PF: > { %s14_s12 = sadd.s32 1, %s2741_s12  }
 0x205   : > { %p11_p5 = scmp.ge.s32.totalorder %s14_s12, 4  }
 0x207   :  { %13 = sbr.rel (!%p11_p5) target bundleno = 1 (0x1), region = 70 }

// kernel: _reference_encoder_forward.10
= control target key start
LH: loop header
LB: loop body
LE: loop exit
PB: predicated region body
PF: predicated region fallthrough
CT: control target
= control target key end

     0   :  { %v2149_v0 = vmov 0.0|0.0   ;;  %vm245_vm0 = vcmask 261120   ;;  %s4375_s1 = inlined_call_operand.vmem [shape: f32[288,32], index: 1, kind: input, shape index: {}]   ;;  %s4376_s0 = inlined_call_operand.vmem [shape: f32[512,288], index: 0, kind: input, shape index: {}]   ;;  %s4377_s2 = inlined_call_operand.vmem [shape: f32[1,32], index: 2, kind: input, shape index: {}]   ;;  %s4378_s3 = inlined_call_operand.vmem [shape: f32[1,32], index: 3, kind: input, shape index: {}]   ;;  %s4379_s4 = inlined_call_operand.vmem [shape: f32[512,32], index: 4, kind: output, shape index: {}]  }
   0x1   :  { %2058 = vmatprep.subr.bf16.mxu0 %v2149_v0  ;;  %2114 = vmatprep.subr.bf16.mxu1 %v2149_v0  ;;  %v209_v1 = vld [vmem:[%s4375_s1] sm:$0xff]  ;;  %v210_v2 = vld [vmem:[%s4375_s1 + $0x8] sm:$0xff]  ;;  %v211_v3 = vld [vmem:[%s4375_s1 + $0x10] sm:$0xff] }
   0x2   :  { %v2059_v4 = vpack.c.bf16 %v210_v2, %v209_v1  ;;  %v212_v5 = vld [vmem:[%s4375_s1 + $0x18] sm:$0xff]  ;;  %v213_v7 = vld [vmem:[%s4375_s1 + $0x20] sm:$0xff]  ;;  %v214_v8 = vld [vmem:[%s4375_s1 + $0x28] sm:$0xff] }
   0x3   :  { %v2062_v6 = vpack.c.bf16 %v212_v5, %v211_v3  ;;  %v2065_v9 = vpack.c.bf16 %v214_v8, %v213_v7  ;;  %v215_v10 = vld [vmem:[%s4375_s1 + $0x30] sm:$0xff]  ;;  %v216_v11 = vld [vmem:[%s4375_s1 + $0x38] sm:$0xff]  ;;  %v18_v12 = vld [vmem:[%s4376_s0 + $0x8] sm:$0xff] }
   0x4   :  { %2060 = vmatpush1.bf16.msra.mxu0 %v2059_v4  ;;  %2130 = vmatpush1.bf16.msra.mxu1 %v2059_v4  ;;  %v2068_v13 = vpack.c.bf16 %v216_v11, %v215_v10  ;;  %v162_v14 = vld [vmem:[%s4376_s0 + $0x488] sm:$0xff]  ;;  %v217_v15 = vld [vmem:[%s4375_s1 + $0x40] sm:$0xff]  ;;  %v219_v18 = vld [vmem:[%s4375_s1 + $0x50] sm:$0xff] }
   0x5   :  { %2061 = vmatprep.subr.bf16.mxu0 %v2149_v0  ;;  %2115 = vmatprep.subr.bf16.mxu1 %v2149_v0  ;;  %v218_v16 = vld [vmem:[%s4375_s1 + $0x48] sm:$0xff]  ;;  %v220_v19 = vld [vmem:[%s4375_s1 + $0x58] sm:$0xff]  ;;  %v221_v21 = vld [vmem:[%s4375_s1 + $0x60] sm:$0xff] }
   0x6   :  { %502 = vmatprep.mubr.f32.mxu0 %v18_v12  ;;  %742 = vmatprep.mubr.f32.mxu1 %v162_v14  ;;  %v2071_v17 = vpack.c.bf16 %v218_v16, %v217_v15  ;;  %v2074_v20 = vpack.c.bf16 %v220_v19, %v219_v18  ;;  %v222_v22 = vld [vmem:[%s4375_s1 + $0x68] sm:$0xff]  ;;  %v223_v24 = vld [vmem:[%s4375_s1 + $0x70] sm:$0xff]  ;;  %v224_v25 = vld [vmem:[%s4375_s1 + $0x78] sm:$0xff] }
   0x7   :  { %v2077_v23 = vpack.c.bf16 %v222_v22, %v221_v21  ;;  %v2080_v26 = vpack.c.bf16 %v224_v25, %v223_v24  ;;  %v225_v27 = vld [vmem:[%s4375_s1 + $0x80] sm:$0xff]  ;;  %v226_v28 = vld [vmem:[%s4375_s1 + $0x88] sm:$0xff]  ;;  %v227_v30 = vld [vmem:[%s4375_s1 + $0x90] sm:$0xff] }
   0x8   :  { %2063 = vmatpush1.bf16.msra.mxu0 %v2062_v6  ;;  %2131 = vmatpush1.bf16.msra.mxu1 %v2062_v6  ;;  %v2083_v29 = vpack.c.bf16 %v226_v28, %v225_v27  ;;  %v228_v31 = vld [vmem:[%s4375_s1 + $0x98] sm:$0xff]  ;;  %v229_v33 = vld [vmem:[%s4375_s1 + $0xa0] sm:$0xff]  ;;  %v230_v34 = vld [vmem:[%s4375_s1 + $0xa8] sm:$0xff] }
   0x9   :  { %2064 = vmatprep.subr.bf16.mxu0 %v2149_v0  ;;  %2116 = vmatprep.subr.bf16.mxu1 %v2149_v0  ;;  %v2086_v32 = vpack.c.bf16 %v228_v31, %v227_v30  ;;  %v2089_v35 = vpack.c.bf16 %v230_v34, %v229_v33  ;;  %v231_v36 = vld [vmem:[%s4375_s1 + $0xb0] sm:$0xff]  ;;  %v232_v37 = vld [vmem:[%s4375_s1 + $0xb8] sm:$0xff]  ;;  %v233_v39 = vld [vmem:[%s4375_s1 + $0xc0] sm:$0xff] }
   0xa   :  { %v2092_v38 = vpack.c.bf16 %v232_v37, %v231_v36  ;;  %v234_v40 = vld [vmem:[%s4375_s1 + $0xc8] sm:$0xff]  ;;  %v235_v42 = vld [vmem:[%s4375_s1 + $0xd0] sm:$0xff]  ;;  %v236_v43 = vld [vmem:[%s4375_s1 + $0xd8] sm:$0xff] }
   0xb   :  { %v2095_v41 = vpack.c.bf16 %v234_v40, %v233_v39  ;;  %v2098_v44 = vpack.c.bf16 %v236_v43, %v235_v42  ;;  %v237_v45 = vld [vmem:[%s4375_s1 + $0xe0] sm:$0xff]  ;;  %v238_v46 = vld [vmem:[%s4375_s1 + $0xe8] sm:$0xff]  ;;  %v239_v48 = vld [vmem:[%s4375_s1 + $0xf0] sm:$0xff] }
   0xc   :  { %2066 = vmatpush1.bf16.msra.mxu0 %v2065_v9  ;;  %2132 = vmatpush1.bf16.msra.mxu1 %v2065_v9  ;;  %v2101_v47 = vpack.c.bf16 %v238_v46, %v237_v45  ;;  %v240_v49 = vld [vmem:[%s4375_s1 + $0xf8] sm:$0xff]  ;;  %v241_v50 = vld [vmem:[%s4375_s1 + $0x100] sm:$0xff]  ;;  %v242_v51 = vld [vmem:[%s4375_s1 + $0x108] sm:$0xff] }
   0xd   :  { %2067 = vmatprep.subr.bf16.mxu0 %v2149_v0  ;;  %2117 = vmatprep.subr.bf16.mxu1 %v2149_v0  ;;  %v2104_v52 = vpack.c.bf16 %v240_v49, %v239_v48  ;;  %v2106_v53 = vpack.c.bf16 %v242_v51, %v241_v50  ;;  %v243_v54 = vld [vmem:[%s4375_s1 + $0x110] sm:$0xff]  ;;  %v244_v55 = vld [vmem:[%s4375_s1 + $0x118] sm:$0xff]  ;;  %v17_v56 = vld [vmem:[%s4376_s0] sm:$0xff] }
   0xe   :  { %v161_v57 = vld [vmem:[%s4376_s0 + $0x480] sm:$0xff]  ;;  %v2110_v60 = vpack.c.bf16 %v244_v55, %v243_v54  ;;  %v20_v61 = vld [vmem:[%s4376_s0 + $0x18] sm:$0xff]  ;;  %v23_v1 = vld [vmem:[%s4376_s0 + $0x30] sm:$0xff] }
   0xf   :  { %v21_v58 = vld [vmem:[%s4376_s0 + $0x20] sm:$0xff]  ;;  %v164_v62 = vld [vmem:[%s4376_s0 + $0x498] sm:$0xff]  ;;  %v167_v2 = vld [vmem:[%s4376_s0 + $0x4b0] sm:$0xff] }
  0x10   :  { %2069 = vmatpush1.bf16.msra.mxu0 %v2068_v13  ;;  %2133 = vmatpush1.bf16.msra.mxu1 %v2068_v13  ;;  %v165_v59 = vld [vmem:[%s4376_s0 + $0x4a0] sm:$0xff]  ;;  %v24_v63 = vld [vmem:[%s4376_s0 + $0x38] sm:$0xff]  ;;  %v27_v3 = vld [vmem:[%s4376_s0 + $0x50] sm:$0xff] }
  0x11   :  { %2070 = vmatprep.subr.bf16.mxu0 %v2149_v0  ;;  %2118 = vmatprep.subr.bf16.mxu1 %v2149_v0  ;;  %v171_v4 = vld [vmem:[%s4376_s0 + $0x4d0] sm:$0xff]  ;;  %v26_v5 = vld [vmem:[%s4376_s0 + $0x48] sm:$0xff]  ;;  %v29_v9 = vld [vmem:[%s4376_s0 + $0x60] sm:$0xff] }
  0x12   :  { %v170_v6 = vld [vmem:[%s4376_s0 + $0x4c8] sm:$0xff]  ;;  %v173_v10 = vld [vmem:[%s4376_s0 + $0x4e0] sm:$0xff]  ;;  %v32_v13 = vld [vmem:[%s4376_s0 + $0x78] sm:$0xff] }
  0x13   :  { %v30_v7 = vld [vmem:[%s4376_s0 + $0x68] sm:$0xff]  ;;  %v33_v11 = vld [vmem:[%s4376_s0 + $0x80] sm:$0xff]  ;;  %v176_v14 = vld [vmem:[%s4376_s0 + $0x4f8] sm:$0xff] }
  0x14   :  { %2072 = vmatpush1.bf16.msra.mxu0 %v2071_v17  ;;  %2134 = vmatpush1.bf16.msra.mxu1 %v2071_v17  ;;  %v174_v8 = vld [vmem:[%s4376_s0 + $0x4e8] sm:$0xff]  ;;  %v177_v12 = vld [vmem:[%s4376_s0 + $0x500] sm:$0xff]  ;;  %v36_v15 = vld [vmem:[%s4376_s0 + $0x98] sm:$0xff] }
  0x15   :  { %2073 = vmatprep.subr.bf16.mxu0 %v2149_v0  ;;  %2119 = vmatprep.subr.bf16.mxu1 %v2149_v0  ;;  %v180_v16 = vld [vmem:[%s4376_s0 + $0x518] sm:$0xff]  ;;  %v35_v17 = vld [vmem:[%s4376_s0 + $0x90] sm:$0xff]  ;;  %v38_v21 = vld [vmem:[%s4376_s0 + $0xa8] sm:$0xff] }
  0x16   :  { %v179_v18 = vld [vmem:[%s4376_s0 + $0x510] sm:$0xff]  ;;  %v182_v22 = vld [vmem:[%s4376_s0 + $0x528] sm:$0xff]  ;;  %v41_v25 = vld [vmem:[%s4376_s0 + $0xc0] sm:$0xff] }
  0x17   :  { %v39_v19 = vld [vmem:[%s4376_s0 + $0xb0] sm:$0xff]  ;;  %v186_v24 = vld [vmem:[%s4376_s0 + $0x548] sm:$0xff]  ;;  %v45_v27 = vld [vmem:[%s4376_s0 + $0xe0] sm:$0xff] }
  0x18   :  { %2075 = vmatpush1.bf16.msra.mxu0 %v2074_v20  ;;  %2135 = vmatpush1.bf16.msra.mxu1 %v2074_v20  ;;  %v183_v20 = vld [vmem:[%s4376_s0 + $0x530] sm:$0xff]  ;;  %v189_v28 = vld [vmem:[%s4376_s0 + $0x560] sm:$0xff]  ;;  %v188_v30 = vld [vmem:[%s4376_s0 + $0x558] sm:$0xff] }
  0x19   :  { %2076 = vmatprep.subr.bf16.mxu0 %v2149_v0  ;;  %2120 = vmatprep.subr.bf16.mxu1 %v2149_v0  ;;  %v48_v31 = vld [vmem:[%s4376_s0 + $0xf8] sm:$0xff]  ;;  %v47_v33 = vld [vmem:[%s4376_s0 + $0xf0] sm:$0xff]  ;;  %v50_v37 = vld [vmem:[%s4376_s0 + $0x108] sm:$0xff] }
  0x1a   :  { %v191_v34 = vld [vmem:[%s4376_s0 + $0x570] sm:$0xff]  ;;  %v54_v39 = vld [vmem:[%s4376_s0 + $0x128] sm:$0xff]  ;;  %v197_v42 = vld [vmem:[%s4376_s0 + $0x5a0] sm:$0xff] }
  0x1b   :  { %v195_v36 = vld [vmem:[%s4376_s0 + $0x590] sm:$0xff]  ;;  %v198_v40 = vld [vmem:[%s4376_s0 + $0x5a8] sm:$0xff]  ;;  %v57_v43 = vld [vmem:[%s4376_s0 + $0x140] sm:$0xff] }
  0x1c   :  { %2078 = vmatpush1.bf16.msra.mxu0 %v2077_v23  ;;  %2136 = vmatpush1.bf16.msra.mxu1 %v2077_v23  ;;  %v42_v23 = vld [vmem:[%s4376_s0 + $0xc8] sm:$0xff]  ;;  %v56_v45 = vld [vmem:[%s4376_s0 + $0x138] sm:$0xff]  ;;  %v59_v49 = vld [vmem:[%s4376_s0 + $0x150] sm:$0xff] }
  0x1d   :  { %2079 = vmatprep.subr.bf16.mxu0 %v2149_v0  ;;  %2121 = vmatprep.subr.bf16.mxu1 %v2149_v0  ;;  %v200_v46 = vld [vmem:[%s4376_s0 + $0x5b8] sm:$0xff]  ;;  %v203_v50 = vld [vmem:[%s4376_s0 + $0x5d0] sm:$0xff]  ;;  %v206_v54 = vld [vmem:[%s4376_s0 + $0x5e8] sm:$0xff] }
  0x1e   :  { %v204_v48 = vld [vmem:[%s4376_s0 + $0x5d8] sm:$0xff]  ;;  %v63_v51 = vld [vmem:[%s4376_s0 + $0x170] sm:$0xff]  ;;  %v66_v55 = vld [vmem:[%s4376_s0 + $0x188] sm:$0xff] }
  0x20   :  { %2081 = vmatpush1.bf16.msra.mxu0 %v2080_v26  ;;  %2137 = vmatpush1.bf16.msra.mxu1 %v2080_v26  ;;  %v185_v26 = vld [vmem:[%s4376_s0 + $0x540] sm:$0xff] }
  0x21   :  { %2082 = vmatprep.subr.bf16.mxu0 %v2149_v0  ;;  %2122 = vmatprep.subr.bf16.mxu1 %v2149_v0 }
  0x24   :  { %2084 = vmatpush1.bf16.msra.mxu0 %v2083_v29  ;;  %2138 = vmatpush1.bf16.msra.mxu1 %v2083_v29  ;;  %v44_v29 = vld [vmem:[%s4376_s0 + $0xd8] sm:$0xff] }
  0x25   :  { %2085 = vmatprep.subr.bf16.mxu0 %v2149_v0  ;;  %2123 = vmatprep.subr.bf16.mxu1 %v2149_v0 }
  0x28   :  { %2087 = vmatpush1.bf16.msra.mxu0 %v2086_v32  ;;  %2139 = vmatpush1.bf16.msra.mxu1 %v2086_v32  ;;  %v192_v32 = vld [vmem:[%s4376_s0 + $0x578] sm:$0xff] }
  0x29   :  { %2088 = vmatprep.subr.bf16.mxu0 %v2149_v0  ;;  %2124 = vmatprep.subr.bf16.mxu1 %v2149_v0 }
  0x2c   :  { %2090 = vmatpush1.bf16.msra.mxu0 %v2089_v35  ;;  %2140 = vmatpush1.bf16.msra.mxu1 %v2089_v35  ;;  %v51_v35 = vld [vmem:[%s4376_s0 + $0x110] sm:$0xff] }
  0x2d   :  { %2091 = vmatprep.subr.bf16.mxu0 %v2149_v0  ;;  %2125 = vmatprep.subr.bf16.mxu1 %v2149_v0 }
  0x30   :  { %2093 = vmatpush1.bf16.msra.mxu0 %v2092_v38  ;;  %2141 = vmatpush1.bf16.msra.mxu1 %v2092_v38  ;;  %v194_v38 = vld [vmem:[%s4376_s0 + $0x588] sm:$0xff] }
  0x31   :  { %2094 = vmatprep.subr.bf16.mxu0 %v2149_v0  ;;  %2126 = vmatprep.subr.bf16.mxu1 %v2149_v0 }
  0x34   :  { %2096 = vmatpush1.bf16.msra.mxu0 %v2095_v41  ;;  %2142 = vmatpush1.bf16.msra.mxu1 %v2095_v41  ;;  %v53_v41 = vld [vmem:[%s4376_s0 + $0x120] sm:$0xff] }
  0x35   :  { %2097 = vmatprep.subr.bf16.mxu0 %v2149_v0  ;;  %2127 = vmatprep.subr.bf16.mxu1 %v2149_v0 }
  0x38   :  { %2099 = vmatpush1.bf16.msra.mxu0 %v2098_v44  ;;  %2143 = vmatpush1.bf16.msra.mxu1 %v2098_v44  ;;  %v201_v44 = vld [vmem:[%s4376_s0 + $0x5c0] sm:$0xff] }
  0x39   :  { %2100 = vmatprep.subr.bf16.mxu0 %v2149_v0  ;;  %2128 = vmatprep.subr.bf16.mxu1 %v2149_v0 }
  0x3c   :  { %2102 = vmatpush1.bf16.msra.mxu0 %v2101_v47  ;;  %2144 = vmatpush1.bf16.msra.mxu1 %v2101_v47  ;;  %v60_v47 = vld [vmem:[%s4376_s0 + $0x158] sm:$0xff] }
  0x3d   :  { %2103 = vmatprep.subr.bf16.mxu0 %v2149_v0  ;;  %2129 = vmatprep.subr.bf16.mxu1 %v2149_v0  ;;  %v168_v0 = vld [vmem:[%s4376_s0 + $0x4b8] sm:$0xff] }
  0x40   :  { %2105 = vmatpush1.bf16.msra.mxu0 %v2104_v52  ;;  %2145 = vmatpush1.bf16.msra.mxu1 %v2104_v52  ;;  %v207_v52 = vld [vmem:[%s4376_s0 + $0x5f0] sm:$0xff] }
  0x41   :  { %2107 = vmatprep.subr.bf16.mxu1 %v2106_v53 }
  0x43   :  { %503 = vmatmul.mubr.f32.vlgmr.msra.gmra.mrb[0].mxu0 %v17_v56  ;;  %743 = vmatmul.mubr.f32.vlgmr.msra.gmra.mrb[0].mxu1 %v161_v57  ;;  %v19_v56 = vld [vmem:[%s4376_s0 + $0x10] sm:$0xff]  ;;  %v65_v57 = vld [vmem:[%s4376_s0 + $0x180] sm:$0xff] }
  0x44   :  { %507 = vmatprep.mubr.f32.mxu0 %v21_v58  ;;  %747 = vmatprep.mubr.f32.mxu1 %v165_v59  ;;  %v22_v58 = vld [vmem:[%s4376_s0 + $0x28] sm:$0xff]  ;;  %v69_v59 = vld [vmem:[%s4376_s0 + $0x1a0] sm:$0xff] }
  0x45   :  { %2109 = vmatpush3.bf16.msra.mxu1 %v2106_v53  ;;  %v62_v53 = vld [vmem:[%s4376_s0 + $0x168] sm:$0xff] }
  0x46   :  { %2111 = vmatprep.subr.bf16.mxu1 %v2110_v60 }
  0x47   :  { %508 = vmatmul.mubr.f32.gmra.mrb[2].mxu0 %v20_v61  ;;  %748 = vmatmul.mubr.f32.gmra.mrb[2].mxu1 %v164_v62  ;;  %v68_v61 = vld [vmem:[%s4376_s0 + $0x198] sm:$0xff] }
  0x48   :  { %512 = vmatprep.mubr.f32.mxu0 %v24_v63  ;;  %752 = vmatprep.mubr.f32.mxu1 %v168_v0  ;;  %v28_v62 = vld [vmem:[%s4376_s0 + $0x58] sm:$0xff]  ;;  %v31_v0 = vld [vmem:[%s4376_s0 + $0x70] sm:$0xff] }
  0x49   :  { %2113 = vmatpush3.bf16.msra.mxu1 %v2110_v60  ;;  %v25_v60 = vld [vmem:[%s4376_s0 + $0x40] sm:$0xff]  ;;  %v72_v63 = vld [vmem:[%s4376_s0 + $0x1b8] sm:$0xff] }
  0x4b   :  { %513 = vmatmul.mubr.f32.gmra.mrb[4].mxu0 %v23_v1  ;;  %753 = vmatmul.mubr.f32.gmra.mrb[4].mxu1 %v167_v2  ;;  %v71_v1 = vld [vmem:[%s4376_s0 + $0x1b0] sm:$0xff]  ;;  %v34_v2 = vld [vmem:[%s4376_s0 + $0x88] sm:$0xff] }
  0x4c   :  { %517 = vmatprep.mubr.f32.mxu0 %v27_v3  ;;  %757 = vmatprep.mubr.f32.mxu1 %v171_v4  ;;  %v75_v3 = vld [vmem:[%s4376_s0 + $0x1d0] sm:$0xff]  ;;  %v37_v4 = vld [vmem:[%s4376_s0 + $0xa0] sm:$0xff] }
  0x4f   :  { %518 = vmatmul.mubr.f32.gmra.mrb[6].mxu0 %v26_v5  ;;  %758 = vmatmul.mubr.f32.gmra.mrb[6].mxu1 %v170_v6  ;;  %v74_v5 = vld [vmem:[%s4376_s0 + $0x1c8] sm:$0xff]  ;;  %v40_v6 = vld [vmem:[%s4376_s0 + $0xb8] sm:$0xff] }
  0x50   :  { %522 = vmatprep.mubr.f32.mxu0 %v30_v7  ;;  %762 = vmatprep.mubr.f32.mxu1 %v174_v8  ;;  %v78_v7 = vld [vmem:[%s4376_s0 + $0x1e8] sm:$0xff]  ;;  %v43_v8 = vld [vmem:[%s4376_s0 + $0xd0] sm:$0xff] }
  0x53   :  { %523 = vmatmul.mubr.f32.gmra.mrb[8].mxu0 %v29_v9  ;;  %763 = vmatmul.mubr.f32.gmra.mrb[8].mxu1 %v173_v10  ;;  %v77_v9 = vld [vmem:[%s4376_s0 + $0x1e0] sm:$0xff]  ;;  %v46_v10 = vld [vmem:[%s4376_s0 + $0xe8] sm:$0xff] }
  0x54   :  { %527 = vmatprep.mubr.f32.mxu0 %v33_v11  ;;  %767 = vmatprep.mubr.f32.mxu1 %v177_v12  ;;  %v81_v11 = vld [vmem:[%s4376_s0 + $0x200] sm:$0xff] }
  0x55   :  { %v49_v12 = vld [vmem:[%s4376_s0 + $0x100] sm:$0xff] }
  0x57   :  { %528 = vmatmul.mubr.f32.gmra.mrb[10].mxu0 %v32_v13  ;;  %768 = vmatmul.mubr.f32.gmra.mrb[10].mxu1 %v176_v14  ;;  %v80_v13 = vld [vmem:[%s4376_s0 + $0x1f8] sm:$0xff] }
  0x58   :  { %532 = vmatprep.mubr.f32.mxu0 %v36_v15  ;;  %772 = vmatprep.mubr.f32.mxu1 %v180_v16  ;;  %v52_v14 = vld [vmem:[%s4376_s0 + $0x118] sm:$0xff]  ;;  %v55_v16 = vld [vmem:[%s4376_s0 + $0x130] sm:$0xff] }
  0x59   :  { %v84_v15 = vld [vmem:[%s4376_s0 + $0x218] sm:$0xff] }
  0x5b   :  { %533 = vmatmul.mubr.f32.gmra.mrb[12].mxu0 %v35_v17  ;;  %773 = vmatmul.mubr.f32.gmra.mrb[12].mxu1 %v179_v18  ;;  %v83_v17 = vld [vmem:[%s4376_s0 + $0x210] sm:$0xff]  ;;  %v58_v18 = vld [vmem:[%s4376_s0 + $0x148] sm:$0xff] }
  0x5c   :  { %537 = vmatprep.mubr.f32.mxu0 %v39_v19  ;;  %777 = vmatprep.mubr.f32.mxu1 %v183_v20  ;;  %v87_v19 = vld [vmem:[%s4376_s0 + $0x230] sm:$0xff]  ;;  %v61_v20 = vld [vmem:[%s4376_s0 + $0x160] sm:$0xff] }
  0x5f   :  { %538 = vmatmul.mubr.f32.gmra.mrb[14].mxu0 %v38_v21  ;;  %778 = vmatmul.mubr.f32.gmra.mrb[14].mxu1 %v182_v22  ;;  %v86_v21 = vld [vmem:[%s4376_s0 + $0x228] sm:$0xff]  ;;  %v64_v22 = vld [vmem:[%s4376_s0 + $0x178] sm:$0xff] }
  0x60   :  { %542 = vmatprep.mubr.f32.mxu0 %v42_v23  ;;  %782 = vmatprep.mubr.f32.mxu1 %v186_v24  ;;  %v90_v23 = vld [vmem:[%s4376_s0 + $0x248] sm:$0xff]  ;;  %v67_v24 = vld [vmem:[%s4376_s0 + $0x190] sm:$0xff] }
  0x63   :  { %543 = vmatmul.mubr.f32.gmra.mrb[16].mxu0 %v41_v25  ;;  %783 = vmatmul.mubr.f32.gmra.mrb[16].mxu1 %v185_v26  ;;  %v89_v25 = vld [vmem:[%s4376_s0 + $0x240] sm:$0xff]  ;;  %v70_v26 = vld [vmem:[%s4376_s0 + $0x1a8] sm:$0xff] }
  0x64   :  { %547 = vmatprep.mubr.f32.mxu0 %v45_v27  ;;  %787 = vmatprep.mubr.f32.mxu1 %v189_v28  ;;  %v93_v27 = vld [vmem:[%s4376_s0 + $0x260] sm:$0xff] }
  0x65   :  { %v73_v28 = vld [vmem:[%s4376_s0 + $0x1c0] sm:$0xff] }
  0x67   :  { %548 = vmatmul.mubr.f32.gmra.mrb[18].mxu0 %v44_v29  ;;  %788 = vmatmul.mubr.f32.gmra.mrb[18].mxu1 %v188_v30  ;;  %v92_v29 = vld [vmem:[%s4376_s0 + $0x258] sm:$0xff] }
  0x68   :  { %552 = vmatprep.mubr.f32.mxu0 %v48_v31  ;;  %792 = vmatprep.mubr.f32.mxu1 %v192_v32  ;;  %v76_v30 = vld [vmem:[%s4376_s0 + $0x1d8] sm:$0xff]  ;;  %v79_v32 = vld [vmem:[%s4376_s0 + $0x1f0] sm:$0xff] }
  0x69   :  { %v96_v31 = vld [vmem:[%s4376_s0 + $0x278] sm:$0xff] }
  0x6b   :  { %553 = vmatmul.mubr.f32.gmra.mrb[20].mxu0 %v47_v33  ;;  %793 = vmatmul.mubr.f32.gmra.mrb[20].mxu1 %v191_v34  ;;  %v95_v33 = vld [vmem:[%s4376_s0 + $0x270] sm:$0xff]  ;;  %v82_v34 = vld [vmem:[%s4376_s0 + $0x208] sm:$0xff] }
  0x6c   :  { %557 = vmatprep.mubr.f32.mxu0 %v51_v35  ;;  %797 = vmatprep.mubr.f32.mxu1 %v195_v36  ;;  %v99_v35 = vld [vmem:[%s4376_s0 + $0x290] sm:$0xff]  ;;  %v85_v36 = vld [vmem:[%s4376_s0 + $0x220] sm:$0xff] }
  0x6f   :  { %558 = vmatmul.mubr.f32.gmra.mrb[22].mxu0 %v50_v37  ;;  %798 = vmatmul.mubr.f32.gmra.mrb[22].mxu1 %v194_v38  ;;  %v98_v37 = vld [vmem:[%s4376_s0 + $0x288] sm:$0xff]  ;;  %v88_v38 = vld [vmem:[%s4376_s0 + $0x238] sm:$0xff] }
  0x70   :  { %562 = vmatprep.mubr.f32.mxu0 %v54_v39  ;;  %802 = vmatprep.mubr.f32.mxu1 %v198_v40  ;;  %v102_v39 = vld [vmem:[%s4376_s0 + $0x2a8] sm:$0xff]  ;;  %v91_v40 = vld [vmem:[%s4376_s0 + $0x250] sm:$0xff] }
  0x73   :  { %563 = vmatmul.mubr.f32.gmra.mrb[24].mxu0 %v53_v41  ;;  %803 = vmatmul.mubr.f32.gmra.mrb[24].mxu1 %v197_v42  ;;  %v101_v41 = vld [vmem:[%s4376_s0 + $0x2a0] sm:$0xff]  ;;  %v94_v42 = vld [vmem:[%s4376_s0 + $0x268] sm:$0xff] }
  0x74   :  { %567 = vmatprep.mubr.f32.mxu0 %v57_v43  ;;  %807 = vmatprep.mubr.f32.mxu1 %v201_v44  ;;  %v105_v43 = vld [vmem:[%s4376_s0 + $0x2c0] sm:$0xff] }
  0x75   :  { %v97_v44 = vld [vmem:[%s4376_s0 + $0x280] sm:$0xff] }
  0x77   :  { %568 = vmatmul.mubr.f32.gmra.mrb[26].mxu0 %v56_v45  ;;  %808 = vmatmul.mubr.f32.gmra.mrb[26].mxu1 %v200_v46  ;;  %v104_v45 = vld [vmem:[%s4376_s0 + $0x2b8] sm:$0xff] }
  0x78   :  { %572 = vmatprep.mubr.f32.mxu0 %v60_v47  ;;  %812 = vmatprep.mubr.f32.mxu1 %v204_v48  ;;  %v100_v46 = vld [vmem:[%s4376_s0 + $0x298] sm:$0xff]  ;;  %v103_v48 = vld [vmem:[%s4376_s0 + $0x2b0] sm:$0xff] }
  0x79   :  { %v108_v47 = vld [vmem:[%s4376_s0 + $0x2d8] sm:$0xff] }
  0x7b   :  { %573 = vmatmul.mubr.f32.gmra.mrb[28].mxu0 %v59_v49  ;;  %813 = vmatmul.mubr.f32.gmra.mrb[28].mxu1 %v203_v50  ;;  %v107_v49 = vld [vmem:[%s4376_s0 + $0x2d0] sm:$0xff]  ;;  %v106_v50 = vld [vmem:[%s4376_s0 + $0x2c8] sm:$0xff] }
  0x7c   :  { %577 = vmatprep.mubr.f32.mxu0 %v63_v51  ;;  %817 = vmatprep.mubr.f32.mxu1 %v207_v52  ;;  %v111_v51 = vld [vmem:[%s4376_s0 + $0x2f0] sm:$0xff]  ;;  %v109_v52 = vld [vmem:[%s4376_s0 + $0x2e0] sm:$0xff] }
  0x7f   :  { %578 = vmatmul.mubr.f32.gmra.mrb[30].mxu0 %v62_v53  ;;  %818 = vmatmul.mubr.f32.gmra.mrb[30].mxu1 %v206_v54  ;;  %v110_v53 = vld [vmem:[%s4376_s0 + $0x2e8] sm:$0xff]  ;;  %v112_v54 = vld [vmem:[%s4376_s0 + $0x2f8] sm:$0xff] }
  0x80   :  { %582 = vmatprep.mubr.f32.mxu0 %v66_v55  ;;  %1962 = vmatprep.mubr.msk.f32.mxu1 %vm245_vm0, %v19_v56  ;;  %v114_v55 = vld [vmem:[%s4376_s0 + $0x308] sm:$0xff]  ;;  %v115_v56 = vld [vmem:[%s4376_s0 + $0x310] sm:$0xff] }
  0x83   :  { %583 = vmatmul.mubr.f32.gmra.mrb[32].mxu0 %v65_v57  ;;  %1963 = vmatmul.mubr.msk.f32.vlgmr.msra.gmra.mrb[32].mxu1 %vm245_vm0, %v22_v58  ;;  %v113_v57 = vld [vmem:[%s4376_s0 + $0x300] sm:$0xff]  ;;  %v118_v58 = vld [vmem:[%s4376_s0 + $0x328] sm:$0xff] }
  0x84   :  { %587 = vmatprep.mubr.f32.mxu0 %v69_v59  ;;  %1965 = vmatprep.mubr.msk.f32.mxu1 %vm245_vm0, %v25_v60  ;;  %v117_v59 = vld [vmem:[%s4376_s0 + $0x320] sm:$0xff] }
  0x85   :  { %v121_v60 = vld [vmem:[%s4376_s0 + $0x340] sm:$0xff] }
  0x87   :  { %588 = vmatmul.mubr.f32.gmra.mrb[34].mxu0 %v68_v61  ;;  %1966 = vmatmul.mubr.msk.f32.gmra.mrb[34].mxu1 %vm245_vm0, %v28_v62  ;;  %v116_v61 = vld [vmem:[%s4376_s0 + $0x318] sm:$0xff] }
  0x88   :  { %592 = vmatprep.mubr.f32.mxu0 %v72_v63  ;;  %1968 = vmatprep.mubr.msk.f32.mxu1 %vm245_vm0, %v31_v0  ;;  %v124_v62 = vld [vmem:[%s4376_s0 + $0x358] sm:$0xff]  ;;  %v127_v0 = vld [vmem:[%s4376_s0 + $0x370] sm:$0xff] }
  0x89   :  { %v120_v63 = vld [vmem:[%s4376_s0 + $0x338] sm:$0xff] }
  0x8b   :  { %593 = vmatmul.mubr.f32.gmra.mrb[36].mxu0 %v71_v1  ;;  %1969 = vmatmul.mubr.msk.f32.gmra.mrb[36].mxu1 %vm245_vm0, %v34_v2  ;;  %v119_v1 = vld [vmem:[%s4376_s0 + $0x330] sm:$0xff]  ;;  %v130_v2 = vld [vmem:[%s4376_s0 + $0x388] sm:$0xff] }
  0x8c   :  { %597 = vmatprep.mubr.f32.mxu0 %v75_v3  ;;  %1971 = vmatprep.mubr.msk.f32.mxu1 %vm245_vm0, %v37_v4  ;;  %v123_v3 = vld [vmem:[%s4376_s0 + $0x350] sm:$0xff]  ;;  %v133_v4 = vld [vmem:[%s4376_s0 + $0x3a0] sm:$0xff] }
  0x8f   :  { %598 = vmatmul.mubr.f32.gmra.mrb[38].mxu0 %v74_v5  ;;  %1972 = vmatmul.mubr.msk.f32.gmra.mrb[38].mxu1 %vm245_vm0, %v40_v6  ;;  %v122_v5 = vld [vmem:[%s4376_s0 + $0x348] sm:$0xff]  ;;  %v136_v6 = vld [vmem:[%s4376_s0 + $0x3b8] sm:$0xff] }
  0x90   :  { %602 = vmatprep.mubr.f32.mxu0 %v78_v7  ;;  %1974 = vmatprep.mubr.msk.f32.mxu1 %vm245_vm0, %v43_v8  ;;  %v126_v7 = vld [vmem:[%s4376_s0 + $0x368] sm:$0xff]  ;;  %v139_v8 = vld [vmem:[%s4376_s0 + $0x3d0] sm:$0xff] }
  0x93   :  { %603 = vmatmul.mubr.f32.gmra.mrb[40].mxu0 %v77_v9  ;;  %1975 = vmatmul.mubr.msk.f32.gmra.mrb[40].mxu1 %vm245_vm0, %v46_v10  ;;  %v125_v9 = vld [vmem:[%s4376_s0 + $0x360] sm:$0xff]  ;;  %v142_v10 = vld [vmem:[%s4376_s0 + $0x3e8] sm:$0xff] }
  0x94   :  { %607 = vmatprep.mubr.f32.mxu0 %v81_v11  ;;  %1977 = vmatprep.mubr.msk.f32.mxu1 %vm245_vm0, %v49_v12  ;;  %v129_v11 = vld [vmem:[%s4376_s0 + $0x380] sm:$0xff] }
  0x95   :  { %v145_v12 = vld [vmem:[%s4376_s0 + $0x400] sm:$0xff] }
  0x97   :  { %608 = vmatmul.mubr.f32.gmra.mrb[42].mxu0 %v80_v13  ;;  %1978 = vmatmul.mubr.msk.f32.gmra.mrb[42].mxu1 %vm245_vm0, %v52_v14  ;;  %v128_v13 = vld [vmem:[%s4376_s0 + $0x378] sm:$0xff] }
  0x98   :  { %612 = vmatprep.mubr.f32.mxu0 %v84_v15  ;;  %1980 = vmatprep.mubr.msk.f32.mxu1 %vm245_vm0, %v55_v16  ;;  %v148_v14 = vld [vmem:[%s4376_s0 + $0x418] sm:$0xff]  ;;  %v151_v16 = vld [vmem:[%s4376_s0 + $0x430] sm:$0xff] }
  0x99   :  { %v132_v15 = vld [vmem:[%s4376_s0 + $0x398] sm:$0xff] }
  0x9b   :  { %613 = vmatmul.mubr.f32.gmra.mrb[44].mxu0 %v83_v17  ;;  %1981 = vmatmul.mubr.msk.f32.gmra.mrb[44].mxu1 %vm245_vm0, %v58_v18  ;;  %v131_v17 = vld [vmem:[%s4376_s0 + $0x390] sm:$0xff]  ;;  %v154_v18 = vld [vmem:[%s4376_s0 + $0x448] sm:$0xff] }
  0x9c   :  { %617 = vmatprep.mubr.f32.mxu0 %v87_v19  ;;  %1983 = vmatprep.mubr.msk.f32.mxu1 %vm245_vm0, %v61_v20  ;;  %v135_v19 = vld [vmem:[%s4376_s0 + $0x3b0] sm:$0xff]  ;;  %v157_v20 = vld [vmem:[%s4376_s0 + $0x460] sm:$0xff] }
  0x9f   :  { %618 = vmatmul.mubr.f32.gmra.mrb[46].mxu0 %v86_v21  ;;  %1984 = vmatmul.mubr.msk.f32.gmra.mrb[46].mxu1 %vm245_vm0, %v64_v22  ;;  %v134_v21 = vld [vmem:[%s4376_s0 + $0x3a8] sm:$0xff]  ;;  %v160_v22 = vld [vmem:[%s4376_s0 + $0x478] sm:$0xff] }
  0xa0   :  { %622 = vmatprep.mubr.f32.mxu0 %v90_v23  ;;  %1986 = vmatprep.mubr.msk.f32.mxu1 %vm245_vm0, %v67_v24  ;;  %v138_v23 = vld [vmem:[%s4376_s0 + $0x3c8] sm:$0xff]  ;;  %v163_v24 = vld [vmem:[%s4376_s0 + $0x490] sm:$0xff] }
  0xa3   :  { %623 = vmatmul.mubr.f32.gmra.mrb[48].mxu0 %v89_v25  ;;  %1987 = vmatmul.mubr.msk.f32.gmra.mrb[48].mxu1 %vm245_vm0, %v70_v26  ;;  %v137_v25 = vld [vmem:[%s4376_s0 + $0x3c0] sm:$0xff]  ;;  %v166_v26 = vld [vmem:[%s4376_s0 + $0x4a8] sm:$0xff] }
  0xa4   :  { %627 = vmatprep.mubr.f32.mxu0 %v93_v27  ;;  %1989 = vmatprep.mubr.msk.f32.mxu1 %vm245_vm0, %v73_v28  ;;  %v141_v27 = vld [vmem:[%s4376_s0 + $0x3e0] sm:$0xff] }
  0xa5   :  { %v169_v28 = vld [vmem:[%s4376_s0 + $0x4c0] sm:$0xff] }
  0xa7   :  { %628 = vmatmul.mubr.f32.gmra.mrb[50].mxu0 %v92_v29  ;;  %1990 = vmatmul.mubr.msk.f32.gmra.mrb[50].mxu1 %vm245_vm0, %v76_v30  ;;  %v140_v29 = vld [vmem:[%s4376_s0 + $0x3d8] sm:$0xff] }
  0xa8   :  { %632 = vmatprep.mubr.f32.mxu0 %v96_v31  ;;  %1992 = vmatprep.mubr.msk.f32.mxu1 %vm245_vm0, %v79_v32  ;;  %v172_v30 = vld [vmem:[%s4376_s0 + $0x4d8] sm:$0xff]  ;;  %v175_v32 = vld [vmem:[%s4376_s0 + $0x4f0] sm:$0xff] }
  0xa9   :  { %v144_v31 = vld [vmem:[%s4376_s0 + $0x3f8] sm:$0xff] }
  0xab   :  { %633 = vmatmul.mubr.f32.gmra.mrb[52].mxu0 %v95_v33  ;;  %1993 = vmatmul.mubr.msk.f32.gmra.mrb[52].mxu1 %vm245_vm0, %v82_v34  ;;  %v143_v33 = vld [vmem:[%s4376_s0 + $0x3f0] sm:$0xff]  ;;  %v178_v34 = vld [vmem:[%s4376_s0 + $0x508] sm:$0xff] }
  0xac   :  { %637 = vmatprep.mubr.f32.mxu0 %v99_v35  ;;  %1995 = vmatprep.mubr.msk.f32.mxu1 %vm245_vm0, %v85_v36  ;;  %v147_v35 = vld [vmem:[%s4376_s0 + $0x410] sm:$0xff]  ;;  %v181_v36 = vld [vmem:[%s4376_s0 + $0x520] sm:$0xff] }
  0xaf   :  { %638 = vmatmul.mubr.f32.gmra.mrb[54].mxu0 %v98_v37  ;;  %1996 = vmatmul.mubr.msk.f32.gmra.mrb[54].mxu1 %vm245_vm0, %v88_v38  ;;  %v146_v37 = vld [vmem:[%s4376_s0 + $0x408] sm:$0xff]  ;;  %v184_v38 = vld [vmem:[%s4376_s0 + $0x538] sm:$0xff] }
  0xb0   :  { %642 = vmatprep.mubr.f32.mxu0 %v102_v39  ;;  %1998 = vmatprep.mubr.msk.f32.mxu1 %vm245_vm0, %v91_v40  ;;  %v150_v39 = vld [vmem:[%s4376_s0 + $0x428] sm:$0xff]  ;;  %v187_v40 = vld [vmem:[%s4376_s0 + $0x550] sm:$0xff] }
  0xb3   :  { %643 = vmatmul.mubr.f32.gmra.mrb[56].mxu0 %v101_v41  ;;  %1999 = vmatmul.mubr.msk.f32.gmra.mrb[56].mxu1 %vm245_vm0, %v94_v42  ;;  %v149_v41 = vld [vmem:[%s4376_s0 + $0x420] sm:$0xff]  ;;  %v190_v42 = vld [vmem:[%s4376_s0 + $0x568] sm:$0xff] }
  0xb4   :  { %647 = vmatprep.mubr.f32.mxu0 %v105_v43  ;;  %2001 = vmatprep.mubr.msk.f32.mxu1 %vm245_vm0, %v97_v44  ;;  %v153_v43 = vld [vmem:[%s4376_s0 + $0x440] sm:$0xff] }
  0xb5   :  { %v193_v44 = vld [vmem:[%s4376_s0 + $0x580] sm:$0xff] }
  0xb7   :  { %648 = vmatmul.mubr.f32.gmra.mrb[58].mxu0 %v104_v45  ;;  %2002 = vmatmul.mubr.msk.f32.gmra.mrb[58].mxu1 %vm245_vm0, %v100_v46  ;;  %v152_v45 = vld [vmem:[%s4376_s0 + $0x438] sm:$0xff] }
  0xb8   :  { %652 = vmatprep.mubr.f32.mxu0 %v108_v47  ;;  %2004 = vmatprep.mubr.msk.f32.mxu1 %vm245_vm0, %v103_v48  ;;  %v196_v46 = vld [vmem:[%s4376_s0 + $0x598] sm:$0xff]  ;;  %v199_v48 = vld [vmem:[%s4376_s0 + $0x5b0] sm:$0xff] }
  0xb9   :  { %v156_v47 = vld [vmem:[%s4376_s0 + $0x458] sm:$0xff] }
  0xbb   :  { %653 = vmatmul.mubr.f32.gmra.mrb[60].mxu0 %v107_v49  ;;  %2005 = vmatmul.mubr.msk.f32.gmra.mrb[60].mxu1 %vm245_vm0, %v106_v50  ;;  %v155_v49 = vld [vmem:[%s4376_s0 + $0x450] sm:$0xff]  ;;  %v202_v50 = vld [vmem:[%s4376_s0 + $0x5c8] sm:$0xff] }
  0xbc   :  { %657 = vmatprep.mubr.f32.mxu0 %v111_v51  ;;  %2007 = vmatprep.mubr.msk.f32.mxu1 %vm245_vm0, %v109_v52  ;;  %v159_v51 = vld [vmem:[%s4376_s0 + $0x470] sm:$0xff]  ;;  %v205_v52 = vld [vmem:[%s4376_s0 + $0x5e0] sm:$0xff] }
  0xbf   :  { %658 = vmatmul.mubr.f32.gmra.mrb[62].mxu0 %v110_v53  ;;  %2008 = vmatmul.mubr.msk.f32.gmra.mrb[62].mxu1 %vm245_vm0, %v112_v54  ;;  %v158_v53 = vld [vmem:[%s4376_s0 + $0x468] sm:$0xff]  ;;  %v208_v54 = vld [vmem:[%s4376_s0 + $0x5f8] sm:$0xff] }
  0xc0   :  { %662 = vmatprep.mubr.f32.mxu0 %v114_v55  ;;  %2010 = vmatprep.mubr.msk.f32.mxu1 %vm245_vm0, %v115_v56 }
  0xc3   :  { %663 = vmatmul.mubr.f32.gmra.mrb[64].mxu0 %v113_v57  ;;  %2011 = vmatmul.mubr.msk.f32.gmra.mrb[64].mxu1 %vm245_vm0, %v118_v58 }
  0xc4   :  { %667 = vmatprep.mubr.f32.mxu0 %v117_v59  ;;  %2013 = vmatprep.mubr.msk.f32.mxu1 %vm245_vm0, %v121_v60 }
  0xc7   :  { %668 = vmatmul.mubr.f32.gmra.mrb[66].mxu0 %v116_v61  ;;  %2014 = vmatmul.mubr.msk.f32.gmra.mrb[66].mxu1 %vm245_vm0, %v124_v62 }
  0xc8   :  { %672 = vmatprep.mubr.f32.mxu0 %v120_v63  ;;  %2016 = vmatprep.mubr.msk.f32.mxu1 %vm245_vm0, %v127_v0 }
  0xcb   :  { %673 = vmatmul.mubr.f32.gmra.mrb[68].mxu0 %v119_v1  ;;  %2017 = vmatmul.mubr.msk.f32.gmra.mrb[68].mxu1 %vm245_vm0, %v130_v2 }
  0xcc   :  { %677 = vmatprep.mubr.f32.mxu0 %v123_v3  ;;  %2019 = vmatprep.mubr.msk.f32.mxu1 %vm245_vm0, %v133_v4 }
  0xcf   :  { %678 = vmatmul.mubr.f32.gmra.mrb[70].mxu0 %v122_v5  ;;  %2020 = vmatmul.mubr.msk.f32.gmra.mrb[70].mxu1 %vm245_vm0, %v136_v6 }
  0xd0   :  { %682 = vmatprep.mubr.f32.mxu0 %v126_v7  ;;  %2022 = vmatprep.mubr.msk.f32.mxu1 %vm245_vm0, %v139_v8 }
  0xd3   :  { %683 = vmatmul.mubr.f32.gmra.mrb[72].mxu0 %v125_v9  ;;  %2023 = vmatmul.mubr.msk.f32.gmra.mrb[72].mxu1 %vm245_vm0, %v142_v10 }
  0xd4   :  { %687 = vmatprep.mubr.f32.mxu0 %v129_v11  ;;  %2025 = vmatprep.mubr.msk.f32.mxu1 %vm245_vm0, %v145_v12 }
  0xd7   :  { %688 = vmatmul.mubr.f32.gmra.mrb[74].mxu0 %v128_v13  ;;  %2026 = vmatmul.mubr.msk.f32.gmra.mrb[74].mxu1 %vm245_vm0, %v148_v14 }
  0xd8   :  { %692 = vmatprep.mubr.f32.mxu0 %v132_v15  ;;  %2028 = vmatprep.mubr.msk.f32.mxu1 %vm245_vm0, %v151_v16 }
  0xdb   :  { %693 = vmatmul.mubr.f32.gmra.mrb[76].mxu0 %v131_v17  ;;  %2029 = vmatmul.mubr.msk.f32.gmra.mrb[76].mxu1 %vm245_vm0, %v154_v18 }
  0xdc   :  { %697 = vmatprep.mubr.f32.mxu0 %v135_v19  ;;  %2031 = vmatprep.mubr.msk.f32.mxu1 %vm245_vm0, %v157_v20 }
  0xdf   :  { %698 = vmatmul.mubr.f32.gmra.mrb[78].mxu0 %v134_v21  ;;  %2032 = vmatmul.mubr.msk.f32.gmra.mrb[78].mxu1 %vm245_vm0, %v160_v22 }
  0xe0   :  { %702 = vmatprep.mubr.f32.mxu0 %v138_v23  ;;  %2034 = vmatprep.mubr.msk.f32.mxu1 %vm245_vm0, %v163_v24 }
  0xe3   :  { %703 = vmatmul.mubr.f32.gmra.mrb[80].mxu0 %v137_v25  ;;  %2035 = vmatmul.mubr.msk.f32.gmra.mrb[80].mxu1 %vm245_vm0, %v166_v26 }
  0xe4   :  { %707 = vmatprep.mubr.f32.mxu0 %v141_v27  ;;  %2037 = vmatprep.mubr.msk.f32.mxu1 %vm245_vm0, %v169_v28 }
  0xe7   :  { %708 = vmatmul.mubr.f32.gmra.mrb[82].mxu0 %v140_v29  ;;  %2038 = vmatmul.mubr.msk.f32.gmra.mrb[82].mxu1 %vm245_vm0, %v172_v30 }
  0xe8   :  { %712 = vmatprep.mubr.f32.mxu0 %v144_v31  ;;  %2040 = vmatprep.mubr.msk.f32.mxu1 %vm245_vm0, %v175_v32 }
  0xeb   :  { %713 = vmatmul.mubr.f32.gmra.mrb[84].mxu0 %v143_v33  ;;  %2041 = vmatmul.mubr.msk.f32.gmra.mrb[84].mxu1 %vm245_vm0, %v178_v34 }
  0xec   :  { %717 = vmatprep.mubr.f32.mxu0 %v147_v35  ;;  %2043 = vmatprep.mubr.msk.f32.mxu1 %vm245_vm0, %v181_v36 }
  0xef   :  { %718 = vmatmul.mubr.f32.gmra.mrb[86].mxu0 %v146_v37  ;;  %2044 = vmatmul.mubr.msk.f32.gmra.mrb[86].mxu1 %vm245_vm0, %v184_v38 }
  0xf0   :  { %722 = vmatprep.mubr.f32.mxu0 %v150_v39  ;;  %2046 = vmatprep.mubr.msk.f32.mxu1 %vm245_vm0, %v187_v40 }
  0xf3   :  { %723 = vmatmul.mubr.f32.gmra.mrb[88].mxu0 %v149_v41  ;;  %2047 = vmatmul.mubr.msk.f32.gmra.mrb[88].mxu1 %vm245_vm0, %v190_v42 }
  0xf4   :  { %727 = vmatprep.mubr.f32.mxu0 %v153_v43  ;;  %2049 = vmatprep.mubr.msk.f32.mxu1 %vm245_vm0, %v193_v44 }
  0xf7   :  { %728 = vmatmul.mubr.f32.gmra.mrb[90].mxu0 %v152_v45  ;;  %2050 = vmatmul.mubr.msk.f32.gmra.mrb[90].mxu1 %vm245_vm0, %v196_v46 }
  0xf8   :  { %732 = vmatprep.mubr.f32.mxu0 %v156_v47  ;;  %2052 = vmatprep.mubr.msk.f32.mxu1 %vm245_vm0, %v199_v48 }
  0xfb   :  { %733 = vmatmul.mubr.f32.gmra.mrb[92].mxu0 %v155_v49  ;;  %2053 = vmatmul.mubr.msk.f32.gmra.mrb[92].mxu1 %vm245_vm0, %v202_v50 }
  0xfc   :  { %737 = vmatprep.mubr.f32.mxu0 %v159_v51  ;;  %2055 = vmatprep.mubr.msk.f32.mxu1 %vm245_vm0, %v205_v52 }
  0xff   :  { %738 = vmatmul.mubr.f32.gmra.mrb[94].mxu0 %v158_v53  ;;  %2056 = vmatmul.mubr.msk.f32.gmra.mrb[94].mxu1 %vm245_vm0, %v208_v54 }
 0x116   :  { %v2955_v55 = vpop.f32.mrb[0].mxu0  ;;  %v2957_v56 = vpop.f32.mrb[0].mxu1 }
 0x117   :  { %v506_v57 = vpop.f32.mrb[1].mxu0  ;;  %v746_v58 = vpop.f32.mrb[1].mxu1 }
 0x11a   :  { %v509_v59 = vpop.f32.mrb[2].mxu0  ;;  %v2959_v60 = vpop.f32.mrb[2].mxu1 }
 0x11b   :  { %v511_v61 = vpop.f32.mrb[3].mxu0  ;;  %v751_v62 = vpop.f32.mrb[3].mxu1 }
 0x11e   :  { %v2961_v63 = vpop.f32.mrb[4].mxu0  ;;  %v2963_v0 = vpop.f32.mrb[4].mxu1 }
 0x11f   :  { %v516_v1 = vpop.f32.mrb[5].mxu0  ;;  %v756_v2 = vpop.f32.mrb[5].mxu1 }
 0x122   :  { %v2965_v3 = vpop.f32.mrb[6].mxu0  ;;  %v2967_v4 = vpop.f32.mrb[6].mxu1 }
 0x123   :  { %v521_v5 = vpop.f32.mrb[7].mxu0  ;;  %v761_v6 = vpop.f32.mrb[7].mxu1 }
 0x126   :  { %v2969_v7 = vpop.f32.mrb[8].mxu0  ;;  %v2971_v8 = vpop.f32.mrb[8].mxu1 }
 0x127   :  { %v526_v9 = vpop.f32.mrb[9].mxu0  ;;  %v766_v10 = vpop.f32.mrb[9].mxu1 }
 0x12a   :  { %v2973_v11 = vpop.f32.mrb[10].mxu0  ;;  %v2975_v12 = vpop.f32.mrb[10].mxu1 }
 0x12b   :  { %v531_v13 = vpop.f32.mrb[11].mxu0  ;;  %v771_v14 = vpop.f32.mrb[11].mxu1 }
 0x12e   :  { %v2977_v15 = vpop.f32.mrb[12].mxu0  ;;  %v2979_v16 = vpop.f32.mrb[12].mxu1 }
 0x12f   :  { %v536_v17 = vpop.f32.mrb[13].mxu0  ;;  %v776_v18 = vpop.f32.mrb[13].mxu1 }
 0x132   :  { %v2981_v19 = vpop.f32.mrb[14].mxu0  ;;  %v2983_v20 = vpop.f32.mrb[14].mxu1 }
 0x133   :  { %v541_v21 = vpop.f32.mrb[15].mxu0  ;;  %v781_v22 = vpop.f32.mrb[15].mxu1 }
 0x136   :  { %v2985_v23 = vpop.f32.mrb[16].mxu0  ;;  %v2987_v24 = vpop.f32.mrb[16].mxu1 }
 0x137   :  { %v546_v25 = vpop.f32.mrb[17].mxu0  ;;  %v786_v26 = vpop.f32.mrb[17].mxu1 }
 0x13a   :  { %v2989_v27 = vpop.f32.mrb[18].mxu0  ;;  %v2991_v28 = vpop.f32.mrb[18].mxu1 }
 0x13b   :  { %v551_v29 = vpop.f32.mrb[19].mxu0  ;;  %v791_v30 = vpop.f32.mrb[19].mxu1 }
 0x13e   :  { %v2993_v31 = vpop.f32.mrb[20].mxu0  ;;  %v2995_v32 = vpop.f32.mrb[20].mxu1 }
 0x13f   :  { %v556_v33 = vpop.f32.mrb[21].mxu0  ;;  %v796_v34 = vpop.f32.mrb[21].mxu1 }
 0x142   :  { %v2997_v35 = vpop.f32.mrb[22].mxu0  ;;  %v2999_v36 = vpop.f32.mrb[22].mxu1 }
 0x143   :  { %v561_v37 = vpop.f32.mrb[23].mxu0  ;;  %v801_v38 = vpop.f32.mrb[23].mxu1 }
 0x146   :  { %v3001_v39 = vpop.f32.mrb[24].mxu0  ;;  %v3003_v40 = vpop.f32.mrb[24].mxu1 }
 0x147   :  { %v566_v41 = vpop.f32.mrb[25].mxu0  ;;  %v806_v42 = vpop.f32.mrb[25].mxu1 }
 0x14a   :  { %v3005_v43 = vpop.f32.mrb[26].mxu0  ;;  %v3007_v44 = vpop.f32.mrb[26].mxu1 }
 0x14b   :  { %v571_v45 = vpop.f32.mrb[27].mxu0  ;;  %v811_v46 = vpop.f32.mrb[27].mxu1 }
 0x14e   :  { %v3009_v47 = vpop.f32.mrb[28].mxu0  ;;  %v3011_v48 = vpop.f32.mrb[28].mxu1 }
 0x14f   :  { %v576_v49 = vpop.f32.mrb[29].mxu0  ;;  %v816_v50 = vpop.f32.mrb[29].mxu1 }
 0x152   :  { %v3013_v51 = vpop.f32.mrb[30].mxu0  ;;  %v3015_v52 = vpop.f32.mrb[30].mxu1 }
 0x153   :  { %v581_v53 = vpop.f32.mrb[31].mxu0  ;;  %v821_v54 = vpop.f32.mrb[31].mxu1 }
 0x156   :  { %v3017_v57 = vpop.f32.mrb[32].mxu0  ;;  %v1964_v58 = vpop.f32.mrb[32].mxu1 }
 0x157   :  { %v3019_v61 = vadd.f32 %v1964_v58, %v509_v59  ;;  %v586_v62 = vpop.f32.mrb[33].mxu0  ;;  %v889_v1 = vpop.f32.mrb[33].mxu1 }
 0x158   :  { %v3022_v2 = vadd.f32 %v889_v1, %v2955_v55 }
 0x159   :  { %v1343_v5 = vmul.f32 %v3019_v61, %v3019_v61  ;;  %v1209_v6 = vsel %vm245_vm0, %v3019_v61, 0.0 }
 0x15a   :  { %v1208_v9 = vsel %vm245_vm0, %v3022_v2, 0.0  ;;  %v1342_v10 = vmul.f32 %v3022_v2, %v3022_v2  ;;  %v3032_v13 = vpop.f32.mrb[34].mxu0  ;;  %v1967_v59 = vpop.f32.mrb[34].mxu1 }
 0x15b   :  { %v3035_v14 = vadd.f32 %v1967_v59, %v2965_v3  ;;  %v591_v55 = vpop.f32.mrb[35].mxu0  ;;  %v899_v17 = vpop.f32.mrb[35].mxu1  ;;  %v1407_v18 = vsel %vm245_vm0, %v1343_v5, 0.0  ;;  %v1210_v25 = vadd.f32 %v1209_v6, %v1208_v9 }
 0x15c   :  { %v1406_v21 = vsel %vm245_vm0, %v1342_v10, 0.0  ;;  %v3040_v22 = vadd.f32 %v899_v17, %v2961_v63 }
 0x15d   :  { %v1345_v26 = vmul.f32 %v3035_v14, %v3035_v14  ;;  %v1408_v34 = vadd.f32 %v1407_v18, %v1406_v21  ;;  %v1213_v42 = vsel %vm245_vm0, %v3035_v14, 0.0 }
 0x15e   :  { %v1211_v29 = vsel %vm245_vm0, %v3040_v22, 0.0  ;;  %v1344_v3 = vmul.f32 %v3040_v22, %v3040_v22  ;;  %v3048_v30 = vpop.f32.mrb[36].mxu0  ;;  %v1970_v33 = vpop.f32.mrb[36].mxu1 }
 0x15f   :  { %v1212_v37 = vadd.f32 %v1211_v29, %v1210_v25  ;;  %v3051_v38 = vadd.f32 %v1970_v33, %v2973_v11  ;;  %v596_v63 = vpop.f32.mrb[37].mxu0  ;;  %v909_v41 = vpop.f32.mrb[37].mxu1  ;;  %v1411_v53 = vsel %vm245_vm0, %v1345_v26, 0.0 }
 0x160   :  { %v1409_v45 = vsel %vm245_vm0, %v1344_v3, 0.0  ;;  %v3057_v46 = vadd.f32 %v909_v41, %v2969_v7 }
 0x161   :  { %v1214_v49 = vadd.f32 %v1213_v42, %v1212_v37  ;;  %v1410_v50 = vadd.f32 %v1409_v45, %v1408_v34  ;;  %v1347_v54 = vmul.f32 %v3051_v38, %v3051_v38  ;;  %v1217_v59 = vsel %vm245_vm0, %v3051_v38, 0.0 }
 0x162   :  { %v1215_v11 = vsel %vm245_vm0, %v3057_v46, 0.0  ;;  %v1346_v58 = vmul.f32 %v3057_v46, %v3057_v46  ;;  %v3066_v62 = vpop.f32.mrb[38].mxu0  ;;  %v1973_v1 = vpop.f32.mrb[38].mxu1 }
 0x163   :  { %v1412_v5 = vadd.f32 %v1411_v53, %v1410_v50  ;;  %v1216_v6 = vadd.f32 %v1215_v11, %v1214_v49  ;;  %v3069_v7 = vadd.f32 %v1973_v1, %v2981_v19  ;;  %v601_v9 = vpop.f32.mrb[39].mxu0  ;;  %v919_v10 = vpop.f32.mrb[39].mxu1  ;;  %v1415_v25 = vsel %vm245_vm0, %v1347_v54, 0.0 }
 0x164   :  { %v1413_v55 = vsel %vm245_vm0, %v1346_v58, 0.0  ;;  %v3075_v17 = vadd.f32 %v919_v10, %v2977_v15 }
 0x165   :  { %v1218_v18 = vadd.f32 %v1217_v59, %v1216_v6  ;;  %v1414_v21 = vadd.f32 %v1413_v55, %v1412_v5  ;;  %v1349_v26 = vmul.f32 %v3069_v7, %v3069_v7  ;;  %v1221_v42 = vsel %vm245_vm0, %v3069_v7, 0.0 }
 0x166   :  { %v1219_v19 = vsel %vm245_vm0, %v3075_v17, 0.0  ;;  %v1348_v29 = vmul.f32 %v3075_v17, %v3075_v17  ;;  %v3084_v3 = vpop.f32.mrb[40].mxu0  ;;  %v1976_v33 = vpop.f32.mrb[40].mxu1 }
 0x167   :  { %v1416_v34 = vadd.f32 %v1415_v25, %v1414_v21  ;;  %v1220_v37 = vadd.f32 %v1219_v19, %v1218_v18  ;;  %v3087_v15 = vadd.f32 %v1976_v33, %v2989_v27  ;;  %v606_v63 = vpop.f32.mrb[41].mxu0  ;;  %v929_v41 = vpop.f32.mrb[41].mxu1  ;;  %v1419_v54 = vsel %vm245_vm0, %v1349_v26, 0.0 }
 0x168   :  { %v1417_v45 = vsel %vm245_vm0, %v1348_v29, 0.0  ;;  %v3093_v49 = vadd.f32 %v929_v41, %v2985_v23 }
 0x169   :  { %v1418_v50 = vadd.f32 %v1417_v45, %v1416_v34  ;;  %v1222_v53 = vadd.f32 %v1221_v42, %v1220_v37  ;;  %v1351_v11 = vmul.f32 %v3087_v15, %v3087_v15  ;;  %v1225_v55 = vsel %vm245_vm0, %v3087_v15, 0.0 }
 0x16a   :  { %v1223_v27 = vsel %vm245_vm0, %v3093_v49, 0.0  ;;  %v1350_v58 = vmul.f32 %v3093_v49, %v3093_v49  ;;  %v3102_v1 = vpop.f32.mrb[42].mxu0  ;;  %v1979_v5 = vpop.f32.mrb[42].mxu1 }
 0x16b   :  { %v1224_v6 = vadd.f32 %v1223_v27, %v1222_v53  ;;  %v1420_v9 = vadd.f32 %v1419_v54, %v1418_v50  ;;  %v3105_v23 = vadd.f32 %v1979_v5, %v2997_v35  ;;  %v611_v10 = vpop.f32.mrb[43].mxu0  ;;  %v939_v59 = vpop.f32.mrb[43].mxu1  ;;  %v1423_v19 = vsel %vm245_vm0, %v1351_v11, 0.0 }
 0x16c   :  { %v1421_v18 = vsel %vm245_vm0, %v1350_v58, 0.0  ;;  %v3111_v21 = vadd.f32 %v939_v59, %v2993_v31 }
 0x16d   :  { %v1422_v25 = vadd.f32 %v1421_v18, %v1420_v9  ;;  %v1226_v26 = vadd.f32 %v1225_v55, %v1224_v6  ;;  %v1353_v29 = vmul.f32 %v3105_v23, %v3105_v23  ;;  %v1229_v50 = vsel %vm245_vm0, %v3105_v23, 0.0 }
 0x16e   :  { %v1227_v35 = vsel %vm245_vm0, %v3111_v21, 0.0  ;;  %v1352_v33 = vmul.f32 %v3111_v21, %v3111_v21  ;;  %v3120_v34 = vpop.f32.mrb[44].mxu0  ;;  %v1982_v37 = vpop.f32.mrb[44].mxu1 }
 0x16f   :  { %v1228_v63 = vadd.f32 %v1227_v35, %v1226_v26  ;;  %v1424_v41 = vadd.f32 %v1423_v19, %v1422_v25  ;;  %v3123_v31 = vadd.f32 %v1982_v37, %v3005_v43  ;;  %v616_v42 = vpop.f32.mrb[45].mxu0  ;;  %v949_v45 = vpop.f32.mrb[45].mxu1  ;;  %v1427_v58 = vsel %vm245_vm0, %v1353_v29, 0.0 }
 0x170   :  { %v1425_v53 = vsel %vm245_vm0, %v1352_v33, 0.0  ;;  %v3129_v54 = vadd.f32 %v949_v45, %v3001_v39 }
 0x171   :  { %v1426_v11 = vadd.f32 %v1425_v53, %v1424_v41  ;;  %v1230_v27 = vadd.f32 %v1229_v50, %v1228_v63  ;;  %v1355_v5 = vmul.f32 %v3123_v31, %v3123_v31  ;;  %v1233_v26 = vsel %vm245_vm0, %v3123_v31, 0.0 }
 0x172   :  { %v1231_v43 = vsel %vm245_vm0, %v3129_v54, 0.0  ;;  %v1354_v6 = vmul.f32 %v3129_v54, %v3129_v54  ;;  %v3138_v9 = vpop.f32.mrb[46].mxu0  ;;  %v1985_v10 = vpop.f32.mrb[46].mxu1 }
 0x173   :  { %v1232_v59 = vadd.f32 %v1231_v43, %v1230_v27  ;;  %v1428_v55 = vadd.f32 %v1427_v58, %v1426_v11  ;;  %v3141_v39 = vadd.f32 %v1985_v10, %v3013_v51  ;;  %v621_v18 = vpop.f32.mrb[47].mxu0  ;;  %v959_v25 = vpop.f32.mrb[47].mxu1  ;;  %v1431_v37 = vsel %vm245_vm0, %v1355_v5, 0.0 }
 0x174   :  { %v1429_v19 = vsel %vm245_vm0, %v1354_v6, 0.0  ;;  %v3147_v29 = vadd.f32 %v959_v25, %v3009_v47 }
 0x175   :  { %v1430_v35 = vadd.f32 %v1429_v19, %v1428_v55  ;;  %v1234_v33 = vadd.f32 %v1233_v26, %v1232_v59  ;;  %v1357_v63 = vmul.f32 %v3141_v39, %v3141_v39  ;;  %v1237_v58 = vsel %vm245_vm0, %v3141_v39, 0.0 }
 0x176   :  { %v1235_v51 = vsel %vm245_vm0, %v3147_v29, 0.0  ;;  %v1356_v41 = vmul.f32 %v3147_v29, %v3147_v29  ;;  %v3156_v42 = vpop.f32.mrb[48].mxu0  ;;  %v1988_v45 = vpop.f32.mrb[48].mxu1 }
 0x177   :  { %v1236_v50 = vadd.f32 %v1235_v51, %v1234_v33  ;;  %v1432_v53 = vadd.f32 %v1431_v37, %v1430_v35  ;;  %v3159_v47 = vadd.f32 %v1988_v45, %v3032_v13  ;;  %v626_v11 = vpop.f32.mrb[49].mxu0  ;;  %v969_v27 = vpop.f32.mrb[49].mxu1  ;;  %v1435_v59 = vsel %vm245_vm0, %v1357_v63, 0.0 }
 0x178   :  { %v1433_v5 = vsel %vm245_vm0, %v1356_v41, 0.0  ;;  %v3165_v43 = vadd.f32 %v969_v27, %v3017_v57 }
 0x179   :  { %4405 = vst [vmem:[#allocation2_spill] sm:$0xff] %v3159_v47  ;;  %v1434_v6 = vadd.f32 %v1433_v5, %v1432_v53  ;;  %v1238_v10 = vadd.f32 %v1237_v58, %v1236_v50  ;;  %v1359_v55 = vmul.f32 %v3159_v47, %v3159_v47  ;;  %v1241_v63 = vsel %vm245_vm0, %v3159_v47, 0.0 }
 0x17a   :  { %4406 = vst [vmem:[#allocation3_spill] sm:$0xff] %v3165_v43  ;;  %v1239_v13 = vsel %vm245_vm0, %v3165_v43, 0.0  ;;  %v1358_v18 = vmul.f32 %v3165_v43, %v3165_v43  ;;  %v629_v25 = vpop.f32.mrb[50].mxu0  ;;  %v1991_v26 = vpop.f32.mrb[50].mxu1 }
 0x17b   :  { %v1240_v19 = vadd.f32 %v1239_v13, %v1238_v10  ;;  %v1436_v35 = vadd.f32 %v1435_v59, %v1434_v6  ;;  %v3175_v57 = vadd.f32 %v1991_v26, %v3066_v62  ;;  %v631_v33 = vpop.f32.mrb[51].mxu0  ;;  %v979_v37 = vpop.f32.mrb[51].mxu1  ;;  %v1439_v53 = vsel %vm245_vm0, %v1359_v55, 0.0 }
 0x17c   :  { %v1437_v51 = vsel %vm245_vm0, %v1358_v18, 0.0  ;;  %v3181_v41 = vadd.f32 %v979_v37, %v3048_v30 }
 0x17d   :  { %4407 = vst [vmem:[#allocation4_spill] sm:$0xff] %v3175_v57  ;;  %v1438_v45 = vadd.f32 %v1437_v51, %v1436_v35  ;;  %v1242_v50 = vadd.f32 %v1241_v63, %v1240_v19  ;;  %v1361_v5 = vmul.f32 %v3175_v57, %v3175_v57  ;;  %v1245_v26 = vsel %vm245_vm0, %v3175_v57, 0.0 }
 0x17e   :  { %4408 = vst [vmem:[#allocation5_spill] sm:$0xff] %v3181_v41  ;;  %v1243_v11 = vsel %vm245_vm0, %v3181_v41, 0.0  ;;  %v1360_v62 = vmul.f32 %v3181_v41, %v3181_v41  ;;  %v634_v27 = vpop.f32.mrb[52].mxu0  ;;  %v1994_v58 = vpop.f32.mrb[52].mxu1 }
 0x17f   :  { %v1244_v6 = vadd.f32 %v1243_v11, %v1242_v50  ;;  %v1440_v10 = vadd.f32 %v1439_v53, %v1438_v45  ;;  %v3191_v30 = vadd.f32 %v1994_v58, %v3102_v1  ;;  %v636_v59 = vpop.f32.mrb[53].mxu0  ;;  %v989_v13 = vpop.f32.mrb[53].mxu1  ;;  %v1443_v1 = vsel %vm245_vm0, %v1361_v5, 0.0 }
 0x180   :  { %v1441_v55 = vsel %vm245_vm0, %v1360_v62, 0.0  ;;  %v3195_v18 = vadd.f32 %v989_v13, %v3084_v3 }
 0x181   :  { %4409 = vst [vmem:[#allocation6_spill] sm:$0xff] %v3191_v30  ;;  %v1442_v19 = vadd.f32 %v1441_v55, %v1440_v10  ;;  %v1246_v35 = vadd.f32 %v1245_v26, %v1244_v6  ;;  %v1363_v5 = vmul.f32 %v3191_v30, %v3191_v30 }
 0x182   :  { %4410 = vst [vmem:[#allocation7_spill] sm:$0xff] %v3195_v18  ;;  %v1362_v33 = vmul.f32 %v3195_v18, %v3195_v18  ;;  %v639_v37 = vpop.f32.mrb[54].mxu0  ;;  %v1997_v63 = vpop.f32.mrb[54].mxu1  ;;  %v1247_v51 = vsel %vm245_vm0, %v3195_v18, 0.0 }
 0x183   :  { %v3205_v45 = vadd.f32 %v1997_v63, %v3138_v9  ;;  %v641_v3 = vpop.f32.mrb[55].mxu0  ;;  %v999_v50 = vpop.f32.mrb[55].mxu1  ;;  %v1444_v53 = vadd.f32 %v1443_v1, %v1442_v19  ;;  %v1248_v58 = vadd.f32 %v1247_v51, %v1246_v35  ;;  %v1447_v1 = vsel %vm245_vm0, %v1363_v5, 0.0 }
 0x184   :  { %v3208_v11 = vadd.f32 %v999_v50, %v3120_v34  ;;  %v1445_v62 = vsel %vm245_vm0, %v1362_v33, 0.0  ;;  %v1249_v34 = vsel %vm245_vm0, %v3191_v30, 0.0 }
 0x185   :  { %4411 = vst [vmem:[#allocation8_spill] sm:$0xff] %v3205_v45  ;;  %v1446_v9 = vadd.f32 %v1445_v62, %v1444_v53  ;;  %v1250_v35 = vadd.f32 %v1249_v34, %v1248_v58  ;;  %v1365_v58 = vmul.f32 %v3205_v45, %v3205_v45 }
 0x186   :  { %4412 = vst [vmem:[#allocation9_spill] sm:$0xff] %v3208_v11  ;;  %v644_v6 = vpop.f32.mrb[56].mxu0  ;;  %v2000_v10 = vpop.f32.mrb[56].mxu1  ;;  %v1364_v19 = vmul.f32 %v3208_v11, %v3208_v11 }
 0x187   :  { %v3213_v59 = vadd.f32 %v2000_v10, %v629_v25  ;;  %v646_v13 = vpop.f32.mrb[57].mxu0  ;;  %v1009_v55 = vpop.f32.mrb[57].mxu1  ;;  %v1251_v25 = vsel %vm245_vm0, %v3208_v11, 0.0 }
 0x188   :  { %v3216_v26 = vadd.f32 %v1009_v55, %v3156_v42  ;;  %v1448_v42 = vadd.f32 %v1447_v1, %v1446_v9  ;;  %v1449_v62 = vsel %vm245_vm0, %v1364_v19, 0.0  ;;  %v1252_v10 = vadd.f32 %v1251_v25, %v1250_v35 }
 0x189   :  { %4413 = vst [vmem:[#allocation10_spill] sm:$0xff] %v3213_v59  ;;  %v1253_v9 = vsel %vm245_vm0, %v3205_v45, 0.0  ;;  %v1451_v1 = vsel %vm245_vm0, %v1365_v58, 0.0 }
 0x18a   :  { %4414 = vst [vmem:[#allocation11_spill] sm:$0xff] %v3216_v26  ;;  %v649_v33 = vpop.f32.mrb[58].mxu0  ;;  %v2003_v63 = vpop.f32.mrb[58].mxu1  ;;  %v1450_v11 = vadd.f32 %v1449_v62, %v1448_v42  ;;  %v1254_v19 = vadd.f32 %v1253_v9, %v1252_v10  ;;  %v1367_v10 = vmul.f32 %v3213_v59, %v3213_v59 }
 0x18b   :  { %v3225_v51 = vadd.f32 %v2003_v63, %v639_v37  ;;  %v651_v3 = vpop.f32.mrb[59].mxu0  ;;  %v1019_v50 = vpop.f32.mrb[59].mxu1 }
 0x18c   :  { %v3227_v53 = vadd.f32 %v1019_v50, %v634_v27  ;;  %v1366_v27 = vmul.f32 %v3216_v26, %v3216_v26 }
 0x18d   :  { %4415 = vst [vmem:[#allocation12_spill] sm:$0xff] %v3225_v51 }
 0x18e   :  { %4416 = vst [vmem:[#allocation13_spill] sm:$0xff] %v3227_v53  ;;  %v654_v13 = vpop.f32.mrb[60].mxu0  ;;  %v2006_v55 = vpop.f32.mrb[60].mxu1  ;;  %v1453_v42 = vsel %vm245_vm0, %v1366_v27, 0.0 }
 0x18f   :  { %v3232_v34 = vadd.f32 %v2006_v55, %v649_v33  ;;  %v656_v5 = vpop.f32.mrb[61].mxu0  ;;  %v1029_v30 = vpop.f32.mrb[61].mxu1  ;;  %v1255_v33 = vsel %vm245_vm0, %v3216_v26, 0.0 }
 0x190   :  { %v3234_v37 = vadd.f32 %v1029_v30, %v644_v6  ;;  %v1452_v30 = vadd.f32 %v1451_v1, %v1450_v11  ;;  %v1256_v62 = vadd.f32 %v1255_v33, %v1254_v19  ;;  %v1368_v11 = vmul.f32 %v3227_v53, %v3227_v53 }
 0x191   :  { %4417 = vst [vmem:[#allocation14_spill] sm:$0xff] %v3232_v34  ;;  %v1455_v19 = vsel %vm245_vm0, %v1367_v10, 0.0  ;;  %v1259_v1 = vsel %vm245_vm0, %v3227_v53, 0.0 }
 0x192   :  { %4418 = vst [vmem:[#allocation15_spill] sm:$0xff] %v3234_v37  ;;  %v659_v35 = vpop.f32.mrb[62].mxu0  ;;  %v2009_v63 = vpop.f32.mrb[62].mxu1  ;;  %v1454_v45 = vadd.f32 %v1453_v42, %v1452_v30  ;;  %v1457_v42 = vsel %vm245_vm0, %v1368_v11, 0.0 }
 0x193   :  { %v3243_v25 = vadd.f32 %v2009_v63, %v659_v35  ;;  %v661_v3 = vpop.f32.mrb[63].mxu0  ;;  %v1039_v50 = vpop.f32.mrb[63].mxu1  ;;  %v1257_v35 = vsel %vm245_vm0, %v3213_v59, 0.0 }
 0x194   :  { %v3245_v6 = vadd.f32 %v1039_v50, %v654_v13  ;;  %v1258_v13 = vadd.f32 %v1257_v35, %v1256_v62  ;;  %v1456_v30 = vadd.f32 %v1455_v19, %v1454_v45  ;;  %v1369_v62 = vmul.f32 %v3225_v51, %v3225_v51 }
 0x195   :  { %4419 = vst [vmem:[#allocation16_spill] sm:$0xff] %v3243_v25 }
 0x196   :  { %4420 = vst [vmem:[#allocation17_spill] sm:$0xff] %v3245_v6  ;;  %v664_v55 = vpop.f32.mrb[64].mxu0  ;;  %v2012_v5 = vpop.f32.mrb[64].mxu1  ;;  %v1458_v26 = vadd.f32 %v1457_v42, %v1456_v30 }
 0x197   :  { %v666_v9 = vpop.f32.mrb[65].mxu0  ;;  %v1049_v58 = vpop.f32.mrb[65].mxu1 }
 0x198   :  { %v3250_v18 = vadd.f32 %v1049_v58, %v664_v55  ;;  %v1260_v55 = vadd.f32 %v1259_v1, %v1258_v13  ;;  %v1459_v13 = vsel %vm245_vm0, %v1369_v62, 0.0  ;;  %v1263_v1 = vsel %vm245_vm0, %v3234_v37, 0.0 }
 0x19a   :  { %4421 = vst [vmem:[#allocation18_spill] sm:$0xff] %v3250_v18  ;;  %v669_v63 = vpop.f32.mrb[66].mxu0  ;;  %v2015_v27 = vpop.f32.mrb[66].mxu1 }
 0x19b   :  { %v3259_v33 = vadd.f32 %v2012_v5, %v669_v63  ;;  %v671_v3 = vpop.f32.mrb[67].mxu0  ;;  %v1059_v50 = vpop.f32.mrb[67].mxu1  ;;  %v1261_v5 = vsel %vm245_vm0, %v3225_v51, 0.0  ;;  %v1370_v63 = vmul.f32 %v3234_v37, %v3234_v37 }
 0x19c   :  { %v1262_v45 = vadd.f32 %v1261_v5, %v1260_v55  ;;  %v1371_v55 = vmul.f32 %v3232_v34, %v3232_v34 }
 0x19d   :  { %4422 = vst [vmem:[#allocation19_spill] sm:$0xff] %v3259_v33  ;;  %v1461_v30 = vsel %vm245_vm0, %v1370_v63, 0.0 }
 0x19e   :  { %v674_v9 = vpop.f32.mrb[68].mxu0  ;;  %v2018_v58 = vpop.f32.mrb[68].mxu1  ;;  %v1264_v42 = vadd.f32 %v1263_v1, %v1262_v45  ;;  %v1463_v45 = vsel %vm245_vm0, %v1371_v55, 0.0  ;;  %v1267_v1 = vsel %vm245_vm0, %v3245_v6, 0.0 }
 0x19f   :  { %v3264_v35 = vadd.f32 %v1059_v50, %v674_v9  ;;  %v676_v59 = vpop.f32.mrb[69].mxu0  ;;  %v1069_v10 = vpop.f32.mrb[69].mxu1  ;;  %v1460_v9 = vadd.f32 %v1459_v13, %v1458_v26 }
 0x1a1   :  { %4423 = vst [vmem:[#allocation20_spill] sm:$0xff] %v3264_v35  ;;  %v1462_v41 = vadd.f32 %v1461_v30, %v1460_v9 }
 0x1a2   :  { %v679_v19 = vpop.f32.mrb[70].mxu0  ;;  %v2021_v11 = vpop.f32.mrb[70].mxu1 }
 0x1a3   :  { %v3273_v3 = vadd.f32 %v2015_v27, %v679_v19  ;;  %v681_v50 = vpop.f32.mrb[71].mxu0  ;;  %v1079_v59 = vpop.f32.mrb[71].mxu1  ;;  %v1265_v27 = vsel %vm245_vm0, %v3232_v34, 0.0  ;;  %v1372_v19 = vmul.f32 %v3245_v6, %v3245_v6 }
 0x1a4   :  { %v1266_v26 = vadd.f32 %v1265_v27, %v1264_v42  ;;  %v1464_v50 = vadd.f32 %v1463_v45, %v1462_v41  ;;  %v1373_v42 = vmul.f32 %v3243_v25, %v3243_v25  ;;  %v1374_v41 = vmul.f32 %v3250_v18, %v3250_v18 }
 0x1a5   :  { %4424 = vst [vmem:[#allocation21_spill] sm:$0xff] %v3273_v3  ;;  %v1465_v9 = vsel %vm245_vm0, %v1372_v19, 0.0  ;;  %v1377_v43 = vmul.f32 %v3273_v3, %v3273_v3 }
 0x1a6   :  { %v684_v51 = vpop.f32.mrb[72].mxu0  ;;  %v2024_v53 = vpop.f32.mrb[72].mxu1  ;;  %v1268_v30 = vadd.f32 %v1267_v1, %v1266_v26  ;;  %v1466_v6 = vadd.f32 %v1465_v9, %v1464_v50  ;;  %v1467_v45 = vsel %vm245_vm0, %v1373_v42, 0.0  ;;  %v1469_v9 = vsel %vm245_vm0, %v1374_v41, 0.0 }
 0x1a7   :  { %v3278_v5 = vadd.f32 %v1069_v10, %v684_v51  ;;  %v686_v57 = vpop.f32.mrb[73].mxu0  ;;  %v1089_v62 = vpop.f32.mrb[73].mxu1 }
 0x1a8   :  { %v1468_v50 = vadd.f32 %v1467_v45, %v1466_v6 }
 0x1aa   :  { %v689_v13 = vpop.f32.mrb[74].mxu0  ;;  %v3284_v63 = vpop.f32.mrb[74].mxu1  ;;  %v1470_v41 = vadd.f32 %v1469_v9, %v1468_v50 }
 0x1ab   :  { %v3289_v51 = vadd.f32 %v2018_v58, %v689_v13  ;;  %v691_v57 = vpop.f32.mrb[75].mxu0  ;;  %v1099_v10 = vpop.f32.mrb[75].mxu1  ;;  %v1269_v58 = vsel %vm245_vm0, %v3243_v25, 0.0 }
 0x1ac   :  { %v1270_v19 = vadd.f32 %v1269_v58, %v1268_v30  ;;  %v1376_v58 = vmul.f32 %v3264_v35, %v3264_v35 }
 0x1ae   :  { %v694_v34 = vpop.f32.mrb[76].mxu0  ;;  %v3292_v37 = vpop.f32.mrb[76].mxu1 }
 0x1af   :  { %v3296_v27 = vadd.f32 %v1079_v59, %v694_v34  ;;  %v696_v55 = vpop.f32.mrb[77].mxu0  ;;  %v3298_v47 = vpop.f32.mrb[77].mxu1  ;;  %v1271_v34 = vsel %vm245_vm0, %v3250_v18, 0.0  ;;  %v1273_v18 = vsel %vm245_vm0, %v3259_v33, 0.0 }
 0x1b0   :  { %v1375_v55 = vmul.f32 %v3259_v33, %v3259_v33  ;;  %v1272_v30 = vadd.f32 %v1271_v34, %v1270_v19  ;;  %v1275_v34 = vsel %vm245_vm0, %v3264_v35, 0.0 }
 0x1b2   :  { %v699_v26 = vpop.f32.mrb[78].mxu0  ;;  %v3304_v13 = vpop.f32.mrb[78].mxu1  ;;  %v1471_v19 = vsel %vm245_vm0, %v1375_v55, 0.0  ;;  %v1274_v33 = vadd.f32 %v1273_v18, %v1272_v30  ;;  %v1475_v30 = vsel %vm245_vm0, %v1377_v43, 0.0 }
 0x1b3   :  { %v3309_v59 = vadd.f32 %v2021_v11, %v699_v26  ;;  %v701_v1 = vpop.f32.mrb[79].mxu0  ;;  %v3311_v57 = vpop.f32.mrb[79].mxu1 }
 0x1b4   :  { %v1276_v35 = vadd.f32 %v1275_v34, %v1274_v33 }
 0x1b6   :  { %v704_v25 = vpop.f32.mrb[80].mxu0  ;;  %v2036_v42 = vpop.f32.mrb[80].mxu1 }
 0x1b7   :  { %v3320_v11 = vadd.f32 %v1089_v62, %v704_v25  ;;  %v3323_v26 = vadd.f32 %v2036_v42, %v2959_v60  ;;  %v706_v6 = vpop.f32.mrb[81].mxu0  ;;  %v1129_v45 = vpop.f32.mrb[81].mxu1  ;;  %v1473_v25 = vsel %vm245_vm0, %v1376_v58, 0.0  ;;  %v1277_v42 = vsel %vm245_vm0, %v3273_v3, 0.0 }
 0x1b8   :  { %v3326_v1 = vadd.f32 %v1129_v45, %v2957_v56  ;;  %v1378_v56 = vmul.f32 %v3278_v5, %v3278_v5  ;;  %v1472_v45 = vadd.f32 %v1471_v19, %v1470_v41  ;;  %v1279_v58 = vsel %vm245_vm0, %v3278_v5, 0.0 }
 0x1b9   :  { %v1379_v3 = vmul.f32 %v3289_v51, %v3289_v51 }
 0x1ba   :  { %v709_v62 = vpop.f32.mrb[82].mxu0  ;;  %v2039_v60 = vpop.f32.mrb[82].mxu1  ;;  %v1477_v33 = vsel %vm245_vm0, %v1378_v56, 0.0  ;;  %v1283_v56 = vsel %vm245_vm0, %v3296_v27, 0.0 }
 0x1bb   :  { %v3338_v50 = vadd.f32 %v2024_v53, %v709_v62  ;;  %v3341_v9 = vadd.f32 %v2039_v60, %v2967_v4  ;;  %v711_v55 = vpop.f32.mrb[83].mxu0  ;;  %v1139_v6 = vpop.f32.mrb[83].mxu1  ;;  %v1474_v53 = vadd.f32 %v1473_v25, %v1472_v45  ;;  %v1278_v62 = vadd.f32 %v1277_v42, %v1276_v35 }
 0x1bc   :  { %v3344_v18 = vadd.f32 %v1139_v6, %v2963_v0  ;;  %v1380_v4 = vmul.f32 %v3296_v27, %v3296_v27  ;;  %v1281_v0 = vsel %vm245_vm0, %v3289_v51, 0.0  ;;  %v1479_v42 = vsel %vm245_vm0, %v1379_v3, 0.0 }
 0x1bd   :  { %v1476_v6 = vadd.f32 %v1475_v30, %v1474_v53  ;;  %v1280_v25 = vadd.f32 %v1279_v58, %v1278_v62  ;;  %v1381_v45 = vmul.f32 %v3309_v59, %v3309_v59  ;;  %v1285_v30 = vsel %vm245_vm0, %v3309_v59, 0.0 }
 0x1be   :  { %v714_v60 = vpop.f32.mrb[84].mxu0  ;;  %v2042_v55 = vpop.f32.mrb[84].mxu1 }
 0x1bf   :  { %v3356_v41 = vadd.f32 %v1099_v10, %v714_v60  ;;  %v3359_v43 = vadd.f32 %v2042_v55, %v2975_v12  ;;  %v716_v19 = vpop.f32.mrb[85].mxu0  ;;  %v1149_v34 = vpop.f32.mrb[85].mxu1  ;;  %v1478_v10 = vadd.f32 %v1477_v33, %v1476_v6  ;;  %v1282_v60 = vadd.f32 %v1281_v0, %v1280_v25 }
 0x1c0   :  { %v3362_v35 = vadd.f32 %v1149_v34, %v2971_v8  ;;  %v1481_v12 = vsel %vm245_vm0, %v1380_v4, 0.0  ;;  %v1382_v8 = vmul.f32 %v3320_v11, %v3320_v11  ;;  %v1483_v34 = vsel %vm245_vm0, %v1381_v45, 0.0 }
 0x1c1   :  { %v1480_v33 = vadd.f32 %v1479_v42, %v1478_v10  ;;  %v1284_v0 = vadd.f32 %v1283_v56, %v1282_v60  ;;  %v1287_v6 = vsel %vm245_vm0, %v3320_v11, 0.0  ;;  %v1383_v25 = vmul.f32 %v3338_v50, %v3338_v50 }
 0x1c2   :  { %v719_v55 = vpop.f32.mrb[86].mxu0  ;;  %v2045_v19 = vpop.f32.mrb[86].mxu1  ;;  %v1485_v42 = vsel %vm245_vm0, %v1382_v8, 0.0  ;;  %v1291_v8 = vsel %vm245_vm0, %v3356_v41, 0.0 }
 0x1c3   :  { %v3375_v3 = vadd.f32 %v3284_v63, %v719_v55  ;;  %v3378_v58 = vadd.f32 %v2045_v19, %v2983_v20  ;;  %v721_v53 = vpop.f32.mrb[87].mxu0  ;;  %v1159_v62 = vpop.f32.mrb[87].mxu1  ;;  %v1482_v63 = vadd.f32 %v1481_v12, %v1480_v33  ;;  %v1286_v55 = vadd.f32 %v1285_v30, %v1284_v0 }
 0x1c4   :  { %v3381_v4 = vadd.f32 %v1159_v62, %v2979_v16  ;;  %v1384_v20 = vmul.f32 %v3356_v41, %v3356_v41  ;;  %v1289_v16 = vsel %vm245_vm0, %v3338_v50, 0.0  ;;  %v1487_v33 = vsel %vm245_vm0, %v1383_v25, 0.0 }
 0x1c5   :  { %4425 = vst [vmem:[#allocation22_spill] sm:$0xff] %v3375_v3  ;;  %v1484_v12 = vadd.f32 %v1483_v34, %v1482_v63  ;;  %v1288_v30 = vadd.f32 %v1287_v6, %v1286_v55  ;;  %v1385_v0 = vmul.f32 %v3375_v3, %v3375_v3  ;;  %v1293_v34 = vsel %vm245_vm0, %v3375_v3, 0.0 }
 0x1c6   :  { %v724_v19 = vpop.f32.mrb[88].mxu0  ;;  %v2048_v53 = vpop.f32.mrb[88].mxu1 }
 0x1c7   :  { %v3394_v56 = vadd.f32 %v3298_v47, %v724_v19  ;;  %v3397_v45 = vadd.f32 %v2048_v53, %v2991_v28  ;;  %v726_v10 = vpop.f32.mrb[89].mxu0  ;;  %v1169_v60 = vpop.f32.mrb[89].mxu1  ;;  %v1486_v47 = vadd.f32 %v1485_v42, %v1484_v12  ;;  %v1290_v19 = vadd.f32 %v1289_v16, %v1288_v30 }
 0x1c8   :  { %v3400_v62 = vadd.f32 %v1169_v60, %v2987_v24  ;;  %v1489_v28 = vsel %vm245_vm0, %v1384_v20, 0.0  ;;  %v1491_v60 = vsel %vm245_vm0, %v1385_v0, 0.0 }
 0x1c9   :  { %4426 = vst [vmem:[#allocation23_spill] sm:$0xff] %v3397_v45  ;;  %v1386_v24 = vmul.f32 %v3394_v56, %v3394_v56  ;;  %v1488_v42 = vadd.f32 %v1487_v33, %v1486_v47  ;;  %v1292_v16 = vadd.f32 %v1291_v8, %v1290_v19  ;;  %v1295_v12 = vsel %vm245_vm0, %v3394_v56, 0.0 }
 0x1ca   :  { %4427 = vst [vmem:[#allocation24_spill] sm:$0xff] %v3400_v62  ;;  %v729_v53 = vpop.f32.mrb[90].mxu0  ;;  %v2051_v10 = vpop.f32.mrb[90].mxu1 }
 0x1cb   :  { %v3413_v6 = vadd.f32 %v3292_v37, %v729_v53  ;;  %v3416_v25 = vadd.f32 %v2051_v10, %v2999_v36  ;;  %v731_v63 = vpop.f32.mrb[91].mxu0  ;;  %v1179_v55 = vpop.f32.mrb[91].mxu1  ;;  %v1490_v37 = vadd.f32 %v1489_v28, %v1488_v42  ;;  %v1294_v53 = vadd.f32 %v1293_v34, %v1292_v16 }
 0x1cc   :  { %v3419_v20 = vadd.f32 %v1179_v55, %v2995_v32  ;;  %v1493_v10 = vsel %vm245_vm0, %v1386_v24, 0.0 }
 0x1cd   :  { %v1387_v30 = vmul.f32 %v3413_v6, %v3413_v6  ;;  %v1297_v33 = vsel %vm245_vm0, %v3413_v6, 0.0  ;;  %v1492_v19 = vadd.f32 %v1491_v60, %v1490_v37  ;;  %v1296_v63 = vadd.f32 %v1295_v12, %v1294_v53 }
 0x1ce   :  { %4428 = vst [vmem:[#allocation25_spill] sm:$0xff] %v3419_v20  ;;  %v734_v3 = vpop.f32.mrb[92].mxu0  ;;  %v2054_v36 = vpop.f32.mrb[92].mxu1 }
 0x1cf   :  { %v3430_v32 = vadd.f32 %v3311_v57, %v734_v3  ;;  %v3433_v8 = vadd.f32 %v2054_v36, %v3007_v44  ;;  %v736_v0 = vpop.f32.mrb[93].mxu0  ;;  %v1189_v47 = vpop.f32.mrb[93].mxu1  ;;  %v1495_v34 = vsel %vm245_vm0, %v1387_v30, 0.0  ;;  %v1494_v57 = vadd.f32 %v1493_v10, %v1492_v19 }
 0x1d0   :  { %v3436_v28 = vadd.f32 %v1189_v47, %v3003_v40  ;;  %v1298_v3 = vadd.f32 %v1297_v33, %v1296_v63  ;;  %v1390_v10 = vmul.f32 %v3326_v1, %v3326_v1  ;;  %v1303_v19 = vsel %vm245_vm0, %v3326_v1, 0.0 }
 0x1d1   :  { %v1299_v24 = vsel %vm245_vm0, %v3430_v32, 0.0  ;;  %v1388_v55 = vmul.f32 %v3430_v32, %v3430_v32  ;;  %v1496_v37 = vadd.f32 %v1495_v34, %v1494_v57  ;;  %v1392_v57 = vmul.f32 %v3344_v18, %v3344_v18 }
 0x1d2   :  { %v739_v42 = vpop.f32.mrb[94].mxu0  ;;  %v2057_v44 = vpop.f32.mrb[94].mxu1  ;;  %v1300_v53 = vadd.f32 %v1299_v24, %v1298_v3  ;;  %v1305_v24 = vsel %vm245_vm0, %v3323_v26, 0.0 }
 0x1d3   :  { %v1497_v16 = vsel %vm245_vm0, %v1388_v55, 0.0  ;;  %v3445_v60 = vadd.f32 %v3304_v13, %v739_v42  ;;  %v3448_v40 = vadd.f32 %v2057_v44, %v3015_v52  ;;  %v741_v12 = vpop.f32.mrb[95].mxu0  ;;  %v1199_v30 = vpop.f32.mrb[95].mxu1  ;;  %v1391_v52 = vmul.f32 %v3323_v26, %v3323_v26 }
 0x1d4   :  { %v3451_v36 = vadd.f32 %v1199_v30, %v3011_v48  ;;  %v1498_v0 = vadd.f32 %v1497_v16, %v1496_v37  ;;  %v1501_v55 = vsel %vm245_vm0, %v1390_v10, 0.0  ;;  %v1393_v16 = vmul.f32 %v3341_v9, %v3341_v9 }
 0x1d5   :  { %v1301_v33 = vsel %vm245_vm0, %v3445_v60, 0.0  ;;  %v1389_v13 = vmul.f32 %v3445_v60, %v3445_v60  ;;  %v1503_v44 = vsel %vm245_vm0, %v1391_v52, 0.0  ;;  %v1307_v12 = vsel %vm245_vm0, %v3344_v18, 0.0 }
 0x1d6   :  { %v1302_v47 = vadd.f32 %v1301_v33, %v1300_v53  ;;  %v1309_v53 = vsel %vm245_vm0, %v3341_v9, 0.0  ;;  %v1505_v10 = vsel %vm245_vm0, %v1392_v57, 0.0  ;;  %v1394_v33 = vmul.f32 %v3362_v35, %v3362_v35 }
 0x1d7   :  { %v1499_v48 = vsel %vm245_vm0, %v1389_v13, 0.0  ;;  %v1395_v52 = vmul.f32 %v3359_v43, %v3359_v43 }
 0x1d8   :  { %v1304_v63 = vadd.f32 %v1303_v19, %v1302_v47  ;;  %v1500_v34 = vadd.f32 %v1499_v48, %v1498_v0  ;;  %v1507_v47 = vsel %vm245_vm0, %v1393_v16, 0.0  ;;  %v1311_v19 = vsel %vm245_vm0, %v3362_v35, 0.0 }
 0x1d9   :  { %v1315_v16 = vsel %vm245_vm0, %v3381_v4, 0.0 }
 0x1da   :  { %v1306_v3 = vadd.f32 %v1305_v24, %v1304_v63  ;;  %v1502_v42 = vadd.f32 %v1501_v55, %v1500_v34  ;;  %v1313_v34 = vsel %vm245_vm0, %v3359_v43, 0.0  ;;  %v1509_v24 = vsel %vm245_vm0, %v1394_v33, 0.0 }
 0x1db   :  { %v1396_v55 = vmul.f32 %v3381_v4, %v3381_v4 }
 0x1dc   :  { %v1308_v30 = vadd.f32 %v1307_v12, %v1306_v3  ;;  %v1504_v37 = vadd.f32 %v1503_v44, %v1502_v42  ;;  %v1511_v42 = vsel %vm245_vm0, %v1395_v52, 0.0  ;;  %v1397_v44 = vmul.f32 %v3378_v58, %v3378_v58 }
 0x1dd   :  { %v1319_v52 = vsel %vm245_vm0, %v3400_v62, 0.0 }
 0x1de   :  { %v1310_v13 = vadd.f32 %v1309_v53, %v1308_v30  ;;  %v1506_v0 = vadd.f32 %v1505_v10, %v1504_v37  ;;  %v1317_v37 = vsel %vm245_vm0, %v3378_v58, 0.0  ;;  %v1513_v53 = vsel %vm245_vm0, %v1396_v55, 0.0 }
 0x1df   :  { %v1398_v10 = vmul.f32 %v3400_v62, %v3400_v62 }
 0x1e0   :  { %v1312_v48 = vadd.f32 %v1311_v19, %v1310_v13  ;;  %v1508_v63 = vadd.f32 %v1507_v47, %v1506_v0  ;;  %v1515_v0 = vsel %vm245_vm0, %v1397_v44, 0.0  ;;  %v1399_v47 = vmul.f32 %v3397_v45, %v3397_v45 }
 0x1e1   :  { %v1323_v44 = vsel %vm245_vm0, %v3419_v20, 0.0 }
 0x1e2   :  { %v1314_v57 = vadd.f32 %v1313_v34, %v1312_v48  ;;  %v1510_v3 = vadd.f32 %v1509_v24, %v1508_v63  ;;  %v1321_v63 = vsel %vm245_vm0, %v3397_v45, 0.0  ;;  %v1517_v34 = vsel %vm245_vm0, %v1398_v10, 0.0 }
 0x1e3   :  { %v1400_v24 = vmul.f32 %v3419_v20, %v3419_v20 }
 0x1e4   :  { %v1316_v12 = vadd.f32 %v1315_v16, %v1314_v57  ;;  %v1512_v30 = vadd.f32 %v1511_v42, %v1510_v3  ;;  %v1519_v3 = vsel %vm245_vm0, %v1399_v47, 0.0  ;;  %v1401_v42 = vmul.f32 %v3416_v25, %v3416_v25 }
 0x1e5   :  { %v1327_v47 = vsel %vm245_vm0, %v3436_v28, 0.0 }
 0x1e6   :  { %v1514_v33 = vadd.f32 %v1513_v53, %v1512_v30  ;;  %v1318_v13 = vadd.f32 %v1317_v37, %v1316_v12  ;;  %v1325_v30 = vsel %vm245_vm0, %v3416_v25, 0.0  ;;  %v1521_v37 = vsel %vm245_vm0, %v1400_v24, 0.0 }
 0x1e7   :  { %v1402_v53 = vmul.f32 %v3436_v28, %v3436_v28 }
 0x1e8   :  { %v1320_v19 = vadd.f32 %v1319_v52, %v1318_v13  ;;  %v1516_v48 = vadd.f32 %v1515_v0, %v1514_v33  ;;  %v1523_v13 = vsel %vm245_vm0, %v1401_v42, 0.0  ;;  %v1403_v0 = vmul.f32 %v3433_v8, %v3433_v8 }
 0x1e9   :  { %v1331_v42 = vsel %vm245_vm0, %v3451_v36, 0.0 }
 0x1ea   :  { %v1322_v55 = vadd.f32 %v1321_v63, %v1320_v19  ;;  %v1518_v57 = vadd.f32 %v1517_v34, %v1516_v48  ;;  %v1329_v48 = vsel %vm245_vm0, %v3433_v8, 0.0  ;;  %v1525_v63 = vsel %vm245_vm0, %v1402_v53, 0.0 }
 0x1eb   :  { %v1404_v34 = vmul.f32 %v3451_v36, %v3451_v36 }
 0x1ec   :  { %v1324_v16 = vadd.f32 %v1323_v44, %v1322_v55  ;;  %v1520_v12 = vadd.f32 %v1519_v3, %v1518_v57  ;;  %v1527_v57 = vsel %vm245_vm0, %v1403_v0, 0.0  ;;  %v1405_v3 = vmul.f32 %v3448_v40, %v3448_v40 }
 0x1ee   :  { %v1326_v10 = vadd.f32 %v1325_v30, %v1324_v16  ;;  %v1522_v33 = vadd.f32 %v1521_v37, %v1520_v12  ;;  %v1333_v12 = vsel %vm245_vm0, %v3448_v40, 0.0  ;;  %v1529_v30 = vsel %vm245_vm0, %v1404_v34, 0.0 }
 0x1f0   :  { %v1328_v52 = vadd.f32 %v1327_v47, %v1326_v10  ;;  %v1524_v19 = vadd.f32 %v1523_v13, %v1522_v33  ;;  %v1531_v10 = vsel %vm245_vm0, %v1405_v3, 0.0  ;;  %v1551_v3 = vlaneseq }
 0x1f2   :  { %v1330_v24 = vadd.f32 %v1329_v48, %v1328_v52  ;;  %v1526_v55 = vadd.f32 %v1525_v63, %v1524_v19 }
 0x1f4   :  { %v1332_v44 = vadd.f32 %v1331_v42, %v1330_v24  ;;  %v1528_v16 = vadd.f32 %v1527_v57, %v1526_v55 }
 0x1f6   :  { %v1334_v37 = vadd.f32 %v1333_v12, %v1332_v44  ;;  %v1530_v53 = vadd.f32 %v1529_v30, %v1528_v16  ;;  %v3538_v30 = vshrl.u32 %v1551_v3, 7  ;;  %v4436_v3 = vld [vmem:[#allocation8_spill] sm:$0xff] }
 0x1f8   :  { %v1335_v33 = vrot.slane %v1334_v37, 4  ;;  %v1532_v13 = vadd.f32 %v1531_v10, %v1530_v53  ;;  %v4404_v53 = vsub.s32 0, %v3538_v30 }
 0x1fa   :  { %v1336_v0 = vadd.f32 %v1335_v33, %v1334_v37  ;;  %v1533_v47 = vrot.slane %v1532_v13, 4  ;;  %v1545_v37 = vld [vmem:[%s4377_s2] sm:$0x1] }
 0x1fc   :  { %v1337_v52 = vrot.slane %v1336_v0, 2  ;;  %v1534_v19 = vadd.f32 %v1533_v47, %v1532_v13 }
 0x1fe   :  { %v1338_v48 = vadd.f32 %v1337_v52, %v1336_v0  ;;  %v1535_v63 = vrot.slane %v1534_v19, 2 }
 0x200   :  { %v1339_v20 = vrot.slane %v1338_v48, 1  ;;  %v1536_v24 = vadd.f32 %v1535_v63, %v1534_v19  ;;  %v4429_v63 = vld [vmem:[#allocation3_spill] sm:$0xff] }
 0x202   :  { %v1340_v55 = vadd.f32 %v1339_v20, %v1338_v48  ;;  %v1537_v57 = vrot.slane %v1536_v24, 1 }
 0x204   :  { %v1341_v42 = vmul.f32 0.001953125, %v1340_v55  ;;  %v1538_v45 = vadd.f32 %v1537_v57, %v1536_v24  ;;  %v4430_v24 = vld [vmem:[#allocation2_spill] sm:$0xff]  ;;  %v4431_v55 = vld [vmem:[#allocation5_spill] sm:$0xff]  ;;  %v4432_v57 = vld [vmem:[#allocation4_spill] sm:$0xff] }
 0x206   :  { %v1539_v62 = vmul.f32 0.001953125, %v1538_v45  ;;  %v1540_v34 = vmul.f32 %v1341_v42, %v1341_v42  ;;  %v3547_v45 = vld [vmem:[%s4378_s3] sm:$0x1] }
 0x208   :  { %v1541_v44 = vsub.f32 %v1539_v62, %v1540_v34  ;;  %v4434_v34 = vld [vmem:[#allocation6_spill] sm:$0xff] }
 0x20a   :  { %v1542_v16 = vmax.f32 %v1541_v44, 0.0 }
 0x20c   :  { %v1543_v12 = vadd.f32 1e-05, %v1542_v16  ;;  %v4435_v16 = vld [vmem:[#allocation9_spill] sm:$0xff] }
 0x20e   :  { %2147 = vrsqrt.f32 %v1543_v12 }
 0x218   :  { %v2148_v10 = vpop.eup %2147 }
 0x219   :  { %v1546_v20 = vmul.f32 %v2148_v10, %v1545_v37  ;;  %v4437_v10 = vld [vmem:[#allocation11_spill] sm:$0xff] }
 0x21b   :  { %v3549_v62 = vmul.f32 %v1546_v20, %v1341_v42  ;;  %v3553_v33 = vrot.slane %v1546_v20, %v4404_v53  ;;  %v4433_v42 = vld [vmem:[#allocation7_spill] sm:$0xff]  ;;  %v4448_v53 = vld [vmem:[#allocation16_spill] sm:$0xff] }
 0x21d   :  { %v1549_v13 = vsub.f32 %v3547_v45, %v3549_v62  ;;  %v3559_v0 = vmul.f32 %v3553_v33, %v3022_v2  ;;  %v3563_v47 = vmul.f32 %v3553_v33, %v3019_v61  ;;  %v3567_v52 = vmul.f32 %v3553_v33, %v3040_v22  ;;  %v4438_v45 = vld [vmem:[#allocation10_spill] sm:$0xff] }
 0x21e   :  { %v3571_v19 = vmul.f32 %v3553_v33, %v3035_v14  ;;  %v3575_v48 = vmul.f32 %v3553_v33, %v3057_v46  ;;  %v3579_v2 = vmul.f32 %v3553_v33, %v3051_v38  ;;  %v3583_v61 = vmul.f32 %v3553_v33, %v3075_v17 }
 0x21f   :  { %v3587_v22 = vmul.f32 %v3553_v33, %v3069_v7  ;;  %v3591_v14 = vmul.f32 %v3553_v33, %v3093_v49  ;;  %v3595_v46 = vmul.f32 %v3553_v33, %v3087_v15  ;;  %v3599_v38 = vmul.f32 %v3553_v33, %v3111_v21 }
 0x220   :  { %v3603_v17 = vmul.f32 %v3553_v33, %v3105_v23  ;;  %v3607_v7 = vmul.f32 %v3553_v33, %v3129_v54  ;;  %v3611_v49 = vmul.f32 %v3553_v33, %v3123_v31  ;;  %v3615_v15 = vmul.f32 %v3553_v33, %v3147_v29 }
 0x221   :  { %v3619_v21 = vmul.f32 %v3553_v33, %v3141_v39  ;;  %v3623_v23 = vmul.f32 %v3553_v33, %v4429_v63  ;;  %v3627_v54 = vmul.f32 %v3553_v33, %v4430_v24  ;;  %v3631_v31 = vmul.f32 %v3553_v33, %v4431_v55  ;;  %v4439_v63 = vld [vmem:[#allocation13_spill] sm:$0xff]  ;;  %v4441_v55 = vld [vmem:[#allocation12_spill] sm:$0xff] }
 0x222   :  { %v3635_v29 = vmul.f32 %v3553_v33, %v4432_v57  ;;  %v3639_v39 = vmul.f32 %v3553_v33, %v4433_v42  ;;  %v3643_v44 = vmul.f32 %v3553_v33, %v4434_v34  ;;  %v3647_v12 = vmul.f32 %v3553_v33, %v4435_v16  ;;  %v4443_v42 = vld [vmem:[#allocation15_spill] sm:$0xff]  ;;  %v4445_v16 = vld [vmem:[#allocation14_spill] sm:$0xff] }
 0x223   :  { %v3651_v37 = vmul.f32 %v3553_v33, %v4436_v3  ;;  %v3655_v20 = vmul.f32 %v3553_v33, %v4437_v10  ;;  %v3659_v62 = vmul.f32 %v3553_v33, %v4438_v45  ;;  %v3663_v24 = vmul.f32 %v3553_v33, %v4439_v63  ;;  %v4447_v10 = vld [vmem:[#allocation17_spill] sm:$0xff] }
 0x224   :  { %v3667_v57 = vmul.f32 %v3553_v33, %v4441_v55  ;;  %v3671_v34 = vmul.f32 %v3553_v33, %v4443_v42  ;;  %v3675_v3 = vmul.f32 %v3553_v33, %v4445_v16  ;;  %v3679_v45 = vmul.f32 %v3553_v33, %v4447_v10 }
 0x225   :  { %4440 = vst [vmem:[#allocation3_spill] sm:$0xff] %v3663_v24  ;;  %v3683_v63 = vmul.f32 %v3553_v33, %v4448_v53  ;;  %v4449_v24 = vld [vmem:[#allocation18_spill] sm:$0xff]  ;;  %v3703_v53 = vmul.f32 %v3553_v33, %v3278_v5  ;;  %v3723_v5 = vmul.f32 %v3553_v33, %v3338_v50  ;;  %v3743_v50 = vmul.f32 %v3553_v33, %v3430_v32 }
 0x226   :  { %4442 = vst [vmem:[#allocation2_spill] sm:$0xff] %v3667_v57  ;;  %4444 = vst [vmem:[#allocation5_spill] sm:$0xff] %v3671_v34  ;;  %v3687_v55 = vmul.f32 %v3553_v33, %v4449_v24  ;;  %v4450_v57 = vld [vmem:[#allocation19_spill] sm:$0xff]  ;;  %v4451_v34 = vld [vmem:[#allocation20_spill] sm:$0xff]  ;;  %v3707_v24 = vmul.f32 %v3553_v33, %v3289_v51  ;;  %v3727_v51 = vmul.f32 %v3553_v33, %v3356_v41 }
 0x227   :  { %4446 = vst [vmem:[#allocation4_spill] sm:$0xff] %v3675_v3  ;;  %v3691_v42 = vmul.f32 %v3553_v33, %v4450_v57  ;;  %v3695_v16 = vmul.f32 %v3553_v33, %v4451_v34  ;;  %v4452_v3 = vld [vmem:[#allocation21_spill] sm:$0xff]  ;;  %v3711_v57 = vmul.f32 %v3553_v33, %v3296_v27  ;;  %v3715_v34 = vmul.f32 %v3553_v33, %v3309_v59 }
 0x228   :  { %v3699_v10 = vmul.f32 %v3553_v33, %v4452_v3  ;;  %4453 = vst [vmem:[#allocation7_spill] sm:$0xff] %v3707_v24  ;;  %v3719_v3 = vmul.f32 %v3553_v33, %v3320_v11  ;;  %v4454_v24 = vld [vmem:[#allocation22_spill] sm:$0xff]  ;;  %v3735_v59 = vmul.f32 %v3553_v33, %v3394_v56  ;;  %v3739_v11 = vmul.f32 %v3553_v33, %v3413_v6 }
 0x229   :  { %v3731_v27 = vmul.f32 %v3553_v33, %v4454_v24  ;;  %v3747_v41 = vmul.f32 %v3553_v33, %v3445_v60  ;;  %v3751_v24 = vmul.f32 %v3553_v33, %v3326_v1  ;;  %v3755_v56 = vmul.f32 %v3553_v33, %v3323_v26 }
 0x22a   :  { %v3759_v6 = vmul.f32 %v3553_v33, %v3344_v18  ;;  %v3763_v32 = vmul.f32 %v3553_v33, %v3341_v9  ;;  %v3767_v60 = vmul.f32 %v3553_v33, %v3362_v35  ;;  %v3771_v1 = vmul.f32 %v3553_v33, %v3416_v25 }
 0x22b   :  { %v3775_v26 = vmul.f32 %v3553_v33, %v3436_v28  ;;  %v3779_v18 = vmul.f32 %v3553_v33, %v3433_v8  ;;  %v3783_v9 = vmul.f32 %v3553_v33, %v3451_v36  ;;  %v1609_v35 = vmul.f32 %v3553_v33, %v3359_v43 }
 0x22c   :  { %4455 = vst [vmem:[#allocation6_spill] sm:$0xff] %v3767_v60  ;;  %4456 = vst [vmem:[#allocation9_spill] sm:$0xff] %v3771_v1  ;;  %v1610_v60 = vmul.f32 %v3553_v33, %v3381_v4  ;;  %v3791_v25 = vmul.f32 %v3553_v33, %v3448_v40  ;;  %v4460_v28 = vsub.s32 0, %v3538_v30  ;;  %v1611_v8 = vmul.f32 %v3553_v33, %v3378_v58  ;;  %v4463_v1 = vld [vmem:[#allocation25_spill] sm:$0xff] }
 0x22d   :  { %4457 = vst [vmem:[#allocation8_spill] sm:$0xff] %v3775_v26  ;;  %4458 = vst [vmem:[#allocation11_spill] sm:$0xff] %v3779_v18  ;;  %v4461_v18 = vld [vmem:[#allocation24_spill] sm:$0xff]  ;;  %v1614_v4 = vmul.f32 %v3553_v33, %v4463_v1  ;;  %v4465_v1 = vld [vmem:[#allocation2_spill] sm:$0xff] }
 0x22e   :  { %4459 = vst [vmem:[#allocation10_spill] sm:$0xff] %v3783_v9  ;;  %v3795_v26 = vrot.slane %v1549_v13, %v4460_v28  ;;  %v1612_v36 = vmul.f32 %v3553_v33, %v4461_v18  ;;  %v4462_v9 = vld [vmem:[#allocation23_spill] sm:$0xff]  ;;  %v4467_v28 = vld [vmem:[#allocation4_spill] sm:$0xff] }
 0x22f   :  { %v1613_v43 = vmul.f32 %v3553_v33, %v4462_v9  ;;  %v4466_v9 = vld [vmem:[#allocation5_spill] sm:$0xff] }
 0x230   :  { %v3807_v40 = vadd.f32 %v3795_v26, %v3559_v0  ;;  %v3811_v30 = vadd.f32 %v3795_v26, %v3563_v47  ;;  %v3815_v58 = vadd.f32 %v3795_v26, %v3567_v52  ;;  %v3819_v13 = vadd.f32 %v3795_v26, %v3571_v19 }
 0x231   :  { %v3823_v18 = vadd.f32 %v3795_v26, %v3575_v48  ;;  %v3827_v33 = vadd.f32 %v3795_v26, %v3579_v2  ;;  %v3831_v0 = vadd.f32 %v3795_v26, %v3583_v61  ;;  %v3835_v47 = vadd.f32 %v3795_v26, %v3587_v22 }
 0x232   :  { %v3839_v52 = vadd.f32 %v3795_v26, %v3591_v14  ;;  %v3843_v19 = vadd.f32 %v3795_v26, %v3595_v46  ;;  %v3847_v48 = vadd.f32 %v3795_v26, %v3599_v38  ;;  %v3851_v2 = vadd.f32 %v3795_v26, %v3603_v17 }
 0x233   :  { %v3855_v61 = vadd.f32 %v3795_v26, %v3607_v7  ;;  %v3859_v22 = vadd.f32 %v3795_v26, %v3611_v49  ;;  %v3863_v14 = vadd.f32 %v3795_v26, %v3615_v15  ;;  %v3867_v46 = vadd.f32 %v3795_v26, %v3619_v21 }
 0x234   :  { %v3871_v38 = vadd.f32 %v3795_v26, %v3623_v23  ;;  %v3875_v17 = vadd.f32 %v3795_v26, %v3627_v54  ;;  %v3879_v7 = vadd.f32 %v3795_v26, %v3631_v31  ;;  %v3883_v49 = vadd.f32 %v3795_v26, %v3635_v29 }
 0x235   :  { %v3887_v15 = vadd.f32 %v3795_v26, %v3639_v39  ;;  %v3891_v21 = vadd.f32 %v3795_v26, %v3643_v44  ;;  %v3895_v23 = vadd.f32 %v3795_v26, %v3647_v12  ;;  %v3899_v54 = vadd.f32 %v3795_v26, %v3651_v37  ;;  %v4464_v39 = vld [vmem:[#allocation3_spill] sm:$0xff] }
 0x236   :  { %v3903_v31 = vadd.f32 %v3795_v26, %v3655_v20  ;;  %v3907_v29 = vadd.f32 %v3795_v26, %v3659_v62  ;;  %v3911_v44 = vadd.f32 %v3795_v26, %v4464_v39  ;;  %v3915_v12 = vadd.f32 %v3795_v26, %v4465_v1 }
 0x237   :  { %v3919_v37 = vadd.f32 %v3795_v26, %v4466_v9  ;;  %v3923_v20 = vadd.f32 %v3795_v26, %v4467_v28  ;;  %v3927_v62 = vadd.f32 %v3795_v26, %v3679_v45  ;;  %v3931_v39 = vadd.f32 %v3795_v26, %v3683_v63 }
 0x238   :  { %v3935_v1 = vadd.f32 %v3795_v26, %v3687_v55  ;;  %v3939_v9 = vadd.f32 %v3795_v26, %v3691_v42  ;;  %v3943_v28 = vadd.f32 %v3795_v26, %v3695_v16  ;;  %v3947_v45 = vadd.f32 %v3795_v26, %v3699_v10 }
 0x239   :  { %4468 = vst [vmem:[#allocation13_spill] sm:$0xff] %v3931_v39  ;;  %v3951_v63 = vadd.f32 %v3795_v26, %v3703_v53  ;;  %v4469_v39 = vld [vmem:[#allocation7_spill] sm:$0xff]  ;;  %v3959_v42 = vadd.f32 %v3795_v26, %v3711_v57  ;;  %v3963_v16 = vadd.f32 %v3795_v26, %v3715_v34  ;;  %v3967_v10 = vadd.f32 %v3795_v26, %v3719_v3 }
 0x23a   :  { %v3955_v55 = vadd.f32 %v3795_v26, %v4469_v39  ;;  %v3971_v53 = vadd.f32 %v3795_v26, %v3723_v5  ;;  %v3975_v39 = vadd.f32 %v3795_v26, %v3727_v51  ;;  %v3979_v57 = vadd.f32 %v3795_v26, %v3731_v27 }
 0x23b   :  { %v3983_v34 = vadd.f32 %v3795_v26, %v3735_v59  ;;  %v3987_v3 = vadd.f32 %v3795_v26, %v3739_v11  ;;  %v3991_v5 = vadd.f32 %v3795_v26, %v3743_v50  ;;  %v3995_v51 = vadd.f32 %v3795_v26, %v3747_v41 }
 0x23c   :  { %v3999_v27 = vadd.f32 %v3795_v26, %v3751_v24  ;;  %v4003_v59 = vadd.f32 %v3795_v26, %v3755_v56  ;;  %v4007_v11 = vadd.f32 %v3795_v26, %v3759_v6  ;;  %v4011_v50 = vadd.f32 %v3795_v26, %v3763_v32 }
 0x23d   :  { %4470 = vst [vmem:[#allocation12_spill] sm:$0xff] %v3991_v5  ;;  %4471 = vst [vmem:[#allocation15_spill] sm:$0xff] %v3995_v51  ;;  %v4473_v5 = vld [vmem:[#allocation6_spill] sm:$0xff]  ;;  %v4018_v51 = vadd.f32 %v3795_v26, %v1609_v35  ;;  %v4021_v24 = vadd.f32 %v3795_v26, %v1610_v60  ;;  %v4024_v56 = vadd.f32 %v3795_v26, %v1611_v8  ;;  %v4479_v35 = vld [vmem:[#allocation8_spill] sm:$0xff] }
 0x23e   :  { %4472 = vst [vmem:[#allocation14_spill] sm:$0xff] %v4007_v11  ;;  %v4015_v41 = vadd.f32 %v3795_v26, %v4473_v5  ;;  %v4027_v6 = vadd.f32 %v3795_v26, %v1612_v36  ;;  %v4030_v11 = vadd.f32 %v3795_v26, %v1613_v43  ;;  %v4033_v32 = vadd.f32 %v3795_v26, %v1614_v4  ;;  %v4477_v5 = vld [vmem:[#allocation9_spill] sm:$0xff]  ;;  %v4483_v36 = vld [vmem:[#allocation10_spill] sm:$0xff] }
 0x23f   :  { %4475 = vst [vmem:[#allocation16_spill] sm:$0xff] %v4021_v24  ;;  %v4041_v60 = vadd.f32 %v3795_v26, %v4479_v35  ;;  %v4481_v24 = vld [vmem:[#allocation11_spill] sm:$0xff]  ;;  %v4053_v43 = vadd.f32 %v3795_v26, %v3791_v25  ;;  %v1690_v4 = vmax.f32 %v3807_v40, 0.0  ;;  %v1693_v35 = vmax.f32 %v3819_v13, 0.0 }
 0x240   :  { %4474 = vst [vmem:[#allocation17_spill] sm:$0xff] %v4015_v41  ;;  %4476 = vst [vmem:[#allocation18_spill] sm:$0xff] %v4027_v6  ;;  %v4037_v41 = vadd.f32 %v3795_v26, %v4477_v5  ;;  %v4045_v8 = vadd.f32 %v3795_v26, %v4481_v24  ;;  %v4049_v6 = vadd.f32 %v3795_v26, %v4483_v36  ;;  %v1691_v5 = vmax.f32 %v3811_v30, 0.0 }
 0x241   :  { %4480 = vst [vmem:[#allocation20_spill] sm:$0xff] %v4041_v60  ;;  %v1694_v60 = vmax.f32 %v3823_v18, 0.0  ;;  %v1695_v24 = vmax.f32 %v3827_v33, 0.0  ;;  %v1697_v36 = vmax.f32 %v3835_v47, 0.0  ;;  %v1699_v26 = vmax.f32 %v3843_v19, 0.0  ;;  %1754 = vst.msk [vmem:[%s4379_s4] sm:$0xff] %vm245_vm0, %v1690_v4 }
 0x242   :  { %4478 = vst [vmem:[#allocation19_spill] sm:$0xff] %v4037_v41  ;;  %4482 = vst [vmem:[#allocation21_spill] sm:$0xff] %v4045_v8  ;;  %v1692_v41 = vmax.f32 %v3815_v58, 0.0  ;;  %v1696_v8 = vmax.f32 %v3831_v0, 0.0  ;;  %v1700_v25 = vmax.f32 %v3847_v48, 0.0  ;;  %v1701_v40 = vmax.f32 %v3851_v2, 0.0 }
 0x243   :  { %4484 = vst [vmem:[#allocation22_spill] sm:$0xff] %v4049_v6  ;;  %v1698_v6 = vmax.f32 %v3839_v52, 0.0  ;;  %1755 = vst.msk [vmem:[%s4379_s4 + $0x8] sm:$0xff] %vm245_vm0, %v1691_v5  ;;  %v1702_v30 = vmax.f32 %v3855_v61, 0.0  ;;  %v1703_v58 = vmax.f32 %v3859_v22, 0.0  ;;  %v1704_v13 = vmax.f32 %v3863_v14, 0.0 }
 0x244   :  { %1756 = vst.msk [vmem:[%s4379_s4 + $0x10] sm:$0xff] %vm245_vm0, %v1692_v41  ;;  %1757 = vst.msk [vmem:[%s4379_s4 + $0x18] sm:$0xff] %vm245_vm0, %v1693_v35  ;;  %v1705_v18 = vmax.f32 %v3867_v46, 0.0  ;;  %v1706_v33 = vmax.f32 %v3871_v38, 0.0  ;;  %v1707_v0 = vmax.f32 %v3875_v17, 0.0  ;;  %v1708_v47 = vmax.f32 %v3879_v7, 0.0 }
 0x245   :  { %1758 = vst.msk [vmem:[%s4379_s4 + $0x20] sm:$0xff] %vm245_vm0, %v1694_v60  ;;  %1759 = vst.msk [vmem:[%s4379_s4 + $0x28] sm:$0xff] %vm245_vm0, %v1695_v24  ;;  %v1709_v52 = vmax.f32 %v3883_v49, 0.0  ;;  %v1710_v19 = vmax.f32 %v3887_v15, 0.0  ;;  %v1711_v48 = vmax.f32 %v3891_v21, 0.0  ;;  %v1712_v2 = vmax.f32 %v3895_v23, 0.0 }
 0x246   :  { %1760 = vst.msk [vmem:[%s4379_s4 + $0x30] sm:$0xff] %vm245_vm0, %v1696_v8  ;;  %1761 = vst.msk [vmem:[%s4379_s4 + $0x38] sm:$0xff] %vm245_vm0, %v1697_v36  ;;  %v1713_v61 = vmax.f32 %v3899_v54, 0.0  ;;  %v1714_v22 = vmax.f32 %v3903_v31, 0.0  ;;  %v1715_v14 = vmax.f32 %v3907_v29, 0.0  ;;  %v1716_v46 = vmax.f32 %v3911_v44, 0.0 }
 0x247   :  { %1762 = vst.msk [vmem:[%s4379_s4 + $0x40] sm:$0xff] %vm245_vm0, %v1698_v6  ;;  %1763 = vst.msk [vmem:[%s4379_s4 + $0x48] sm:$0xff] %vm245_vm0, %v1699_v26  ;;  %v1717_v38 = vmax.f32 %v3915_v12, 0.0  ;;  %v1718_v17 = vmax.f32 %v3919_v37, 0.0  ;;  %v1719_v7 = vmax.f32 %v3923_v20, 0.0  ;;  %v1720_v49 = vmax.f32 %v3927_v62, 0.0 }
 0x248   :  { %1764 = vst.msk [vmem:[%s4379_s4 + $0x50] sm:$0xff] %vm245_vm0, %v1700_v25  ;;  %1765 = vst.msk [vmem:[%s4379_s4 + $0x58] sm:$0xff] %vm245_vm0, %v1701_v40  ;;  %v4485_v15 = vld [vmem:[#allocation13_spill] sm:$0xff]  ;;  %v1722_v23 = vmax.f32 %v3935_v1, 0.0  ;;  %v1723_v54 = vmax.f32 %v3939_v9, 0.0  ;;  %v1724_v31 = vmax.f32 %v3943_v28, 0.0 }
 0x249   :  { %1766 = vst.msk [vmem:[%s4379_s4 + $0x60] sm:$0xff] %vm245_vm0, %v1702_v30  ;;  %1767 = vst.msk [vmem:[%s4379_s4 + $0x68] sm:$0xff] %vm245_vm0, %v1703_v58  ;;  %v1721_v21 = vmax.f32 %v4485_v15, 0.0  ;;  %v1725_v29 = vmax.f32 %v3947_v45, 0.0  ;;  %v1726_v44 = vmax.f32 %v3951_v63, 0.0  ;;  %v1727_v12 = vmax.f32 %v3955_v55, 0.0 }
 0x24a   :  { %1768 = vst.msk [vmem:[%s4379_s4 + $0x70] sm:$0xff] %vm245_vm0, %v1704_v13  ;;  %1769 = vst.msk [vmem:[%s4379_s4 + $0x78] sm:$0xff] %vm245_vm0, %v1705_v18  ;;  %v1728_v37 = vmax.f32 %v3959_v42, 0.0  ;;  %v1729_v20 = vmax.f32 %v3963_v16, 0.0  ;;  %v1730_v62 = vmax.f32 %v3967_v10, 0.0  ;;  %v1731_v1 = vmax.f32 %v3971_v53, 0.0 }
 0x24b   :  { %1770 = vst.msk [vmem:[%s4379_s4 + $0x80] sm:$0xff] %vm245_vm0, %v1706_v33  ;;  %1771 = vst.msk [vmem:[%s4379_s4 + $0x88] sm:$0xff] %vm245_vm0, %v1707_v0  ;;  %v1732_v9 = vmax.f32 %v3975_v39, 0.0  ;;  %v1733_v28 = vmax.f32 %v3979_v57, 0.0  ;;  %v1734_v45 = vmax.f32 %v3983_v34, 0.0  ;;  %v1735_v63 = vmax.f32 %v3987_v3, 0.0 }
 0x24c   :  { %1772 = vst.msk [vmem:[%s4379_s4 + $0x90] sm:$0xff] %vm245_vm0, %v1708_v47  ;;  %1773 = vst.msk [vmem:[%s4379_s4 + $0x98] sm:$0xff] %vm245_vm0, %v1709_v52  ;;  %v4486_v55 = vld [vmem:[#allocation12_spill] sm:$0xff]  ;;  %v4487_v16 = vld [vmem:[#allocation15_spill] sm:$0xff]  ;;  %v1738_v53 = vmax.f32 %v3999_v27, 0.0  ;;  %v1739_v39 = vmax.f32 %v4003_v59, 0.0 }
 0x24d   :  { %1774 = vst.msk [vmem:[%s4379_s4 + $0xa0] sm:$0xff] %vm245_vm0, %v1710_v19  ;;  %1775 = vst.msk [vmem:[%s4379_s4 + $0xa8] sm:$0xff] %vm245_vm0, %v1711_v48  ;;  %v1736_v42 = vmax.f32 %v4486_v55, 0.0  ;;  %v1737_v10 = vmax.f32 %v4487_v16, 0.0  ;;  %v4488_v57 = vld [vmem:[#allocation14_spill] sm:$0xff]  ;;  %v1741_v3 = vmax.f32 %v4011_v50, 0.0 }
 0x24e   :  { %1776 = vst.msk [vmem:[%s4379_s4 + $0xb0] sm:$0xff] %vm245_vm0, %v1712_v2  ;;  %1777 = vst.msk [vmem:[%s4379_s4 + $0xb8] sm:$0xff] %vm245_vm0, %v1713_v61  ;;  %v1740_v34 = vmax.f32 %v4488_v57, 0.0  ;;  %v4489_v27 = vld [vmem:[#allocation17_spill] sm:$0xff]  ;;  %v1743_v50 = vmax.f32 %v4018_v51, 0.0  ;;  %v4490_v41 = vld [vmem:[#allocation16_spill] sm:$0xff] }
 0x24f   :  { %1778 = vst.msk [vmem:[%s4379_s4 + $0xc0] sm:$0xff] %vm245_vm0, %v1714_v22  ;;  %1779 = vst.msk [vmem:[%s4379_s4 + $0xc8] sm:$0xff] %vm245_vm0, %v1715_v14  ;;  %v1742_v59 = vmax.f32 %v4489_v27, 0.0  ;;  %v1744_v6 = vmax.f32 %v4490_v41, 0.0  ;;  %v1745_v60 = vmax.f32 %v4024_v56, 0.0  ;;  %v4491_v51 = vld [vmem:[#allocation18_spill] sm:$0xff] }
 0x250   :  { %1780 = vst.msk [vmem:[%s4379_s4 + $0xd0] sm:$0xff] %vm245_vm0, %v1716_v46  ;;  %1781 = vst.msk [vmem:[%s4379_s4 + $0xd8] sm:$0xff] %vm245_vm0, %v1717_v38  ;;  %v1746_v56 = vmax.f32 %v4491_v51, 0.0  ;;  %v1747_v8 = vmax.f32 %v4030_v11, 0.0  ;;  %v1748_v4 = vmax.f32 %v4033_v32, 0.0  ;;  %v4492_v5 = vld [vmem:[#allocation19_spill] sm:$0xff] }
 0x251   :  { %1782 = vst.msk [vmem:[%s4379_s4 + $0xe0] sm:$0xff] %vm245_vm0, %v1718_v17  ;;  %1783 = vst.msk [vmem:[%s4379_s4 + $0xe8] sm:$0xff] %vm245_vm0, %v1719_v7  ;;  %v1749_v35 = vmax.f32 %v4492_v5, 0.0  ;;  %v4493_v11 = vld [vmem:[#allocation20_spill] sm:$0xff]  ;;  %v4494_v24 = vld [vmem:[#allocation21_spill] sm:$0xff]  ;;  %v1753_v40 = vmax.f32 %v4053_v43, 0.0 }
 0x252   :  { %1784 = vst.msk [vmem:[%s4379_s4 + $0xf0] sm:$0xff] %vm245_vm0, %v1720_v49  ;;  %1785 = vst.msk [vmem:[%s4379_s4 + $0xf8] sm:$0xff] %vm245_vm0, %v1721_v21  ;;  %v1750_v32 = vmax.f32 %v4493_v11, 0.0  ;;  %v1751_v36 = vmax.f32 %v4494_v24, 0.0  ;;  %v4495_v26 = vld [vmem:[#allocation22_spill] sm:$0xff] }
 0x253   :  { %1786 = vst.msk [vmem:[%s4379_s4 + $0x100] sm:$0xff] %vm245_vm0, %v1722_v23  ;;  %1787 = vst.msk [vmem:[%s4379_s4 + $0x108] sm:$0xff] %vm245_vm0, %v1723_v54  ;;  %v1752_v25 = vmax.f32 %v4495_v26, 0.0 }
 0x254   :  { %1788 = vst.msk [vmem:[%s4379_s4 + $0x110] sm:$0xff] %vm245_vm0, %v1724_v31  ;;  %1789 = vst.msk [vmem:[%s4379_s4 + $0x118] sm:$0xff] %vm245_vm0, %v1725_v29 }
 0x255   :  { %1790 = vst.msk [vmem:[%s4379_s4 + $0x120] sm:$0xff] %vm245_vm0, %v1726_v44  ;;  %1791 = vst.msk [vmem:[%s4379_s4 + $0x128] sm:$0xff] %vm245_vm0, %v1727_v12 }
 0x256   :  { %1792 = vst.msk [vmem:[%s4379_s4 + $0x130] sm:$0xff] %vm245_vm0, %v1728_v37  ;;  %1793 = vst.msk [vmem:[%s4379_s4 + $0x138] sm:$0xff] %vm245_vm0, %v1729_v20 }
 0x257   :  { %1794 = vst.msk [vmem:[%s4379_s4 + $0x140] sm:$0xff] %vm245_vm0, %v1730_v62  ;;  %1795 = vst.msk [vmem:[%s4379_s4 + $0x148] sm:$0xff] %vm245_vm0, %v1731_v1 }
 0x258   :  { %1796 = vst.msk [vmem:[%s4379_s4 + $0x150] sm:$0xff] %vm245_vm0, %v1732_v9  ;;  %1797 = vst.msk [vmem:[%s4379_s4 + $0x158] sm:$0xff] %vm245_vm0, %v1733_v28 }
 0x259   :  { %1798 = vst.msk [vmem:[%s4379_s4 + $0x160] sm:$0xff] %vm245_vm0, %v1734_v45  ;;  %1799 = vst.msk [vmem:[%s4379_s4 + $0x168] sm:$0xff] %vm245_vm0, %v1735_v63 }
 0x25a   :  { %1800 = vst.msk [vmem:[%s4379_s4 + $0x170] sm:$0xff] %vm245_vm0, %v1736_v42  ;;  %1801 = vst.msk [vmem:[%s4379_s4 + $0x178] sm:$0xff] %vm245_vm0, %v1737_v10 }
 0x25b   :  { %1802 = vst.msk [vmem:[%s4379_s4 + $0x180] sm:$0xff] %vm245_vm0, %v1738_v53  ;;  %1803 = vst.msk [vmem:[%s4379_s4 + $0x188] sm:$0xff] %vm245_vm0, %v1739_v39 }
 0x25c   :  { %1804 = vst.msk [vmem:[%s4379_s4 + $0x190] sm:$0xff] %vm245_vm0, %v1740_v34  ;;  %1805 = vst.msk [vmem:[%s4379_s4 + $0x198] sm:$0xff] %vm245_vm0, %v1741_v3 }
 0x25d   :  { %1806 = vst.msk [vmem:[%s4379_s4 + $0x1a0] sm:$0xff] %vm245_vm0, %v1742_v59  ;;  %1807 = vst.msk [vmem:[%s4379_s4 + $0x1a8] sm:$0xff] %vm245_vm0, %v1743_v50 }
 0x25e   :  { %1808 = vst.msk [vmem:[%s4379_s4 + $0x1b0] sm:$0xff] %vm245_vm0, %v1744_v6  ;;  %1809 = vst.msk [vmem:[%s4379_s4 + $0x1b8] sm:$0xff] %vm245_vm0, %v1745_v60 }
 0x25f   :  { %1810 = vst.msk [vmem:[%s4379_s4 + $0x1c0] sm:$0xff] %vm245_vm0, %v1746_v56  ;;  %1811 = vst.msk [vmem:[%s4379_s4 + $0x1c8] sm:$0xff] %vm245_vm0, %v1747_v8 }
 0x260   :  { %1812 = vst.msk [vmem:[%s4379_s4 + $0x1d0] sm:$0xff] %vm245_vm0, %v1748_v4  ;;  %1813 = vst.msk [vmem:[%s4379_s4 + $0x1d8] sm:$0xff] %vm245_vm0, %v1749_v35 }
 0x261   :  { %1814 = vst.msk [vmem:[%s4379_s4 + $0x1e0] sm:$0xff] %vm245_vm0, %v1750_v32  ;;  %1815 = vst.msk [vmem:[%s4379_s4 + $0x1e8] sm:$0xff] %vm245_vm0, %v1751_v36 }
 0x262   :  { %1816 = vst.msk [vmem:[%s4379_s4 + $0x1f0] sm:$0xff] %vm245_vm0, %v1752_v25  ;;  %1817 = vst.msk [vmem:[%s4379_s4 + $0x1f8] sm:$0xff] %vm245_vm0, %v1753_v40 }

// kernel: _reference_encoder_forward.11
= control target key start
LH: loop header
LB: loop body
LE: loop exit
PB: predicated region body
PF: predicated region fallthrough
CT: control target
= control target key end

     0   :  { %vm101_vm0 = vcmask 261120   ;;  %vm440_vm1 = vcmask 523264   ;;  %s1332_s1 = inlined_call_operand.vmem [shape: f32[288,64], index: 1, kind: input, shape index: {}]   ;;  %s1333_s0 = inlined_call_operand.vmem [shape: f32[128,288], index: 0, kind: input, shape index: {}]   ;;  %s1334_s2 = inlined_call_operand.vmem [shape: f32[1,64], index: 2, kind: input, shape index: {}]   ;;  %s1335_s3 = inlined_call_operand.vmem [shape: f32[1,64], index: 3, kind: input, shape index: {}]   ;;  %s1336_s4 = inlined_call_operand.vmem [shape: f32[128,64], index: 4, kind: output, shape index: {}]  }
   0x1   :  { %v81_v0 = vld [vmem:[%s1332_s1 + $0x80] sm:$0xff]  ;;  %v82_v1 = vld [vmem:[%s1332_s1 + $0x88] sm:$0xff]  ;;  %v83_v5 = vld [vmem:[%s1332_s1 + $0x90] sm:$0xff] }
   0x2   :  { %v65_v2 = vld [vmem:[%s1332_s1] sm:$0xff]  ;;  %v771_v3 = vpack.c.bf16 %v82_v1, %v81_v0  ;;  %v66_v4 = vld [vmem:[%s1332_s1 + $0x8] sm:$0xff]  ;;  %v84_v6 = vld [vmem:[%s1332_s1 + $0x98] sm:$0xff] }
   0x3   :  { %v773_v7 = vpack.c.bf16 %v66_v4, %v65_v2  ;;  %v775_v8 = vpack.c.bf16 %v84_v6, %v83_v5  ;;  %v67_v9 = vld [vmem:[%s1332_s1 + $0x10] sm:$0xff]  ;;  %v68_v10 = vld [vmem:[%s1332_s1 + $0x18] sm:$0xff]  ;;  %v85_v11 = vld [vmem:[%s1332_s1 + $0xa0] sm:$0xff] }
   0x4   :  { %772 = vmatprep.subr.bf16.mxu0 %v771_v3  ;;  %811 = vmatprep.subr.bf16.mxu1 %v771_v3  ;;  %v86_v12 = vld [vmem:[%s1332_s1 + $0xa8] sm:$0xff]  ;;  %v777_v13 = vpack.c.bf16 %v68_v10, %v67_v9  ;;  %v69_v15 = vld [vmem:[%s1332_s1 + $0x20] sm:$0xff]  ;;  %v87_v17 = vld [vmem:[%s1332_s1 + $0xb0] sm:$0xff] }
   0x5   :  { %774 = vmatpush3.bf16.msra.mxu0 %v773_v7  ;;  %819 = vmatpush3.bf16.msra.mxu1 %v773_v7  ;;  %v779_v14 = vpack.c.bf16 %v86_v12, %v85_v11  ;;  %v70_v16 = vld [vmem:[%s1332_s1 + $0x28] sm:$0xff]  ;;  %v88_v18 = vld [vmem:[%s1332_s1 + $0xb8] sm:$0xff]  ;;  %v71_v21 = vld [vmem:[%s1332_s1 + $0x30] sm:$0xff] }
   0x6   :  { %776 = vmatprep.subr.bf16.mxu0 %v775_v8  ;;  %812 = vmatprep.subr.bf16.mxu1 %v775_v8  ;;  %v781_v19 = vpack.c.bf16 %v70_v16, %v69_v15  ;;  %v783_v20 = vpack.c.bf16 %v88_v18, %v87_v17  ;;  %v72_v22 = vld [vmem:[%s1332_s1 + $0x38] sm:$0xff]  ;;  %v89_v23 = vld [vmem:[%s1332_s1 + $0xc0] sm:$0xff]  ;;  %v90_v24 = vld [vmem:[%s1332_s1 + $0xc8] sm:$0xff] }
   0x7   :  { %v18_v25 = vld [vmem:[%s1333_s0 + $0x8] sm:$0xff]  ;;  %v785_v27 = vpack.c.bf16 %v72_v22, %v71_v21  ;;  %v787_v28 = vpack.c.bf16 %v90_v24, %v89_v23  ;;  %v73_v29 = vld [vmem:[%s1332_s1 + $0x40] sm:$0xff]  ;;  %v91_v31 = vld [vmem:[%s1332_s1 + $0xd0] sm:$0xff] }
   0x8   :  { %214 = vmatprep.mubr.f32.mxu0 %v18_v25  ;;  %v54_v26 = vld [vmem:[%s1333_s0 + $0x128] sm:$0xff]  ;;  %v92_v32 = vld [vmem:[%s1332_s1 + $0xd8] sm:$0xff]  ;;  %v75_v35 = vld [vmem:[%s1332_s1 + $0x50] sm:$0xff] }
   0x9   :  { %778 = vmatpush3.bf16.msra.mxu0 %v777_v13  ;;  %820 = vmatpush3.bf16.msra.mxu1 %v777_v13  ;;  %v74_v30 = vld [vmem:[%s1332_s1 + $0x48] sm:$0xff]  ;;  %v791_v34 = vpack.c.bf16 %v92_v32, %v91_v31  ;;  %v76_v36 = vld [vmem:[%s1332_s1 + $0x58] sm:$0xff]  ;;  %v93_v37 = vld [vmem:[%s1332_s1 + $0xe0] sm:$0xff] }
   0xa   :  { %780 = vmatprep.subr.bf16.mxu0 %v779_v14  ;;  %813 = vmatprep.subr.bf16.mxu1 %v779_v14  ;;  %v789_v33 = vpack.c.bf16 %v74_v30, %v73_v29  ;;  %v94_v38 = vld [vmem:[%s1332_s1 + $0xe8] sm:$0xff]  ;;  %v793_v39 = vpack.c.bf16 %v76_v36, %v75_v35  ;;  %v77_v41 = vld [vmem:[%s1332_s1 + $0x60] sm:$0xff]  ;;  %v95_v43 = vld [vmem:[%s1332_s1 + $0xf0] sm:$0xff] }
   0xb   :  { %274 = vmatprep.mubr.f32.mxu1 %v54_v26  ;;  %v795_v40 = vpack.c.bf16 %v94_v38, %v93_v37  ;;  %v78_v42 = vld [vmem:[%s1332_s1 + $0x68] sm:$0xff]  ;;  %v96_v44 = vld [vmem:[%s1332_s1 + $0xf8] sm:$0xff]  ;;  %v79_v47 = vld [vmem:[%s1332_s1 + $0x70] sm:$0xff] }
   0xc   :  { %v797_v45 = vpack.c.bf16 %v78_v42, %v77_v41  ;;  %v799_v46 = vpack.c.bf16 %v96_v44, %v95_v43  ;;  %v80_v48 = vld [vmem:[%s1332_s1 + $0x78] sm:$0xff]  ;;  %v97_v49 = vld [vmem:[%s1332_s1 + $0x100] sm:$0xff]  ;;  %v98_v50 = vld [vmem:[%s1332_s1 + $0x108] sm:$0xff] }
   0xd   :  { %782 = vmatpush3.bf16.msra.mxu0 %v781_v19  ;;  %821 = vmatpush3.bf16.msra.mxu1 %v781_v19  ;;  %v801_v51 = vpack.c.bf16 %v80_v48, %v79_v47  ;;  %v803_v52 = vpack.c.bf16 %v98_v50, %v97_v49  ;;  %v99_v53 = vld [vmem:[%s1332_s1 + $0x110] sm:$0xff]  ;;  %v100_v54 = vld [vmem:[%s1332_s1 + $0x118] sm:$0xff]  ;;  %v17_v55 = vld [vmem:[%s1333_s0] sm:$0xff] }
   0xe   :  { %784 = vmatprep.subr.bf16.mxu0 %v783_v20  ;;  %814 = vmatprep.subr.bf16.mxu1 %v783_v20  ;;  %v53_v56 = vld [vmem:[%s1333_s0 + $0x120] sm:$0xff]  ;;  %v807_v59 = vpack.c.bf16 %v100_v54, %v99_v53  ;;  %v20_v60 = vld [vmem:[%s1333_s0 + $0x18] sm:$0xff]  ;;  %v23_v0 = vld [vmem:[%s1333_s0 + $0x30] sm:$0xff] }
   0xf   :  { %v21_v57 = vld [vmem:[%s1333_s0 + $0x20] sm:$0xff]  ;;  %v56_v61 = vld [vmem:[%s1333_s0 + $0x138] sm:$0xff]  ;;  %v59_v1 = vld [vmem:[%s1333_s0 + $0x150] sm:$0xff] }
  0x10   :  { %v57_v58 = vld [vmem:[%s1333_s0 + $0x140] sm:$0xff]  ;;  %v24_v62 = vld [vmem:[%s1333_s0 + $0x38] sm:$0xff]  ;;  %v27_v2 = vld [vmem:[%s1333_s0 + $0x50] sm:$0xff] }
  0x11   :  { %786 = vmatpush3.bf16.msra.mxu0 %v785_v27  ;;  %822 = vmatpush3.bf16.msra.mxu1 %v785_v27  ;;  %v60_v63 = vld [vmem:[%s1333_s0 + $0x158] sm:$0xff]  ;;  %v63_v3 = vld [vmem:[%s1333_s0 + $0x170] sm:$0xff]  ;;  %v26_v4 = vld [vmem:[%s1333_s0 + $0x48] sm:$0xff] }
  0x12   :  { %788 = vmatprep.subr.bf16.mxu0 %v787_v28  ;;  %815 = vmatprep.subr.bf16.mxu1 %v787_v28  ;;  %v62_v5 = vld [vmem:[%s1333_s0 + $0x168] sm:$0xff]  ;;  %v19_v7 = vld [vmem:[%s1333_s0 + $0x10] sm:$0xff]  ;;  %v29_v8 = vld [vmem:[%s1333_s0 + $0x60] sm:$0xff] }
  0x13   :  { %v30_v6 = vld [vmem:[%s1333_s0 + $0x68] sm:$0xff]  ;;  %v33_v10 = vld [vmem:[%s1333_s0 + $0x80] sm:$0xff]  ;;  %v32_v12 = vld [vmem:[%s1333_s0 + $0x78] sm:$0xff] }
  0x14   :  { %v22_v9 = vld [vmem:[%s1333_s0 + $0x28] sm:$0xff]  ;;  %v25_v11 = vld [vmem:[%s1333_s0 + $0x40] sm:$0xff]  ;;  %v28_v13 = vld [vmem:[%s1333_s0 + $0x58] sm:$0xff] }
  0x15   :  { %790 = vmatpush3.bf16.msra.mxu0 %v789_v33  ;;  %823 = vmatpush3.bf16.msra.mxu1 %v789_v33  ;;  %v36_v14 = vld [vmem:[%s1333_s0 + $0x98] sm:$0xff]  ;;  %v31_v15 = vld [vmem:[%s1333_s0 + $0x70] sm:$0xff]  ;;  %v34_v17 = vld [vmem:[%s1333_s0 + $0x88] sm:$0xff] }
  0x16   :  { %792 = vmatprep.subr.bf16.mxu0 %v791_v34  ;;  %816 = vmatprep.subr.bf16.mxu1 %v791_v34  ;;  %v35_v16 = vld [vmem:[%s1333_s0 + $0x90] sm:$0xff]  ;;  %v37_v19 = vld [vmem:[%s1333_s0 + $0xa0] sm:$0xff]  ;;  %v38_v20 = vld [vmem:[%s1333_s0 + $0xa8] sm:$0xff] }
  0x17   :  { %v39_v18 = vld [vmem:[%s1333_s0 + $0xb0] sm:$0xff]  ;;  %v40_v21 = vld [vmem:[%s1333_s0 + $0xb8] sm:$0xff]  ;;  %v42_v22 = vld [vmem:[%s1333_s0 + $0xc8] sm:$0xff] }
  0x18   :  { %v43_v23 = vld [vmem:[%s1333_s0 + $0xd0] sm:$0xff]  ;;  %v41_v24 = vld [vmem:[%s1333_s0 + $0xc0] sm:$0xff]  ;;  %v46_v25 = vld [vmem:[%s1333_s0 + $0xe8] sm:$0xff] }
  0x19   :  { %794 = vmatpush3.bf16.msra.mxu0 %v793_v39  ;;  %824 = vmatpush3.bf16.msra.mxu1 %v793_v39  ;;  %v45_v26 = vld [vmem:[%s1333_s0 + $0xe0] sm:$0xff]  ;;  %v44_v28 = vld [vmem:[%s1333_s0 + $0xd8] sm:$0xff]  ;;  %v55_v31 = vld [vmem:[%s1333_s0 + $0x130] sm:$0xff] }
  0x1a   :  { %796 = vmatprep.subr.bf16.mxu0 %v795_v40  ;;  %817 = vmatprep.subr.bf16.mxu1 %v795_v40  ;;  %v49_v27 = vld [vmem:[%s1333_s0 + $0x100] sm:$0xff]  ;;  %v52_v29 = vld [vmem:[%s1333_s0 + $0x118] sm:$0xff]  ;;  %v47_v32 = vld [vmem:[%s1333_s0 + $0xf0] sm:$0xff] }
  0x1b   :  { %v48_v30 = vld [vmem:[%s1333_s0 + $0xf8] sm:$0xff]  ;;  %v58_v33 = vld [vmem:[%s1333_s0 + $0x148] sm:$0xff]  ;;  %v51_v34 = vld [vmem:[%s1333_s0 + $0x110] sm:$0xff] }
  0x1c   :  { %v61_v35 = vld [vmem:[%s1333_s0 + $0x160] sm:$0xff]  ;;  %v50_v36 = vld [vmem:[%s1333_s0 + $0x108] sm:$0xff]  ;;  %v64_v37 = vld [vmem:[%s1333_s0 + $0x178] sm:$0xff] }
  0x1d   :  { %798 = vmatpush3.bf16.msra.mxu0 %v797_v45  ;;  %825 = vmatpush3.bf16.msra.mxu1 %v797_v45 }
  0x1e   :  { %800 = vmatprep.subr.bf16.mxu0 %v799_v46  ;;  %818 = vmatprep.subr.bf16.mxu1 %v799_v46 }
  0x21   :  { %802 = vmatpush3.bf16.msra.mxu0 %v801_v51  ;;  %826 = vmatpush3.bf16.msra.mxu1 %v801_v51 }
  0x22   :  { %804 = vmatprep.subr.bf16.mxu1 %v803_v52 }
  0x24   :  { %215 = vmatmul.mubr.f32.vlgmr.msra.gmra.mrb[0].mxu0 %v17_v55  ;;  %275 = vmatmul.mubr.f32.vlgmr.msra.gmra.mrb[0].mxu1 %v53_v56 }
  0x25   :  { %219 = vmatprep.mubr.f32.mxu0 %v21_v57  ;;  %279 = vmatprep.mubr.f32.mxu1 %v57_v58 }
  0x26   :  { %806 = vmatpush3.bf16.msra.mxu1 %v803_v52 }
  0x27   :  { %808 = vmatprep.subr.bf16.mxu1 %v807_v59 }
  0x28   :  { %220 = vmatmul.mubr.f32.gmra.mrb[2].mxu0 %v20_v60  ;;  %280 = vmatmul.mubr.f32.gmra.mrb[2].mxu1 %v56_v61 }
  0x29   :  { %224 = vmatprep.mubr.f32.mxu0 %v24_v62  ;;  %284 = vmatprep.mubr.f32.mxu1 %v60_v63 }
  0x2a   :  { %810 = vmatpush3.bf16.msra.mxu1 %v807_v59 }
  0x2c   :  { %225 = vmatmul.mubr.f32.gmra.mrb[4].mxu0 %v23_v0  ;;  %285 = vmatmul.mubr.f32.gmra.mrb[4].mxu1 %v59_v1 }
  0x2d   :  { %229 = vmatprep.mubr.f32.mxu0 %v27_v2  ;;  %289 = vmatprep.mubr.f32.mxu1 %v63_v3 }
  0x30   :  { %230 = vmatmul.mubr.f32.gmra.mrb[6].mxu0 %v26_v4  ;;  %290 = vmatmul.mubr.f32.gmra.mrb[6].mxu1 %v62_v5 }
  0x31   :  { %234 = vmatprep.mubr.f32.mxu0 %v30_v6  ;;  %747 = vmatprep.mubr.msk.f32.mxu1 %vm101_vm0, %v19_v7 }
  0x34   :  { %235 = vmatmul.mubr.f32.gmra.mrb[8].mxu0 %v29_v8  ;;  %748 = vmatmul.mubr.msk.f32.vlgmr.msra.gmra.mrb[8].mxu1 %vm101_vm0, %v22_v9 }
  0x35   :  { %239 = vmatprep.mubr.f32.mxu0 %v33_v10  ;;  %750 = vmatprep.mubr.msk.f32.mxu1 %vm101_vm0, %v25_v11 }
  0x38   :  { %240 = vmatmul.mubr.f32.gmra.mrb[10].mxu0 %v32_v12  ;;  %751 = vmatmul.mubr.msk.f32.gmra.mrb[10].mxu1 %vm101_vm0, %v28_v13 }
  0x39   :  { %244 = vmatprep.mubr.f32.mxu0 %v36_v14  ;;  %753 = vmatprep.mubr.msk.f32.mxu1 %vm101_vm0, %v31_v15 }
  0x3c   :  { %245 = vmatmul.mubr.f32.gmra.mrb[12].mxu0 %v35_v16  ;;  %754 = vmatmul.mubr.msk.f32.gmra.mrb[12].mxu1 %vm101_vm0, %v34_v17 }
  0x3d   :  { %249 = vmatprep.mubr.f32.mxu0 %v39_v18  ;;  %756 = vmatprep.mubr.msk.f32.mxu1 %vm101_vm0, %v37_v19 }
  0x40   :  { %250 = vmatmul.mubr.f32.gmra.mrb[14].mxu0 %v38_v20  ;;  %757 = vmatmul.mubr.msk.f32.gmra.mrb[14].mxu1 %vm101_vm0, %v40_v21 }
  0x41   :  { %254 = vmatprep.mubr.f32.mxu0 %v42_v22  ;;  %759 = vmatprep.mubr.msk.f32.mxu1 %vm101_vm0, %v43_v23 }
  0x44   :  { %255 = vmatmul.mubr.f32.gmra.mrb[16].mxu0 %v41_v24  ;;  %760 = vmatmul.mubr.msk.f32.gmra.mrb[16].mxu1 %vm101_vm0, %v46_v25 }
  0x45   :  { %259 = vmatprep.mubr.f32.mxu0 %v45_v26  ;;  %762 = vmatprep.mubr.msk.f32.mxu1 %vm101_vm0, %v49_v27 }
  0x48   :  { %260 = vmatmul.mubr.f32.gmra.mrb[18].mxu0 %v44_v28  ;;  %763 = vmatmul.mubr.msk.f32.gmra.mrb[18].mxu1 %vm101_vm0, %v52_v29 }
  0x49   :  { %264 = vmatprep.mubr.f32.mxu0 %v48_v30  ;;  %765 = vmatprep.mubr.msk.f32.mxu1 %vm101_vm0, %v55_v31 }
  0x4c   :  { %265 = vmatmul.mubr.f32.gmra.mrb[20].mxu0 %v47_v32  ;;  %766 = vmatmul.mubr.msk.f32.gmra.mrb[20].mxu1 %vm101_vm0, %v58_v33 }
  0x4d   :  { %269 = vmatprep.mubr.f32.mxu0 %v51_v34  ;;  %768 = vmatprep.mubr.msk.f32.mxu1 %vm101_vm0, %v61_v35 }
  0x50   :  { %270 = vmatmul.mubr.f32.gmra.mrb[22].mxu0 %v50_v36  ;;  %769 = vmatmul.mubr.msk.f32.gmra.mrb[22].mxu1 %vm101_vm0, %v64_v37 }
  0xf7   :  { %v671_v38 = vpop.f32.mrb[0].mxu0  ;;  %v707_v39 = vpop.f32.mrb[0].mxu1 }
  0xf8   :  { %v672_v40 = vpop.f32.mrb[1].mxu0  ;;  %v708_v41 = vpop.f32.mrb[1].mxu1 }
  0xf9   :  { %v673_v42 = vadd.f32 %v672_v40, %v671_v38  ;;  %v1122_v43 = vadd.f32 %v708_v41, %v707_v39 }
  0xfb   :  { %v674_v44 = vpop.f32.mrb[2].mxu0  ;;  %v710_v45 = vpop.f32.mrb[2].mxu1 }
  0xfc   :  { %v675_v46 = vpop.f32.mrb[3].mxu0  ;;  %v711_v47 = vpop.f32.mrb[3].mxu1 }
  0xfd   :  { %v676_v48 = vadd.f32 %v675_v46, %v674_v44  ;;  %v1124_v49 = vadd.f32 %v711_v47, %v710_v45 }
  0xff   :  { %v677_v50 = vpop.f32.mrb[4].mxu0  ;;  %v713_v51 = vpop.f32.mrb[4].mxu1 }
 0x100   :  { %v678_v52 = vpop.f32.mrb[5].mxu0  ;;  %v714_v53 = vpop.f32.mrb[5].mxu1 }
 0x101   :  { %v679_v54 = vadd.f32 %v678_v52, %v677_v50  ;;  %v1126_v55 = vadd.f32 %v714_v53, %v713_v51 }
 0x103   :  { %v680_v56 = vpop.f32.mrb[6].mxu0  ;;  %v716_v57 = vpop.f32.mrb[6].mxu1 }
 0x104   :  { %v681_v58 = vpop.f32.mrb[7].mxu0  ;;  %v717_v59 = vpop.f32.mrb[7].mxu1 }
 0x105   :  { %v682_v60 = vadd.f32 %v681_v58, %v680_v56  ;;  %v1128_v61 = vadd.f32 %v717_v59, %v716_v57 }
 0x107   :  { %v683_v62 = vpop.f32.mrb[8].mxu0  ;;  %v749_v63 = vpop.f32.mrb[8].mxu1 }
 0x108   :  { %v1130_v0 = vadd.f32 %v749_v63, %v676_v48  ;;  %v684_v1 = vpop.f32.mrb[9].mxu0  ;;  %v361_v2 = vpop.f32.mrb[9].mxu1 }
 0x109   :  { %v685_v3 = vadd.f32 %v684_v1, %v683_v62  ;;  %v1132_v4 = vadd.f32 %v673_v42, %v361_v2 }
 0x10a   :  { %v480_v5 = vmul.f32 %v1130_v0, %v1130_v0  ;;  %v442_v6 = vsel %vm440_vm1, %v1130_v0, 0.0 }
 0x10b   :  { %v441_v7 = vsel %vm440_vm1, %v1132_v4, 0.0  ;;  %v479_v8 = vmul.f32 %v1132_v4, %v1132_v4  ;;  %v686_v9 = vpop.f32.mrb[10].mxu0  ;;  %v752_v10 = vpop.f32.mrb[10].mxu1 }
 0x10c   :  { %v1142_v11 = vadd.f32 %v752_v10, %v682_v60  ;;  %v687_v12 = vpop.f32.mrb[11].mxu0  ;;  %v371_v13 = vpop.f32.mrb[11].mxu1  ;;  %v496_v14 = vsel %vm440_vm1, %v480_v5, 0.0  ;;  %v443_v18 = vadd.f32 %v442_v6, %v441_v7 }
 0x10d   :  { %v495_v15 = vsel %vm440_vm1, %v479_v8, 0.0  ;;  %v688_v16 = vadd.f32 %v687_v12, %v686_v9  ;;  %v1146_v17 = vadd.f32 %v679_v54, %v371_v13 }
 0x10e   :  { %v482_v19 = vmul.f32 %v1142_v11, %v1142_v11  ;;  %v497_v24 = vadd.f32 %v496_v14, %v495_v15  ;;  %v446_v29 = vsel %vm440_vm1, %v1142_v11, 0.0 }
 0x10f   :  { %v444_v20 = vsel %vm440_vm1, %v1146_v17, 0.0  ;;  %v481_v21 = vmul.f32 %v1146_v17, %v1146_v17  ;;  %v689_v22 = vpop.f32.mrb[12].mxu0  ;;  %v755_v23 = vpop.f32.mrb[12].mxu1 }
 0x110   :  { %v445_v25 = vadd.f32 %v444_v20, %v443_v18  ;;  %v1154_v26 = vadd.f32 %v755_v23, %v688_v16  ;;  %v690_v27 = vpop.f32.mrb[13].mxu0  ;;  %v381_v28 = vpop.f32.mrb[13].mxu1  ;;  %v500_v35 = vsel %vm440_vm1, %v482_v19, 0.0 }
 0x111   :  { %v498_v30 = vsel %vm440_vm1, %v481_v21, 0.0  ;;  %v691_v31 = vadd.f32 %v690_v27, %v689_v22  ;;  %v1159_v32 = vadd.f32 %v685_v3, %v381_v28 }
 0x112   :  { %v499_v33 = vadd.f32 %v498_v30, %v497_v24  ;;  %v447_v34 = vadd.f32 %v446_v29, %v445_v25  ;;  %v484_v36 = vmul.f32 %v1154_v26, %v1154_v26  ;;  %v450_v46 = vsel %vm440_vm1, %v1154_v26, 0.0 }
 0x113   :  { %v448_v37 = vsel %vm440_vm1, %v1159_v32, 0.0  ;;  %v483_v38 = vmul.f32 %v1159_v32, %v1159_v32  ;;  %v692_v39 = vpop.f32.mrb[14].mxu0  ;;  %v758_v40 = vpop.f32.mrb[14].mxu1 }
 0x114   :  { %v449_v41 = vadd.f32 %v448_v37, %v447_v34  ;;  %v501_v42 = vadd.f32 %v500_v35, %v499_v33  ;;  %v693_v44 = vpop.f32.mrb[15].mxu0  ;;  %v391_v45 = vpop.f32.mrb[15].mxu1  ;;  %v504_v53 = vsel %vm440_vm1, %v484_v36, 0.0 }
 0x115   :  { %v502_v47 = vsel %vm440_vm1, %v483_v38, 0.0  ;;  %v694_v48 = vadd.f32 %v693_v44, %v692_v39  ;;  %v1171_v50 = vadd.f32 %v691_v31, %v391_v45 }
 0x116   :  { %v503_v51 = vadd.f32 %v502_v47, %v501_v42  ;;  %v451_v52 = vadd.f32 %v450_v46, %v449_v41 }
 0x117   :  { %v1174_v54 = vadd.f32 %v758_v40, %v694_v48  ;;  %v452_v56 = vsel %vm440_vm1, %v1171_v50, 0.0  ;;  %v485_v57 = vmul.f32 %v1171_v50, %v1171_v50  ;;  %v695_v58 = vpop.f32.mrb[16].mxu0  ;;  %v761_v59 = vpop.f32.mrb[16].mxu1 }
 0x118   :  { %v453_v60 = vadd.f32 %v452_v56, %v451_v52  ;;  %v505_v62 = vadd.f32 %v504_v53, %v503_v51  ;;  %v696_v63 = vpop.f32.mrb[17].mxu0  ;;  %v401_v1 = vpop.f32.mrb[17].mxu1 }
 0x119   :  { %v454_v2 = vsel %vm440_vm1, %v1174_v54, 0.0  ;;  %v486_v3 = vmul.f32 %v1174_v54, %v1174_v54  ;;  %v506_v5 = vsel %vm440_vm1, %v485_v57, 0.0  ;;  %v697_v6 = vadd.f32 %v696_v63, %v695_v58 }
 0x11a   :  { %v507_v7 = vadd.f32 %v506_v5, %v505_v62  ;;  %v455_v8 = vadd.f32 %v454_v2, %v453_v60 }
 0x11b   :  { %v508_v9 = vsel %vm440_vm1, %v486_v3, 0.0  ;;  %v1186_v10 = vadd.f32 %v697_v6, %v401_v1  ;;  %v698_v12 = vpop.f32.mrb[18].mxu0  ;;  %v764_v13 = vpop.f32.mrb[18].mxu1 }
 0x11c   :  { %v509_v14 = vadd.f32 %v508_v9, %v507_v7  ;;  %v699_v15 = vpop.f32.mrb[19].mxu0  ;;  %v411_v16 = vpop.f32.mrb[19].mxu1 }
 0x11d   :  { %v456_v18 = vsel %vm440_vm1, %v1186_v10, 0.0  ;;  %v487_v19 = vmul.f32 %v1186_v10, %v1186_v10  ;;  %v700_v20 = vadd.f32 %v699_v15, %v698_v12 }
 0x11e   :  { %v457_v21 = vadd.f32 %v456_v18, %v455_v8 }
 0x11f   :  { %v510_v22 = vsel %vm440_vm1, %v487_v19, 0.0  ;;  %v1193_v23 = vadd.f32 %v761_v59, %v700_v20  ;;  %v701_v24 = vpop.f32.mrb[20].mxu0  ;;  %v767_v25 = vpop.f32.mrb[20].mxu1 }
 0x120   :  { %v511_v27 = vadd.f32 %v510_v22, %v509_v14  ;;  %v1196_v28 = vadd.f32 %v767_v25, %v1124_v49  ;;  %v702_v29 = vpop.f32.mrb[21].mxu0  ;;  %v421_v30 = vpop.f32.mrb[21].mxu1 }
 0x121   :  { %v458_v31 = vsel %vm440_vm1, %v1193_v23, 0.0  ;;  %v488_v33 = vmul.f32 %v1193_v23, %v1193_v23  ;;  %v703_v34 = vadd.f32 %v702_v29, %v701_v24  ;;  %v1203_v35 = vadd.f32 %v1122_v43, %v421_v30 }
 0x122   :  { %v459_v36 = vadd.f32 %v458_v31, %v457_v21  ;;  %v492_v59 = vmul.f32 %v1196_v28, %v1196_v28  ;;  %v466_v1 = vsel %vm440_vm1, %v1196_v28, 0.0 }
 0x123   :  { %v512_v37 = vsel %vm440_vm1, %v488_v33, 0.0  ;;  %v1206_v38 = vadd.f32 %v703_v34, %v411_v16  ;;  %v704_v39 = vpop.f32.mrb[22].mxu0  ;;  %v770_v49 = vpop.f32.mrb[22].mxu1 }
 0x124   :  { %v513_v40 = vadd.f32 %v512_v37, %v511_v27  ;;  %v1209_v41 = vadd.f32 %v770_v49, %v1128_v61  ;;  %v705_v42 = vpop.f32.mrb[23].mxu0  ;;  %v431_v44 = vpop.f32.mrb[23].mxu1  ;;  %v491_v61 = vmul.f32 %v1203_v35, %v1203_v35  ;;  %v520_v7 = vsel %vm440_vm1, %v492_v59, 0.0 }
 0x125   :  { %v460_v45 = vsel %vm440_vm1, %v1206_v38, 0.0  ;;  %v489_v43 = vmul.f32 %v1206_v38, %v1206_v38  ;;  %v706_v46 = vadd.f32 %v705_v42, %v704_v39  ;;  %v1216_v48 = vadd.f32 %v1126_v55, %v431_v44 }
 0x126   :  { %v461_v47 = vadd.f32 %v460_v45, %v459_v36  ;;  %v464_v55 = vsel %vm440_vm1, %v1203_v35, 0.0  ;;  %v518_v2 = vsel %vm440_vm1, %v491_v61, 0.0  ;;  %v494_v8 = vmul.f32 %v1209_v41, %v1209_v41 }
 0x127   :  { %v514_v51 = vsel %vm440_vm1, %v489_v43, 0.0  ;;  %v1219_v52 = vadd.f32 %v764_v13, %v706_v46  ;;  %v493_v3 = vmul.f32 %v1216_v48, %v1216_v48  ;;  %v468_v9 = vsel %vm440_vm1, %v1216_v48, 0.0 }
 0x128   :  { %v515_v53 = vadd.f32 %v514_v51, %v513_v40  ;;  %v470_v14 = vsel %vm440_vm1, %v1209_v41, 0.0  ;;  %v524_v19 = vsel %vm440_vm1, %v494_v8, 0.0  ;;  %v544_v43 = vlaneseq }
 0x129   :  { %v462_v56 = vsel %vm440_vm1, %v1219_v52, 0.0  ;;  %v490_v57 = vmul.f32 %v1219_v52, %v1219_v52  ;;  %v522_v15 = vsel %vm440_vm1, %v493_v3, 0.0 }
 0x12a   :  { %v463_v58 = vadd.f32 %v462_v56, %v461_v47  ;;  %v545_v46 = vshrl.u32 %v544_v43, 7  ;;  %v538_v47 = vld [vmem:[%s1334_s2] sm:$0x1] }
 0x12b   :  { %v516_v60 = vsel %vm440_vm1, %v490_v57, 0.0  ;;  %v540_v56 = vld [vmem:[%s1335_s3] sm:$0x1] }
 0x12c   :  { %v517_v62 = vadd.f32 %v516_v60, %v515_v53  ;;  %v465_v63 = vadd.f32 %v464_v55, %v463_v58  ;;  %v546_v51 = vsub.s32 0, %v545_v46 }
 0x12e   :  { %v467_v5 = vadd.f32 %v466_v1, %v465_v63  ;;  %v519_v6 = vadd.f32 %v518_v2, %v517_v62 }
 0x130   :  { %v469_v12 = vadd.f32 %v468_v9, %v467_v5  ;;  %v521_v13 = vadd.f32 %v520_v7, %v519_v6 }
 0x132   :  { %v471_v16 = vadd.f32 %v470_v14, %v469_v12  ;;  %v523_v18 = vadd.f32 %v522_v15, %v521_v13 }
 0x134   :  { %v472_v20 = vrot.slane %v471_v16, 4  ;;  %v525_v21 = vadd.f32 %v524_v19, %v523_v18 }
 0x136   :  { %v473_v22 = vadd.f32 %v472_v20, %v471_v16  ;;  %v526_v24 = vrot.slane %v525_v21, 4 }
 0x138   :  { %v474_v25 = vrot.slane %v473_v22, 2  ;;  %v527_v27 = vadd.f32 %v526_v24, %v525_v21 }
 0x13a   :  { %v475_v29 = vadd.f32 %v474_v25, %v473_v22  ;;  %v528_v30 = vrot.slane %v527_v27, 2 }
 0x13c   :  { %v476_v31 = vrot.slane %v475_v29, 1  ;;  %v529_v33 = vadd.f32 %v528_v30, %v527_v27 }
 0x13e   :  { %v477_v34 = vadd.f32 %v476_v31, %v475_v29  ;;  %v530_v36 = vrot.slane %v529_v33, 1 }
 0x140   :  { %v478_v37 = vmul.f32 0.0078125, %v477_v34  ;;  %v531_v39 = vadd.f32 %v530_v36, %v529_v33 }
 0x142   :  { %v532_v49 = vmul.f32 0.0078125, %v531_v39  ;;  %v533_v40 = vmul.f32 %v478_v37, %v478_v37 }
 0x144   :  { %v534_v42 = vsub.f32 %v532_v49, %v533_v40 }
 0x146   :  { %v535_v44 = vmax.f32 %v534_v42, 0.0 }
 0x148   :  { %v536_v45 = vadd.f32 1e-05, %v535_v44 }
 0x14a   :  { %827 = vrsqrt.f32 %v536_v45 }
 0x154   :  { %v828_v53 = vpop.eup %827 }
 0x155   :  { %v539_v61 = vmul.f32 %v828_v53, %v538_v47 }
 0x157   :  { %v541_v57 = vmul.f32 %v539_v61, %v478_v37  ;;  %v547_v58 = vrot.slane %v539_v61, %v546_v51 }
 0x159   :  { %v542_v59 = vsub.f32 %v540_v56, %v541_v57  ;;  %v549_v55 = vmul.f32 %v547_v58, %v1132_v4  ;;  %v550_v60 = vmul.f32 %v547_v58, %v1130_v0  ;;  %v554_v62 = vmul.f32 %v547_v58, %v1154_v26 }
 0x15a   :  { %v555_v63 = vmul.f32 %v547_v58, %v1171_v50  ;;  %v556_v1 = vmul.f32 %v547_v58, %v1174_v54  ;;  %v557_v2 = vmul.f32 %v547_v58, %v1186_v10  ;;  %v558_v3 = vmul.f32 %v547_v58, %v1193_v23 }
 0x15b   :  { %v559_v5 = vmul.f32 %v547_v58, %v1206_v38  ;;  %v560_v6 = vmul.f32 %v547_v58, %v1219_v52  ;;  %v561_v7 = vmul.f32 %v547_v58, %v1203_v35  ;;  %v562_v4 = vmul.f32 %v547_v58, %v1196_v28 }
 0x15c   :  { %v563_v0 = vmul.f32 %v547_v58, %v1216_v48  ;;  %v551_v26 = vmul.f32 %v547_v58, %v1146_v17  ;;  %v552_v50 = vmul.f32 %v547_v58, %v1142_v11  ;;  %v564_v54 = vmul.f32 %v547_v58, %v1209_v41 }
 0x15d   :  { %v569_v8 = vrot.slane %v542_v59, %v546_v51  ;;  %v553_v10 = vmul.f32 %v547_v58, %v1159_v32 }
 0x15f   :  { %v571_v23 = vadd.f32 %v569_v8, %v549_v55  ;;  %v572_v9 = vadd.f32 %v569_v8, %v550_v60  ;;  %v573_v38 = vadd.f32 %v569_v8, %v551_v26  ;;  %v574_v12 = vadd.f32 %v569_v8, %v552_v50 }
 0x160   :  { %v575_v52 = vadd.f32 %v569_v8, %v553_v10  ;;  %v576_v13 = vadd.f32 %v569_v8, %v554_v62  ;;  %v577_v35 = vadd.f32 %v569_v8, %v555_v63  ;;  %v578_v14 = vadd.f32 %v569_v8, %v556_v1 }
 0x161   :  { %v579_v28 = vadd.f32 %v569_v8, %v557_v2  ;;  %v580_v15 = vadd.f32 %v569_v8, %v558_v3  ;;  %v581_v48 = vadd.f32 %v569_v8, %v559_v5  ;;  %v582_v16 = vadd.f32 %v569_v8, %v560_v6 }
 0x162   :  { %v583_v17 = vadd.f32 %v569_v8, %v561_v7  ;;  %v584_v18 = vadd.f32 %v569_v8, %v562_v4  ;;  %v585_v11 = vadd.f32 %v569_v8, %v563_v0  ;;  %v586_v19 = vadd.f32 %v569_v8, %v564_v54 }
 0x163   :  { %v587_v41 = vmax.f32 %v571_v23, 0.0  ;;  %v588_v20 = vmax.f32 %v572_v9, 0.0  ;;  %v589_v21 = vmax.f32 %v573_v38, 0.0  ;;  %v590_v32 = vmax.f32 %v574_v12, 0.0 }
 0x164   :  { %v591_v22 = vmax.f32 %v575_v52, 0.0  ;;  %v592_v24 = vmax.f32 %v576_v13, 0.0  ;;  %v593_v25 = vmax.f32 %v577_v35, 0.0  ;;  %v594_v27 = vmax.f32 %v578_v14, 0.0 }
 0x165   :  { %v595_v29 = vmax.f32 %v579_v28, 0.0  ;;  %v596_v30 = vmax.f32 %v580_v15, 0.0  ;;  %v597_v31 = vmax.f32 %v581_v48, 0.0  ;;  %v598_v33 = vmax.f32 %v582_v16, 0.0  ;;  %603 = vst.msk [vmem:[%s1336_s4] sm:$0xff] %vm440_vm1, %v587_v41  ;;  %604 = vst.msk [vmem:[%s1336_s4 + $0x8] sm:$0xff] %vm440_vm1, %v588_v20 }
 0x166   :  { %605 = vst.msk [vmem:[%s1336_s4 + $0x10] sm:$0xff] %vm440_vm1, %v589_v21  ;;  %606 = vst.msk [vmem:[%s1336_s4 + $0x18] sm:$0xff] %vm440_vm1, %v590_v32  ;;  %v599_v34 = vmax.f32 %v583_v17, 0.0  ;;  %v600_v36 = vmax.f32 %v584_v18, 0.0  ;;  %v601_v37 = vmax.f32 %v585_v11, 0.0  ;;  %v602_v39 = vmax.f32 %v586_v19, 0.0 }
 0x167   :  { %607 = vst.msk [vmem:[%s1336_s4 + $0x20] sm:$0xff] %vm440_vm1, %v591_v22  ;;  %608 = vst.msk [vmem:[%s1336_s4 + $0x28] sm:$0xff] %vm440_vm1, %v592_v24 }
 0x168   :  { %609 = vst.msk [vmem:[%s1336_s4 + $0x30] sm:$0xff] %vm440_vm1, %v593_v25  ;;  %610 = vst.msk [vmem:[%s1336_s4 + $0x38] sm:$0xff] %vm440_vm1, %v594_v27 }
 0x169   :  { %611 = vst.msk [vmem:[%s1336_s4 + $0x40] sm:$0xff] %vm440_vm1, %v595_v29  ;;  %612 = vst.msk [vmem:[%s1336_s4 + $0x48] sm:$0xff] %vm440_vm1, %v596_v30 }
 0x16a   :  { %613 = vst.msk [vmem:[%s1336_s4 + $0x50] sm:$0xff] %vm440_vm1, %v597_v31  ;;  %614 = vst.msk [vmem:[%s1336_s4 + $0x58] sm:$0xff] %vm440_vm1, %v598_v33 }
 0x16b   :  { %615 = vst.msk [vmem:[%s1336_s4 + $0x60] sm:$0xff] %vm440_vm1, %v599_v34  ;;  %616 = vst.msk [vmem:[%s1336_s4 + $0x68] sm:$0xff] %vm440_vm1, %v600_v36 }
 0x16c   :  { %617 = vst.msk [vmem:[%s1336_s4 + $0x70] sm:$0xff] %vm440_vm1, %v601_v37  ;;  %618 = vst.msk [vmem:[%s1336_s4 + $0x78] sm:$0xff] %vm440_vm1, %v602_v39 }

// kernel: _reference_encoder_forward.12
= control target key start
LH: loop header
LB: loop body
LE: loop exit
PB: predicated region body
PF: predicated region fallthrough
CT: control target
= control target key end

     0   :  { %vm109_vm0 = vcmask 523264   ;;  %s1002_s1 = inlined_call_operand.vmem [shape: f32[576,64], index: 1, kind: input, shape index: {}]   ;;  %s1003_s0 = inlined_call_operand.vmem [shape: f32[32,576], index: 0, kind: input, shape index: {}]   ;;  %s1004_s2 = inlined_call_operand.vmem [shape: f32[1,64], index: 2, kind: input, shape index: {}]   ;;  %s1005_s3 = inlined_call_operand.vmem [shape: f32[1,64], index: 3, kind: input, shape index: {}]   ;;  %s1006_s4 = inlined_call_operand.vmem [shape: f32[32,64], index: 4, kind: output, shape index: {}]  }
   0x1   :  { %v53_v0 = vld [vmem:[%s1002_s1 + $0x80] sm:$0xff]  ;;  %v54_v1 = vld [vmem:[%s1002_s1 + $0x88] sm:$0xff]  ;;  %v55_v11 = vld [vmem:[%s1002_s1 + $0x90] sm:$0xff] }
   0x2   :  { %v85_v2 = vld [vmem:[%s1002_s1 + $0x180] sm:$0xff]  ;;  %v577_v3 = vpack.c.bf16 %v54_v1, %v53_v0  ;;  %v86_v4 = vld [vmem:[%s1002_s1 + $0x188] sm:$0xff]  ;;  %v56_v13 = vld [vmem:[%s1002_s1 + $0x98] sm:$0xff] }
   0x3   :  { %v37_v5 = vld [vmem:[%s1002_s1] sm:$0xff]  ;;  %v38_v6 = vld [vmem:[%s1002_s1 + $0x8] sm:$0xff]  ;;  %v609_v7 = vpack.c.bf16 %v86_v4, %v85_v2  ;;  %v87_v14 = vld [vmem:[%s1002_s1 + $0x190] sm:$0xff]  ;;  %v581_v16 = vpack.c.bf16 %v56_v13, %v55_v11 }
   0x4   :  { %v579_v8 = vpack.c.bf16 %v38_v6, %v37_v5  ;;  %v69_v9 = vld [vmem:[%s1002_s1 + $0x100] sm:$0xff]  ;;  %v70_v10 = vld [vmem:[%s1002_s1 + $0x108] sm:$0xff]  ;;  %578 = vmatprep.subr.bf16.mxu0 %v577_v3  ;;  %v88_v15 = vld [vmem:[%s1002_s1 + $0x198] sm:$0xff] }
   0x5   :  { %v611_v12 = vpack.c.bf16 %v70_v10, %v69_v9  ;;  %610 = vmatprep.subr.bf16.mxu1 %v609_v7  ;;  %v613_v17 = vpack.c.bf16 %v88_v15, %v87_v14  ;;  %v39_v18 = vld [vmem:[%s1002_s1 + $0x10] sm:$0xff]  ;;  %v40_v19 = vld [vmem:[%s1002_s1 + $0x18] sm:$0xff]  ;;  %v57_v23 = vld [vmem:[%s1002_s1 + $0xa0] sm:$0xff] }
   0x6   :  { %580 = vmatpush3.bf16.msra.mxu0 %v579_v8  ;;  %v71_v20 = vld [vmem:[%s1002_s1 + $0x110] sm:$0xff]  ;;  %v583_v21 = vpack.c.bf16 %v40_v19, %v39_v18  ;;  %v72_v22 = vld [vmem:[%s1002_s1 + $0x118] sm:$0xff]  ;;  %v58_v24 = vld [vmem:[%s1002_s1 + $0xa8] sm:$0xff] }
   0x7   :  { %612 = vmatpush3.bf16.msra.mxu1 %v611_v12  ;;  %582 = vmatprep.subr.bf16.mxu0 %v581_v16  ;;  %v615_v25 = vpack.c.bf16 %v72_v22, %v71_v20  ;;  %v585_v26 = vpack.c.bf16 %v58_v24, %v57_v23  ;;  %v89_v27 = vld [vmem:[%s1002_s1 + $0x1a0] sm:$0xff]  ;;  %v90_v28 = vld [vmem:[%s1002_s1 + $0x1a8] sm:$0xff]  ;;  %v59_v35 = vld [vmem:[%s1002_s1 + $0xb0] sm:$0xff] }
   0x8   :  { %614 = vmatprep.subr.bf16.mxu1 %v613_v17  ;;  %v41_v29 = vld [vmem:[%s1002_s1 + $0x20] sm:$0xff]  ;;  %v617_v30 = vpack.c.bf16 %v90_v28, %v89_v27  ;;  %v42_v31 = vld [vmem:[%s1002_s1 + $0x28] sm:$0xff]  ;;  %v60_v36 = vld [vmem:[%s1002_s1 + $0xb8] sm:$0xff] }
   0x9   :  { %v73_v32 = vld [vmem:[%s1002_s1 + $0x120] sm:$0xff]  ;;  %v74_v33 = vld [vmem:[%s1002_s1 + $0x128] sm:$0xff]  ;;  %v587_v34 = vpack.c.bf16 %v42_v31, %v41_v29  ;;  %v91_v37 = vld [vmem:[%s1002_s1 + $0x1b0] sm:$0xff]  ;;  %v589_v39 = vpack.c.bf16 %v60_v36, %v59_v35 }
   0xa   :  { %584 = vmatpush3.bf16.msra.mxu0 %v583_v21  ;;  %v619_v38 = vpack.c.bf16 %v74_v33, %v73_v32  ;;  %v92_v40 = vld [vmem:[%s1002_s1 + $0x1b8] sm:$0xff]  ;;  %v43_v41 = vld [vmem:[%s1002_s1 + $0x30] sm:$0xff]  ;;  %v61_v46 = vld [vmem:[%s1002_s1 + $0xc0] sm:$0xff] }
   0xb   :  { %616 = vmatpush3.bf16.msra.mxu1 %v615_v25  ;;  %586 = vmatprep.subr.bf16.mxu0 %v585_v26  ;;  %v44_v42 = vld [vmem:[%s1002_s1 + $0x38] sm:$0xff]  ;;  %v621_v43 = vpack.c.bf16 %v92_v40, %v91_v37  ;;  %v75_v44 = vld [vmem:[%s1002_s1 + $0x130] sm:$0xff]  ;;  %v62_v47 = vld [vmem:[%s1002_s1 + $0xc8] sm:$0xff] }
   0xc   :  { %618 = vmatprep.subr.bf16.mxu1 %v617_v30  ;;  %v76_v45 = vld [vmem:[%s1002_s1 + $0x138] sm:$0xff]  ;;  %v93_v48 = vld [vmem:[%s1002_s1 + $0x1c0] sm:$0xff]  ;;  %v94_v49 = vld [vmem:[%s1002_s1 + $0x1c8] sm:$0xff]  ;;  %v591_v50 = vpack.c.bf16 %v44_v42, %v43_v41  ;;  %v593_v52 = vpack.c.bf16 %v62_v47, %v61_v46 }
   0xd   :  { %v623_v51 = vpack.c.bf16 %v76_v45, %v75_v44  ;;  %v45_v53 = vld [vmem:[%s1002_s1 + $0x40] sm:$0xff]  ;;  %v46_v54 = vld [vmem:[%s1002_s1 + $0x48] sm:$0xff]  ;;  %v625_v56 = vpack.c.bf16 %v94_v49, %v93_v48  ;;  %v63_v58 = vld [vmem:[%s1002_s1 + $0xd0] sm:$0xff] }
   0xe   :  { %588 = vmatpush3.bf16.msra.mxu0 %v587_v34  ;;  %v77_v55 = vld [vmem:[%s1002_s1 + $0x140] sm:$0xff]  ;;  %v78_v57 = vld [vmem:[%s1002_s1 + $0x148] sm:$0xff]  ;;  %v64_v59 = vld [vmem:[%s1002_s1 + $0xd8] sm:$0xff]  ;;  %v595_v62 = vpack.c.bf16 %v46_v54, %v45_v53 }
   0xf   :  { %620 = vmatpush3.bf16.msra.mxu1 %v619_v38  ;;  %590 = vmatprep.subr.bf16.mxu0 %v589_v39  ;;  %v95_v60 = vld [vmem:[%s1002_s1 + $0x1d0] sm:$0xff]  ;;  %v96_v61 = vld [vmem:[%s1002_s1 + $0x1d8] sm:$0xff]  ;;  %v627_v63 = vpack.c.bf16 %v78_v57, %v77_v55  ;;  %v597_v0 = vpack.c.bf16 %v64_v59, %v63_v58  ;;  %v65_v6 = vld [vmem:[%s1002_s1 + $0xe0] sm:$0xff] }
  0x10   :  { %622 = vmatprep.subr.bf16.mxu1 %v621_v43  ;;  %v47_v1 = vld [vmem:[%s1002_s1 + $0x50] sm:$0xff]  ;;  %v48_v2 = vld [vmem:[%s1002_s1 + $0x58] sm:$0xff]  ;;  %v629_v4 = vpack.c.bf16 %v96_v61, %v95_v60  ;;  %v66_v7 = vld [vmem:[%s1002_s1 + $0xe8] sm:$0xff] }
  0x11   :  { %v79_v3 = vld [vmem:[%s1002_s1 + $0x150] sm:$0xff]  ;;  %v80_v5 = vld [vmem:[%s1002_s1 + $0x158] sm:$0xff]  ;;  %v97_v8 = vld [vmem:[%s1002_s1 + $0x1e0] sm:$0xff]  ;;  %v599_v10 = vpack.c.bf16 %v48_v2, %v47_v1  ;;  %v601_v14 = vpack.c.bf16 %v66_v7, %v65_v6 }
  0x12   :  { %592 = vmatpush3.bf16.msra.mxu0 %v591_v50  ;;  %v98_v9 = vld [vmem:[%s1002_s1 + $0x1e8] sm:$0xff]  ;;  %v49_v11 = vld [vmem:[%s1002_s1 + $0x60] sm:$0xff]  ;;  %v631_v13 = vpack.c.bf16 %v80_v5, %v79_v3  ;;  %v20_v17 = vld [vmem:[%s1003_s0 + $0x18] sm:$0xff] }
  0x13   :  { %624 = vmatpush3.bf16.msra.mxu1 %v623_v51  ;;  %594 = vmatprep.subr.bf16.mxu0 %v593_v52  ;;  %v50_v12 = vld [vmem:[%s1002_s1 + $0x68] sm:$0xff]  ;;  %v81_v15 = vld [vmem:[%s1002_s1 + $0x160] sm:$0xff]  ;;  %v633_v18 = vpack.c.bf16 %v98_v9, %v97_v8  ;;  %v67_v20 = vld [vmem:[%s1002_s1 + $0xf0] sm:$0xff] }
  0x14   :  { %626 = vmatprep.subr.bf16.mxu1 %v625_v56  ;;  %v18_v16 = vld [vmem:[%s1003_s0 + $0x8] sm:$0xff]  ;;  %v68_v21 = vld [vmem:[%s1002_s1 + $0xf8] sm:$0xff]  ;;  %v99_v22 = vld [vmem:[%s1002_s1 + $0x1f0] sm:$0xff]  ;;  %271 = vmatprep.mubr.f32.mxu1 %v20_v17  ;;  %v603_v24 = vpack.c.bf16 %v50_v12, %v49_v11 }
  0x15   :  { %v82_v19 = vld [vmem:[%s1002_s1 + $0x168] sm:$0xff]  ;;  %186 = vmatprep.mubr.f32.mxu0 %v18_v16  ;;  %v100_v23 = vld [vmem:[%s1002_s1 + $0x1f8] sm:$0xff]  ;;  %v605_v26 = vpack.c.bf16 %v68_v21, %v67_v20  ;;  %v51_v27 = vld [vmem:[%s1002_s1 + $0x70] sm:$0xff] }
  0x16   :  { %596 = vmatpush3.bf16.msra.mxu0 %v595_v62  ;;  %v635_v25 = vpack.c.bf16 %v82_v19, %v81_v15  ;;  %v52_v28 = vld [vmem:[%s1002_s1 + $0x78] sm:$0xff]  ;;  %v83_v29 = vld [vmem:[%s1002_s1 + $0x170] sm:$0xff]  ;;  %v637_v30 = vpack.c.bf16 %v100_v23, %v99_v22  ;;  %v101_v32 = vld [vmem:[%s1002_s1 + $0x200] sm:$0xff] }
  0x17   :  { %628 = vmatpush3.bf16.msra.mxu1 %v627_v63  ;;  %598 = vmatprep.subr.bf16.mxu0 %v597_v0  ;;  %v84_v31 = vld [vmem:[%s1002_s1 + $0x178] sm:$0xff]  ;;  %v102_v33 = vld [vmem:[%s1002_s1 + $0x208] sm:$0xff]  ;;  %v607_v34 = vpack.c.bf16 %v52_v28, %v51_v27  ;;  %v103_v37 = vld [vmem:[%s1002_s1 + $0x210] sm:$0xff] }
  0x18   :  { %630 = vmatprep.subr.bf16.mxu1 %v629_v4  ;;  %v639_v35 = vpack.c.bf16 %v84_v31, %v83_v29  ;;  %v641_v36 = vpack.c.bf16 %v102_v33, %v101_v32  ;;  %v104_v38 = vld [vmem:[%s1002_s1 + $0x218] sm:$0xff]  ;;  %v17_v39 = vld [vmem:[%s1003_s0] sm:$0xff]  ;;  %v19_v40 = vld [vmem:[%s1003_s0 + $0x10] sm:$0xff] }
  0x19   :  { %v23_v41 = vld [vmem:[%s1003_s0 + $0x30] sm:$0xff]  ;;  %v645_v42 = vpack.c.bf16 %v104_v38, %v103_v37  ;;  %v25_v43 = vld [vmem:[%s1003_s0 + $0x40] sm:$0xff]  ;;  %v106_v45 = vld [vmem:[%s1002_s1 + $0x228] sm:$0xff] }
  0x1a   :  { %600 = vmatpush3.bf16.msra.mxu0 %v599_v10  ;;  %v105_v44 = vld [vmem:[%s1002_s1 + $0x220] sm:$0xff]  ;;  %v22_v46 = vld [vmem:[%s1003_s0 + $0x28] sm:$0xff]  ;;  %v24_v47 = vld [vmem:[%s1003_s0 + $0x38] sm:$0xff] }
  0x1b   :  { %632 = vmatpush3.bf16.msra.mxu1 %v631_v13  ;;  %602 = vmatprep.subr.bf16.mxu0 %v601_v14  ;;  %v28_v48 = vld [vmem:[%s1003_s0 + $0x58] sm:$0xff]  ;;  %v649_v49 = vpack.c.bf16 %v106_v45, %v105_v44  ;;  %v30_v50 = vld [vmem:[%s1003_s0 + $0x68] sm:$0xff]  ;;  %v107_v51 = vld [vmem:[%s1002_s1 + $0x230] sm:$0xff] }
  0x1c   :  { %634 = vmatprep.subr.bf16.mxu1 %v633_v18  ;;  %v108_v52 = vld [vmem:[%s1002_s1 + $0x238] sm:$0xff]  ;;  %v27_v53 = vld [vmem:[%s1003_s0 + $0x50] sm:$0xff]  ;;  %v29_v54 = vld [vmem:[%s1003_s0 + $0x60] sm:$0xff] }
  0x1d   :  { %v33_v55 = vld [vmem:[%s1003_s0 + $0x80] sm:$0xff]  ;;  %v653_v56 = vpack.c.bf16 %v108_v52, %v107_v51  ;;  %v35_v57 = vld [vmem:[%s1003_s0 + $0x90] sm:$0xff]  ;;  %v32_v58 = vld [vmem:[%s1003_s0 + $0x78] sm:$0xff] }
  0x1e   :  { %604 = vmatpush3.bf16.msra.mxu0 %v603_v24  ;;  %v34_v59 = vld [vmem:[%s1003_s0 + $0x88] sm:$0xff]  ;;  %v21_v60 = vld [vmem:[%s1003_s0 + $0x20] sm:$0xff]  ;;  %v31_v61 = vld [vmem:[%s1003_s0 + $0x70] sm:$0xff] }
  0x1f   :  { %636 = vmatpush3.bf16.msra.mxu1 %v635_v25  ;;  %606 = vmatprep.subr.bf16.mxu0 %v605_v26  ;;  %v26_v62 = vld [vmem:[%s1003_s0 + $0x48] sm:$0xff]  ;;  %v36_v63 = vld [vmem:[%s1003_s0 + $0x98] sm:$0xff] }
  0x20   :  { %638 = vmatprep.subr.bf16.mxu1 %v637_v30 }
  0x22   :  { %608 = vmatpush3.bf16.msra.mxu0 %v607_v34 }
  0x23   :  { %640 = vmatpush3.bf16.msra.mxu1 %v639_v35  ;;  %642 = vmatprep.subr.bf16.mxu0 %v641_v36 }
  0x24   :  { %657 = vmatprep.subr.bf16.mxu1 %v641_v36 }
  0x25   :  { %187 = vmatmul.mubr.f32.vlgmr.msra.gmra.mrb[0].mxu0 %v17_v39 }
  0x26   :  { %272 = vmatmul.mubr.f32.vlgmr.msra.gmra.mrb[0].mxu1 %v19_v40  ;;  %644 = vmatpush3.bf16.msra.mxu0 %v641_v36 }
  0x27   :  { %661 = vmatpush3.bf16.msra.mxu1 %v641_v36  ;;  %191 = vmatprep.mubr.f32.mxu0 %v23_v41 }
  0x28   :  { %276 = vmatprep.mubr.f32.mxu1 %v25_v43  ;;  %646 = vmatprep.subr.bf16.mxu0 %v645_v42 }
  0x29   :  { %192 = vmatmul.mubr.f32.gmra.mrb[2].mxu0 %v22_v46  ;;  %658 = vmatprep.subr.bf16.mxu1 %v645_v42 }
  0x2a   :  { %277 = vmatmul.mubr.f32.gmra.mrb[2].mxu1 %v24_v47  ;;  %648 = vmatpush3.bf16.msra.mxu0 %v645_v42 }
  0x2b   :  { %662 = vmatpush3.bf16.msra.mxu1 %v645_v42  ;;  %196 = vmatprep.mubr.f32.mxu0 %v28_v48 }
  0x2c   :  { %281 = vmatprep.mubr.f32.mxu1 %v30_v50  ;;  %650 = vmatprep.subr.bf16.mxu0 %v649_v49 }
  0x2d   :  { %197 = vmatmul.mubr.f32.gmra.mrb[4].mxu0 %v27_v53  ;;  %659 = vmatprep.subr.bf16.mxu1 %v649_v49 }
  0x2e   :  { %282 = vmatmul.mubr.f32.gmra.mrb[4].mxu1 %v29_v54  ;;  %652 = vmatpush3.bf16.msra.mxu0 %v649_v49 }
  0x2f   :  { %663 = vmatpush3.bf16.msra.mxu1 %v649_v49  ;;  %201 = vmatprep.mubr.f32.mxu0 %v33_v55 }
  0x30   :  { %286 = vmatprep.mubr.f32.mxu1 %v35_v57  ;;  %654 = vmatprep.subr.bf16.mxu0 %v653_v56 }
  0x31   :  { %202 = vmatmul.mubr.f32.gmra.mrb[6].mxu0 %v32_v58  ;;  %660 = vmatprep.subr.bf16.mxu1 %v653_v56 }
  0x32   :  { %287 = vmatmul.mubr.f32.gmra.mrb[6].mxu1 %v34_v59  ;;  %656 = vmatpush3.bf16.msra.mxu0 %v653_v56 }
  0x33   :  { %664 = vmatpush3.bf16.msra.mxu1 %v653_v56  ;;  %571 = vmatprep.mubr.msk.f32.mxu0 %vm109_vm0, %v21_v60 }
  0x34   :  { %574 = vmatprep.mubr.msk.f32.mxu1 %vm109_vm0, %v31_v61 }
  0x35   :  { %572 = vmatmul.mubr.msk.f32.vlgmr.msra.gmra.mrb[8].mxu0 %vm109_vm0, %v26_v62 }
  0x36   :  { %575 = vmatmul.mubr.msk.f32.vlgmr.msra.gmra.mrb[8].mxu1 %vm109_vm0, %v36_v63 }
  0xf8   :  { %v487_v0 = vpop.f32.mrb[0].mxu0 }
  0xf9   :  { %v531_v1 = vpop.f32.mrb[0].mxu1  ;;  %v488_v2 = vpop.f32.mrb[1].mxu0 }
  0xfa   :  { %v489_v3 = vadd.f32 %v488_v2, %v487_v0  ;;  %v532_v4 = vpop.f32.mrb[1].mxu1 }
  0xfb   :  { %v533_v5 = vadd.f32 %v532_v4, %v531_v1 }
  0xfc   :  { %v490_v6 = vpop.f32.mrb[2].mxu0 }
  0xfd   :  { %v534_v7 = vpop.f32.mrb[2].mxu1  ;;  %v491_v8 = vpop.f32.mrb[3].mxu0  ;;  %v274_v9 = vadd.f32 %v533_v5, %v489_v3 }
  0xfe   :  { %v492_v10 = vadd.f32 %v491_v8, %v490_v6  ;;  %v535_v11 = vpop.f32.mrb[3].mxu1  ;;  %v420_v8 = vlaneseq }
  0xff   :  { %v536_v12 = vadd.f32 %v535_v11, %v534_v7 }
 0x100   :  { %v493_v13 = vpop.f32.mrb[4].mxu0 }
 0x101   :  { %v537_v14 = vpop.f32.mrb[4].mxu1  ;;  %v494_v15 = vpop.f32.mrb[5].mxu0  ;;  %v279_v16 = vadd.f32 %v536_v12, %v492_v10  ;;  %v414_v10 = vld [vmem:[%s1004_s2] sm:$0x1] }
 0x102   :  { %v495_v17 = vadd.f32 %v494_v15, %v493_v13  ;;  %v538_v18 = vpop.f32.mrb[5].mxu1 }
 0x103   :  { %v539_v19 = vadd.f32 %v538_v18, %v537_v14  ;;  %v416_v14 = vld [vmem:[%s1005_s3] sm:$0x1] }
 0x104   :  { %v496_v20 = vpop.f32.mrb[6].mxu0 }
 0x105   :  { %v540_v21 = vpop.f32.mrb[6].mxu1  ;;  %v497_v22 = vpop.f32.mrb[7].mxu0  ;;  %v284_v23 = vadd.f32 %v539_v19, %v495_v17 }
 0x106   :  { %v498_v24 = vadd.f32 %v497_v22, %v496_v20  ;;  %v541_v25 = vpop.f32.mrb[7].mxu1 }
 0x107   :  { %v542_v26 = vadd.f32 %v541_v25, %v540_v21 }
 0x108   :  { %v573_v27 = vpop.f32.mrb[8].mxu0 }
 0x109   :  { %v364_v28 = vadd.f32 %v573_v27, %v279_v16  ;;  %v289_v29 = vadd.f32 %v542_v26, %v498_v24  ;;  %v576_v30 = vpop.f32.mrb[8].mxu1  ;;  %v358_v31 = vpop.f32.mrb[9].mxu0 }
 0x10a   :  { %v359_v32 = vadd.f32 %v358_v31, %v274_v9  ;;  %v368_v33 = vpop.f32.mrb[9].mxu1  ;;  %v421_v9 = vshrl.u32 %v420_v8, 7 }
 0x10b   :  { %v378_v34 = vsel %vm109_vm0, %v364_v28, 0.0  ;;  %v392_v35 = vmul.f32 %v364_v28, %v364_v28  ;;  %v374_v36 = vadd.f32 %v576_v30, %v289_v29  ;;  %v369_v37 = vadd.f32 %v368_v33, %v284_v23 }
 0x10c   :  { %v377_v38 = vsel %vm109_vm0, %v359_v32, 0.0  ;;  %v391_v39 = vmul.f32 %v359_v32, %v359_v32  ;;  %v422_v11 = vsub.s32 0, %v421_v9 }
 0x10d   :  { %v396_v40 = vsel %vm109_vm0, %v392_v35, 0.0  ;;  %v379_v41 = vadd.f32 %v378_v34, %v377_v38  ;;  %v394_v42 = vmul.f32 %v374_v36, %v374_v36  ;;  %v380_v44 = vsel %vm109_vm0, %v369_v37, 0.0 }
 0x10e   :  { %v395_v43 = vsel %vm109_vm0, %v391_v39, 0.0  ;;  %v393_v45 = vmul.f32 %v369_v37, %v369_v37  ;;  %v382_v48 = vsel %vm109_vm0, %v374_v36, 0.0 }
 0x10f   :  { %v397_v46 = vadd.f32 %v396_v40, %v395_v43  ;;  %v381_v47 = vadd.f32 %v380_v44, %v379_v41  ;;  %v400_v52 = vsel %vm109_vm0, %v394_v42, 0.0 }
 0x110   :  { %v398_v49 = vsel %vm109_vm0, %v393_v45, 0.0 }
 0x111   :  { %v383_v50 = vadd.f32 %v382_v48, %v381_v47  ;;  %v399_v51 = vadd.f32 %v398_v49, %v397_v46 }
 0x113   :  { %v384_v53 = vrot.slane %v383_v50, 4  ;;  %v401_v54 = vadd.f32 %v400_v52, %v399_v51 }
 0x115   :  { %v385_v55 = vadd.f32 %v384_v53, %v383_v50  ;;  %v402_v56 = vrot.slane %v401_v54, 4 }
 0x117   :  { %v386_v57 = vrot.slane %v385_v55, 2  ;;  %v403_v58 = vadd.f32 %v402_v56, %v401_v54 }
 0x119   :  { %v387_v59 = vadd.f32 %v386_v57, %v385_v55  ;;  %v404_v60 = vrot.slane %v403_v58, 2 }
 0x11b   :  { %v388_v61 = vrot.slane %v387_v59, 1  ;;  %v405_v62 = vadd.f32 %v404_v60, %v403_v58 }
 0x11d   :  { %v389_v63 = vadd.f32 %v388_v61, %v387_v59  ;;  %v406_v0 = vrot.slane %v405_v62, 1 }
 0x11f   :  { %v390_v1 = vmul.f32 0.03125, %v389_v63  ;;  %v407_v2 = vadd.f32 %v406_v0, %v405_v62 }
 0x121   :  { %v408_v3 = vmul.f32 0.03125, %v407_v2  ;;  %v409_v4 = vmul.f32 %v390_v1, %v390_v1 }
 0x123   :  { %v410_v5 = vsub.f32 %v408_v3, %v409_v4 }
 0x125   :  { %v411_v6 = vmax.f32 %v410_v5, 0.0 }
 0x127   :  { %v412_v7 = vadd.f32 1e-05, %v411_v6 }
 0x129   :  { %665 = vrsqrt.f32 %v412_v7 }
 0x133   :  { %v666_v12 = vpop.eup %665 }
 0x134   :  { %v415_v13 = vmul.f32 %v666_v12, %v414_v10 }
 0x136   :  { %v417_v15 = vmul.f32 %v415_v13, %v390_v1  ;;  %v423_v16 = vrot.slane %v415_v13, %v422_v11 }
 0x138   :  { %v418_v17 = vsub.f32 %v416_v14, %v417_v15  ;;  %v425_v18 = vmul.f32 %v423_v16, %v359_v32  ;;  %v426_v19 = vmul.f32 %v423_v16, %v364_v28  ;;  %v427_v20 = vmul.f32 %v423_v16, %v369_v37 }
 0x139   :  { %v428_v21 = vmul.f32 %v423_v16, %v374_v36 }
 0x13a   :  { %v433_v22 = vrot.slane %v418_v17, %v422_v11 }
 0x13c   :  { %v435_v23 = vadd.f32 %v433_v22, %v425_v18  ;;  %v436_v24 = vadd.f32 %v433_v22, %v426_v19  ;;  %v437_v25 = vadd.f32 %v433_v22, %v427_v20  ;;  %v438_v26 = vadd.f32 %v433_v22, %v428_v21 }
 0x13e   :  { %v439_v27 = vmax.f32 %v435_v23, 0.0  ;;  %v440_v29 = vmax.f32 %v436_v24, 0.0  ;;  %v441_v30 = vmax.f32 %v437_v25, 0.0  ;;  %v442_v31 = vmax.f32 %v438_v26, 0.0 }
 0x140   :  { %443 = vst.msk [vmem:[%s1006_s4] sm:$0xff] %vm109_vm0, %v439_v27  ;;  %444 = vst.msk [vmem:[%s1006_s4 + $0x8] sm:$0xff] %vm109_vm0, %v440_v29 }
 0x141   :  { %445 = vst.msk [vmem:[%s1006_s4 + $0x10] sm:$0xff] %vm109_vm0, %v441_v30  ;;  %446 = vst.msk [vmem:[%s1006_s4 + $0x18] sm:$0xff] %vm109_vm0, %v442_v31 }

// kernel: _reference_encoder_forward.13
= control target key start
LH: loop header
LB: loop body
LE: loop exit
PB: predicated region body
PF: predicated region fallthrough
CT: control target
= control target key end

     0   :  { %vm534_vm0 = vmmov 0   ;;  %vm94_vm1 = vcmask 523264   ;;  %s801_s1 = inlined_call_operand.vmem [shape: f32[576,128], index: 1, kind: input, shape index: {}]   ;;  %s802_s0 = inlined_call_operand.vmem [shape: f32[8,576], index: 0, kind: input, shape index: {}]   ;;  %s803_s2 = inlined_call_operand.vmem [shape: f32[1,128], index: 2, kind: input, shape index: {}]   ;;  %s804_s3 = inlined_call_operand.vmem [shape: f32[1,128], index: 3, kind: input, shape index: {}]   ;;  %s805_s4 = inlined_call_operand.vmem [shape: f32[8,128], index: 4, kind: output, shape index: {}]  }
   0x1   :  { %v38_v0 = vld [vmem:[%s801_s1 + $0x80] sm:$0xff]  ;;  %v39_v1 = vld [vmem:[%s801_s1 + $0x88] sm:$0xff]  ;;  %v40_v11 = vld [vmem:[%s801_s1 + $0x90] sm:$0xff] }
   0x2   :  { %v70_v2 = vld [vmem:[%s801_s1 + $0x180] sm:$0xff]  ;;  %v452_v3 = vpack.c.bf16 %v39_v1, %v38_v0  ;;  %v71_v4 = vld [vmem:[%s801_s1 + $0x188] sm:$0xff]  ;;  %v41_v13 = vld [vmem:[%s801_s1 + $0x98] sm:$0xff] }
   0x3   :  { %v22_v5 = vld [vmem:[%s801_s1] sm:$0xff]  ;;  %v23_v6 = vld [vmem:[%s801_s1 + $0x8] sm:$0xff]  ;;  %v484_v7 = vpack.c.bf16 %v71_v4, %v70_v2  ;;  %v72_v14 = vld [vmem:[%s801_s1 + $0x190] sm:$0xff]  ;;  %v456_v16 = vpack.c.bf16 %v41_v13, %v40_v11 }
   0x4   :  { %v454_v8 = vpack.c.bf16 %v23_v6, %v22_v5  ;;  %v54_v9 = vld [vmem:[%s801_s1 + $0x100] sm:$0xff]  ;;  %v55_v10 = vld [vmem:[%s801_s1 + $0x108] sm:$0xff]  ;;  %453 = vmatprep.subr.bf16.mxu0 %v452_v3  ;;  %v73_v15 = vld [vmem:[%s801_s1 + $0x198] sm:$0xff] }
   0x5   :  { %v486_v12 = vpack.c.bf16 %v55_v10, %v54_v9  ;;  %485 = vmatprep.subr.bf16.mxu1 %v484_v7  ;;  %v488_v17 = vpack.c.bf16 %v73_v15, %v72_v14  ;;  %v24_v18 = vld [vmem:[%s801_s1 + $0x10] sm:$0xff]  ;;  %v25_v19 = vld [vmem:[%s801_s1 + $0x18] sm:$0xff]  ;;  %v42_v23 = vld [vmem:[%s801_s1 + $0xa0] sm:$0xff] }
   0x6   :  { %455 = vmatpush3.bf16.msra.mxu0 %v454_v8  ;;  %v56_v20 = vld [vmem:[%s801_s1 + $0x110] sm:$0xff]  ;;  %v458_v21 = vpack.c.bf16 %v25_v19, %v24_v18  ;;  %v57_v22 = vld [vmem:[%s801_s1 + $0x118] sm:$0xff]  ;;  %v43_v24 = vld [vmem:[%s801_s1 + $0xa8] sm:$0xff] }
   0x7   :  { %487 = vmatpush3.bf16.msra.mxu1 %v486_v12  ;;  %457 = vmatprep.subr.bf16.mxu0 %v456_v16  ;;  %v490_v25 = vpack.c.bf16 %v57_v22, %v56_v20  ;;  %v460_v26 = vpack.c.bf16 %v43_v24, %v42_v23  ;;  %v74_v27 = vld [vmem:[%s801_s1 + $0x1a0] sm:$0xff]  ;;  %v75_v28 = vld [vmem:[%s801_s1 + $0x1a8] sm:$0xff]  ;;  %v44_v35 = vld [vmem:[%s801_s1 + $0xb0] sm:$0xff] }
   0x8   :  { %489 = vmatprep.subr.bf16.mxu1 %v488_v17  ;;  %v26_v29 = vld [vmem:[%s801_s1 + $0x20] sm:$0xff]  ;;  %v492_v30 = vpack.c.bf16 %v75_v28, %v74_v27  ;;  %v27_v31 = vld [vmem:[%s801_s1 + $0x28] sm:$0xff]  ;;  %v45_v36 = vld [vmem:[%s801_s1 + $0xb8] sm:$0xff] }
   0x9   :  { %v58_v32 = vld [vmem:[%s801_s1 + $0x120] sm:$0xff]  ;;  %v59_v33 = vld [vmem:[%s801_s1 + $0x128] sm:$0xff]  ;;  %v462_v34 = vpack.c.bf16 %v27_v31, %v26_v29  ;;  %v76_v37 = vld [vmem:[%s801_s1 + $0x1b0] sm:$0xff]  ;;  %v464_v39 = vpack.c.bf16 %v45_v36, %v44_v35 }
   0xa   :  { %459 = vmatpush3.bf16.msra.mxu0 %v458_v21  ;;  %v494_v38 = vpack.c.bf16 %v59_v33, %v58_v32  ;;  %v77_v40 = vld [vmem:[%s801_s1 + $0x1b8] sm:$0xff]  ;;  %v28_v41 = vld [vmem:[%s801_s1 + $0x30] sm:$0xff]  ;;  %v46_v46 = vld [vmem:[%s801_s1 + $0xc0] sm:$0xff] }
   0xb   :  { %491 = vmatpush3.bf16.msra.mxu1 %v490_v25  ;;  %461 = vmatprep.subr.bf16.mxu0 %v460_v26  ;;  %v29_v42 = vld [vmem:[%s801_s1 + $0x38] sm:$0xff]  ;;  %v496_v43 = vpack.c.bf16 %v77_v40, %v76_v37  ;;  %v60_v44 = vld [vmem:[%s801_s1 + $0x130] sm:$0xff]  ;;  %v47_v47 = vld [vmem:[%s801_s1 + $0xc8] sm:$0xff] }
   0xc   :  { %493 = vmatprep.subr.bf16.mxu1 %v492_v30  ;;  %v61_v45 = vld [vmem:[%s801_s1 + $0x138] sm:$0xff]  ;;  %v78_v48 = vld [vmem:[%s801_s1 + $0x1c0] sm:$0xff]  ;;  %v79_v49 = vld [vmem:[%s801_s1 + $0x1c8] sm:$0xff]  ;;  %v466_v50 = vpack.c.bf16 %v29_v42, %v28_v41  ;;  %v468_v52 = vpack.c.bf16 %v47_v47, %v46_v46 }
   0xd   :  { %v498_v51 = vpack.c.bf16 %v61_v45, %v60_v44  ;;  %v30_v53 = vld [vmem:[%s801_s1 + $0x40] sm:$0xff]  ;;  %v31_v54 = vld [vmem:[%s801_s1 + $0x48] sm:$0xff]  ;;  %v500_v56 = vpack.c.bf16 %v79_v49, %v78_v48  ;;  %v48_v58 = vld [vmem:[%s801_s1 + $0xd0] sm:$0xff]  ;;  %v535_v45 = vmov 0.0  }
   0xe   :  { %463 = vmatpush3.bf16.msra.mxu0 %v462_v34  ;;  %v62_v55 = vld [vmem:[%s801_s1 + $0x140] sm:$0xff]  ;;  %v63_v57 = vld [vmem:[%s801_s1 + $0x148] sm:$0xff]  ;;  %v49_v59 = vld [vmem:[%s801_s1 + $0xd8] sm:$0xff]  ;;  %v470_v62 = vpack.c.bf16 %v31_v54, %v30_v53 }
   0xf   :  { %495 = vmatpush3.bf16.msra.mxu1 %v494_v38  ;;  %465 = vmatprep.subr.bf16.mxu0 %v464_v39  ;;  %v80_v60 = vld [vmem:[%s801_s1 + $0x1d0] sm:$0xff]  ;;  %v81_v61 = vld [vmem:[%s801_s1 + $0x1d8] sm:$0xff]  ;;  %v502_v63 = vpack.c.bf16 %v63_v57, %v62_v55  ;;  %v472_v0 = vpack.c.bf16 %v49_v59, %v48_v58  ;;  %v50_v6 = vld [vmem:[%s801_s1 + $0xe0] sm:$0xff]  ;;  %v533_v39 = vmov 0.0|0.0  }
  0x10   :  { %497 = vmatprep.subr.bf16.mxu1 %v496_v43  ;;  %v32_v1 = vld [vmem:[%s801_s1 + $0x50] sm:$0xff]  ;;  %v33_v2 = vld [vmem:[%s801_s1 + $0x58] sm:$0xff]  ;;  %v504_v4 = vpack.c.bf16 %v81_v61, %v80_v60  ;;  %v51_v7 = vld [vmem:[%s801_s1 + $0xe8] sm:$0xff] }
  0x11   :  { %v64_v3 = vld [vmem:[%s801_s1 + $0x150] sm:$0xff]  ;;  %v65_v5 = vld [vmem:[%s801_s1 + $0x158] sm:$0xff]  ;;  %v82_v8 = vld [vmem:[%s801_s1 + $0x1e0] sm:$0xff]  ;;  %v474_v10 = vpack.c.bf16 %v33_v2, %v32_v1  ;;  %v476_v14 = vpack.c.bf16 %v51_v7, %v50_v6 }
  0x12   :  { %467 = vmatpush3.bf16.msra.mxu0 %v466_v50  ;;  %v83_v9 = vld [vmem:[%s801_s1 + $0x1e8] sm:$0xff]  ;;  %v34_v11 = vld [vmem:[%s801_s1 + $0x60] sm:$0xff]  ;;  %v506_v13 = vpack.c.bf16 %v65_v5, %v64_v3  ;;  %v20_v17 = vld [vmem:[%s802_s0 + $0x18] sm:$0xff] }
  0x13   :  { %499 = vmatpush3.bf16.msra.mxu1 %v498_v51  ;;  %469 = vmatprep.subr.bf16.mxu0 %v468_v52  ;;  %v35_v12 = vld [vmem:[%s801_s1 + $0x68] sm:$0xff]  ;;  %v66_v15 = vld [vmem:[%s801_s1 + $0x160] sm:$0xff]  ;;  %v508_v18 = vpack.c.bf16 %v83_v9, %v82_v8  ;;  %v52_v20 = vld [vmem:[%s801_s1 + $0xf0] sm:$0xff] }
  0x14   :  { %501 = vmatprep.subr.bf16.mxu1 %v500_v56  ;;  %v18_v16 = vld [vmem:[%s802_s0 + $0x8] sm:$0xff]  ;;  %v53_v21 = vld [vmem:[%s801_s1 + $0xf8] sm:$0xff]  ;;  %v84_v22 = vld [vmem:[%s801_s1 + $0x1f0] sm:$0xff]  ;;  %232 = vmatprep.mubr.f32.mxu1 %v20_v17  ;;  %v478_v24 = vpack.c.bf16 %v35_v12, %v34_v11 }
  0x15   :  { %v67_v19 = vld [vmem:[%s801_s1 + $0x168] sm:$0xff]  ;;  %162 = vmatprep.mubr.f32.mxu0 %v18_v16  ;;  %v85_v23 = vld [vmem:[%s801_s1 + $0x1f8] sm:$0xff]  ;;  %v480_v26 = vpack.c.bf16 %v53_v21, %v52_v20  ;;  %v36_v27 = vld [vmem:[%s801_s1 + $0x70] sm:$0xff]  ;;  %v334_v16 = vlaneseq }
  0x16   :  { %471 = vmatpush3.bf16.msra.mxu0 %v470_v62  ;;  %v510_v25 = vpack.c.bf16 %v67_v19, %v66_v15  ;;  %v37_v28 = vld [vmem:[%s801_s1 + $0x78] sm:$0xff]  ;;  %v512_v29 = vpack.c.bf16 %v85_v23, %v84_v22  ;;  %v68_v30 = vld [vmem:[%s801_s1 + $0x170] sm:$0xff]  ;;  %v86_v34 = vld [vmem:[%s801_s1 + $0x200] sm:$0xff] }
  0x17   :  { %503 = vmatpush3.bf16.msra.mxu1 %v502_v63  ;;  %473 = vmatprep.subr.bf16.mxu0 %v472_v0  ;;  %v69_v31 = vld [vmem:[%s801_s1 + $0x178] sm:$0xff]  ;;  %v482_v32 = vpack.c.bf16 %v37_v28, %v36_v27  ;;  %v87_v35 = vld [vmem:[%s801_s1 + $0x208] sm:$0xff]  ;;  %v17_v36 = vld [vmem:[%s802_s0] sm:$0xff]  ;;  %v335_v17 = vshrl.u32 %v334_v16, 7 }
  0x18   :  { %505 = vmatprep.subr.bf16.mxu1 %v504_v4  ;;  %v514_v33 = vpack.c.bf16 %v69_v31, %v68_v30  ;;  %v517_v37 = vpack.c.bf16 %v87_v35, %v86_v34  ;;  %v19_v38 = vld [vmem:[%s802_s0 + $0x10] sm:$0xff]  ;;  %v89_v41 = vld [vmem:[%s801_s1 + $0x218] sm:$0xff]  ;;  %v90_v43 = vld [vmem:[%s801_s1 + $0x220] sm:$0xff] }
  0x19   :  { %v88_v40 = vld [vmem:[%s801_s1 + $0x210] sm:$0xff]  ;;  %v91_v44 = vld [vmem:[%s801_s1 + $0x228] sm:$0xff]  ;;  %v93_v48 = vld [vmem:[%s801_s1 + $0x238] sm:$0xff]  ;;  %v336_v19 = vsub.s32 0, %v335_v17 }
  0x1a   :  { %475 = vmatpush3.bf16.msra.mxu0 %v474_v10  ;;  %v520_v42 = vpack.c.bf16 %v89_v41, %v88_v40  ;;  %v523_v46 = vpack.c.bf16 %v91_v44, %v90_v43  ;;  %v92_v47 = vld [vmem:[%s801_s1 + $0x230] sm:$0xff]  ;;  %v21_v50 = vld [vmem:[%s802_s0 + $0x20] sm:$0xff] }
  0x1b   :  { %507 = vmatpush3.bf16.msra.mxu1 %v506_v13  ;;  %477 = vmatprep.subr.bf16.mxu0 %v476_v14  ;;  %v526_v49 = vpack.c.bf16 %v93_v48, %v92_v47  ;;  %v330_v22 = vld [vmem:[%s804_s3] sm:$0x1] }
  0x1c   :  { %509 = vmatprep.subr.bf16.mxu1 %v508_v18  ;;  %v328_v18 = vld [vmem:[%s803_s2] sm:$0x1] }
  0x1e   :  { %479 = vmatpush3.bf16.msra.mxu0 %v478_v24 }
  0x1f   :  { %511 = vmatpush3.bf16.msra.mxu1 %v510_v25  ;;  %481 = vmatprep.subr.bf16.mxu0 %v480_v26 }
  0x20   :  { %513 = vmatprep.subr.bf16.mxu1 %v512_v29 }
  0x22   :  { %483 = vmatpush3.bf16.msra.mxu0 %v482_v32 }
  0x23   :  { %515 = vmatpush3.bf16.msra.mxu1 %v514_v33  ;;  %516 = vmatprep.subr.bf16.mxu0 %v533_v39 }
  0x25   :  { %163 = vmatmul.mubr.f32.vlgmr.msra.gmra.mrb[0].mxu0 %v17_v36 }
  0x26   :  { %233 = vmatmul.mubr.f32.vlgmr.msra.gmra.mrb[0].mxu1 %v19_v38  ;;  %518 = vmatpush3.bf16.msra.mxu0 %v517_v37 }
  0x27   :  { %519 = vmatprep.subr.bf16.mxu0 %v533_v39  ;;  %449 = vmatprep.mubr.msk.f32.mxu0 %vm534_vm0, %v535_v45 }
  0x2a   :  { %521 = vmatpush3.bf16.msra.mxu0 %v520_v42 }
  0x2b   :  { %522 = vmatprep.subr.bf16.mxu0 %v533_v39 }
  0x2e   :  { %524 = vmatpush3.bf16.msra.mxu0 %v523_v46 }
  0x2f   :  { %525 = vmatprep.subr.bf16.mxu0 %v533_v39 }
  0x32   :  { %527 = vmatpush3.bf16.msra.mxu0 %v526_v49 }
  0x35   :  { %450 = vmatmul.mubr.msk.f32.vlgmr.msra.gmra.mrb[2].mxu0 %vm94_vm1, %v21_v50 }
  0xf8   :  { %v386_v51 = vpop.f32.mrb[0].mxu0 }
  0xf9   :  { %v421_v52 = vpop.f32.mrb[0].mxu1  ;;  %v387_v53 = vpop.f32.mrb[1].mxu0 }
  0xfa   :  { %v388_v54 = vadd.f32 %v387_v53, %v386_v51  ;;  %v422_v55 = vpop.f32.mrb[1].mxu1 }
  0xfb   :  { %v423_v56 = vadd.f32 %v422_v55, %v421_v52 }
  0xfd   :  { %v235_v57 = vadd.f32 %v423_v56, %v388_v54 }
 0x108   :  { %v304_v58 = vpop.f32.mrb[2].mxu0 }
 0x109   :  { %v305_v59 = vadd.f32 %v304_v58, %v235_v57  ;;  %v451_v60 = vpop.f32.mrb[3].mxu0 }
 0x10b   :  { %v308_v61 = vrot.slane %v305_v59, 4  ;;  %v315_v62 = vmul.f32 %v305_v59, %v305_v59 }
 0x10d   :  { %v309_v63 = vadd.f32 %v308_v61, %v305_v59  ;;  %v316_v0 = vrot.slane %v315_v62, 4 }
 0x10f   :  { %v310_v1 = vrot.slane %v309_v63, 2  ;;  %v317_v2 = vadd.f32 %v316_v0, %v315_v62 }
 0x111   :  { %v311_v3 = vadd.f32 %v310_v1, %v309_v63  ;;  %v318_v4 = vrot.slane %v317_v2, 2 }
 0x113   :  { %v312_v5 = vrot.slane %v311_v3, 1  ;;  %v319_v6 = vadd.f32 %v318_v4, %v317_v2 }
 0x115   :  { %v313_v7 = vadd.f32 %v312_v5, %v311_v3  ;;  %v320_v8 = vrot.slane %v319_v6, 1 }
 0x117   :  { %v314_v9 = vmul.f32 0.125, %v313_v7  ;;  %v321_v10 = vadd.f32 %v320_v8, %v319_v6 }
 0x119   :  { %v322_v11 = vmul.f32 0.125, %v321_v10  ;;  %v323_v12 = vmul.f32 %v314_v9, %v314_v9 }
 0x11b   :  { %v324_v13 = vsub.f32 %v322_v11, %v323_v12 }
 0x11d   :  { %v325_v14 = vmax.f32 %v324_v13, 0.0 }
 0x11f   :  { %v326_v15 = vadd.f32 1e-05, %v325_v14 }
 0x121   :  { %531 = vrsqrt.f32 %v326_v15 }
 0x12b   :  { %v532_v20 = vpop.eup %531 }
 0x12c   :  { %v329_v21 = vmul.f32 %v532_v20, %v328_v18 }
 0x12e   :  { %v331_v23 = vmul.f32 %v329_v21, %v314_v9  ;;  %v337_v24 = vrot.slane %v329_v21, %v336_v19 }
 0x130   :  { %v332_v25 = vsub.f32 %v330_v22, %v331_v23  ;;  %v339_v26 = vmul.f32 %v337_v24, %v305_v59 }
 0x132   :  { %v344_v27 = vrot.slane %v332_v25, %v336_v19 }
 0x134   :  { %v346_v28 = vadd.f32 %v344_v27, %v339_v26 }
 0x136   :  { %v347_v29 = vmax.f32 %v346_v28, 0.0 }
 0x138   :  { %348 = vst [vmem:[%s805_s4] sm:$0xff] %v347_v29 }

// kernel: _reference_encoder_forward.14
= control target key start
LH: loop header
LB: loop body
LE: loop exit
PB: predicated region body
PF: predicated region fallthrough
CT: control target
= control target key end

     0   :  { %vm930_vm0 = vmmov 0   ;;  %vm528_vm1 = vcmask 1043456   ;;  %s1423_s1 = inlined_call_operand.vmem [shape: f32[1152,128], index: 1, kind: input, shape index: {}]   ;;  %s1424_s0 = inlined_call_operand.vmem [shape: f32[4,1152], index: 0, kind: input, shape index: {}]   ;;  %s1425_s2 = inlined_call_operand.vmem [shape: f32[1,128], index: 2, kind: input, shape index: {}]   ;;  %s1426_s3 = inlined_call_operand.vmem [shape: f32[1,128], index: 3, kind: input, shape index: {}]   ;;  %s1427_s4 = inlined_call_operand.vmem [shape: f32[4,128], index: 4, kind: output, shape index: {}]  }
   0x1   :  { %v38_v0 = vld [vmem:[%s1423_s1 + $0x80] sm:$0xff]  ;;  %v39_v1 = vld [vmem:[%s1423_s1 + $0x88] sm:$0xff]  ;;  %v40_v11 = vld [vmem:[%s1423_s1 + $0x90] sm:$0xff] }
   0x2   :  { %v70_v2 = vld [vmem:[%s1423_s1 + $0x180] sm:$0xff]  ;;  %v768_v3 = vpack.c.bf16 %v39_v1, %v38_v0  ;;  %v71_v4 = vld [vmem:[%s1423_s1 + $0x188] sm:$0xff]  ;;  %v41_v13 = vld [vmem:[%s1423_s1 + $0x98] sm:$0xff] }
   0x3   :  { %v22_v5 = vld [vmem:[%s1423_s1] sm:$0xff]  ;;  %v23_v6 = vld [vmem:[%s1423_s1 + $0x8] sm:$0xff]  ;;  %v800_v7 = vpack.c.bf16 %v71_v4, %v70_v2  ;;  %v72_v14 = vld [vmem:[%s1423_s1 + $0x190] sm:$0xff]  ;;  %v772_v16 = vpack.c.bf16 %v41_v13, %v40_v11 }
   0x4   :  { %v770_v8 = vpack.c.bf16 %v23_v6, %v22_v5  ;;  %v54_v9 = vld [vmem:[%s1423_s1 + $0x100] sm:$0xff]  ;;  %v55_v10 = vld [vmem:[%s1423_s1 + $0x108] sm:$0xff]  ;;  %769 = vmatprep.subr.bf16.mxu0 %v768_v3  ;;  %v73_v15 = vld [vmem:[%s1423_s1 + $0x198] sm:$0xff] }
   0x5   :  { %v802_v12 = vpack.c.bf16 %v55_v10, %v54_v9  ;;  %801 = vmatprep.subr.bf16.mxu1 %v800_v7  ;;  %v804_v17 = vpack.c.bf16 %v73_v15, %v72_v14  ;;  %v24_v18 = vld [vmem:[%s1423_s1 + $0x10] sm:$0xff]  ;;  %v25_v19 = vld [vmem:[%s1423_s1 + $0x18] sm:$0xff]  ;;  %v42_v23 = vld [vmem:[%s1423_s1 + $0xa0] sm:$0xff] }
   0x6   :  { %771 = vmatpush3.bf16.msra.mxu0 %v770_v8  ;;  %v56_v20 = vld [vmem:[%s1423_s1 + $0x110] sm:$0xff]  ;;  %v774_v21 = vpack.c.bf16 %v25_v19, %v24_v18  ;;  %v57_v22 = vld [vmem:[%s1423_s1 + $0x118] sm:$0xff]  ;;  %v43_v24 = vld [vmem:[%s1423_s1 + $0xa8] sm:$0xff] }
   0x7   :  { %803 = vmatpush3.bf16.msra.mxu1 %v802_v12  ;;  %773 = vmatprep.subr.bf16.mxu0 %v772_v16  ;;  %v806_v25 = vpack.c.bf16 %v57_v22, %v56_v20  ;;  %v776_v26 = vpack.c.bf16 %v43_v24, %v42_v23  ;;  %v74_v27 = vld [vmem:[%s1423_s1 + $0x1a0] sm:$0xff]  ;;  %v75_v28 = vld [vmem:[%s1423_s1 + $0x1a8] sm:$0xff]  ;;  %v44_v35 = vld [vmem:[%s1423_s1 + $0xb0] sm:$0xff] }
   0x8   :  { %805 = vmatprep.subr.bf16.mxu1 %v804_v17  ;;  %v26_v29 = vld [vmem:[%s1423_s1 + $0x20] sm:$0xff]  ;;  %v808_v30 = vpack.c.bf16 %v75_v28, %v74_v27  ;;  %v27_v31 = vld [vmem:[%s1423_s1 + $0x28] sm:$0xff]  ;;  %v45_v36 = vld [vmem:[%s1423_s1 + $0xb8] sm:$0xff] }
   0x9   :  { %v58_v32 = vld [vmem:[%s1423_s1 + $0x120] sm:$0xff]  ;;  %v59_v33 = vld [vmem:[%s1423_s1 + $0x128] sm:$0xff]  ;;  %v778_v34 = vpack.c.bf16 %v27_v31, %v26_v29  ;;  %v76_v37 = vld [vmem:[%s1423_s1 + $0x1b0] sm:$0xff]  ;;  %v780_v39 = vpack.c.bf16 %v45_v36, %v44_v35 }
   0xa   :  { %775 = vmatpush3.bf16.msra.mxu0 %v774_v21  ;;  %v810_v38 = vpack.c.bf16 %v59_v33, %v58_v32  ;;  %v77_v40 = vld [vmem:[%s1423_s1 + $0x1b8] sm:$0xff]  ;;  %v28_v41 = vld [vmem:[%s1423_s1 + $0x30] sm:$0xff]  ;;  %v46_v46 = vld [vmem:[%s1423_s1 + $0xc0] sm:$0xff] }
   0xb   :  { %807 = vmatpush3.bf16.msra.mxu1 %v806_v25  ;;  %777 = vmatprep.subr.bf16.mxu0 %v776_v26  ;;  %v29_v42 = vld [vmem:[%s1423_s1 + $0x38] sm:$0xff]  ;;  %v812_v43 = vpack.c.bf16 %v77_v40, %v76_v37  ;;  %v60_v44 = vld [vmem:[%s1423_s1 + $0x130] sm:$0xff]  ;;  %v47_v47 = vld [vmem:[%s1423_s1 + $0xc8] sm:$0xff] }
   0xc   :  { %809 = vmatprep.subr.bf16.mxu1 %v808_v30  ;;  %v61_v45 = vld [vmem:[%s1423_s1 + $0x138] sm:$0xff]  ;;  %v78_v48 = vld [vmem:[%s1423_s1 + $0x1c0] sm:$0xff]  ;;  %v79_v49 = vld [vmem:[%s1423_s1 + $0x1c8] sm:$0xff]  ;;  %v782_v50 = vpack.c.bf16 %v29_v42, %v28_v41  ;;  %v784_v52 = vpack.c.bf16 %v47_v47, %v46_v46 }
   0xd   :  { %v814_v51 = vpack.c.bf16 %v61_v45, %v60_v44  ;;  %v30_v53 = vld [vmem:[%s1423_s1 + $0x40] sm:$0xff]  ;;  %v31_v54 = vld [vmem:[%s1423_s1 + $0x48] sm:$0xff]  ;;  %v816_v56 = vpack.c.bf16 %v79_v49, %v78_v48  ;;  %v48_v58 = vld [vmem:[%s1423_s1 + $0xd0] sm:$0xff] }
   0xe   :  { %779 = vmatpush3.bf16.msra.mxu0 %v778_v34  ;;  %v62_v55 = vld [vmem:[%s1423_s1 + $0x140] sm:$0xff]  ;;  %v63_v57 = vld [vmem:[%s1423_s1 + $0x148] sm:$0xff]  ;;  %v49_v59 = vld [vmem:[%s1423_s1 + $0xd8] sm:$0xff]  ;;  %v786_v62 = vpack.c.bf16 %v31_v54, %v30_v53 }
   0xf   :  { %811 = vmatpush3.bf16.msra.mxu1 %v810_v38  ;;  %781 = vmatprep.subr.bf16.mxu0 %v780_v39  ;;  %v80_v60 = vld [vmem:[%s1423_s1 + $0x1d0] sm:$0xff]  ;;  %v81_v61 = vld [vmem:[%s1423_s1 + $0x1d8] sm:$0xff]  ;;  %v818_v63 = vpack.c.bf16 %v63_v57, %v62_v55  ;;  %v788_v0 = vpack.c.bf16 %v49_v59, %v48_v58  ;;  %v50_v6 = vld [vmem:[%s1423_s1 + $0xe0] sm:$0xff] }
  0x10   :  { %813 = vmatprep.subr.bf16.mxu1 %v812_v43  ;;  %v32_v1 = vld [vmem:[%s1423_s1 + $0x50] sm:$0xff]  ;;  %v33_v2 = vld [vmem:[%s1423_s1 + $0x58] sm:$0xff]  ;;  %v820_v4 = vpack.c.bf16 %v81_v61, %v80_v60  ;;  %v51_v7 = vld [vmem:[%s1423_s1 + $0xe8] sm:$0xff] }
  0x11   :  { %v64_v3 = vld [vmem:[%s1423_s1 + $0x150] sm:$0xff]  ;;  %v65_v5 = vld [vmem:[%s1423_s1 + $0x158] sm:$0xff]  ;;  %v82_v8 = vld [vmem:[%s1423_s1 + $0x1e0] sm:$0xff]  ;;  %v790_v10 = vpack.c.bf16 %v33_v2, %v32_v1  ;;  %v792_v14 = vpack.c.bf16 %v51_v7, %v50_v6 }
  0x12   :  { %783 = vmatpush3.bf16.msra.mxu0 %v782_v50  ;;  %v83_v9 = vld [vmem:[%s1423_s1 + $0x1e8] sm:$0xff]  ;;  %v34_v11 = vld [vmem:[%s1423_s1 + $0x60] sm:$0xff]  ;;  %v822_v13 = vpack.c.bf16 %v65_v5, %v64_v3  ;;  %v52_v20 = vld [vmem:[%s1423_s1 + $0xf0] sm:$0xff] }
  0x13   :  { %815 = vmatpush3.bf16.msra.mxu1 %v814_v51  ;;  %785 = vmatprep.subr.bf16.mxu0 %v784_v52  ;;  %v35_v12 = vld [vmem:[%s1423_s1 + $0x68] sm:$0xff]  ;;  %v66_v15 = vld [vmem:[%s1423_s1 + $0x160] sm:$0xff]  ;;  %v824_v18 = vpack.c.bf16 %v83_v9, %v82_v8  ;;  %v53_v21 = vld [vmem:[%s1423_s1 + $0xf8] sm:$0xff] }
  0x14   :  { %817 = vmatprep.subr.bf16.mxu1 %v816_v56  ;;  %v17_v16 = vld [vmem:[%s1424_s0] sm:$0xff]  ;;  %v18_v17 = vld [vmem:[%s1424_s0 + $0x8] sm:$0xff]  ;;  %v84_v24 = vld [vmem:[%s1423_s1 + $0x1f0] sm:$0xff]  ;;  %v794_v26 = vpack.c.bf16 %v35_v12, %v34_v11  ;;  %v796_v28 = vpack.c.bf16 %v53_v21, %v52_v20 }
  0x15   :  { %v67_v19 = vld [vmem:[%s1423_s1 + $0x168] sm:$0xff]  ;;  %v170_v22 = vcombine.high %v17_v16, %v17_v16  ;;  %v171_v23 = vcombine.high %v18_v17, %v18_v17  ;;  %v85_v25 = vld [vmem:[%s1423_s1 + $0x1f8] sm:$0xff]  ;;  %v36_v29 = vld [vmem:[%s1423_s1 + $0x70] sm:$0xff] }
  0x16   :  { %787 = vmatpush3.bf16.msra.mxu0 %v786_v62  ;;  %v826_v27 = vpack.c.bf16 %v67_v19, %v66_v15  ;;  %v37_v30 = vld [vmem:[%s1423_s1 + $0x78] sm:$0xff]  ;;  %v68_v31 = vld [vmem:[%s1423_s1 + $0x170] sm:$0xff]  ;;  %v828_v32 = vpack.c.bf16 %v85_v25, %v84_v24  ;;  %v102_v34 = vld [vmem:[%s1423_s1 + $0x280] sm:$0xff] }
  0x17   :  { %819 = vmatpush3.bf16.msra.mxu1 %v818_v63  ;;  %789 = vmatprep.subr.bf16.mxu0 %v788_v0  ;;  %v69_v33 = vld [vmem:[%s1423_s1 + $0x178] sm:$0xff]  ;;  %v103_v35 = vld [vmem:[%s1423_s1 + $0x288] sm:$0xff]  ;;  %v134_v36 = vld [vmem:[%s1423_s1 + $0x380] sm:$0xff]  ;;  %v798_v38 = vpack.c.bf16 %v37_v30, %v36_v29 }
  0x18   :  { %821 = vmatprep.subr.bf16.mxu1 %v820_v4  ;;  %242 = vmatprep.mubr.f32.mxu0 %v170_v22  ;;  %v135_v37 = vld [vmem:[%s1423_s1 + $0x388] sm:$0xff]  ;;  %v830_v39 = vpack.c.bf16 %v69_v33, %v68_v31  ;;  %v832_v40 = vpack.c.bf16 %v103_v35, %v102_v34  ;;  %v86_v41 = vld [vmem:[%s1423_s1 + $0x200] sm:$0xff]  ;;  %v104_v46 = vld [vmem:[%s1423_s1 + $0x290] sm:$0xff] }
  0x19   :  { %312 = vmatprep.mubr.f32.mxu1 %v171_v23  ;;  %v87_v42 = vld [vmem:[%s1423_s1 + $0x208] sm:$0xff]  ;;  %v118_v43 = vld [vmem:[%s1423_s1 + $0x300] sm:$0xff]  ;;  %v864_v44 = vpack.c.bf16 %v135_v37, %v134_v36  ;;  %v105_v47 = vld [vmem:[%s1423_s1 + $0x298] sm:$0xff] }
  0x1a   :  { %791 = vmatpush3.bf16.msra.mxu0 %v790_v10  ;;  %v119_v45 = vld [vmem:[%s1423_s1 + $0x308] sm:$0xff]  ;;  %v136_v48 = vld [vmem:[%s1423_s1 + $0x390] sm:$0xff]  ;;  %v137_v49 = vld [vmem:[%s1423_s1 + $0x398] sm:$0xff]  ;;  %v834_v50 = vpack.c.bf16 %v87_v42, %v86_v41  ;;  %v836_v52 = vpack.c.bf16 %v105_v47, %v104_v46 }
  0x1b   :  { %823 = vmatpush3.bf16.msra.mxu1 %v822_v13  ;;  %793 = vmatprep.subr.bf16.mxu0 %v792_v14  ;;  %v866_v51 = vpack.c.bf16 %v119_v45, %v118_v43  ;;  %v88_v53 = vld [vmem:[%s1423_s1 + $0x210] sm:$0xff]  ;;  %v89_v54 = vld [vmem:[%s1423_s1 + $0x218] sm:$0xff]  ;;  %v868_v56 = vpack.c.bf16 %v137_v49, %v136_v48  ;;  %v106_v58 = vld [vmem:[%s1423_s1 + $0x2a0] sm:$0xff] }
  0x1c   :  { %825 = vmatprep.subr.bf16.mxu1 %v824_v18  ;;  %v120_v55 = vld [vmem:[%s1423_s1 + $0x310] sm:$0xff]  ;;  %v121_v57 = vld [vmem:[%s1423_s1 + $0x318] sm:$0xff]  ;;  %v107_v59 = vld [vmem:[%s1423_s1 + $0x2a8] sm:$0xff]  ;;  %v838_v62 = vpack.c.bf16 %v89_v54, %v88_v53 }
  0x1d   :  { %v138_v60 = vld [vmem:[%s1423_s1 + $0x3a0] sm:$0xff]  ;;  %v139_v61 = vld [vmem:[%s1423_s1 + $0x3a8] sm:$0xff]  ;;  %v870_v63 = vpack.c.bf16 %v121_v57, %v120_v55  ;;  %v840_v0 = vpack.c.bf16 %v107_v59, %v106_v58  ;;  %v108_v6 = vld [vmem:[%s1423_s1 + $0x2b0] sm:$0xff] }
  0x1e   :  { %795 = vmatpush3.bf16.msra.mxu0 %v794_v26  ;;  %v90_v1 = vld [vmem:[%s1423_s1 + $0x220] sm:$0xff]  ;;  %v91_v2 = vld [vmem:[%s1423_s1 + $0x228] sm:$0xff]  ;;  %v872_v4 = vpack.c.bf16 %v139_v61, %v138_v60  ;;  %v109_v7 = vld [vmem:[%s1423_s1 + $0x2b8] sm:$0xff] }
  0x1f   :  { %827 = vmatpush3.bf16.msra.mxu1 %v826_v27  ;;  %797 = vmatprep.subr.bf16.mxu0 %v796_v28  ;;  %v122_v3 = vld [vmem:[%s1423_s1 + $0x320] sm:$0xff]  ;;  %v123_v5 = vld [vmem:[%s1423_s1 + $0x328] sm:$0xff]  ;;  %v140_v8 = vld [vmem:[%s1423_s1 + $0x3b0] sm:$0xff]  ;;  %v842_v10 = vpack.c.bf16 %v91_v2, %v90_v1  ;;  %v844_v13 = vpack.c.bf16 %v109_v7, %v108_v6 }
  0x20   :  { %829 = vmatprep.subr.bf16.mxu1 %v828_v32  ;;  %v141_v9 = vld [vmem:[%s1423_s1 + $0x3b8] sm:$0xff]  ;;  %v92_v11 = vld [vmem:[%s1423_s1 + $0x230] sm:$0xff]  ;;  %v874_v12 = vpack.c.bf16 %v123_v5, %v122_v3  ;;  %v110_v18 = vld [vmem:[%s1423_s1 + $0x2c0] sm:$0xff] }
  0x21   :  { %v93_v14 = vld [vmem:[%s1423_s1 + $0x238] sm:$0xff]  ;;  %v124_v15 = vld [vmem:[%s1423_s1 + $0x330] sm:$0xff]  ;;  %v111_v19 = vld [vmem:[%s1423_s1 + $0x2c8] sm:$0xff] }
  0x22   :  { %799 = vmatpush3.bf16.msra.mxu0 %v798_v38  ;;  %v1260_v20 = vld [vmem:[%s1424_s0 + $0x10] sm:$0xff]  ;;  %v142_v21 = vld [vmem:[%s1423_s1 + $0x3c0] sm:$0xff]  ;;  %v143_v22 = vld [vmem:[%s1423_s1 + $0x3c8] sm:$0xff]  ;;  %v846_v25 = vpack.c.bf16 %v93_v14, %v92_v11  ;;  %v848_v28 = vpack.c.bf16 %v111_v19, %v110_v18  ;;  %v929_v11 = vmov 0.0|0.0  }
  0x23   :  { %831 = vmatpush3.bf16.msra.mxu1 %v830_v39  ;;  %833 = vmatprep.subr.bf16.mxu0 %v832_v40  ;;  %v172_v23 = vcombine.high %v1260_v20, %v1260_v20  ;;  %v1273_v24 = vld [vmem:[%s1424_s0 + $0x18] sm:$0xff]  ;;  %v94_v29 = vld [vmem:[%s1423_s1 + $0x240] sm:$0xff]  ;;  %v95_v30 = vld [vmem:[%s1423_s1 + $0x248] sm:$0xff]  ;;  %v880_v32 = vpack.c.bf16 %v143_v22, %v142_v21 }
  0x24   :  { %865 = vmatprep.subr.bf16.mxu1 %v864_v44  ;;  %v173_v26 = vcombine.high %v1273_v24, %v1273_v24  ;;  %v126_v31 = vld [vmem:[%s1423_s1 + $0x340] sm:$0xff]  ;;  %v127_v33 = vld [vmem:[%s1423_s1 + $0x348] sm:$0xff]  ;;  %v112_v34 = vld [vmem:[%s1423_s1 + $0x2d0] sm:$0xff]  ;;  %v850_v38 = vpack.c.bf16 %v95_v30, %v94_v29 }
  0x25   :  { %243 = vmatmul.mubr.f32.vlgmr.msra.gmra.mrb[0].mxu0 %v17_v16  ;;  %v125_v16 = vld [vmem:[%s1423_s1 + $0x338] sm:$0xff]  ;;  %v144_v36 = vld [vmem:[%s1423_s1 + $0x3d0] sm:$0xff]  ;;  %v882_v39 = vpack.c.bf16 %v127_v33, %v126_v31  ;;  %v114_v46 = vld [vmem:[%s1423_s1 + $0x2e0] sm:$0xff] }
  0x26   :  { %313 = vmatmul.mubr.f32.vlgmr.msra.gmra.mrb[0].mxu1 %v18_v17  ;;  %835 = vmatpush3.bf16.msra.mxu0 %v834_v50  ;;  %v876_v17 = vpack.c.bf16 %v141_v9, %v140_v8  ;;  %v878_v27 = vpack.c.bf16 %v125_v16, %v124_v15  ;;  %v113_v35 = vld [vmem:[%s1423_s1 + $0x2d8] sm:$0xff]  ;;  %v96_v41 = vld [vmem:[%s1423_s1 + $0x250] sm:$0xff]  ;;  %v115_v47 = vld [vmem:[%s1423_s1 + $0x2e8] sm:$0xff] }
  0x27   :  { %867 = vmatpush3.bf16.msra.mxu1 %v866_v51  ;;  %837 = vmatprep.subr.bf16.mxu0 %v836_v52  ;;  %v145_v37 = vld [vmem:[%s1423_s1 + $0x3d8] sm:$0xff]  ;;  %v852_v40 = vpack.c.bf16 %v113_v35, %v112_v34  ;;  %v128_v43 = vld [vmem:[%s1423_s1 + $0x350] sm:$0xff]  ;;  %v146_v48 = vld [vmem:[%s1423_s1 + $0x3e0] sm:$0xff]  ;;  %v856_v52 = vpack.c.bf16 %v115_v47, %v114_v46 }
  0x28   :  { %869 = vmatprep.subr.bf16.mxu1 %v868_v56  ;;  %382 = vmatprep.mubr.f32.mxu0 %v172_v23  ;;  %v97_v42 = vld [vmem:[%s1423_s1 + $0x258] sm:$0xff]  ;;  %v884_v44 = vpack.c.bf16 %v145_v37, %v144_v36  ;;  %v147_v49 = vld [vmem:[%s1423_s1 + $0x3e8] sm:$0xff]  ;;  %v98_v53 = vld [vmem:[%s1423_s1 + $0x260] sm:$0xff] }
  0x29   :  { %452 = vmatprep.mubr.f32.mxu1 %v173_v26  ;;  %v129_v45 = vld [vmem:[%s1423_s1 + $0x358] sm:$0xff]  ;;  %v854_v50 = vpack.c.bf16 %v97_v42, %v96_v41  ;;  %v99_v54 = vld [vmem:[%s1423_s1 + $0x268] sm:$0xff]  ;;  %v130_v55 = vld [vmem:[%s1423_s1 + $0x360] sm:$0xff]  ;;  %v888_v56 = vpack.c.bf16 %v147_v49, %v146_v48 }
  0x2a   :  { %839 = vmatpush3.bf16.msra.mxu0 %v838_v62  ;;  %v886_v51 = vpack.c.bf16 %v129_v45, %v128_v43  ;;  %v131_v57 = vld [vmem:[%s1423_s1 + $0x368] sm:$0xff]  ;;  %v116_v58 = vld [vmem:[%s1423_s1 + $0x2f0] sm:$0xff]  ;;  %v117_v59 = vld [vmem:[%s1423_s1 + $0x2f8] sm:$0xff]  ;;  %v858_v62 = vpack.c.bf16 %v99_v54, %v98_v53 }
  0x2b   :  { %871 = vmatpush3.bf16.msra.mxu1 %v870_v63  ;;  %841 = vmatprep.subr.bf16.mxu0 %v840_v0  ;;  %v148_v60 = vld [vmem:[%s1423_s1 + $0x3f0] sm:$0xff]  ;;  %v149_v61 = vld [vmem:[%s1423_s1 + $0x3f8] sm:$0xff]  ;;  %v890_v63 = vpack.c.bf16 %v131_v57, %v130_v55  ;;  %v860_v0 = vpack.c.bf16 %v117_v59, %v116_v58  ;;  %v150_v8 = vld [vmem:[%s1423_s1 + $0x400] sm:$0xff] }
  0x2c   :  { %873 = vmatprep.subr.bf16.mxu1 %v872_v4  ;;  %v100_v1 = vld [vmem:[%s1423_s1 + $0x270] sm:$0xff]  ;;  %v101_v2 = vld [vmem:[%s1423_s1 + $0x278] sm:$0xff]  ;;  %v892_v3 = vpack.c.bf16 %v149_v61, %v148_v60  ;;  %v151_v9 = vld [vmem:[%s1423_s1 + $0x408] sm:$0xff] }
  0x2d   :  { %v132_v4 = vld [vmem:[%s1423_s1 + $0x370] sm:$0xff]  ;;  %v133_v5 = vld [vmem:[%s1423_s1 + $0x378] sm:$0xff]  ;;  %v862_v6 = vpack.c.bf16 %v101_v2, %v100_v1  ;;  %v154_v15 = vld [vmem:[%s1423_s1 + $0x420] sm:$0xff] }
  0x2e   :  { %843 = vmatpush3.bf16.msra.mxu0 %v842_v10  ;;  %v894_v7 = vpack.c.bf16 %v133_v5, %v132_v4  ;;  %v897_v10 = vpack.c.bf16 %v151_v9, %v150_v8  ;;  %v155_v16 = vld [vmem:[%s1423_s1 + $0x428] sm:$0xff]  ;;  %v156_v19 = vld [vmem:[%s1423_s1 + $0x430] sm:$0xff]  ;;  %v158_v22 = vld [vmem:[%s1423_s1 + $0x440] sm:$0xff] }
  0x2f   :  { %875 = vmatpush3.bf16.msra.mxu1 %v874_v12  ;;  %845 = vmatprep.subr.bf16.mxu0 %v844_v13  ;;  %v152_v12 = vld [vmem:[%s1423_s1 + $0x410] sm:$0xff]  ;;  %v153_v13 = vld [vmem:[%s1423_s1 + $0x418] sm:$0xff]  ;;  %v903_v18 = vpack.c.bf16 %v155_v16, %v154_v15  ;;  %v159_v23 = vld [vmem:[%s1423_s1 + $0x448] sm:$0xff] }
  0x30   :  { %877 = vmatprep.subr.bf16.mxu1 %v876_v17  ;;  %v900_v14 = vpack.c.bf16 %v153_v13, %v152_v12  ;;  %v931_v17 = vmov 0.0   ;;  %v161_v26 = vld [vmem:[%s1423_s1 + $0x458] sm:$0xff]  ;;  %v163_v29 = vld [vmem:[%s1423_s1 + $0x468] sm:$0xff]  ;;  %v164_v31 = vld [vmem:[%s1423_s1 + $0x470] sm:$0xff] }
  0x31   :  { %v21_v34 = vld [vmem:[%s1424_s0 + $0x20] sm:$0xf] }
  0x32   :  { %847 = vmatpush3.bf16.msra.mxu0 %v846_v25  ;;  %v160_v25 = vld [vmem:[%s1423_s1 + $0x450] sm:$0xff]  ;;  %v551_v12 = vld [vmem:[%s1425_s2] sm:$0x1] }
  0x33   :  { %879 = vmatpush3.bf16.msra.mxu1 %v878_v27  ;;  %849 = vmatprep.subr.bf16.mxu0 %v848_v28  ;;  %v912_v27 = vpack.c.bf16 %v161_v26, %v160_v25  ;;  %v162_v28 = vld [vmem:[%s1423_s1 + $0x460] sm:$0xff] }
  0x34   :  { %881 = vmatprep.subr.bf16.mxu1 %v880_v32  ;;  %v915_v30 = vpack.c.bf16 %v163_v29, %v162_v28  ;;  %v165_v32 = vld [vmem:[%s1423_s1 + $0x478] sm:$0xff]  ;;  %v553_v16 = vld [vmem:[%s1426_s3] sm:$0x1] }
  0x35   :  { %v918_v33 = vpack.c.bf16 %v165_v32, %v164_v31 }
  0x36   :  { %851 = vmatpush3.bf16.msra.mxu0 %v850_v38 }
  0x37   :  { %883 = vmatpush3.bf16.msra.mxu1 %v882_v39  ;;  %853 = vmatprep.subr.bf16.mxu0 %v852_v40 }
  0x38   :  { %885 = vmatprep.subr.bf16.mxu1 %v884_v44 }
  0x3a   :  { %855 = vmatpush3.bf16.msra.mxu0 %v854_v50 }
  0x3b   :  { %887 = vmatpush3.bf16.msra.mxu1 %v886_v51  ;;  %857 = vmatprep.subr.bf16.mxu0 %v856_v52 }
  0x3c   :  { %889 = vmatprep.subr.bf16.mxu1 %v888_v56 }
  0x3e   :  { %859 = vmatpush3.bf16.msra.mxu0 %v858_v62 }
  0x3f   :  { %891 = vmatpush3.bf16.msra.mxu1 %v890_v63  ;;  %861 = vmatprep.subr.bf16.mxu0 %v860_v0 }
  0x40   :  { %893 = vmatprep.subr.bf16.mxu1 %v892_v3 }
  0x42   :  { %863 = vmatpush3.bf16.msra.mxu0 %v862_v6 }
  0x43   :  { %895 = vmatpush3.bf16.msra.mxu1 %v894_v7  ;;  %896 = vmatprep.subr.bf16.mxu0 %v929_v11 }
  0x45   :  { %383 = vmatmul.mubr.f32.vlgmr.msra.gmra.mrb[2].mxu0 %v1260_v20  ;;  %v157_v20 = vld [vmem:[%s1423_s1 + $0x438] sm:$0xff] }
  0x46   :  { %898 = vmatpush3.bf16.msra.mxu0 %v897_v10  ;;  %453 = vmatmul.mubr.f32.vlgmr.msra.gmra.mrb[2].mxu1 %v1273_v24  ;;  %v906_v21 = vpack.c.bf16 %v157_v20, %v156_v19  ;;  %v909_v24 = vpack.c.bf16 %v159_v23, %v158_v22  ;;  %v557_v10 = vlaneseq }
  0x47   :  { %899 = vmatprep.subr.bf16.mxu0 %v929_v11  ;;  %765 = vmatprep.mubr.msk.f32.mxu0 %vm930_vm0, %v931_v17 }
  0x4a   :  { %901 = vmatpush3.bf16.msra.mxu0 %v900_v14 }
  0x4b   :  { %902 = vmatprep.subr.bf16.mxu0 %v929_v11 }
  0x4e   :  { %904 = vmatpush3.bf16.msra.mxu0 %v903_v18 }
  0x4f   :  { %905 = vmatprep.subr.bf16.mxu0 %v929_v11 }
  0x52   :  { %907 = vmatpush3.bf16.msra.mxu0 %v906_v21 }
  0x53   :  { %908 = vmatprep.subr.bf16.mxu0 %v929_v11 }
  0x56   :  { %910 = vmatpush3.bf16.msra.mxu0 %v909_v24 }
  0x57   :  { %911 = vmatprep.subr.bf16.mxu0 %v929_v11 }
  0x5a   :  { %913 = vmatpush3.bf16.msra.mxu0 %v912_v27 }
  0x5b   :  { %914 = vmatprep.subr.bf16.mxu0 %v929_v11 }
  0x5e   :  { %916 = vmatpush3.bf16.msra.mxu0 %v915_v30 }
  0x5f   :  { %917 = vmatprep.subr.bf16.mxu0 %v929_v11  ;;  %v558_v11 = vshrl.u32 %v557_v10, 7 }
  0x61   :  { %v559_v13 = vsub.s32 0, %v558_v11 }
  0x62   :  { %919 = vmatpush3.bf16.msra.mxu0 %v918_v33 }
  0x65   :  { %766 = vmatmul.mubr.f32.vlgmr.msra.gmra.mrb[4].mxu0 %v21_v34 }
  0xf8   :  { %v608_v35 = vpop.f32.mrb[0].mxu0 }
  0xf9   :  { %v643_v36 = vpop.f32.mrb[0].mxu1  ;;  %v609_v37 = vpop.f32.mrb[1].mxu0 }
  0xfa   :  { %v610_v38 = vadd.f32 %v609_v37, %v608_v35  ;;  %v644_v39 = vpop.f32.mrb[1].mxu1 }
  0xfb   :  { %v645_v40 = vadd.f32 %v644_v39, %v643_v36 }
  0xfd   :  { %v315_v41 = vadd.f32 %v645_v40, %v610_v38 }
 0x118   :  { %v678_v42 = vpop.f32.mrb[2].mxu0 }
 0x119   :  { %v679_v43 = vpop.f32.mrb[3].mxu0  ;;  %v713_v44 = vpop.f32.mrb[2].mxu1 }
 0x11a   :  { %v680_v45 = vadd.f32 %v679_v43, %v678_v42  ;;  %v714_v46 = vpop.f32.mrb[3].mxu1 }
 0x11b   :  { %v715_v47 = vadd.f32 %v714_v46, %v713_v44 }
 0x11c   :  { %v385_v48 = vadd.f32 %v680_v45, %v315_v41 }
 0x11e   :  { %v455_v49 = vadd.f32 %v715_v47, %v385_v48 }
 0x138   :  { %v524_v50 = vpop.f32.mrb[4].mxu0 }
 0x139   :  { %v525_v51 = vadd.f32 %v524_v50, %v455_v49  ;;  %v767_v52 = vpop.f32.mrb[5].mxu0 }
 0x13b   :  { %v529_v53 = vsel %vm528_vm1, %v525_v51, 0.0  ;;  %v537_v54 = vmul.f32 %v525_v51, %v525_v51 }
 0x13c   :  { %v530_v55 = vrot.slane %v529_v53, 4 }
 0x13d   :  { %v538_v56 = vsel %vm528_vm1, %v537_v54, 0.0 }
 0x13e   :  { %v531_v57 = vadd.f32 %v530_v55, %v529_v53  ;;  %v539_v58 = vrot.slane %v538_v56, 4 }
 0x140   :  { %v532_v59 = vrot.slane %v531_v57, 2  ;;  %v540_v60 = vadd.f32 %v539_v58, %v538_v56 }
 0x142   :  { %v533_v61 = vadd.f32 %v532_v59, %v531_v57  ;;  %v541_v62 = vrot.slane %v540_v60, 2 }
 0x144   :  { %v534_v63 = vrot.slane %v533_v61, 1  ;;  %v542_v0 = vadd.f32 %v541_v62, %v540_v60 }
 0x146   :  { %v535_v1 = vadd.f32 %v534_v63, %v533_v61  ;;  %v543_v2 = vrot.slane %v542_v0, 1 }
 0x148   :  { %v536_v3 = vmul.f32 0.25, %v535_v1  ;;  %v544_v4 = vadd.f32 %v543_v2, %v542_v0 }
 0x14a   :  { %v545_v5 = vmul.f32 0.25, %v544_v4  ;;  %v546_v6 = vmul.f32 %v536_v3, %v536_v3 }
 0x14c   :  { %v547_v7 = vsub.f32 %v545_v5, %v546_v6 }
 0x14e   :  { %v548_v8 = vmax.f32 %v547_v7, 0.0 }
 0x150   :  { %v549_v9 = vadd.f32 1e-05, %v548_v8 }
 0x152   :  { %927 = vrsqrt.f32 %v549_v9 }
 0x15c   :  { %v928_v14 = vpop.eup %927 }
 0x15d   :  { %v552_v15 = vmul.f32 %v928_v14, %v551_v12 }
 0x15f   :  { %v554_v17 = vmul.f32 %v552_v15, %v536_v3  ;;  %v560_v18 = vrot.slane %v552_v15, %v559_v13 }
 0x161   :  { %v555_v19 = vsub.f32 %v553_v16, %v554_v17  ;;  %v562_v20 = vmul.f32 %v560_v18, %v525_v51 }
 0x163   :  { %v567_v21 = vrot.slane %v555_v19, %v559_v13 }
 0x165   :  { %v569_v22 = vadd.f32 %v567_v21, %v562_v20 }
 0x167   :  { %v570_v23 = vmax.f32 %v569_v22, 0.0 }
 0x169   :  { %571 = vst [vmem:[%s1427_s4] sm:$0xf] %v570_v23 }

// kernel: _reference_encoder_forward.15
= control target key start
LH: loop header
LB: loop body
LE: loop exit
PB: predicated region body
PF: predicated region fallthrough
CT: control target
= control target key end

     0   :  { %v1025_v3 = vmov 0.0   ;;  %vm1027_vm0 = vmmov 0   ;;  %s1447_s1 = inlined_call_operand.vmem [shape: f32[128,384], index: 1, kind: input, shape index: {}]   ;;  %s1448_s0 = inlined_call_operand.vmem [shape: f32[16,128], index: 0, kind: input, shape index: {}]   ;;  %s1449_s3 = inlined_call_operand.vmem [shape: f32[128,384], index: 3, kind: input, shape index: {}]   ;;  %s1450_s2 = inlined_call_operand.vmem [shape: f32[1,384], index: 2, kind: input, shape index: {}]   ;;  %s1451_s4 = inlined_call_operand.vmem [shape: f32[1,384], index: 4, kind: input, shape index: {}]   ;;  %s1452_s5 = inlined_call_operand.vmem [shape: f32[8,128], index: 5, kind: output, shape index: {}]  }
   0x1   :  { %v28_v0 = vld [vmem:[%s1447_s1 + $0x8] sm:$0xff]  ;;  %v31_v1 = vld [vmem:[%s1447_s1 + $0x20] sm:$0xff]  ;;  %156 = vmatprep.mubr.f32.mxu0 %v1025_v3  ;;  %v30_v5 = vld [vmem:[%s1447_s1 + $0x18] sm:$0xff] }
   0x2   :  { %v27_v2 = vld [vmem:[%s1447_s1] sm:$0xff]  ;;  %v814_v4 = vpack.c.bf16 %v31_v1, %v28_v0  ;;  %v34_v6 = vld [vmem:[%s1447_s1 + $0x38] sm:$0xff]  ;;  %v37_v7 = vld [vmem:[%s1447_s1 + $0x50] sm:$0xff] }
   0x3   :  { %v816_v8 = vpack.c.bf16 %v30_v5, %v27_v2  ;;  %v818_v9 = vpack.c.bf16 %v37_v7, %v34_v6  ;;  %v33_v10 = vld [vmem:[%s1447_s1 + $0x30] sm:$0xff]  ;;  %v36_v11 = vld [vmem:[%s1447_s1 + $0x48] sm:$0xff]  ;;  %v43_v13 = vld [vmem:[%s1447_s1 + $0x80] sm:$0xff] }
   0x4   :  { %v40_v12 = vld [vmem:[%s1447_s1 + $0x68] sm:$0xff]  ;;  %815 = vmatprep.subr.bf16.mxu0 %v814_v4  ;;  %v820_v14 = vpack.c.bf16 %v36_v11, %v33_v10  ;;  %v39_v16 = vld [vmem:[%s1447_s1 + $0x60] sm:$0xff]  ;;  %v42_v17 = vld [vmem:[%s1447_s1 + $0x78] sm:$0xff] }
   0x5   :  { %817 = vmatpush1.bf16.msra.mxu0 %v816_v8  ;;  %v822_v15 = vpack.c.bf16 %v43_v13, %v40_v12  ;;  %v46_v18 = vld [vmem:[%s1447_s1 + $0x98] sm:$0xff]  ;;  %v49_v19 = vld [vmem:[%s1447_s1 + $0xb0] sm:$0xff]  ;;  %v824_v20 = vpack.c.bf16 %v42_v17, %v39_v16  ;;  %v48_v23 = vld [vmem:[%s1447_s1 + $0xa8] sm:$0xff] }
   0x6   :  { %819 = vmatprep.subr.bf16.mxu0 %v818_v9  ;;  %v45_v21 = vld [vmem:[%s1447_s1 + $0x90] sm:$0xff]  ;;  %v826_v22 = vpack.c.bf16 %v49_v19, %v46_v18  ;;  %v32_v25 = vld [vmem:[%s1447_s1 + $0x28] sm:$0xff]  ;;  %v55_v27 = vld [vmem:[%s1447_s1 + $0xe0] sm:$0xff] }
   0x7   :  { %v29_v24 = vld [vmem:[%s1447_s1 + $0x10] sm:$0xff]  ;;  %v52_v26 = vld [vmem:[%s1447_s1 + $0xc8] sm:$0xff]  ;;  %v35_v29 = vld [vmem:[%s1447_s1 + $0x40] sm:$0xff]  ;;  %v828_v31 = vpack.c.bf16 %v48_v23, %v45_v21 }
   0x8   :  { %v846_v28 = vpack.c.bf16 %v32_v25, %v29_v24  ;;  %v38_v30 = vld [vmem:[%s1447_s1 + $0x58] sm:$0xff]  ;;  %v51_v32 = vld [vmem:[%s1447_s1 + $0xc0] sm:$0xff]  ;;  %v830_v35 = vpack.c.bf16 %v55_v27, %v52_v26  ;;  %v41_v37 = vld [vmem:[%s1447_s1 + $0x70] sm:$0xff] }
   0x9   :  { %821 = vmatpush1.bf16.msra.mxu0 %v820_v14  ;;  %v54_v33 = vld [vmem:[%s1447_s1 + $0xd8] sm:$0xff]  ;;  %v850_v34 = vpack.c.bf16 %v38_v30, %v35_v29  ;;  %v1134_v36 = vld [vmem:[%s1448_s0] sm:$0xff]  ;;  %v44_v38 = vld [vmem:[%s1447_s1 + $0x88] sm:$0xff] }
   0xa   :  { %823 = vmatprep.subr.bf16.mxu0 %v822_v15  ;;  %847 = vmatprep.subr.bf16.mxu1 %v846_v28  ;;  %v58_v39 = vld [vmem:[%s1447_s1 + $0xf8] sm:$0xff]  ;;  %v61_v40 = vld [vmem:[%s1447_s1 + $0x110] sm:$0xff]  ;;  %v854_v41 = vpack.c.bf16 %v44_v38, %v41_v37  ;;  %v47_v42 = vld [vmem:[%s1447_s1 + $0xa0] sm:$0xff]  ;;  %v832_v44 = vpack.c.bf16 %v54_v33, %v51_v32 }
   0xb   :  { %849 = vmatpush3.bf16.msra.mxu1 %v846_v28  ;;  %741 = vmatprep.mubr.f32.mxu1 %v1134_v36  ;;  %v50_v43 = vld [vmem:[%s1447_s1 + $0xb8] sm:$0xff]  ;;  %v834_v45 = vpack.c.bf16 %v61_v40, %v58_v39  ;;  %v57_v46 = vld [vmem:[%s1447_s1 + $0xf0] sm:$0xff]  ;;  %v60_v47 = vld [vmem:[%s1447_s1 + $0x108] sm:$0xff]  ;;  %v1026_v40 = vmov 0.0|0.0  }
   0xc   :  { %851 = vmatprep.subr.bf16.mxu1 %v850_v34  ;;  %v64_v48 = vld [vmem:[%s1447_s1 + $0x128] sm:$0xff]  ;;  %v67_v49 = vld [vmem:[%s1447_s1 + $0x140] sm:$0xff]  ;;  %v858_v50 = vpack.c.bf16 %v50_v43, %v47_v42  ;;  %v53_v51 = vld [vmem:[%s1447_s1 + $0xd0] sm:$0xff]  ;;  %v836_v53 = vpack.c.bf16 %v60_v47, %v57_v46 }
   0xd   :  { %825 = vmatpush1.bf16.msra.mxu0 %v824_v20  ;;  %v56_v52 = vld [vmem:[%s1447_s1 + $0xe8] sm:$0xff]  ;;  %v838_v54 = vpack.c.bf16 %v67_v49, %v64_v48  ;;  %v63_v55 = vld [vmem:[%s1447_s1 + $0x120] sm:$0xff]  ;;  %v66_v56 = vld [vmem:[%s1447_s1 + $0x138] sm:$0xff] }
   0xe   :  { %827 = vmatprep.subr.bf16.mxu0 %v826_v22  ;;  %v70_v57 = vld [vmem:[%s1447_s1 + $0x158] sm:$0xff]  ;;  %v73_v58 = vld [vmem:[%s1447_s1 + $0x170] sm:$0xff]  ;;  %v862_v59 = vpack.c.bf16 %v56_v52, %v53_v51  ;;  %v59_v60 = vld [vmem:[%s1447_s1 + $0x100] sm:$0xff]  ;;  %v840_v62 = vpack.c.bf16 %v66_v56, %v63_v55 }
   0xf   :  { %853 = vmatpush3.bf16.msra.mxu1 %v850_v34  ;;  %v62_v61 = vld [vmem:[%s1447_s1 + $0x118] sm:$0xff]  ;;  %v842_v63 = vpack.c.bf16 %v73_v58, %v70_v57  ;;  %v69_v0 = vld [vmem:[%s1447_s1 + $0x150] sm:$0xff]  ;;  %v72_v1 = vld [vmem:[%s1447_s1 + $0x168] sm:$0xff] }
  0x10   :  { %855 = vmatprep.subr.bf16.mxu1 %v854_v41  ;;  %v251_v2 = vld [vmem:[%s1449_s3 + $0x8] sm:$0xff]  ;;  %v254_v4 = vld [vmem:[%s1449_s3 + $0x20] sm:$0xff]  ;;  %v866_v5 = vpack.c.bf16 %v62_v61, %v59_v60  ;;  %v65_v6 = vld [vmem:[%s1447_s1 + $0x130] sm:$0xff]  ;;  %v844_v8 = vpack.c.bf16 %v72_v1, %v69_v0 }
  0x11   :  { %829 = vmatpush1.bf16.msra.mxu0 %v828_v31  ;;  %v68_v7 = vld [vmem:[%s1447_s1 + $0x148] sm:$0xff]  ;;  %v1209_v9 = vpack.c.bf16 %v254_v4, %v251_v2  ;;  %v250_v10 = vld [vmem:[%s1449_s3] sm:$0xff]  ;;  %v253_v11 = vld [vmem:[%s1449_s3 + $0x18] sm:$0xff] }
  0x12   :  { %831 = vmatprep.subr.bf16.mxu0 %v830_v35  ;;  %v257_v12 = vld [vmem:[%s1449_s3 + $0x38] sm:$0xff]  ;;  %v260_v13 = vld [vmem:[%s1449_s3 + $0x50] sm:$0xff]  ;;  %v870_v14 = vpack.c.bf16 %v68_v7, %v65_v6  ;;  %v71_v15 = vld [vmem:[%s1447_s1 + $0x160] sm:$0xff]  ;;  %v1229_v17 = vpack.c.bf16 %v253_v11, %v250_v10 }
  0x13   :  { %857 = vmatpush3.bf16.msra.mxu1 %v854_v41  ;;  %v74_v16 = vld [vmem:[%s1447_s1 + $0x178] sm:$0xff]  ;;  %v1232_v18 = vpack.c.bf16 %v260_v13, %v257_v12  ;;  %v256_v19 = vld [vmem:[%s1449_s3 + $0x30] sm:$0xff]  ;;  %v259_v20 = vld [vmem:[%s1449_s3 + $0x48] sm:$0xff] }
  0x14   :  { %859 = vmatprep.subr.bf16.mxu1 %v858_v50  ;;  %v263_v21 = vld [vmem:[%s1449_s3 + $0x68] sm:$0xff]  ;;  %v266_v22 = vld [vmem:[%s1449_s3 + $0x80] sm:$0xff]  ;;  %v874_v23 = vpack.c.bf16 %v74_v16, %v71_v15  ;;  %v1248_v24 = vpack.c.bf16 %v259_v20, %v256_v19  ;;  %v265_v27 = vld [vmem:[%s1449_s3 + $0x78] sm:$0xff] }
  0x15   :  { %833 = vmatpush1.bf16.msra.mxu0 %v832_v44  ;;  %v262_v25 = vld [vmem:[%s1449_s3 + $0x60] sm:$0xff]  ;;  %v1255_v26 = vpack.c.bf16 %v266_v22, %v263_v21  ;;  %v269_v28 = vld [vmem:[%s1449_s3 + $0x98] sm:$0xff]  ;;  %v272_v29 = vld [vmem:[%s1449_s3 + $0xb0] sm:$0xff] }
  0x16   :  { %835 = vmatprep.subr.bf16.mxu0 %v834_v45  ;;  %v26_v30 = vld [vmem:[%s1448_s0 + $0x8] sm:$0xff]  ;;  %v252_v31 = vld [vmem:[%s1449_s3 + $0x10] sm:$0xff]  ;;  %v1276_v33 = vpack.c.bf16 %v265_v27, %v262_v25  ;;  %v1280_v34 = vpack.c.bf16 %v272_v29, %v269_v28  ;;  %v278_v39 = vld [vmem:[%s1449_s3 + $0xe0] sm:$0xff] }
  0x17   :  { %861 = vmatpush3.bf16.msra.mxu1 %v858_v50  ;;  %v255_v32 = vld [vmem:[%s1449_s3 + $0x28] sm:$0xff]  ;;  %v268_v35 = vld [vmem:[%s1449_s3 + $0x90] sm:$0xff]  ;;  %v258_v41 = vld [vmem:[%s1449_s3 + $0x40] sm:$0xff] }
  0x18   :  { %863 = vmatprep.subr.bf16.mxu1 %v862_v59  ;;  %v275_v37 = vld [vmem:[%s1449_s3 + $0xc8] sm:$0xff]  ;;  %v1291_v38 = vpack.c.bf16 %v255_v32, %v252_v31  ;;  %v261_v42 = vld [vmem:[%s1449_s3 + $0x58] sm:$0xff]  ;;  %v274_v45 = vld [vmem:[%s1449_s3 + $0xc0] sm:$0xff] }
  0x19   :  { %837 = vmatpush1.bf16.msra.mxu0 %v836_v53  ;;  %v1307_v44 = vpack.c.bf16 %v278_v39, %v275_v37  ;;  %v277_v46 = vld [vmem:[%s1449_s3 + $0xd8] sm:$0xff]  ;;  %v1319_v48 = vpack.c.bf16 %v261_v42, %v258_v41  ;;  %v284_v49 = vld [vmem:[%s1449_s3 + $0x110] sm:$0xff]  ;;  %v267_v51 = vld [vmem:[%s1449_s3 + $0x88] sm:$0xff] }
  0x1a   :  { %839 = vmatprep.subr.bf16.mxu0 %v838_v54  ;;  %v281_v47 = vld [vmem:[%s1449_s3 + $0xf8] sm:$0xff]  ;;  %v264_v50 = vld [vmem:[%s1449_s3 + $0x70] sm:$0xff]  ;;  %v1334_v52 = vpack.c.bf16 %v277_v46, %v274_v45  ;;  %v283_v55 = vld [vmem:[%s1449_s3 + $0x108] sm:$0xff] }
  0x1b   :  { %865 = vmatpush3.bf16.msra.mxu1 %v862_v59  ;;  %v1337_v53 = vpack.c.bf16 %v284_v49, %v281_v47  ;;  %v280_v54 = vld [vmem:[%s1449_s3 + $0xf0] sm:$0xff]  ;;  %v287_v56 = vld [vmem:[%s1449_s3 + $0x128] sm:$0xff]  ;;  %v1349_v57 = vpack.c.bf16 %v267_v51, %v264_v50  ;;  %v290_v58 = vld [vmem:[%s1449_s3 + $0x140] sm:$0xff] }
  0x1c   :  { %867 = vmatprep.subr.bf16.mxu1 %v866_v5  ;;  %v270_v59 = vld [vmem:[%s1449_s3 + $0xa0] sm:$0xff]  ;;  %v273_v60 = vld [vmem:[%s1449_s3 + $0xb8] sm:$0xff]  ;;  %v900_v61 = vpack.c.bf16 %v283_v55, %v280_v54  ;;  %v296_v4 = vld [vmem:[%s1449_s3 + $0x170] sm:$0xff] }
  0x1d   :  { %841 = vmatpush1.bf16.msra.mxu0 %v840_v62  ;;  %v902_v62 = vpack.c.bf16 %v290_v58, %v287_v56  ;;  %v289_v0 = vld [vmem:[%s1449_s3 + $0x138] sm:$0xff]  ;;  %v920_v2 = vpack.c.bf16 %v273_v60, %v270_v59  ;;  %v279_v6 = vld [vmem:[%s1449_s3 + $0xe8] sm:$0xff]  ;;  %v292_v10 = vld [vmem:[%s1449_s3 + $0x150] sm:$0xff] }
  0x1e   :  { %843 = vmatprep.subr.bf16.mxu0 %v842_v63  ;;  %v286_v63 = vld [vmem:[%s1449_s3 + $0x120] sm:$0xff]  ;;  %v293_v1 = vld [vmem:[%s1449_s3 + $0x158] sm:$0xff]  ;;  %v295_v11 = vld [vmem:[%s1449_s3 + $0x168] sm:$0xff] }
  0x1f   :  { %869 = vmatpush3.bf16.msra.mxu1 %v866_v5  ;;  %v276_v5 = vld [vmem:[%s1449_s3 + $0xd0] sm:$0xff]  ;;  %v904_v7 = vpack.c.bf16 %v289_v0, %v286_v63  ;;  %v282_v13 = vld [vmem:[%s1449_s3 + $0x100] sm:$0xff]  ;;  %v908_v15 = vpack.c.bf16 %v295_v11, %v292_v10  ;;  %v291_v20 = vld [vmem:[%s1449_s3 + $0x148] sm:$0xff] }
  0x20   :  { %871 = vmatprep.subr.bf16.mxu1 %v870_v14  ;;  %v923_v12 = vpack.c.bf16 %v279_v6, %v276_v5  ;;  %v288_v19 = vld [vmem:[%s1449_s3 + $0x130] sm:$0xff]  ;;  %v294_v22 = vld [vmem:[%s1449_s3 + $0x160] sm:$0xff] }
  0x21   :  { %845 = vmatpush1.bf16.msra.mxu0 %v844_v8  ;;  %v906_v8 = vpack.c.bf16 %v296_v4, %v293_v1  ;;  %v929_v21 = vpack.c.bf16 %v291_v20, %v288_v19 }
  0x22   :  { %879 = vmatprep.subr.bf16.mxu0 %v1209_v9 }
  0x23   :  { %873 = vmatpush3.bf16.msra.mxu1 %v870_v14  ;;  %v285_v14 = vld [vmem:[%s1449_s3 + $0x118] sm:$0xff] }
  0x24   :  { %157 = vmatmul.mubr.f32.vlgmr.msra.gmra.mrb[0].mxu0 %v1134_v36  ;;  %875 = vmatprep.subr.bf16.mxu1 %v874_v23  ;;  %v271_v36 = vld [vmem:[%s1449_s3 + $0xa8] sm:$0xff]  ;;  %v926_v16 = vpack.c.bf16 %v285_v14, %v282_v13 }
  0x25   :  { %881 = vmatpush1.bf16.msra.mxu0 %v1229_v17  ;;  %162 = vmatprep.mubr.f32.mxu0 %v1025_v3  ;;  %v1304_v43 = vpack.c.bf16 %v271_v36, %v268_v35 }
  0x26   :  { %883 = vmatprep.subr.bf16.mxu0 %v1232_v18 }
  0x27   :  { %877 = vmatpush3.bf16.msra.mxu1 %v874_v23  ;;  %v297_v23 = vld [vmem:[%s1449_s3 + $0x178] sm:$0xff] }
  0x28   :  { %163 = vmatmul.mubr.f32.gmra.mrb[2].mxu0 %v26_v30  ;;  %910 = vmatprep.subr.bf16.mxu1 %v1026_v40  ;;  %v932_v25 = vpack.c.bf16 %v297_v23, %v294_v22 }
  0x29   :  { %885 = vmatpush1.bf16.msra.mxu0 %v1248_v24  ;;  %383 = vmatprep.mubr.f32.mxu0 %v1025_v3 }
  0x2a   :  { %887 = vmatprep.subr.bf16.mxu0 %v1255_v26  ;;  %742 = vmatmul.mubr.f32.vlgmr.msra.gmra.mrb[0].mxu1 %v26_v30  ;;  %v298_v30 = vld [vmem:[%s1451_s4] sm:$0x7] }
  0x2b   :  { %912 = vmatpush3.bf16.msra.mxu1 %v1291_v38  ;;  %776 = vmatprep.mubr.msk.f32.mxu1 %vm1027_vm0, %v1025_v3 }
  0x2c   :  { %913 = vmatprep.subr.bf16.mxu1 %v1026_v40 }
  0x2d   :  { %889 = vmatpush1.bf16.msra.mxu0 %v1276_v33 }
  0x2e   :  { %891 = vmatprep.subr.bf16.mxu0 %v1280_v34 }
  0x2f   :  { %915 = vmatpush3.bf16.msra.mxu1 %v1319_v48 }
  0x30   :  { %916 = vmatprep.subr.bf16.mxu1 %v1026_v40 }
  0x31   :  { %893 = vmatpush1.bf16.msra.mxu0 %v1304_v43 }
  0x32   :  { %895 = vmatprep.subr.bf16.mxu0 %v1307_v44 }
  0x33   :  { %918 = vmatpush3.bf16.msra.mxu1 %v1349_v57 }
  0x34   :  { %919 = vmatprep.subr.bf16.mxu1 %v1026_v40 }
  0x35   :  { %897 = vmatpush1.bf16.msra.mxu0 %v1334_v52 }
  0x36   :  { %899 = vmatprep.subr.bf16.mxu0 %v1337_v53 }
  0x37   :  { %921 = vmatpush3.bf16.msra.mxu1 %v920_v2 }
  0x38   :  { %922 = vmatprep.subr.bf16.mxu1 %v1026_v40 }
  0x39   :  { %901 = vmatpush1.bf16.msra.mxu0 %v900_v61 }
  0x3a   :  { %903 = vmatprep.subr.bf16.mxu0 %v902_v62 }
  0x3b   :  { %924 = vmatpush3.bf16.msra.mxu1 %v923_v12 }
  0x3c   :  { %925 = vmatprep.subr.bf16.mxu1 %v1026_v40 }
  0x3d   :  { %905 = vmatpush1.bf16.msra.mxu0 %v904_v7 }
  0x3e   :  { %907 = vmatprep.subr.bf16.mxu0 %v906_v8 }
  0x3f   :  { %927 = vmatpush3.bf16.msra.mxu1 %v926_v16 }
  0x40   :  { %928 = vmatprep.subr.bf16.mxu1 %v1026_v40 }
  0x41   :  { %909 = vmatpush1.bf16.msra.mxu0 %v908_v15 }
  0x42   :  { %935 = vmatprep.subr.bf16.mxu0 %v1209_v9 }
  0x43   :  { %930 = vmatpush3.bf16.msra.mxu1 %v929_v21 }
  0x44   :  { %384 = vmatmul.mubr.f32.vlgmr.msra.gmra.mrb[0].mxu0 %v1025_v3  ;;  %931 = vmatprep.subr.bf16.mxu1 %v1026_v40 }
  0x45   :  { %937 = vmatpush1.bf16.msra.mxu0 %v1229_v17  ;;  %549 = vmatprep.mubr.f32.mxu0 %v1025_v3 }
  0x46   :  { %939 = vmatprep.subr.bf16.mxu0 %v1232_v18  ;;  %v75_v18 = vld [vmem:[%s1450_s2] sm:$0x7] }
  0x47   :  { %933 = vmatpush3.bf16.msra.mxu1 %v932_v25 }
  0x48   :  { %966 = vmatprep.subr.bf16.mxu1 %v1026_v40 }
  0x49   :  { %941 = vmatpush1.bf16.msra.mxu0 %v1248_v24 }
  0x4a   :  { %943 = vmatprep.subr.bf16.mxu0 %v1255_v26  ;;  %777 = vmatmul.mubr.f32.vlgmr.msra.gmra.mrb[2].mxu1 %v1025_v3 }
  0x4b   :  { %968 = vmatpush3.bf16.msra.mxu1 %v1291_v38  ;;  %811 = vmatprep.mubr.msk.f32.mxu1 %vm1027_vm0, %v1025_v3  ;;  %v77_v3 = vlaneseq }
  0x4c   :  { %969 = vmatprep.subr.bf16.mxu1 %v1026_v40 }
  0x4d   :  { %945 = vmatpush1.bf16.msra.mxu0 %v1276_v33  ;;  %v78_v9 = vshrl.u32 %v77_v3, 7 }
  0x4e   :  { %947 = vmatprep.subr.bf16.mxu0 %v1280_v34 }
  0x4f   :  { %971 = vmatpush3.bf16.msra.mxu1 %v1319_v48  ;;  %v87_v17 = vsub.s32 2, %v78_v9  ;;  %v79_v29 = vsub.s32 0, %v78_v9  ;;  %v83_v31 = vsub.s32 1, %v78_v9 }
  0x50   :  { %972 = vmatprep.subr.bf16.mxu1 %v1026_v40 }
  0x51   :  { %949 = vmatpush1.bf16.msra.mxu0 %v1304_v43  ;;  %v88_v24 = vrot.slane %v75_v18, %v87_v17  ;;  %v80_v32 = vrot.slane %v75_v18, %v79_v29  ;;  %v307_v33 = vrot.slane %v298_v30, %v79_v29  ;;  %v84_v34 = vrot.slane %v75_v18, %v83_v31 }
  0x52   :  { %951 = vmatprep.subr.bf16.mxu0 %v1307_v44  ;;  %v311_v35 = vrot.slane %v298_v30, %v83_v31  ;;  %v315_v48 = vrot.slane %v298_v30, %v87_v17 }
  0x53   :  { %974 = vmatpush3.bf16.msra.mxu1 %v1349_v57  ;;  %v990_v36 = vadd.f32 %v307_v33, %v80_v32 }
  0x54   :  { %975 = vmatprep.subr.bf16.mxu1 %v1026_v40  ;;  %v992_v38 = vadd.f32 %v311_v35, %v84_v34 }
  0x55   :  { %953 = vmatpush1.bf16.msra.mxu0 %v1334_v52 }
  0x56   :  { %955 = vmatprep.subr.bf16.mxu0 %v1337_v53 }
  0x57   :  { %977 = vmatpush3.bf16.msra.mxu1 %v920_v2 }
  0x58   :  { %978 = vmatprep.subr.bf16.mxu1 %v1026_v40 }
  0x59   :  { %957 = vmatpush1.bf16.msra.mxu0 %v900_v61 }
  0x5a   :  { %959 = vmatprep.subr.bf16.mxu0 %v902_v62 }
  0x5b   :  { %980 = vmatpush3.bf16.msra.mxu1 %v923_v12 }
  0x5c   :  { %981 = vmatprep.subr.bf16.mxu1 %v1026_v40 }
  0x5d   :  { %961 = vmatpush1.bf16.msra.mxu0 %v904_v7 }
  0x5e   :  { %963 = vmatprep.subr.bf16.mxu0 %v906_v8 }
  0x5f   :  { %983 = vmatpush3.bf16.msra.mxu1 %v926_v16 }
  0x60   :  { %984 = vmatprep.subr.bf16.mxu1 %v1026_v40 }
  0x61   :  { %965 = vmatpush1.bf16.msra.mxu0 %v908_v15 }
  0x63   :  { %986 = vmatpush3.bf16.msra.mxu1 %v929_v21 }
  0x64   :  { %987 = vmatprep.subr.bf16.mxu1 %v1026_v40 }
  0x67   :  { %989 = vmatpush3.bf16.msra.mxu1 %v932_v25 }
  0xfd   :  { %v743_v26 = vpop.f32.mrb[0].mxu1 }
  0xfe   :  { %v241_v27 = vadd.f32 %v743_v26, %v88_v24  ;;  %v235_v28 = vpop.f32.mrb[1].mxu1 }
  0xff   :  { %v236_v53 = vadd.f32 %v235_v28, %v88_v24 }
 0x117   :  { %v385_v37 = vpop.f32.mrb[0].mxu0 }
 0x118   :  { %v991_v39 = vadd.f32 %v990_v36, %v385_v37  ;;  %v387_v40 = vpop.f32.mrb[1].mxu0 }
 0x119   :  { %v993_v42 = vadd.f32 %v992_v38, %v387_v40 }
 0x11a   :  { %v653_v41 = vmul.f32 -1.442695, %v991_v39 }
 0x11b   :  { %v654_v43 = vmul.f32 -1.442695, %v993_v42 }
 0x11c   :  { %1005 = vpow2.f32 %v653_v41 }
 0x11d   :  { %v456_v44 = vpop.f32.mrb[2].mxu1  ;;  %1007 = vpow2.f32 %v654_v43 }
 0x11e   :  { %v778_v45 = vpop.f32.mrb[3].mxu1  ;;  %v457_v51 = vadd.f32 %v456_v44, %v315_v48 }
 0x126   :  { %v1006_v46 = vpop.eup %1005 }
 0x127   :  { %v464_v47 = vadd.f32 1.0, %v1006_v46  ;;  %v1008_v49 = vpop.eup %1007 }
 0x128   :  { %v471_v50 = vadd.f32 1.0, %v1008_v49 }
 0x129   :  { %1009 = vrcp.f32 %v464_v47 }
 0x12a   :  { %1011 = vrcp.f32 %v471_v50 }
 0x133   :  { %v1010_v52 = vpop.eup %1009 }
 0x134   :  { %v474_v54 = vmul.f32 %v1010_v52, %v457_v51  ;;  %v1012_v56 = vpop.eup %1011 }
 0x135   :  { %v477_v57 = vsub.f32 1.0, %v1012_v56  ;;  %v479_v60 = vmul.f32 0.0, %v1012_v56 }
 0x136   :  { %v475_v55 = vadd.f32 %v474_v54, %v236_v53 }
 0x138   :  { %1013 = vtanh.f32 %v475_v55 }
 0x142   :  { %v1014_v58 = vpop.eup %1013 }
 0x143   :  { %v478_v59 = vmul.f32 %v1014_v58, %v477_v57 }
 0x145   :  { %v480_v61 = vadd.f32 %v479_v60, %v478_v59 }
 0x147   :  { %550 = vmatmul.mubr.f32.vlgmr.msra.gmra.mrb[2].mxu0 %v480_v61  ;;  %812 = vmatmul.mubr.f32.vlgmr.msra.gmra.mrb[4].mxu1 %v480_v61 }
 0x21a   :  { %v551_v62 = vpop.f32.mrb[2].mxu0  ;;  %v622_v63 = vpop.f32.mrb[4].mxu1 }
 0x21b   :  { %v995_v0 = vadd.f32 %v990_v36, %v551_v62  ;;  %v553_v1 = vpop.f32.mrb[3].mxu0  ;;  %v813_v2 = vpop.f32.mrb[5].mxu1  ;;  %v623_v12 = vadd.f32 %v622_v63, %v315_v48 }
 0x21c   :  { %v997_v5 = vadd.f32 %v992_v38, %v553_v1 }
 0x21d   :  { %v655_v4 = vmul.f32 -1.442695, %v995_v0 }
 0x21e   :  { %v656_v6 = vmul.f32 -1.442695, %v997_v5 }
 0x21f   :  { %1015 = vpow2.f32 %v655_v4 }
 0x220   :  { %1017 = vpow2.f32 %v656_v6 }
 0x229   :  { %v1016_v7 = vpop.eup %1015 }
 0x22a   :  { %v630_v8 = vadd.f32 1.0, %v1016_v7  ;;  %v1018_v10 = vpop.eup %1017 }
 0x22b   :  { %v637_v11 = vadd.f32 1.0, %v1018_v10 }
 0x22c   :  { %1019 = vrcp.f32 %v630_v8 }
 0x22d   :  { %1021 = vrcp.f32 %v637_v11 }
 0x236   :  { %v1020_v13 = vpop.eup %1019 }
 0x237   :  { %v640_v14 = vmul.f32 %v1020_v13, %v623_v12  ;;  %v1022_v16 = vpop.eup %1021 }
 0x238   :  { %v643_v19 = vsub.f32 1.0, %v1022_v16  ;;  %v645_v22 = vmul.f32 %v1022_v16, %v480_v61 }
 0x239   :  { %v641_v15 = vadd.f32 %v640_v14, %v241_v27 }
 0x23b   :  { %1023 = vtanh.f32 %v641_v15 }
 0x245   :  { %v1024_v20 = vpop.eup %1023 }
 0x246   :  { %v644_v21 = vmul.f32 %v1024_v20, %v643_v19 }
 0x248   :  { %v646_v23 = vadd.f32 %v645_v22, %v644_v21 }
 0x24a   :  { %648 = vst [vmem:[%s1452_s5] sm:$0xff] %v646_v23 }

</bundles_post_ra>
